<compile_context>
chip_gen: v5e
topology: v5e:2x2
jax: 0.10.0
libtpu: 0.0.40
codegen_flags: <defaults>
</compile_context>

<pallas_src>
import functools

import jax
import jax.numpy as jnp
from jax.experimental import pallas as pl
from jax.experimental.pallas import tpu as pltpu

LN_EPS = 1e-5  # torch.nn.LayerNorm default
BF16 = jnp.bfloat16

_CROSS_ORDER = ("lnq_w", "lnq_b", "lnkv_w", "lnkv_b", "wq", "bq", "wkv", "bkv",
                "wo", "bo", "lnm_w", "lnm_b", "w1", "b1", "w2", "b2")
_SELF_ORDER = ("ln_w", "ln_b", "wqkv", "bqkv", "wo", "bo",
               "lnm_w", "lnm_b", "w1", "b1", "w2", "b2")


# ----------------------------- kernel helpers -------------------------------

def _layernorm(x, w, b):
    # Two independent reductions so the serial mu -> (x-mu)^2 -> mean chain is
    # broken and the cross-lane reduces overlap.
    m1 = jnp.mean(x, axis=-1, keepdims=True)
    m2 = jnp.mean(x * x, axis=-1, keepdims=True)
    var = m2 - m1 * m1
    return (x - m1) * jax.lax.rsqrt(var + LN_EPS) * w + b


def _gelu(x):
    # TODO(synk): torch nn.GELU() is exact erf-GELU; tanh approximation used here
    # (guaranteed Mosaic lowering). Max deviation ~1e-3.
    return jax.nn.gelu(x, approximate=True)


# --------------------------- fused encoder kernel ----------------------------
# One grid step = `block_b` batch elements; the full (static, de-duplicated)
# layer schedule runs inside the kernel with the latent resident on-chip.

def _encoder_kernel(*refs, schedule, cross_heads, self_heads, qk_cross, qk_self,
                    block_b, num_latents, latent_dim, kv_len, kv_dim):
    lat_ref, kv_ref = refs[0], refs[1]
    (ca_lnq_w, ca_lnq_b, ca_lnkv_w, ca_lnkv_b,
     ca_wq, ca_bq, ca_wkv, ca_bkv, ca_wo, ca_bo,
     ca_lnm_w, ca_lnm_b, ca_w1, ca_b1, ca_w2, ca_b2) = refs[2:18]
    (sa_ln_w, sa_ln_b, sa_wqkv, sa_bqkv, sa_wo, sa_bo,
     sa_lnm_w, sa_lnm_b, sa_w1, sa_b1, sa_w2, sa_b2) = refs[18:30]
    out_ref = refs[30]

    BB, N, D, M, C = block_b, num_latents, latent_dim, kv_len, kv_dim

    # Latent stays resident in vregs/VMEM for the whole layer schedule.
    # Batch-folded rows: (BB*N, D) latent rows, (BB*M, C) adapted-input rows.
    x = lat_ref[...].reshape(BB * N, D).astype(jnp.float32)
    kv = kv_ref[...].reshape(BB * M, C).astype(jnp.float32)

    def matmul(a, w, b):
        # bf16 operands into the MXU, f32 accumulation, f32 bias add on the VPU.
        return jnp.dot(a.astype(w.dtype), w, preferred_element_type=jnp.float32) + b

    def mha(q, k, v, heads, n_rows, m_rows):
        # q: (BB*n_rows, H*dqk), k: (BB*m_rows, H*dqk), v: (BB*m_rows, H*dv), f32.
        # Static head loop, but every matmul is batched over the BB batch block
        # (canonical leading-batch dot_general -> guaranteed Mosaic lowering).
        dqk = q.shape[-1] // heads
        dv = v.shape[-1] // heads
        q3 = q.reshape(BB, n_rows, heads * dqk)
        k3 = k.reshape(BB, m_rows, heads * dqk)
        v3 = v.reshape(BB, m_rows, heads * dv)
        ctxs = []
        for h in range(heads):
            qh = q3[:, :, h * dqk:(h + 1) * dqk].astype(BF16)
            kh = k3[:, :, h * dqk:(h + 1) * dqk].astype(BF16)
            vh = v3[:, :, h * dv:(h + 1) * dv].astype(BF16)
            logits = jnp.einsum("bnd,bmd->bnm", qh, kh,
                                preferred_element_type=jnp.float32)  # (BB, n, m)
            mx = jnp.max(logits, axis=-1, keepdims=True)
            p = jnp.exp(logits - mx)
            p = p / jnp.sum(p, axis=-1, keepdims=True)  # exact softmax denominator
            ctxs.append(jnp.einsum("bnm,bmd->bnd", p.astype(BF16), vh,
                                   preferred_element_type=jnp.float32))
        o = jnp.concatenate(ctxs, axis=-1)              # (BB, n_rows, H*dv)
        return o.reshape(BB * n_rows, heads * dv)

    def mlp(y, ln_w, ln_b, w1, b1, w2, b2):
        z = _layernorm(y, ln_w, ln_b)
        h = _gelu(matmul(z, w1, b1))
        return y + matmul(h, w2, b2)

    def cross_layer(y, c):                              # c: static unique-layer idx
        qn = _layernorm(y, ca_lnq_w[c], ca_lnq_b[c])
        kvn = _layernorm(kv, ca_lnkv_w[c], ca_lnkv_b[c])
        q = matmul(qn, ca_wq[c], ca_bq[c])              # attention scale folded in
        kvp = matmul(kvn, ca_wkv[c], ca_bkv[c])         # fused k|v projection
        o = mha(q, kvp[:, :qk_cross], kvp[:, qk_cross:], cross_heads, N, M)
        y = y + matmul(o, ca_wo[c], ca_bo[c])
        return mlp(y, ca_lnm_w[c], ca_lnm_b[c], ca_w1[c], ca_b1[c], ca_w2[c], ca_b2[c])

    def self_layer(y, s):                               # s: static unique-layer idx
        yn = _layernorm(y, sa_ln_w[s], sa_ln_b[s])      # shared q/kv pre-norm (once)
        qkv = matmul(yn, sa_wqkv[s], sa_bqkv[s])        # fused q|k|v projection
        o = mha(qkv[:, :qk_self], qkv[:, qk_self:2 * qk_self], qkv[:, 2 * qk_self:],
                self_heads, N, N)
        y = y + matmul(o, sa_wo[s], sa_bo[s])
        return mlp(y, sa_lnm_w[s], sa_lnm_b[s], sa_w1[s], sa_b1[s], sa_w2[s], sa_b2[s])

    # Static, de-duplicated layer schedule mirroring PerceiverEncoder.forward.
    # TODO(synk): for very deep configs (v7x, D>=512) convert to lax.fori_loop with
    # per-layer weight streaming (pltpu.emit_pipeline) to bound code size / VMEM.
    for kind, idx in schedule:
        x = cross_layer(x, idx) if kind == "cross" else self_layer(x, idx)

    # Lane-dense writeback: fold the N latent rows into the lane dimension so the
    # store covers N*D (>=128) lanes; built from slices + lane concat only.
    x3 = x.reshape(BB, N, D)
    dense = jnp.concatenate([x3[:, n, :] for n in range(N)], axis=-1)  # (BB, N*D)
    out_ref[...] = dense[:, None, :].astype(out_ref.dtype)


def _largest_divisor_at_most(n, cap):
    cap = max(1, min(n, cap))
    for d in range(cap, 0, -1):
        if n % d == 0:
            return d
    return 1


def perceiver_encoder_forward(latent, x_adapted, cross_stack, self_stack, *,
                              schedule, cross_heads, self_heads, qk_cross, qk_self,
                              block_b=None):
    """Single fused pallas_call for the whole encoder.

    latent: (B, N, D) f32, x_adapted: (B, M, C) f32.  Returns (B, N, D) f32.
    """
    B, N, D = latent.shape
    _, M, C = x_adapted.shape

    if block_b is None:
        # Fold enough batch elements per grid step to fill the MXU row dimension
        # (~128 folded rows).  On dual-TC parts (v7x) pick block_b <= B//2 so the
        # "parallel" grid axis feeds both TensorCores.
        block_b = _largest_divisor_at_most(B, max(1, 128 // max(N, 1)))
    assert B % block_b == 0, (B, block_b)
    grid = (B // block_b,)

    weights = [cross_stack[k] for k in _CROSS_ORDER] + [self_stack[k] for k in _SELF_ORDER]

    in_specs = [
        pl.BlockSpec((block_b, N, D), lambda b: (b, 0, 0)),
        pl.BlockSpec((block_b, M, C), lambda b: (b, 0, 0)),
    ]
    # Weight stacks: grid-invariant blocks (block index never changes across the
    # batch grid), so the pipeline only issues their DMAs once.
    in_specs += [pl.BlockSpec(w.shape, lambda b, nd=w.ndim: (0,) * nd) for w in weights]

    weight_bytes = sum(int(w.size) * w.dtype.itemsize for w in weights)
    act_bytes = 4 * block_b * (N * D + M * C)
    vmem_limit = int(min(48 << 20, max(16 << 20, 2 * weight_bytes + 4 * act_bytes + (4 << 20))))

    kernel = functools.partial(
        _encoder_kernel, schedule=schedule, cross_heads=cross_heads,
        self_heads=self_heads, qk_cross=qk_cross, qk_self=qk_self,
        block_b=block_b, num_latents=N, latent_dim=D, kv_len=M, kv_dim=C)

    out = pl.pallas_call(
        kernel,
        out_shape=jax.ShapeDtypeStruct((B, 1, N * D), jnp.float32),
        grid=grid,
        in_specs=in_specs,
        out_specs=pl.BlockSpec((block_b, 1, N * D), lambda b: (b, 0, 0)),
        compiler_params=pltpu.CompilerParams(
            dimension_semantics=("parallel",),
            vmem_limit_bytes=vmem_limit),
    )(latent, x_adapted, *weights)
    return out.reshape(B, N, D)


# ------------------------------- parameters ----------------------------------

def _init_attn_layer_params(key, dq, dkv, qk_ch, v_ch, widen, init_scale=0.02):
    ks = jax.random.split(key, 6)

    def lin(k, din, dout):
        w = jax.random.normal(k, (din, dout), jnp.float32) * init_scale
        return w, jnp.zeros((1, dout), jnp.float32)

    wq, bq = lin(ks[0], dq, qk_ch)
    wk, bk = lin(ks[1], dkv, qk_ch)
    wv, bv = lin(ks[2], dkv, v_ch)
    wo, bo = lin(ks[3], v_ch, dq)
    w1, b1 = lin(ks[4], dq, widen * dq)
    w2, b2 = lin(ks[5], widen * dq, dq)
    ones = lambda d: jnp.ones((1, d), jnp.float32)
    zeros = lambda d: jnp.zeros((1, d), jnp.float32)
    return dict(lnq_w=ones(dq), lnq_b=zeros(dq),
                lnkv_w=ones(dkv), lnkv_b=zeros(dkv),
                wq=wq, bq=bq, wk=wk, bk=bk, wv=wv, bv=bv, wo=wo, bo=bo,
                lnm_w=ones(dq), lnm_b=zeros(dq),
                w1=w1, b1=b1, w2=w2, b2=b2)


def _pack_cross_stack(layers, num_heads):
    """Stack unique cross-attention layers; fuse wk|wv; fold scale into wq/bq.

    Matmul weights are stored in bf16 (MXU native); biases / LN params stay f32.
    """
    qk = layers[0]["wq"].shape[1]
    scale = float(qk // num_heads) ** -0.5
    stack = lambda k: jnp.stack([p[k] for p in layers])
    packed = dict(
        lnq_w=stack("lnq_w"), lnq_b=stack("lnq_b"),
        lnkv_w=stack("lnkv_w"), lnkv_b=stack("lnkv_b"),
        wq=jnp.stack([p["wq"] * scale for p in layers]).astype(BF16),
        bq=jnp.stack([p["bq"] * scale for p in layers]),
        wkv=jnp.stack([jnp.concatenate([p["wk"], p["wv"]], axis=1)
                       for p in layers]).astype(BF16),
        bkv=jnp.stack([jnp.concatenate([p["bk"], p["bv"]], axis=-1) for p in layers]),
        wo=stack("wo").astype(BF16), bo=stack("bo"),
        lnm_w=stack("lnm_w"), lnm_b=stack("lnm_b"),
        w1=stack("w1").astype(BF16), b1=stack("b1"),
        w2=stack("w2").astype(BF16), b2=stack("b2"),
    )
    return packed, qk


def _pack_self_stack(layers, num_heads):
    """Stack unique self-attention layers; fuse wq|wk|wv; fold scale into wq/bq."""
    qk = layers[0]["wq"].shape[1]
    scale = float(qk // num_heads) ** -0.5
    stack = lambda k: jnp.stack([p[k] for p in layers])
    packed = dict(
        ln_w=stack("lnq_w"), ln_b=stack("lnq_b"),   # shared q/kv pre-norm
        wqkv=jnp.stack([jnp.concatenate([p["wq"] * scale, p["wk"], p["wv"]], axis=1)
                        for p in layers]).astype(BF16),
        bqkv=jnp.stack([jnp.concatenate([p["bq"] * scale, p["bk"], p["bv"]], axis=-1)
                        for p in layers]),
        wo=stack("wo").astype(BF16), bo=stack("bo"),
        lnm_w=stack("lnm_w"), lnm_b=stack("lnm_b"),
        w1=stack("w1").astype(BF16), b1=stack("b1"),
        w2=stack("w2").astype(BF16), b2=stack("b2"),
    )
    return packed, qk


# ------------------------------ encoder module --------------------------------

class PerceiverEncoderPallas:
    """JAX/Pallas mirror of PerceiverEncoder (text input adapter built in)."""

    def __init__(self, *, vocab_size, max_seq_len, num_input_channels,
                 num_latents, num_latent_channels,
                 num_cross_attention_heads=4,
                 num_cross_attention_qk_channels=None,
                 num_cross_attention_v_channels=None,
                 num_cross_attention_layers=1,
                 first_cross_attention_layer_shared=False,
                 cross_attention_widening_factor=1,
                 num_self_attention_heads=4,
                 num_self_attention_qk_channels=None,
                 num_self_attention_v_channels=None,
                 num_self_attention_layers_per_block=6,
                 num_self_attention_blocks=1,
                 first_self_attention_block_shared=True,
                 self_attention_widening_factor=1,
                 init_scale=0.02,
                 key=None):
        if num_cross_attention_layers <= 0:
            raise ValueError("num_cross_attention_layers must be > 0")
        if num_self_attention_blocks <= 0:
            raise ValueError("num_self_attention_blocks must be > 0")
        if num_cross_attention_layers > num_self_attention_blocks:
            raise ValueError("num_cross_attention_layers must be <= num_self_attention_blocks")

        self.num_cross_attention_layers = num_cross_attention_layers
        self.num_self_attention_blocks = num_self_attention_blocks
        self.num_self_attention_layers_per_block = num_self_attention_layers_per_block
        self.first_cross_attention_layer_shared = first_cross_attention_layer_shared
        self.first_self_attention_block_shared = first_self_attention_block_shared
        self.num_cross_heads = num_cross_attention_heads
        self.num_self_heads = num_self_attention_heads
        self.num_latents = num_latents

        D = num_latent_channels
        C = num_input_channels
        ca_qk = num_cross_attention_qk_channels or D
        ca_v = num_cross_attention_v_channels or ca_qk
        sa_qk = num_self_attention_qk_channels or D
        sa_v = num_self_attention_v_channels or sa_qk

        keys = jax.random.split(key, 6)

        # input adapter (text): token embedding + learned position embedding
        self.token_emb = jax.random.normal(keys[0], (vocab_size, C), jnp.float32) * init_scale
        self.pos_emb = jax.random.normal(keys[1], (max_seq_len, C), jnp.float32) * init_scale

        def cross_attn(k):
            return _init_attn_layer_params(k, D, C, ca_qk, ca_v,
                                           cross_attention_widening_factor, init_scale)

        def self_attn(k):
            lks = jax.random.split(k, num_self_attention_layers_per_block)
            return [_init_attn_layer_params(lk, D, D, sa_qk, sa_v,
                                            self_attention_widening_factor, init_scale)
                    for lk in lks]

        self.cross_attn_1 = cross_attn(keys[2])
        self.self_attn_1 = self_attn(keys[3])
        if self.extra_cross_attention_layer:
            self.cross_attn_n = cross_attn(keys[4])
        if self.extra_self_attention_block:
            self.self_attn_n = self_attn(keys[5])

        # ---- de-duplicated weight stacks + static layer schedule -------------
        cross_unique = [self.cross_attn_1]
        if self.extra_cross_attention_layer:
            cross_unique.append(self.cross_attn_n)
        self_unique = list(self.self_attn_1)
        if self.extra_self_attention_block:
            self_unique += list(self.self_attn_n)

        schedule = []
        lpb = num_self_attention_layers_per_block
        for b in range(num_self_attention_blocks):
            if b < num_cross_attention_layers:
                c = 0 if b == 0 else (1 if self.extra_cross_attention_layer else 0)
                schedule.append(("cross", c))
            base = 0 if (b == 0 or not self.extra_self_attention_block) else lpb
            for l in range(lpb):
                schedule.append(("self", base + l))
        self._schedule = tuple(schedule)

        self._cross_stack, self._qk_cross = _pack_cross_stack(
            cross_unique, num_cross_attention_heads)
        self._self_stack, self._qk_self = _pack_self_stack(
            self_unique, num_self_attention_heads)

    @property
    def extra_cross_attention_layer(self):
        return (self.num_cross_attention_layers > 1
                and not self.first_cross_attention_layer_shared)

    @property
    def extra_self_attention_block(self):
        return (self.num_self_attention_blocks > 1
                and not self.first_self_attention_block_shared)

    # -- building blocks ------------------------------------------------------
    def _adapt_input(self, x):
        # glue: embedding gather + position embedding (plain JAX)
        return self.token_emb[x] + self.pos_emb[None, : x.shape[1]]

    # -- forward --------------------------------------------------------------
    def __call__(self, x, latent, pad_mask=None, return_adapted_input=False):
        # TODO(synk): pad_mask attention masking path not implemented (None only).
        x_adapted = self._adapt_input(x)
        x_latent = perceiver_encoder_forward(
            latent, x_adapted, self._cross_stack, self._self_stack,
            schedule=self._schedule,
            cross_heads=self.num_cross_heads,
            self_heads=self.num_self_heads,
            qk_cross=self._qk_cross,
            qk_self=self._qk_self)
        if return_adapted_input:
            return x_latent, x_adapted
        return x_latent


# ----------------------------------- main ------------------------------------

if __name__ == "__main__":
    key = jax.random.PRNGKey(0)
    k_enc, k_x, k_lat = jax.random.split(key, 3)

    B = 2          # batch
    M = 8          # input sequence length (name length)
    N = 8          # num_latents
    C_IN = 32      # input_adapter.num_input_channels
    D_LAT = 32     # num_latent_channels
    VOCAB = 32

    enc = PerceiverEncoderPallas(
        vocab_size=VOCAB, max_seq_len=M,
        num_input_channels=C_IN,
        num_latents=N, num_latent_channels=D_LAT,
        num_cross_attention_heads=4,
        num_self_attention_heads=4,
        num_cross_attention_layers=1,
        num_self_attention_blocks=2,            # exercises the shared-block schedule
        num_self_attention_layers_per_block=2,
        first_self_attention_block_shared=True,
        cross_attention_widening_factor=1,
        self_attention_widening_factor=1,
        key=k_enc,
    )

    x = jax.random.randint(k_x, (B, M), 0, VOCAB, dtype=jnp.int32)
    latent = jax.random.normal(k_lat, (B, N, D_LAT), jnp.float32) * 0.02

    out = enc(x, latent)
    out = jax.block_until_ready(out)
    assert out.shape == (B, N, D_LAT), out.shape
    assert bool(jnp.all(jnp.isfinite(out)))
    print("KERNEL_OK")
</pallas_src>

<mosaic_0001>
module attributes {stable_mosaic.version = 11 : i64} {
  func.func @_encoder_kernel(%arg0: i32, %arg1: memref<2x8x32xf32, #tpu.memory_space<vmem>>, %arg2: memref<2x8x32xf32, #tpu.memory_space<vmem>>, %arg3: memref<1x1x32xf32, #tpu.memory_space<vmem>>, %arg4: memref<1x1x32xf32, #tpu.memory_space<vmem>>, %arg5: memref<1x1x32xf32, #tpu.memory_space<vmem>>, %arg6: memref<1x1x32xf32, #tpu.memory_space<vmem>>, %arg7: memref<1x32x32xbf16, #tpu.memory_space<vmem>>, %arg8: memref<1x1x32xf32, #tpu.memory_space<vmem>>, %arg9: memref<1x32x64xbf16, #tpu.memory_space<vmem>>, %arg10: memref<1x1x64xf32, #tpu.memory_space<vmem>>, %arg11: memref<1x32x32xbf16, #tpu.memory_space<vmem>>, %arg12: memref<1x1x32xf32, #tpu.memory_space<vmem>>, %arg13: memref<1x1x32xf32, #tpu.memory_space<vmem>>, %arg14: memref<1x1x32xf32, #tpu.memory_space<vmem>>, %arg15: memref<1x32x32xbf16, #tpu.memory_space<vmem>>, %arg16: memref<1x1x32xf32, #tpu.memory_space<vmem>>, %arg17: memref<1x32x32xbf16, #tpu.memory_space<vmem>>, %arg18: memref<1x1x32xf32, #tpu.memory_space<vmem>>, %arg19: memref<2x1x32xf32, #tpu.memory_space<vmem>>, %arg20: memref<2x1x32xf32, #tpu.memory_space<vmem>>, %arg21: memref<2x32x96xbf16, #tpu.memory_space<vmem>>, %arg22: memref<2x1x96xf32, #tpu.memory_space<vmem>>, %arg23: memref<2x32x32xbf16, #tpu.memory_space<vmem>>, %arg24: memref<2x1x32xf32, #tpu.memory_space<vmem>>, %arg25: memref<2x1x32xf32, #tpu.memory_space<vmem>>, %arg26: memref<2x1x32xf32, #tpu.memory_space<vmem>>, %arg27: memref<2x32x32xbf16, #tpu.memory_space<vmem>>, %arg28: memref<2x1x32xf32, #tpu.memory_space<vmem>>, %arg29: memref<2x32x32xbf16, #tpu.memory_space<vmem>>, %arg30: memref<2x1x32xf32, #tpu.memory_space<vmem>>, %arg31: memref<2x1x256xf32, #tpu.memory_space<vmem>>) attributes {dimension_semantics = [#tpu.dimension_semantics<parallel>], iteration_bounds = array<i64: 1>, scalar_prefetch = 0 : i64, scratch_operands = 0 : i64, tpu.core_type = #tpu.core_type<tc>, window_params = [{transform_indices = @transform_0, window_bounds = array<i64: 2, 8, 32>}, {transform_indices = @transform_1, window_bounds = array<i64: 2, 8, 32>}, {pipeline_mode = #tpu.pipeline_mode<synchronous>, transform_indices = @transform_2, window_bounds = array<i64: 1, 1, 32>}, {pipeline_mode = #tpu.pipeline_mode<synchronous>, transform_indices = @transform_3, window_bounds = array<i64: 1, 1, 32>}, {pipeline_mode = #tpu.pipeline_mode<synchronous>, transform_indices = @transform_4, window_bounds = array<i64: 1, 1, 32>}, {pipeline_mode = #tpu.pipeline_mode<synchronous>, transform_indices = @transform_5, window_bounds = array<i64: 1, 1, 32>}, {pipeline_mode = #tpu.pipeline_mode<synchronous>, transform_indices = @transform_6, window_bounds = array<i64: 1, 32, 32>}, {pipeline_mode = #tpu.pipeline_mode<synchronous>, transform_indices = @transform_7, window_bounds = array<i64: 1, 1, 32>}, {pipeline_mode = #tpu.pipeline_mode<synchronous>, transform_indices = @transform_8, window_bounds = array<i64: 1, 32, 64>}, {pipeline_mode = #tpu.pipeline_mode<synchronous>, transform_indices = @transform_9, window_bounds = array<i64: 1, 1, 64>}, {pipeline_mode = #tpu.pipeline_mode<synchronous>, transform_indices = @transform_10, window_bounds = array<i64: 1, 32, 32>}, {pipeline_mode = #tpu.pipeline_mode<synchronous>, transform_indices = @transform_11, window_bounds = array<i64: 1, 1, 32>}, {pipeline_mode = #tpu.pipeline_mode<synchronous>, transform_indices = @transform_12, window_bounds = array<i64: 1, 1, 32>}, {pipeline_mode = #tpu.pipeline_mode<synchronous>, transform_indices = @transform_13, window_bounds = array<i64: 1, 1, 32>}, {pipeline_mode = #tpu.pipeline_mode<synchronous>, transform_indices = @transform_14, window_bounds = array<i64: 1, 32, 32>}, {pipeline_mode = #tpu.pipeline_mode<synchronous>, transform_indices = @transform_15, window_bounds = array<i64: 1, 1, 32>}, {pipeline_mode = #tpu.pipeline_mode<synchronous>, transform_indices = @transform_16, window_bounds = array<i64: 1, 32, 32>}, {pipeline_mode = #tpu.pipeline_mode<synchronous>, transform_indices = @transform_17, window_bounds = array<i64: 1, 1, 32>}, {pipeline_mode = #tpu.pipeline_mode<synchronous>, transform_indices = @transform_18, window_bounds = array<i64: 2, 1, 32>}, {pipeline_mode = #tpu.pipeline_mode<synchronous>, transform_indices = @transform_19, window_bounds = array<i64: 2, 1, 32>}, {pipeline_mode = #tpu.pipeline_mode<synchronous>, transform_indices = @transform_20, window_bounds = array<i64: 2, 32, 96>}, {pipeline_mode = #tpu.pipeline_mode<synchronous>, transform_indices = @transform_21, window_bounds = array<i64: 2, 1, 96>}, {pipeline_mode = #tpu.pipeline_mode<synchronous>, transform_indices = @transform_22, window_bounds = array<i64: 2, 32, 32>}, {pipeline_mode = #tpu.pipeline_mode<synchronous>, transform_indices = @transform_23, window_bounds = array<i64: 2, 1, 32>}, {pipeline_mode = #tpu.pipeline_mode<synchronous>, transform_indices = @transform_24, window_bounds = array<i64: 2, 1, 32>}, {pipeline_mode = #tpu.pipeline_mode<synchronous>, transform_indices = @transform_25, window_bounds = array<i64: 2, 1, 32>}, {pipeline_mode = #tpu.pipeline_mode<synchronous>, transform_indices = @transform_26, window_bounds = array<i64: 2, 32, 32>}, {pipeline_mode = #tpu.pipeline_mode<synchronous>, transform_indices = @transform_27, window_bounds = array<i64: 2, 1, 32>}, {pipeline_mode = #tpu.pipeline_mode<synchronous>, transform_indices = @transform_28, window_bounds = array<i64: 2, 32, 32>}, {pipeline_mode = #tpu.pipeline_mode<synchronous>, transform_indices = @transform_29, window_bounds = array<i64: 2, 1, 32>}, {transform_indices = @transform_30, window_bounds = array<i64: 2, 1, 256>}]} {
    %c0 = arith.constant 0 : index
    %c0_0 = arith.constant 0 : index
    %c0_1 = arith.constant 0 : index
    %0 = vector.load %arg1[%c0, %c0_0, %c0_1] : memref<2x8x32xf32, #tpu.memory_space<vmem>>, vector<2x8x32xf32>
    %1 = vector.shape_cast %0 : vector<2x8x32xf32> to vector<16x32xf32>
    %c0_2 = arith.constant 0 : index
    %c0_3 = arith.constant 0 : index
    %c0_4 = arith.constant 0 : index
    %2 = vector.load %arg2[%c0_2, %c0_3, %c0_4] : memref<2x8x32xf32, #tpu.memory_space<vmem>>, vector<2x8x32xf32>
    %3 = vector.shape_cast %2 : vector<2x8x32xf32> to vector<16x32xf32>
    %c0_5 = arith.constant 0 : index
    %c0_6 = arith.constant 0 : index
    %c0_7 = arith.constant 0 : index
    %4 = vector.load %arg3[%c0_5, %c0_6, %c0_7] : memref<1x1x32xf32, #tpu.memory_space<vmem>>, vector<1x1x32xf32>
    %5 = vector.shape_cast %4 : vector<1x1x32xf32> to vector<1x32xf32>
    %c0_8 = arith.constant 0 : index
    %c0_9 = arith.constant 0 : index
    %c0_10 = arith.constant 0 : index
    %6 = vector.load %arg4[%c0_8, %c0_9, %c0_10] : memref<1x1x32xf32, #tpu.memory_space<vmem>>, vector<1x1x32xf32>
    %7 = vector.shape_cast %6 : vector<1x1x32xf32> to vector<1x32xf32>
    %cst = arith.constant dense<0.000000e+00> : vector<16xf32>
    %8 = vector.multi_reduction <add>, %1, %cst [1] : vector<16x32xf32> to vector<16xf32>
    %9 = vector.shape_cast %8 : vector<16xf32> to vector<16x1xf32>
    %cst_11 = arith.constant 3.200000e+01 : f32
    %10 = vector.broadcast %cst_11 : f32 to vector<16x1xf32>
    %11 = arith.divf %9, %10 : vector<16x1xf32>
    %12 = arith.mulf %1, %1 : vector<16x32xf32>
    %cst_12 = arith.constant dense<0.000000e+00> : vector<16xf32>
    %13 = vector.multi_reduction <add>, %12, %cst_12 [1] : vector<16x32xf32> to vector<16xf32>
    %14 = vector.shape_cast %13 : vector<16xf32> to vector<16x1xf32>
    %cst_13 = arith.constant 3.200000e+01 : f32
    %15 = vector.broadcast %cst_13 : f32 to vector<16x1xf32>
    %16 = arith.divf %14, %15 : vector<16x1xf32>
    %17 = arith.mulf %11, %11 : vector<16x1xf32>
    %18 = arith.subf %16, %17 : vector<16x1xf32>
    %19 = vector.broadcast %11 : vector<16x1xf32> to vector<16x32xf32>
    %20 = arith.subf %1, %19 : vector<16x32xf32>
    %cst_14 = arith.constant 9.99999974E-6 : f32
    %21 = vector.broadcast %cst_14 : f32 to vector<16x1xf32>
    %22 = arith.addf %18, %21 : vector<16x1xf32>
    %23 = math.rsqrt %22 : vector<16x1xf32>
    %24 = vector.broadcast %23 : vector<16x1xf32> to vector<16x32xf32>
    %25 = arith.mulf %20, %24 : vector<16x32xf32>
    %26 = vector.broadcast %5 : vector<1x32xf32> to vector<16x32xf32>
    %27 = arith.mulf %25, %26 : vector<16x32xf32>
    %28 = vector.broadcast %7 : vector<1x32xf32> to vector<16x32xf32>
    %29 = arith.addf %27, %28 : vector<16x32xf32>
    %c0_15 = arith.constant 0 : index
    %c0_16 = arith.constant 0 : index
    %c0_17 = arith.constant 0 : index
    %30 = vector.load %arg5[%c0_15, %c0_16, %c0_17] : memref<1x1x32xf32, #tpu.memory_space<vmem>>, vector<1x1x32xf32>
    %31 = vector.shape_cast %30 : vector<1x1x32xf32> to vector<1x32xf32>
    %c0_18 = arith.constant 0 : index
    %c0_19 = arith.constant 0 : index
    %c0_20 = arith.constant 0 : index
    %32 = vector.load %arg6[%c0_18, %c0_19, %c0_20] : memref<1x1x32xf32, #tpu.memory_space<vmem>>, vector<1x1x32xf32>
    %33 = vector.shape_cast %32 : vector<1x1x32xf32> to vector<1x32xf32>
    %cst_21 = arith.constant dense<0.000000e+00> : vector<16xf32>
    %34 = vector.multi_reduction <add>, %3, %cst_21 [1] : vector<16x32xf32> to vector<16xf32>
    %35 = vector.shape_cast %34 : vector<16xf32> to vector<16x1xf32>
    %cst_22 = arith.constant 3.200000e+01 : f32
    %36 = vector.broadcast %cst_22 : f32 to vector<16x1xf32>
    %37 = arith.divf %35, %36 : vector<16x1xf32>
    %38 = arith.mulf %3, %3 : vector<16x32xf32>
    %cst_23 = arith.constant dense<0.000000e+00> : vector<16xf32>
    %39 = vector.multi_reduction <add>, %38, %cst_23 [1] : vector<16x32xf32> to vector<16xf32>
    %40 = vector.shape_cast %39 : vector<16xf32> to vector<16x1xf32>
    %cst_24 = arith.constant 3.200000e+01 : f32
    %41 = vector.broadcast %cst_24 : f32 to vector<16x1xf32>
    %42 = arith.divf %40, %41 : vector<16x1xf32>
    %43 = arith.mulf %37, %37 : vector<16x1xf32>
    %44 = arith.subf %42, %43 : vector<16x1xf32>
    %45 = vector.broadcast %37 : vector<16x1xf32> to vector<16x32xf32>
    %46 = arith.subf %3, %45 : vector<16x32xf32>
    %cst_25 = arith.constant 9.99999974E-6 : f32
    %47 = vector.broadcast %cst_25 : f32 to vector<16x1xf32>
    %48 = arith.addf %44, %47 : vector<16x1xf32>
    %49 = math.rsqrt %48 : vector<16x1xf32>
    %50 = vector.broadcast %49 : vector<16x1xf32> to vector<16x32xf32>
    %51 = arith.mulf %46, %50 : vector<16x32xf32>
    %52 = vector.broadcast %31 : vector<1x32xf32> to vector<16x32xf32>
    %53 = arith.mulf %51, %52 : vector<16x32xf32>
    %54 = vector.broadcast %33 : vector<1x32xf32> to vector<16x32xf32>
    %55 = arith.addf %53, %54 : vector<16x32xf32>
    %c0_26 = arith.constant 0 : index
    %c0_27 = arith.constant 0 : index
    %c0_28 = arith.constant 0 : index
    %56 = vector.load %arg7[%c0_26, %c0_27, %c0_28] : memref<1x32x32xbf16, #tpu.memory_space<vmem>>, vector<1x32x32xbf16>
    %57 = vector.shape_cast %56 : vector<1x32x32xbf16> to vector<32x32xbf16>
    %c0_29 = arith.constant 0 : index
    %c0_30 = arith.constant 0 : index
    %c0_31 = arith.constant 0 : index
    %58 = vector.load %arg8[%c0_29, %c0_30, %c0_31] : memref<1x1x32xf32, #tpu.memory_space<vmem>>, vector<1x1x32xf32>
    %59 = vector.shape_cast %58 : vector<1x1x32xf32> to vector<1x32xf32>
    %60 = arith.truncf %29 : vector<16x32xf32> to vector<16x32xbf16>
    %cst_32 = arith.constant dense<0.000000e+00> : vector<16x32xf32>
    %61 = tpu.matmul %60, %57, %cst_32 {dimension_numbers = #tpu.dot_dimension_numbers<[1], [0], [0], [1], [0, 0, 1, 1], [], []>} : vector<16x32xbf16>, vector<32x32xbf16>, vector<16x32xf32> -> vector<16x32xf32>
    %62 = vector.broadcast %59 : vector<1x32xf32> to vector<16x32xf32>
    %63 = arith.addf %61, %62 : vector<16x32xf32>
    %c0_33 = arith.constant 0 : index
    %c0_34 = arith.constant 0 : index
    %c0_35 = arith.constant 0 : index
    %64 = vector.load %arg9[%c0_33, %c0_34, %c0_35] : memref<1x32x64xbf16, #tpu.memory_space<vmem>>, vector<1x32x64xbf16>
    %65 = vector.shape_cast %64 : vector<1x32x64xbf16> to vector<32x64xbf16>
    %c0_36 = arith.constant 0 : index
    %c0_37 = arith.constant 0 : index
    %c0_38 = arith.constant 0 : index
    %66 = vector.load %arg10[%c0_36, %c0_37, %c0_38] : memref<1x1x64xf32, #tpu.memory_space<vmem>>, vector<1x1x64xf32>
    %67 = vector.shape_cast %66 : vector<1x1x64xf32> to vector<1x64xf32>
    %68 = arith.truncf %55 : vector<16x32xf32> to vector<16x32xbf16>
    %cst_39 = arith.constant dense<0.000000e+00> : vector<16x64xf32>
    %69 = tpu.matmul %68, %65, %cst_39 {dimension_numbers = #tpu.dot_dimension_numbers<[1], [0], [0], [1], [0, 0, 1, 1], [], []>} : vector<16x32xbf16>, vector<32x64xbf16>, vector<16x64xf32> -> vector<16x64xf32>
    %70 = vector.broadcast %67 : vector<1x64xf32> to vector<16x64xf32>
    %71 = arith.addf %69, %70 : vector<16x64xf32>
    %72 = vector.extract_strided_slice %71 {offsets = [0, 0], sizes = [16, 32], strides = [1, 1]} : vector<16x64xf32> to vector<16x32xf32>
    %73 = vector.extract_strided_slice %71 {offsets = [0, 32], sizes = [16, 32], strides = [1, 1]} : vector<16x64xf32> to vector<16x32xf32>
    %74 = vector.shape_cast %63 : vector<16x32xf32> to vector<2x8x32xf32>
    %75 = vector.shape_cast %72 : vector<16x32xf32> to vector<2x8x32xf32>
    %76 = vector.shape_cast %73 : vector<16x32xf32> to vector<2x8x32xf32>
    %77 = vector.extract_strided_slice %74 {offsets = [0, 0, 0], sizes = [2, 8, 8], strides = [1, 1, 1]} : vector<2x8x32xf32> to vector<2x8x8xf32>
    %78 = arith.truncf %77 : vector<2x8x8xf32> to vector<2x8x8xbf16>
    %79 = vector.extract_strided_slice %75 {offsets = [0, 0, 0], sizes = [2, 8, 8], strides = [1, 1, 1]} : vector<2x8x32xf32> to vector<2x8x8xf32>
    %80 = arith.truncf %79 : vector<2x8x8xf32> to vector<2x8x8xbf16>
    %81 = vector.extract_strided_slice %76 {offsets = [0, 0, 0], sizes = [2, 8, 8], strides = [1, 1, 1]} : vector<2x8x32xf32> to vector<2x8x8xf32>
    %82 = arith.truncf %81 : vector<2x8x8xf32> to vector<2x8x8xbf16>
    "tpu.trace_start"() <{level = 10 : i32, message = "bnd,bmd->bnm"}> : () -> ()
    %cst_40 = arith.constant dense<0.000000e+00> : vector<2x8x8xf32>
    %83 = tpu.matmul %78, %80, %cst_40 {dimension_numbers = #tpu.dot_dimension_numbers<[2], [2], [1], [1], [0, 0, 0, 1, 1, 1], [0], [0]>} : vector<2x8x8xbf16>, vector<2x8x8xbf16>, vector<2x8x8xf32> -> vector<2x8x8xf32>
    "tpu.trace_stop"() : () -> ()
    %cst_41 = arith.constant dense<0xFF800000> : vector<2x8xf32>
    %84 = vector.multi_reduction <maximumf>, %83, %cst_41 [2] : vector<2x8x8xf32> to vector<2x8xf32>
    %85 = vector.shape_cast %84 : vector<2x8xf32> to vector<2x8x1xf32>
    %86 = vector.broadcast %85 : vector<2x8x1xf32> to vector<2x8x8xf32>
    %87 = arith.subf %83, %86 : vector<2x8x8xf32>
    %88 = math.exp %87 : vector<2x8x8xf32>
    %cst_42 = arith.constant dense<0.000000e+00> : vector<2x8xf32>
    %89 = vector.multi_reduction <add>, %88, %cst_42 [2] : vector<2x8x8xf32> to vector<2x8xf32>
    %90 = vector.shape_cast %89 : vector<2x8xf32> to vector<2x8x1xf32>
    %91 = vector.broadcast %90 : vector<2x8x1xf32> to vector<2x8x8xf32>
    %92 = arith.divf %88, %91 : vector<2x8x8xf32>
    %93 = arith.truncf %92 : vector<2x8x8xf32> to vector<2x8x8xbf16>
    "tpu.trace_start"() <{level = 10 : i32, message = "bnm,bmd->bnd"}> : () -> ()
    %cst_43 = arith.constant dense<0.000000e+00> : vector<2x8x8xf32>
    %94 = tpu.matmul %93, %82, %cst_43 {dimension_numbers = #tpu.dot_dimension_numbers<[2], [1], [1], [2], [0, 0, 0, 1, 1, 2], [0], [0]>} : vector<2x8x8xbf16>, vector<2x8x8xbf16>, vector<2x8x8xf32> -> vector<2x8x8xf32>
    "tpu.trace_stop"() : () -> ()
    %95 = vector.extract_strided_slice %74 {offsets = [0, 0, 8], sizes = [2, 8, 8], strides = [1, 1, 1]} : vector<2x8x32xf32> to vector<2x8x8xf32>
    %96 = arith.truncf %95 : vector<2x8x8xf32> to vector<2x8x8xbf16>
    %97 = vector.extract_strided_slice %75 {offsets = [0, 0, 8], sizes = [2, 8, 8], strides = [1, 1, 1]} : vector<2x8x32xf32> to vector<2x8x8xf32>
    %98 = arith.truncf %97 : vector<2x8x8xf32> to vector<2x8x8xbf16>
    %99 = vector.extract_strided_slice %76 {offsets = [0, 0, 8], sizes = [2, 8, 8], strides = [1, 1, 1]} : vector<2x8x32xf32> to vector<2x8x8xf32>
    %100 = arith.truncf %99 : vector<2x8x8xf32> to vector<2x8x8xbf16>
    "tpu.trace_start"() <{level = 10 : i32, message = "bnd,bmd->bnm"}> : () -> ()
    %cst_44 = arith.constant dense<0.000000e+00> : vector<2x8x8xf32>
    %101 = tpu.matmul %96, %98, %cst_44 {dimension_numbers = #tpu.dot_dimension_numbers<[2], [2], [1], [1], [0, 0, 0, 1, 1, 1], [0], [0]>} : vector<2x8x8xbf16>, vector<2x8x8xbf16>, vector<2x8x8xf32> -> vector<2x8x8xf32>
    "tpu.trace_stop"() : () -> ()
    %cst_45 = arith.constant dense<0xFF800000> : vector<2x8xf32>
    %102 = vector.multi_reduction <maximumf>, %101, %cst_45 [2] : vector<2x8x8xf32> to vector<2x8xf32>
    %103 = vector.shape_cast %102 : vector<2x8xf32> to vector<2x8x1xf32>
    %104 = vector.broadcast %103 : vector<2x8x1xf32> to vector<2x8x8xf32>
    %105 = arith.subf %101, %104 : vector<2x8x8xf32>
    %106 = math.exp %105 : vector<2x8x8xf32>
    %cst_46 = arith.constant dense<0.000000e+00> : vector<2x8xf32>
    %107 = vector.multi_reduction <add>, %106, %cst_46 [2] : vector<2x8x8xf32> to vector<2x8xf32>
    %108 = vector.shape_cast %107 : vector<2x8xf32> to vector<2x8x1xf32>
    %109 = vector.broadcast %108 : vector<2x8x1xf32> to vector<2x8x8xf32>
    %110 = arith.divf %106, %109 : vector<2x8x8xf32>
    %111 = arith.truncf %110 : vector<2x8x8xf32> to vector<2x8x8xbf16>
    "tpu.trace_start"() <{level = 10 : i32, message = "bnm,bmd->bnd"}> : () -> ()
    %cst_47 = arith.constant dense<0.000000e+00> : vector<2x8x8xf32>
    %112 = tpu.matmul %111, %100, %cst_47 {dimension_numbers = #tpu.dot_dimension_numbers<[2], [1], [1], [2], [0, 0, 0, 1, 1, 2], [0], [0]>} : vector<2x8x8xbf16>, vector<2x8x8xbf16>, vector<2x8x8xf32> -> vector<2x8x8xf32>
    "tpu.trace_stop"() : () -> ()
    %113 = vector.extract_strided_slice %74 {offsets = [0, 0, 16], sizes = [2, 8, 8], strides = [1, 1, 1]} : vector<2x8x32xf32> to vector<2x8x8xf32>
    %114 = arith.truncf %113 : vector<2x8x8xf32> to vector<2x8x8xbf16>
    %115 = vector.extract_strided_slice %75 {offsets = [0, 0, 16], sizes = [2, 8, 8], strides = [1, 1, 1]} : vector<2x8x32xf32> to vector<2x8x8xf32>
    %116 = arith.truncf %115 : vector<2x8x8xf32> to vector<2x8x8xbf16>
    %117 = vector.extract_strided_slice %76 {offsets = [0, 0, 16], sizes = [2, 8, 8], strides = [1, 1, 1]} : vector<2x8x32xf32> to vector<2x8x8xf32>
    %118 = arith.truncf %117 : vector<2x8x8xf32> to vector<2x8x8xbf16>
    "tpu.trace_start"() <{level = 10 : i32, message = "bnd,bmd->bnm"}> : () -> ()
    %cst_48 = arith.constant dense<0.000000e+00> : vector<2x8x8xf32>
    %119 = tpu.matmul %114, %116, %cst_48 {dimension_numbers = #tpu.dot_dimension_numbers<[2], [2], [1], [1], [0, 0, 0, 1, 1, 1], [0], [0]>} : vector<2x8x8xbf16>, vector<2x8x8xbf16>, vector<2x8x8xf32> -> vector<2x8x8xf32>
    "tpu.trace_stop"() : () -> ()
    %cst_49 = arith.constant dense<0xFF800000> : vector<2x8xf32>
    %120 = vector.multi_reduction <maximumf>, %119, %cst_49 [2] : vector<2x8x8xf32> to vector<2x8xf32>
    %121 = vector.shape_cast %120 : vector<2x8xf32> to vector<2x8x1xf32>
    %122 = vector.broadcast %121 : vector<2x8x1xf32> to vector<2x8x8xf32>
    %123 = arith.subf %119, %122 : vector<2x8x8xf32>
    %124 = math.exp %123 : vector<2x8x8xf32>
    %cst_50 = arith.constant dense<0.000000e+00> : vector<2x8xf32>
    %125 = vector.multi_reduction <add>, %124, %cst_50 [2] : vector<2x8x8xf32> to vector<2x8xf32>
    %126 = vector.shape_cast %125 : vector<2x8xf32> to vector<2x8x1xf32>
    %127 = vector.broadcast %126 : vector<2x8x1xf32> to vector<2x8x8xf32>
    %128 = arith.divf %124, %127 : vector<2x8x8xf32>
    %129 = arith.truncf %128 : vector<2x8x8xf32> to vector<2x8x8xbf16>
    "tpu.trace_start"() <{level = 10 : i32, message = "bnm,bmd->bnd"}> : () -> ()
    %cst_51 = arith.constant dense<0.000000e+00> : vector<2x8x8xf32>
    %130 = tpu.matmul %129, %118, %cst_51 {dimension_numbers = #tpu.dot_dimension_numbers<[2], [1], [1], [2], [0, 0, 0, 1, 1, 2], [0], [0]>} : vector<2x8x8xbf16>, vector<2x8x8xbf16>, vector<2x8x8xf32> -> vector<2x8x8xf32>
    "tpu.trace_stop"() : () -> ()
    %131 = vector.extract_strided_slice %74 {offsets = [0, 0, 24], sizes = [2, 8, 8], strides = [1, 1, 1]} : vector<2x8x32xf32> to vector<2x8x8xf32>
    %132 = arith.truncf %131 : vector<2x8x8xf32> to vector<2x8x8xbf16>
    %133 = vector.extract_strided_slice %75 {offsets = [0, 0, 24], sizes = [2, 8, 8], strides = [1, 1, 1]} : vector<2x8x32xf32> to vector<2x8x8xf32>
    %134 = arith.truncf %133 : vector<2x8x8xf32> to vector<2x8x8xbf16>
    %135 = vector.extract_strided_slice %76 {offsets = [0, 0, 24], sizes = [2, 8, 8], strides = [1, 1, 1]} : vector<2x8x32xf32> to vector<2x8x8xf32>
    %136 = arith.truncf %135 : vector<2x8x8xf32> to vector<2x8x8xbf16>
    "tpu.trace_start"() <{level = 10 : i32, message = "bnd,bmd->bnm"}> : () -> ()
    %cst_52 = arith.constant dense<0.000000e+00> : vector<2x8x8xf32>
    %137 = tpu.matmul %132, %134, %cst_52 {dimension_numbers = #tpu.dot_dimension_numbers<[2], [2], [1], [1], [0, 0, 0, 1, 1, 1], [0], [0]>} : vector<2x8x8xbf16>, vector<2x8x8xbf16>, vector<2x8x8xf32> -> vector<2x8x8xf32>
    "tpu.trace_stop"() : () -> ()
    %cst_53 = arith.constant dense<0xFF800000> : vector<2x8xf32>
    %138 = vector.multi_reduction <maximumf>, %137, %cst_53 [2] : vector<2x8x8xf32> to vector<2x8xf32>
    %139 = vector.shape_cast %138 : vector<2x8xf32> to vector<2x8x1xf32>
    %140 = vector.broadcast %139 : vector<2x8x1xf32> to vector<2x8x8xf32>
    %141 = arith.subf %137, %140 : vector<2x8x8xf32>
    %142 = math.exp %141 : vector<2x8x8xf32>
    %cst_54 = arith.constant dense<0.000000e+00> : vector<2x8xf32>
    %143 = vector.multi_reduction <add>, %142, %cst_54 [2] : vector<2x8x8xf32> to vector<2x8xf32>
    %144 = vector.shape_cast %143 : vector<2x8xf32> to vector<2x8x1xf32>
    %145 = vector.broadcast %144 : vector<2x8x1xf32> to vector<2x8x8xf32>
    %146 = arith.divf %142, %145 : vector<2x8x8xf32>
    %147 = arith.truncf %146 : vector<2x8x8xf32> to vector<2x8x8xbf16>
    "tpu.trace_start"() <{level = 10 : i32, message = "bnm,bmd->bnd"}> : () -> ()
    %cst_55 = arith.constant dense<0.000000e+00> : vector<2x8x8xf32>
    %148 = tpu.matmul %147, %136, %cst_55 {dimension_numbers = #tpu.dot_dimension_numbers<[2], [1], [1], [2], [0, 0, 0, 1, 1, 2], [0], [0]>} : vector<2x8x8xbf16>, vector<2x8x8xbf16>, vector<2x8x8xf32> -> vector<2x8x8xf32>
    "tpu.trace_stop"() : () -> ()
    %149 = tpu.concatenate %94, %112, %130, %148 in 2 : vector<2x8x8xf32>, vector<2x8x8xf32>, vector<2x8x8xf32>, vector<2x8x8xf32> -> vector<2x8x32xf32>
    %150 = vector.shape_cast %149 : vector<2x8x32xf32> to vector<16x32xf32>
    %c0_56 = arith.constant 0 : index
    %c0_57 = arith.constant 0 : index
    %c0_58 = arith.constant 0 : index
    %151 = vector.load %arg11[%c0_56, %c0_57, %c0_58] : memref<1x32x32xbf16, #tpu.memory_space<vmem>>, vector<1x32x32xbf16>
    %152 = vector.shape_cast %151 : vector<1x32x32xbf16> to vector<32x32xbf16>
    %c0_59 = arith.constant 0 : index
    %c0_60 = arith.constant 0 : index
    %c0_61 = arith.constant 0 : index
    %153 = vector.load %arg12[%c0_59, %c0_60, %c0_61] : memref<1x1x32xf32, #tpu.memory_space<vmem>>, vector<1x1x32xf32>
    %154 = vector.shape_cast %153 : vector<1x1x32xf32> to vector<1x32xf32>
    %155 = arith.truncf %150 : vector<16x32xf32> to vector<16x32xbf16>
    %cst_62 = arith.constant dense<0.000000e+00> : vector<16x32xf32>
    %156 = tpu.matmul %155, %152, %cst_62 {dimension_numbers = #tpu.dot_dimension_numbers<[1], [0], [0], [1], [0, 0, 1, 1], [], []>} : vector<16x32xbf16>, vector<32x32xbf16>, vector<16x32xf32> -> vector<16x32xf32>
    %157 = vector.broadcast %154 : vector<1x32xf32> to vector<16x32xf32>
    %158 = arith.addf %156, %157 : vector<16x32xf32>
    %159 = arith.addf %1, %158 : vector<16x32xf32>
    %c0_63 = arith.constant 0 : index
    %c0_64 = arith.constant 0 : index
    %c0_65 = arith.constant 0 : index
    %160 = vector.load %arg13[%c0_63, %c0_64, %c0_65] : memref<1x1x32xf32, #tpu.memory_space<vmem>>, vector<1x1x32xf32>
    %161 = vector.shape_cast %160 : vector<1x1x32xf32> to vector<1x32xf32>
    %c0_66 = arith.constant 0 : index
    %c0_67 = arith.constant 0 : index
    %c0_68 = arith.constant 0 : index
    %162 = vector.load %arg14[%c0_66, %c0_67, %c0_68] : memref<1x1x32xf32, #tpu.memory_space<vmem>>, vector<1x1x32xf32>
    %163 = vector.shape_cast %162 : vector<1x1x32xf32> to vector<1x32xf32>
    %c0_69 = arith.constant 0 : index
    %c0_70 = arith.constant 0 : index
    %c0_71 = arith.constant 0 : index
    %164 = vector.load %arg15[%c0_69, %c0_70, %c0_71] : memref<1x32x32xbf16, #tpu.memory_space<vmem>>, vector<1x32x32xbf16>
    %165 = vector.shape_cast %164 : vector<1x32x32xbf16> to vector<32x32xbf16>
    %c0_72 = arith.constant 0 : index
    %c0_73 = arith.constant 0 : index
    %c0_74 = arith.constant 0 : index
    %166 = vector.load %arg16[%c0_72, %c0_73, %c0_74] : memref<1x1x32xf32, #tpu.memory_space<vmem>>, vector<1x1x32xf32>
    %167 = vector.shape_cast %166 : vector<1x1x32xf32> to vector<1x32xf32>
    %c0_75 = arith.constant 0 : index
    %c0_76 = arith.constant 0 : index
    %c0_77 = arith.constant 0 : index
    %168 = vector.load %arg17[%c0_75, %c0_76, %c0_77] : memref<1x32x32xbf16, #tpu.memory_space<vmem>>, vector<1x32x32xbf16>
    %169 = vector.shape_cast %168 : vector<1x32x32xbf16> to vector<32x32xbf16>
    %c0_78 = arith.constant 0 : index
    %c0_79 = arith.constant 0 : index
    %c0_80 = arith.constant 0 : index
    %170 = vector.load %arg18[%c0_78, %c0_79, %c0_80] : memref<1x1x32xf32, #tpu.memory_space<vmem>>, vector<1x1x32xf32>
    %171 = vector.shape_cast %170 : vector<1x1x32xf32> to vector<1x32xf32>
    %cst_81 = arith.constant dense<0.000000e+00> : vector<16xf32>
    %172 = vector.multi_reduction <add>, %159, %cst_81 [1] : vector<16x32xf32> to vector<16xf32>
    %173 = vector.shape_cast %172 : vector<16xf32> to vector<16x1xf32>
    %cst_82 = arith.constant 3.200000e+01 : f32
    %174 = vector.broadcast %cst_82 : f32 to vector<16x1xf32>
    %175 = arith.divf %173, %174 : vector<16x1xf32>
    %176 = arith.mulf %159, %159 : vector<16x32xf32>
    %cst_83 = arith.constant dense<0.000000e+00> : vector<16xf32>
    %177 = vector.multi_reduction <add>, %176, %cst_83 [1] : vector<16x32xf32> to vector<16xf32>
    %178 = vector.shape_cast %177 : vector<16xf32> to vector<16x1xf32>
    %cst_84 = arith.constant 3.200000e+01 : f32
    %179 = vector.broadcast %cst_84 : f32 to vector<16x1xf32>
    %180 = arith.divf %178, %179 : vector<16x1xf32>
    %181 = arith.mulf %175, %175 : vector<16x1xf32>
    %182 = arith.subf %180, %181 : vector<16x1xf32>
    %183 = vector.broadcast %175 : vector<16x1xf32> to vector<16x32xf32>
    %184 = arith.subf %159, %183 : vector<16x32xf32>
    %cst_85 = arith.constant 9.99999974E-6 : f32
    %185 = vector.broadcast %cst_85 : f32 to vector<16x1xf32>
    %186 = arith.addf %182, %185 : vector<16x1xf32>
    %187 = math.rsqrt %186 : vector<16x1xf32>
    %188 = vector.broadcast %187 : vector<16x1xf32> to vector<16x32xf32>
    %189 = arith.mulf %184, %188 : vector<16x32xf32>
    %190 = vector.broadcast %161 : vector<1x32xf32> to vector<16x32xf32>
    %191 = arith.mulf %189, %190 : vector<16x32xf32>
    %192 = vector.broadcast %163 : vector<1x32xf32> to vector<16x32xf32>
    %193 = arith.addf %191, %192 : vector<16x32xf32>
    %194 = arith.truncf %193 : vector<16x32xf32> to vector<16x32xbf16>
    %cst_86 = arith.constant dense<0.000000e+00> : vector<16x32xf32>
    %195 = tpu.matmul %194, %165, %cst_86 {dimension_numbers = #tpu.dot_dimension_numbers<[1], [0], [0], [1], [0, 0, 1, 1], [], []>} : vector<16x32xbf16>, vector<32x32xbf16>, vector<16x32xf32> -> vector<16x32xf32>
    %196 = vector.broadcast %167 : vector<1x32xf32> to vector<16x32xf32>
    %197 = arith.addf %195, %196 : vector<16x32xf32>
    %198 = arith.mulf %197, %197 : vector<16x32xf32>
    %199 = arith.mulf %197, %198 : vector<16x32xf32>
    %cst_87 = arith.constant 4.471500e-02 : f32
    %200 = vector.broadcast %cst_87 : f32 to vector<16x32xf32>
    %201 = arith.mulf %200, %199 : vector<16x32xf32>
    %202 = arith.addf %197, %201 : vector<16x32xf32>
    %cst_88 = arith.constant 0.797884583 : f32
    %203 = vector.broadcast %cst_88 : f32 to vector<16x32xf32>
    %204 = arith.mulf %203, %202 : vector<16x32xf32>
    %205 = math.tanh %204 : vector<16x32xf32>
    %cst_89 = arith.constant 1.000000e+00 : f32
    %206 = vector.broadcast %cst_89 : f32 to vector<16x32xf32>
    %207 = arith.addf %206, %205 : vector<16x32xf32>
    %cst_90 = arith.constant 5.000000e-01 : f32
    %208 = vector.broadcast %cst_90 : f32 to vector<16x32xf32>
    %209 = arith.mulf %208, %207 : vector<16x32xf32>
    %210 = arith.mulf %197, %209 : vector<16x32xf32>
    %211 = arith.truncf %210 : vector<16x32xf32> to vector<16x32xbf16>
    %cst_91 = arith.constant dense<0.000000e+00> : vector<16x32xf32>
    %212 = tpu.matmul %211, %169, %cst_91 {dimension_numbers = #tpu.dot_dimension_numbers<[1], [0], [0], [1], [0, 0, 1, 1], [], []>} : vector<16x32xbf16>, vector<32x32xbf16>, vector<16x32xf32> -> vector<16x32xf32>
    %213 = vector.broadcast %171 : vector<1x32xf32> to vector<16x32xf32>
    %214 = arith.addf %212, %213 : vector<16x32xf32>
    %215 = arith.addf %159, %214 : vector<16x32xf32>
    %c0_92 = arith.constant 0 : index
    %c0_93 = arith.constant 0 : index
    %c0_94 = arith.constant 0 : index
    %216 = vector.load %arg19[%c0_92, %c0_93, %c0_94] : memref<2x1x32xf32, #tpu.memory_space<vmem>>, vector<1x1x32xf32>
    %217 = vector.shape_cast %216 : vector<1x1x32xf32> to vector<1x32xf32>
    %c0_95 = arith.constant 0 : index
    %c0_96 = arith.constant 0 : index
    %c0_97 = arith.constant 0 : index
    %218 = vector.load %arg20[%c0_95, %c0_96, %c0_97] : memref<2x1x32xf32, #tpu.memory_space<vmem>>, vector<1x1x32xf32>
    %219 = vector.shape_cast %218 : vector<1x1x32xf32> to vector<1x32xf32>
    %cst_98 = arith.constant dense<0.000000e+00> : vector<16xf32>
    %220 = vector.multi_reduction <add>, %215, %cst_98 [1] : vector<16x32xf32> to vector<16xf32>
    %221 = vector.shape_cast %220 : vector<16xf32> to vector<16x1xf32>
    %cst_99 = arith.constant 3.200000e+01 : f32
    %222 = vector.broadcast %cst_99 : f32 to vector<16x1xf32>
    %223 = arith.divf %221, %222 : vector<16x1xf32>
    %224 = arith.mulf %215, %215 : vector<16x32xf32>
    %cst_100 = arith.constant dense<0.000000e+00> : vector<16xf32>
    %225 = vector.multi_reduction <add>, %224, %cst_100 [1] : vector<16x32xf32> to vector<16xf32>
    %226 = vector.shape_cast %225 : vector<16xf32> to vector<16x1xf32>
    %cst_101 = arith.constant 3.200000e+01 : f32
    %227 = vector.broadcast %cst_101 : f32 to vector<16x1xf32>
    %228 = arith.divf %226, %227 : vector<16x1xf32>
    %229 = arith.mulf %223, %223 : vector<16x1xf32>
    %230 = arith.subf %228, %229 : vector<16x1xf32>
    %231 = vector.broadcast %223 : vector<16x1xf32> to vector<16x32xf32>
    %232 = arith.subf %215, %231 : vector<16x32xf32>
    %cst_102 = arith.constant 9.99999974E-6 : f32
    %233 = vector.broadcast %cst_102 : f32 to vector<16x1xf32>
    %234 = arith.addf %230, %233 : vector<16x1xf32>
    %235 = math.rsqrt %234 : vector<16x1xf32>
    %236 = vector.broadcast %235 : vector<16x1xf32> to vector<16x32xf32>
    %237 = arith.mulf %232, %236 : vector<16x32xf32>
    %238 = vector.broadcast %217 : vector<1x32xf32> to vector<16x32xf32>
    %239 = arith.mulf %237, %238 : vector<16x32xf32>
    %240 = vector.broadcast %219 : vector<1x32xf32> to vector<16x32xf32>
    %241 = arith.addf %239, %240 : vector<16x32xf32>
    %c0_103 = arith.constant 0 : index
    %c0_104 = arith.constant 0 : index
    %c0_105 = arith.constant 0 : index
    %242 = vector.load %arg21[%c0_103, %c0_104, %c0_105] : memref<2x32x96xbf16, #tpu.memory_space<vmem>>, vector<1x32x96xbf16>
    %243 = vector.shape_cast %242 : vector<1x32x96xbf16> to vector<32x96xbf16>
    %c0_106 = arith.constant 0 : index
    %c0_107 = arith.constant 0 : index
    %c0_108 = arith.constant 0 : index
    %244 = vector.load %arg22[%c0_106, %c0_107, %c0_108] : memref<2x1x96xf32, #tpu.memory_space<vmem>>, vector<1x1x96xf32>
    %245 = vector.shape_cast %244 : vector<1x1x96xf32> to vector<1x96xf32>
    %246 = arith.truncf %241 : vector<16x32xf32> to vector<16x32xbf16>
    %cst_109 = arith.constant dense<0.000000e+00> : vector<16x96xf32>
    %247 = tpu.matmul %246, %243, %cst_109 {dimension_numbers = #tpu.dot_dimension_numbers<[1], [0], [0], [1], [0, 0, 1, 1], [], []>} : vector<16x32xbf16>, vector<32x96xbf16>, vector<16x96xf32> -> vector<16x96xf32>
    %248 = vector.broadcast %245 : vector<1x96xf32> to vector<16x96xf32>
    %249 = arith.addf %247, %248 : vector<16x96xf32>
    %250 = vector.extract_strided_slice %249 {offsets = [0, 0], sizes = [16, 32], strides = [1, 1]} : vector<16x96xf32> to vector<16x32xf32>
    %251 = vector.extract_strided_slice %249 {offsets = [0, 32], sizes = [16, 32], strides = [1, 1]} : vector<16x96xf32> to vector<16x32xf32>
    %252 = vector.extract_strided_slice %249 {offsets = [0, 64], sizes = [16, 32], strides = [1, 1]} : vector<16x96xf32> to vector<16x32xf32>
    %253 = vector.shape_cast %250 : vector<16x32xf32> to vector<2x8x32xf32>
    %254 = vector.shape_cast %251 : vector<16x32xf32> to vector<2x8x32xf32>
    %255 = vector.shape_cast %252 : vector<16x32xf32> to vector<2x8x32xf32>
    %256 = vector.extract_strided_slice %253 {offsets = [0, 0, 0], sizes = [2, 8, 8], strides = [1, 1, 1]} : vector<2x8x32xf32> to vector<2x8x8xf32>
    %257 = arith.truncf %256 : vector<2x8x8xf32> to vector<2x8x8xbf16>
    %258 = vector.extract_strided_slice %254 {offsets = [0, 0, 0], sizes = [2, 8, 8], strides = [1, 1, 1]} : vector<2x8x32xf32> to vector<2x8x8xf32>
    %259 = arith.truncf %258 : vector<2x8x8xf32> to vector<2x8x8xbf16>
    %260 = vector.extract_strided_slice %255 {offsets = [0, 0, 0], sizes = [2, 8, 8], strides = [1, 1, 1]} : vector<2x8x32xf32> to vector<2x8x8xf32>
    %261 = arith.truncf %260 : vector<2x8x8xf32> to vector<2x8x8xbf16>
    "tpu.trace_start"() <{level = 10 : i32, message = "bnd,bmd->bnm"}> : () -> ()
    %cst_110 = arith.constant dense<0.000000e+00> : vector<2x8x8xf32>
    %262 = tpu.matmul %257, %259, %cst_110 {dimension_numbers = #tpu.dot_dimension_numbers<[2], [2], [1], [1], [0, 0, 0, 1, 1, 1], [0], [0]>} : vector<2x8x8xbf16>, vector<2x8x8xbf16>, vector<2x8x8xf32> -> vector<2x8x8xf32>
    "tpu.trace_stop"() : () -> ()
    %cst_111 = arith.constant dense<0xFF800000> : vector<2x8xf32>
    %263 = vector.multi_reduction <maximumf>, %262, %cst_111 [2] : vector<2x8x8xf32> to vector<2x8xf32>
    %264 = vector.shape_cast %263 : vector<2x8xf32> to vector<2x8x1xf32>
    %265 = vector.broadcast %264 : vector<2x8x1xf32> to vector<2x8x8xf32>
    %266 = arith.subf %262, %265 : vector<2x8x8xf32>
    %267 = math.exp %266 : vector<2x8x8xf32>
    %cst_112 = arith.constant dense<0.000000e+00> : vector<2x8xf32>
    %268 = vector.multi_reduction <add>, %267, %cst_112 [2] : vector<2x8x8xf32> to vector<2x8xf32>
    %269 = vector.shape_cast %268 : vector<2x8xf32> to vector<2x8x1xf32>
    %270 = vector.broadcast %269 : vector<2x8x1xf32> to vector<2x8x8xf32>
    %271 = arith.divf %267, %270 : vector<2x8x8xf32>
    %272 = arith.truncf %271 : vector<2x8x8xf32> to vector<2x8x8xbf16>
    "tpu.trace_start"() <{level = 10 : i32, message = "bnm,bmd->bnd"}> : () -> ()
    %cst_113 = arith.constant dense<0.000000e+00> : vector<2x8x8xf32>
    %273 = tpu.matmul %272, %261, %cst_113 {dimension_numbers = #tpu.dot_dimension_numbers<[2], [1], [1], [2], [0, 0, 0, 1, 1, 2], [0], [0]>} : vector<2x8x8xbf16>, vector<2x8x8xbf16>, vector<2x8x8xf32> -> vector<2x8x8xf32>
    "tpu.trace_stop"() : () -> ()
    %274 = vector.extract_strided_slice %253 {offsets = [0, 0, 8], sizes = [2, 8, 8], strides = [1, 1, 1]} : vector<2x8x32xf32> to vector<2x8x8xf32>
    %275 = arith.truncf %274 : vector<2x8x8xf32> to vector<2x8x8xbf16>
    %276 = vector.extract_strided_slice %254 {offsets = [0, 0, 8], sizes = [2, 8, 8], strides = [1, 1, 1]} : vector<2x8x32xf32> to vector<2x8x8xf32>
    %277 = arith.truncf %276 : vector<2x8x8xf32> to vector<2x8x8xbf16>
    %278 = vector.extract_strided_slice %255 {offsets = [0, 0, 8], sizes = [2, 8, 8], strides = [1, 1, 1]} : vector<2x8x32xf32> to vector<2x8x8xf32>
    %279 = arith.truncf %278 : vector<2x8x8xf32> to vector<2x8x8xbf16>
    "tpu.trace_start"() <{level = 10 : i32, message = "bnd,bmd->bnm"}> : () -> ()
    %cst_114 = arith.constant dense<0.000000e+00> : vector<2x8x8xf32>
    %280 = tpu.matmul %275, %277, %cst_114 {dimension_numbers = #tpu.dot_dimension_numbers<[2], [2], [1], [1], [0, 0, 0, 1, 1, 1], [0], [0]>} : vector<2x8x8xbf16>, vector<2x8x8xbf16>, vector<2x8x8xf32> -> vector<2x8x8xf32>
    "tpu.trace_stop"() : () -> ()
    %cst_115 = arith.constant dense<0xFF800000> : vector<2x8xf32>
    %281 = vector.multi_reduction <maximumf>, %280, %cst_115 [2] : vector<2x8x8xf32> to vector<2x8xf32>
    %282 = vector.shape_cast %281 : vector<2x8xf32> to vector<2x8x1xf32>
    %283 = vector.broadcast %282 : vector<2x8x1xf32> to vector<2x8x8xf32>
    %284 = arith.subf %280, %283 : vector<2x8x8xf32>
    %285 = math.exp %284 : vector<2x8x8xf32>
    %cst_116 = arith.constant dense<0.000000e+00> : vector<2x8xf32>
    %286 = vector.multi_reduction <add>, %285, %cst_116 [2] : vector<2x8x8xf32> to vector<2x8xf32>
    %287 = vector.shape_cast %286 : vector<2x8xf32> to vector<2x8x1xf32>
    %288 = vector.broadcast %287 : vector<2x8x1xf32> to vector<2x8x8xf32>
    %289 = arith.divf %285, %288 : vector<2x8x8xf32>
    %290 = arith.truncf %289 : vector<2x8x8xf32> to vector<2x8x8xbf16>
    "tpu.trace_start"() <{level = 10 : i32, message = "bnm,bmd->bnd"}> : () -> ()
    %cst_117 = arith.constant dense<0.000000e+00> : vector<2x8x8xf32>
    %291 = tpu.matmul %290, %279, %cst_117 {dimension_numbers = #tpu.dot_dimension_numbers<[2], [1], [1], [2], [0, 0, 0, 1, 1, 2], [0], [0]>} : vector<2x8x8xbf16>, vector<2x8x8xbf16>, vector<2x8x8xf32> -> vector<2x8x8xf32>
    "tpu.trace_stop"() : () -> ()
    %292 = vector.extract_strided_slice %253 {offsets = [0, 0, 16], sizes = [2, 8, 8], strides = [1, 1, 1]} : vector<2x8x32xf32> to vector<2x8x8xf32>
    %293 = arith.truncf %292 : vector<2x8x8xf32> to vector<2x8x8xbf16>
    %294 = vector.extract_strided_slice %254 {offsets = [0, 0, 16], sizes = [2, 8, 8], strides = [1, 1, 1]} : vector<2x8x32xf32> to vector<2x8x8xf32>
    %295 = arith.truncf %294 : vector<2x8x8xf32> to vector<2x8x8xbf16>
    %296 = vector.extract_strided_slice %255 {offsets = [0, 0, 16], sizes = [2, 8, 8], strides = [1, 1, 1]} : vector<2x8x32xf32> to vector<2x8x8xf32>
    %297 = arith.truncf %296 : vector<2x8x8xf32> to vector<2x8x8xbf16>
    "tpu.trace_start"() <{level = 10 : i32, message = "bnd,bmd->bnm"}> : () -> ()
    %cst_118 = arith.constant dense<0.000000e+00> : vector<2x8x8xf32>
    %298 = tpu.matmul %293, %295, %cst_118 {dimension_numbers = #tpu.dot_dimension_numbers<[2], [2], [1], [1], [0, 0, 0, 1, 1, 1], [0], [0]>} : vector<2x8x8xbf16>, vector<2x8x8xbf16>, vector<2x8x8xf32> -> vector<2x8x8xf32>
    "tpu.trace_stop"() : () -> ()
    %cst_119 = arith.constant dense<0xFF800000> : vector<2x8xf32>
    %299 = vector.multi_reduction <maximumf>, %298, %cst_119 [2] : vector<2x8x8xf32> to vector<2x8xf32>
    %300 = vector.shape_cast %299 : vector<2x8xf32> to vector<2x8x1xf32>
    %301 = vector.broadcast %300 : vector<2x8x1xf32> to vector<2x8x8xf32>
    %302 = arith.subf %298, %301 : vector<2x8x8xf32>
    %303 = math.exp %302 : vector<2x8x8xf32>
    %cst_120 = arith.constant dense<0.000000e+00> : vector<2x8xf32>
    %304 = vector.multi_reduction <add>, %303, %cst_120 [2] : vector<2x8x8xf32> to vector<2x8xf32>
    %305 = vector.shape_cast %304 : vector<2x8xf32> to vector<2x8x1xf32>
    %306 = vector.broadcast %305 : vector<2x8x1xf32> to vector<2x8x8xf32>
    %307 = arith.divf %303, %306 : vector<2x8x8xf32>
    %308 = arith.truncf %307 : vector<2x8x8xf32> to vector<2x8x8xbf16>
    "tpu.trace_start"() <{level = 10 : i32, message = "bnm,bmd->bnd"}> : () -> ()
    %cst_121 = arith.constant dense<0.000000e+00> : vector<2x8x8xf32>
    %309 = tpu.matmul %308, %297, %cst_121 {dimension_numbers = #tpu.dot_dimension_numbers<[2], [1], [1], [2], [0, 0, 0, 1, 1, 2], [0], [0]>} : vector<2x8x8xbf16>, vector<2x8x8xbf16>, vector<2x8x8xf32> -> vector<2x8x8xf32>
    "tpu.trace_stop"() : () -> ()
    %310 = vector.extract_strided_slice %253 {offsets = [0, 0, 24], sizes = [2, 8, 8], strides = [1, 1, 1]} : vector<2x8x32xf32> to vector<2x8x8xf32>
    %311 = arith.truncf %310 : vector<2x8x8xf32> to vector<2x8x8xbf16>
    %312 = vector.extract_strided_slice %254 {offsets = [0, 0, 24], sizes = [2, 8, 8], strides = [1, 1, 1]} : vector<2x8x32xf32> to vector<2x8x8xf32>
    %313 = arith.truncf %312 : vector<2x8x8xf32> to vector<2x8x8xbf16>
    %314 = vector.extract_strided_slice %255 {offsets = [0, 0, 24], sizes = [2, 8, 8], strides = [1, 1, 1]} : vector<2x8x32xf32> to vector<2x8x8xf32>
    %315 = arith.truncf %314 : vector<2x8x8xf32> to vector<2x8x8xbf16>
    "tpu.trace_start"() <{level = 10 : i32, message = "bnd,bmd->bnm"}> : () -> ()
    %cst_122 = arith.constant dense<0.000000e+00> : vector<2x8x8xf32>
    %316 = tpu.matmul %311, %313, %cst_122 {dimension_numbers = #tpu.dot_dimension_numbers<[2], [2], [1], [1], [0, 0, 0, 1, 1, 1], [0], [0]>} : vector<2x8x8xbf16>, vector<2x8x8xbf16>, vector<2x8x8xf32> -> vector<2x8x8xf32>
    "tpu.trace_stop"() : () -> ()
    %cst_123 = arith.constant dense<0xFF800000> : vector<2x8xf32>
    %317 = vector.multi_reduction <maximumf>, %316, %cst_123 [2] : vector<2x8x8xf32> to vector<2x8xf32>
    %318 = vector.shape_cast %317 : vector<2x8xf32> to vector<2x8x1xf32>
    %319 = vector.broadcast %318 : vector<2x8x1xf32> to vector<2x8x8xf32>
    %320 = arith.subf %316, %319 : vector<2x8x8xf32>
    %321 = math.exp %320 : vector<2x8x8xf32>
    %cst_124 = arith.constant dense<0.000000e+00> : vector<2x8xf32>
    %322 = vector.multi_reduction <add>, %321, %cst_124 [2] : vector<2x8x8xf32> to vector<2x8xf32>
    %323 = vector.shape_cast %322 : vector<2x8xf32> to vector<2x8x1xf32>
    %324 = vector.broadcast %323 : vector<2x8x1xf32> to vector<2x8x8xf32>
    %325 = arith.divf %321, %324 : vector<2x8x8xf32>
    %326 = arith.truncf %325 : vector<2x8x8xf32> to vector<2x8x8xbf16>
    "tpu.trace_start"() <{level = 10 : i32, message = "bnm,bmd->bnd"}> : () -> ()
    %cst_125 = arith.constant dense<0.000000e+00> : vector<2x8x8xf32>
    %327 = tpu.matmul %326, %315, %cst_125 {dimension_numbers = #tpu.dot_dimension_numbers<[2], [1], [1], [2], [0, 0, 0, 1, 1, 2], [0], [0]>} : vector<2x8x8xbf16>, vector<2x8x8xbf16>, vector<2x8x8xf32> -> vector<2x8x8xf32>
    "tpu.trace_stop"() : () -> ()
    %328 = tpu.concatenate %273, %291, %309, %327 in 2 : vector<2x8x8xf32>, vector<2x8x8xf32>, vector<2x8x8xf32>, vector<2x8x8xf32> -> vector<2x8x32xf32>
    %329 = vector.shape_cast %328 : vector<2x8x32xf32> to vector<16x32xf32>
    %c0_126 = arith.constant 0 : index
    %c0_127 = arith.constant 0 : index
    %c0_128 = arith.constant 0 : index
    %330 = vector.load %arg23[%c0_126, %c0_127, %c0_128] : memref<2x32x32xbf16, #tpu.memory_space<vmem>>, vector<1x32x32xbf16>
    %331 = vector.shape_cast %330 : vector<1x32x32xbf16> to vector<32x32xbf16>
    %c0_129 = arith.constant 0 : index
    %c0_130 = arith.constant 0 : index
    %c0_131 = arith.constant 0 : index
    %332 = vector.load %arg24[%c0_129, %c0_130, %c0_131] : memref<2x1x32xf32, #tpu.memory_space<vmem>>, vector<1x1x32xf32>
    %333 = vector.shape_cast %332 : vector<1x1x32xf32> to vector<1x32xf32>
    %334 = arith.truncf %329 : vector<16x32xf32> to vector<16x32xbf16>
    %cst_132 = arith.constant dense<0.000000e+00> : vector<16x32xf32>
    %335 = tpu.matmul %334, %331, %cst_132 {dimension_numbers = #tpu.dot_dimension_numbers<[1], [0], [0], [1], [0, 0, 1, 1], [], []>} : vector<16x32xbf16>, vector<32x32xbf16>, vector<16x32xf32> -> vector<16x32xf32>
    %336 = vector.broadcast %333 : vector<1x32xf32> to vector<16x32xf32>
    %337 = arith.addf %335, %336 : vector<16x32xf32>
    %338 = arith.addf %215, %337 : vector<16x32xf32>
    %c0_133 = arith.constant 0 : index
    %c0_134 = arith.constant 0 : index
    %c0_135 = arith.constant 0 : index
    %339 = vector.load %arg25[%c0_133, %c0_134, %c0_135] : memref<2x1x32xf32, #tpu.memory_space<vmem>>, vector<1x1x32xf32>
    %340 = vector.shape_cast %339 : vector<1x1x32xf32> to vector<1x32xf32>
    %c0_136 = arith.constant 0 : index
    %c0_137 = arith.constant 0 : index
    %c0_138 = arith.constant 0 : index
    %341 = vector.load %arg26[%c0_136, %c0_137, %c0_138] : memref<2x1x32xf32, #tpu.memory_space<vmem>>, vector<1x1x32xf32>
    %342 = vector.shape_cast %341 : vector<1x1x32xf32> to vector<1x32xf32>
    %c0_139 = arith.constant 0 : index
    %c0_140 = arith.constant 0 : index
    %c0_141 = arith.constant 0 : index
    %343 = vector.load %arg27[%c0_139, %c0_140, %c0_141] : memref<2x32x32xbf16, #tpu.memory_space<vmem>>, vector<1x32x32xbf16>
    %344 = vector.shape_cast %343 : vector<1x32x32xbf16> to vector<32x32xbf16>
    %c0_142 = arith.constant 0 : index
    %c0_143 = arith.constant 0 : index
    %c0_144 = arith.constant 0 : index
    %345 = vector.load %arg28[%c0_142, %c0_143, %c0_144] : memref<2x1x32xf32, #tpu.memory_space<vmem>>, vector<1x1x32xf32>
    %346 = vector.shape_cast %345 : vector<1x1x32xf32> to vector<1x32xf32>
    %c0_145 = arith.constant 0 : index
    %c0_146 = arith.constant 0 : index
    %c0_147 = arith.constant 0 : index
    %347 = vector.load %arg29[%c0_145, %c0_146, %c0_147] : memref<2x32x32xbf16, #tpu.memory_space<vmem>>, vector<1x32x32xbf16>
    %348 = vector.shape_cast %347 : vector<1x32x32xbf16> to vector<32x32xbf16>
    %c0_148 = arith.constant 0 : index
    %c0_149 = arith.constant 0 : index
    %c0_150 = arith.constant 0 : index
    %349 = vector.load %arg30[%c0_148, %c0_149, %c0_150] : memref<2x1x32xf32, #tpu.memory_space<vmem>>, vector<1x1x32xf32>
    %350 = vector.shape_cast %349 : vector<1x1x32xf32> to vector<1x32xf32>
    %cst_151 = arith.constant dense<0.000000e+00> : vector<16xf32>
    %351 = vector.multi_reduction <add>, %338, %cst_151 [1] : vector<16x32xf32> to vector<16xf32>
    %352 = vector.shape_cast %351 : vector<16xf32> to vector<16x1xf32>
    %cst_152 = arith.constant 3.200000e+01 : f32
    %353 = vector.broadcast %cst_152 : f32 to vector<16x1xf32>
    %354 = arith.divf %352, %353 : vector<16x1xf32>
    %355 = arith.mulf %338, %338 : vector<16x32xf32>
    %cst_153 = arith.constant dense<0.000000e+00> : vector<16xf32>
    %356 = vector.multi_reduction <add>, %355, %cst_153 [1] : vector<16x32xf32> to vector<16xf32>
    %357 = vector.shape_cast %356 : vector<16xf32> to vector<16x1xf32>
    %cst_154 = arith.constant 3.200000e+01 : f32
    %358 = vector.broadcast %cst_154 : f32 to vector<16x1xf32>
    %359 = arith.divf %357, %358 : vector<16x1xf32>
    %360 = arith.mulf %354, %354 : vector<16x1xf32>
    %361 = arith.subf %359, %360 : vector<16x1xf32>
    %362 = vector.broadcast %354 : vector<16x1xf32> to vector<16x32xf32>
    %363 = arith.subf %338, %362 : vector<16x32xf32>
    %cst_155 = arith.constant 9.99999974E-6 : f32
    %364 = vector.broadcast %cst_155 : f32 to vector<16x1xf32>
    %365 = arith.addf %361, %364 : vector<16x1xf32>
    %366 = math.rsqrt %365 : vector<16x1xf32>
    %367 = vector.broadcast %366 : vector<16x1xf32> to vector<16x32xf32>
    %368 = arith.mulf %363, %367 : vector<16x32xf32>
    %369 = vector.broadcast %340 : vector<1x32xf32> to vector<16x32xf32>
    %370 = arith.mulf %368, %369 : vector<16x32xf32>
    %371 = vector.broadcast %342 : vector<1x32xf32> to vector<16x32xf32>
    %372 = arith.addf %370, %371 : vector<16x32xf32>
    %373 = arith.truncf %372 : vector<16x32xf32> to vector<16x32xbf16>
    %cst_156 = arith.constant dense<0.000000e+00> : vector<16x32xf32>
    %374 = tpu.matmul %373, %344, %cst_156 {dimension_numbers = #tpu.dot_dimension_numbers<[1], [0], [0], [1], [0, 0, 1, 1], [], []>} : vector<16x32xbf16>, vector<32x32xbf16>, vector<16x32xf32> -> vector<16x32xf32>
    %375 = vector.broadcast %346 : vector<1x32xf32> to vector<16x32xf32>
    %376 = arith.addf %374, %375 : vector<16x32xf32>
    %377 = arith.mulf %376, %376 : vector<16x32xf32>
    %378 = arith.mulf %376, %377 : vector<16x32xf32>
    %cst_157 = arith.constant 4.471500e-02 : f32
    %379 = vector.broadcast %cst_157 : f32 to vector<16x32xf32>
    %380 = arith.mulf %379, %378 : vector<16x32xf32>
    %381 = arith.addf %376, %380 : vector<16x32xf32>
    %cst_158 = arith.constant 0.797884583 : f32
    %382 = vector.broadcast %cst_158 : f32 to vector<16x32xf32>
    %383 = arith.mulf %382, %381 : vector<16x32xf32>
    %384 = math.tanh %383 : vector<16x32xf32>
    %cst_159 = arith.constant 1.000000e+00 : f32
    %385 = vector.broadcast %cst_159 : f32 to vector<16x32xf32>
    %386 = arith.addf %385, %384 : vector<16x32xf32>
    %cst_160 = arith.constant 5.000000e-01 : f32
    %387 = vector.broadcast %cst_160 : f32 to vector<16x32xf32>
    %388 = arith.mulf %387, %386 : vector<16x32xf32>
    %389 = arith.mulf %376, %388 : vector<16x32xf32>
    %390 = arith.truncf %389 : vector<16x32xf32> to vector<16x32xbf16>
    %cst_161 = arith.constant dense<0.000000e+00> : vector<16x32xf32>
    %391 = tpu.matmul %390, %348, %cst_161 {dimension_numbers = #tpu.dot_dimension_numbers<[1], [0], [0], [1], [0, 0, 1, 1], [], []>} : vector<16x32xbf16>, vector<32x32xbf16>, vector<16x32xf32> -> vector<16x32xf32>
    %392 = vector.broadcast %350 : vector<1x32xf32> to vector<16x32xf32>
    %393 = arith.addf %391, %392 : vector<16x32xf32>
    %394 = arith.addf %338, %393 : vector<16x32xf32>
    %c1 = arith.constant 1 : index
    %c0_162 = arith.constant 0 : index
    %c0_163 = arith.constant 0 : index
    %395 = vector.load %arg19[%c1, %c0_162, %c0_163] : memref<2x1x32xf32, #tpu.memory_space<vmem>>, vector<1x1x32xf32>
    %396 = vector.shape_cast %395 : vector<1x1x32xf32> to vector<1x32xf32>
    %c1_164 = arith.constant 1 : index
    %c0_165 = arith.constant 0 : index
    %c0_166 = arith.constant 0 : index
    %397 = vector.load %arg20[%c1_164, %c0_165, %c0_166] : memref<2x1x32xf32, #tpu.memory_space<vmem>>, vector<1x1x32xf32>
    %398 = vector.shape_cast %397 : vector<1x1x32xf32> to vector<1x32xf32>
    %cst_167 = arith.constant dense<0.000000e+00> : vector<16xf32>
    %399 = vector.multi_reduction <add>, %394, %cst_167 [1] : vector<16x32xf32> to vector<16xf32>
    %400 = vector.shape_cast %399 : vector<16xf32> to vector<16x1xf32>
    %cst_168 = arith.constant 3.200000e+01 : f32
    %401 = vector.broadcast %cst_168 : f32 to vector<16x1xf32>
    %402 = arith.divf %400, %401 : vector<16x1xf32>
    %403 = arith.mulf %394, %394 : vector<16x32xf32>
    %cst_169 = arith.constant dense<0.000000e+00> : vector<16xf32>
    %404 = vector.multi_reduction <add>, %403, %cst_169 [1] : vector<16x32xf32> to vector<16xf32>
    %405 = vector.shape_cast %404 : vector<16xf32> to vector<16x1xf32>
    %cst_170 = arith.constant 3.200000e+01 : f32
    %406 = vector.broadcast %cst_170 : f32 to vector<16x1xf32>
    %407 = arith.divf %405, %406 : vector<16x1xf32>
    %408 = arith.mulf %402, %402 : vector<16x1xf32>
    %409 = arith.subf %407, %408 : vector<16x1xf32>
    %410 = vector.broadcast %402 : vector<16x1xf32> to vector<16x32xf32>
    %411 = arith.subf %394, %410 : vector<16x32xf32>
    %cst_171 = arith.constant 9.99999974E-6 : f32
    %412 = vector.broadcast %cst_171 : f32 to vector<16x1xf32>
    %413 = arith.addf %409, %412 : vector<16x1xf32>
    %414 = math.rsqrt %413 : vector<16x1xf32>
    %415 = vector.broadcast %414 : vector<16x1xf32> to vector<16x32xf32>
    %416 = arith.mulf %411, %415 : vector<16x32xf32>
    %417 = vector.broadcast %396 : vector<1x32xf32> to vector<16x32xf32>
    %418 = arith.mulf %416, %417 : vector<16x32xf32>
    %419 = vector.broadcast %398 : vector<1x32xf32> to vector<16x32xf32>
    %420 = arith.addf %418, %419 : vector<16x32xf32>
    %c1_172 = arith.constant 1 : index
    %c0_173 = arith.constant 0 : index
    %c0_174 = arith.constant 0 : index
    %421 = vector.load %arg21[%c1_172, %c0_173, %c0_174] : memref<2x32x96xbf16, #tpu.memory_space<vmem>>, vector<1x32x96xbf16>
    %422 = vector.shape_cast %421 : vector<1x32x96xbf16> to vector<32x96xbf16>
    %c1_175 = arith.constant 1 : index
    %c0_176 = arith.constant 0 : index
    %c0_177 = arith.constant 0 : index
    %423 = vector.load %arg22[%c1_175, %c0_176, %c0_177] : memref<2x1x96xf32, #tpu.memory_space<vmem>>, vector<1x1x96xf32>
    %424 = vector.shape_cast %423 : vector<1x1x96xf32> to vector<1x96xf32>
    %425 = arith.truncf %420 : vector<16x32xf32> to vector<16x32xbf16>
    %cst_178 = arith.constant dense<0.000000e+00> : vector<16x96xf32>
    %426 = tpu.matmul %425, %422, %cst_178 {dimension_numbers = #tpu.dot_dimension_numbers<[1], [0], [0], [1], [0, 0, 1, 1], [], []>} : vector<16x32xbf16>, vector<32x96xbf16>, vector<16x96xf32> -> vector<16x96xf32>
    %427 = vector.broadcast %424 : vector<1x96xf32> to vector<16x96xf32>
    %428 = arith.addf %426, %427 : vector<16x96xf32>
    %429 = vector.extract_strided_slice %428 {offsets = [0, 0], sizes = [16, 32], strides = [1, 1]} : vector<16x96xf32> to vector<16x32xf32>
    %430 = vector.extract_strided_slice %428 {offsets = [0, 32], sizes = [16, 32], strides = [1, 1]} : vector<16x96xf32> to vector<16x32xf32>
    %431 = vector.extract_strided_slice %428 {offsets = [0, 64], sizes = [16, 32], strides = [1, 1]} : vector<16x96xf32> to vector<16x32xf32>
    %432 = vector.shape_cast %429 : vector<16x32xf32> to vector<2x8x32xf32>
    %433 = vector.shape_cast %430 : vector<16x32xf32> to vector<2x8x32xf32>
    %434 = vector.shape_cast %431 : vector<16x32xf32> to vector<2x8x32xf32>
    %435 = vector.extract_strided_slice %432 {offsets = [0, 0, 0], sizes = [2, 8, 8], strides = [1, 1, 1]} : vector<2x8x32xf32> to vector<2x8x8xf32>
    %436 = arith.truncf %435 : vector<2x8x8xf32> to vector<2x8x8xbf16>
    %437 = vector.extract_strided_slice %433 {offsets = [0, 0, 0], sizes = [2, 8, 8], strides = [1, 1, 1]} : vector<2x8x32xf32> to vector<2x8x8xf32>
    %438 = arith.truncf %437 : vector<2x8x8xf32> to vector<2x8x8xbf16>
    %439 = vector.extract_strided_slice %434 {offsets = [0, 0, 0], sizes = [2, 8, 8], strides = [1, 1, 1]} : vector<2x8x32xf32> to vector<2x8x8xf32>
    %440 = arith.truncf %439 : vector<2x8x8xf32> to vector<2x8x8xbf16>
    "tpu.trace_start"() <{level = 10 : i32, message = "bnd,bmd->bnm"}> : () -> ()
    %cst_179 = arith.constant dense<0.000000e+00> : vector<2x8x8xf32>
    %441 = tpu.matmul %436, %438, %cst_179 {dimension_numbers = #tpu.dot_dimension_numbers<[2], [2], [1], [1], [0, 0, 0, 1, 1, 1], [0], [0]>} : vector<2x8x8xbf16>, vector<2x8x8xbf16>, vector<2x8x8xf32> -> vector<2x8x8xf32>
    "tpu.trace_stop"() : () -> ()
    %cst_180 = arith.constant dense<0xFF800000> : vector<2x8xf32>
    %442 = vector.multi_reduction <maximumf>, %441, %cst_180 [2] : vector<2x8x8xf32> to vector<2x8xf32>
    %443 = vector.shape_cast %442 : vector<2x8xf32> to vector<2x8x1xf32>
    %444 = vector.broadcast %443 : vector<2x8x1xf32> to vector<2x8x8xf32>
    %445 = arith.subf %441, %444 : vector<2x8x8xf32>
    %446 = math.exp %445 : vector<2x8x8xf32>
    %cst_181 = arith.constant dense<0.000000e+00> : vector<2x8xf32>
    %447 = vector.multi_reduction <add>, %446, %cst_181 [2] : vector<2x8x8xf32> to vector<2x8xf32>
    %448 = vector.shape_cast %447 : vector<2x8xf32> to vector<2x8x1xf32>
    %449 = vector.broadcast %448 : vector<2x8x1xf32> to vector<2x8x8xf32>
    %450 = arith.divf %446, %449 : vector<2x8x8xf32>
    %451 = arith.truncf %450 : vector<2x8x8xf32> to vector<2x8x8xbf16>
    "tpu.trace_start"() <{level = 10 : i32, message = "bnm,bmd->bnd"}> : () -> ()
    %cst_182 = arith.constant dense<0.000000e+00> : vector<2x8x8xf32>
    %452 = tpu.matmul %451, %440, %cst_182 {dimension_numbers = #tpu.dot_dimension_numbers<[2], [1], [1], [2], [0, 0, 0, 1, 1, 2], [0], [0]>} : vector<2x8x8xbf16>, vector<2x8x8xbf16>, vector<2x8x8xf32> -> vector<2x8x8xf32>
    "tpu.trace_stop"() : () -> ()
    %453 = vector.extract_strided_slice %432 {offsets = [0, 0, 8], sizes = [2, 8, 8], strides = [1, 1, 1]} : vector<2x8x32xf32> to vector<2x8x8xf32>
    %454 = arith.truncf %453 : vector<2x8x8xf32> to vector<2x8x8xbf16>
    %455 = vector.extract_strided_slice %433 {offsets = [0, 0, 8], sizes = [2, 8, 8], strides = [1, 1, 1]} : vector<2x8x32xf32> to vector<2x8x8xf32>
    %456 = arith.truncf %455 : vector<2x8x8xf32> to vector<2x8x8xbf16>
    %457 = vector.extract_strided_slice %434 {offsets = [0, 0, 8], sizes = [2, 8, 8], strides = [1, 1, 1]} : vector<2x8x32xf32> to vector<2x8x8xf32>
    %458 = arith.truncf %457 : vector<2x8x8xf32> to vector<2x8x8xbf16>
    "tpu.trace_start"() <{level = 10 : i32, message = "bnd,bmd->bnm"}> : () -> ()
    %cst_183 = arith.constant dense<0.000000e+00> : vector<2x8x8xf32>
    %459 = tpu.matmul %454, %456, %cst_183 {dimension_numbers = #tpu.dot_dimension_numbers<[2], [2], [1], [1], [0, 0, 0, 1, 1, 1], [0], [0]>} : vector<2x8x8xbf16>, vector<2x8x8xbf16>, vector<2x8x8xf32> -> vector<2x8x8xf32>
    "tpu.trace_stop"() : () -> ()
    %cst_184 = arith.constant dense<0xFF800000> : vector<2x8xf32>
    %460 = vector.multi_reduction <maximumf>, %459, %cst_184 [2] : vector<2x8x8xf32> to vector<2x8xf32>
    %461 = vector.shape_cast %460 : vector<2x8xf32> to vector<2x8x1xf32>
    %462 = vector.broadcast %461 : vector<2x8x1xf32> to vector<2x8x8xf32>
    %463 = arith.subf %459, %462 : vector<2x8x8xf32>
    %464 = math.exp %463 : vector<2x8x8xf32>
    %cst_185 = arith.constant dense<0.000000e+00> : vector<2x8xf32>
    %465 = vector.multi_reduction <add>, %464, %cst_185 [2] : vector<2x8x8xf32> to vector<2x8xf32>
    %466 = vector.shape_cast %465 : vector<2x8xf32> to vector<2x8x1xf32>
    %467 = vector.broadcast %466 : vector<2x8x1xf32> to vector<2x8x8xf32>
    %468 = arith.divf %464, %467 : vector<2x8x8xf32>
    %469 = arith.truncf %468 : vector<2x8x8xf32> to vector<2x8x8xbf16>
    "tpu.trace_start"() <{level = 10 : i32, message = "bnm,bmd->bnd"}> : () -> ()
    %cst_186 = arith.constant dense<0.000000e+00> : vector<2x8x8xf32>
    %470 = tpu.matmul %469, %458, %cst_186 {dimension_numbers = #tpu.dot_dimension_numbers<[2], [1], [1], [2], [0, 0, 0, 1, 1, 2], [0], [0]>} : vector<2x8x8xbf16>, vector<2x8x8xbf16>, vector<2x8x8xf32> -> vector<2x8x8xf32>
    "tpu.trace_stop"() : () -> ()
    %471 = vector.extract_strided_slice %432 {offsets = [0, 0, 16], sizes = [2, 8, 8], strides = [1, 1, 1]} : vector<2x8x32xf32> to vector<2x8x8xf32>
    %472 = arith.truncf %471 : vector<2x8x8xf32> to vector<2x8x8xbf16>
    %473 = vector.extract_strided_slice %433 {offsets = [0, 0, 16], sizes = [2, 8, 8], strides = [1, 1, 1]} : vector<2x8x32xf32> to vector<2x8x8xf32>
    %474 = arith.truncf %473 : vector<2x8x8xf32> to vector<2x8x8xbf16>
    %475 = vector.extract_strided_slice %434 {offsets = [0, 0, 16], sizes = [2, 8, 8], strides = [1, 1, 1]} : vector<2x8x32xf32> to vector<2x8x8xf32>
    %476 = arith.truncf %475 : vector<2x8x8xf32> to vector<2x8x8xbf16>
    "tpu.trace_start"() <{level = 10 : i32, message = "bnd,bmd->bnm"}> : () -> ()
    %cst_187 = arith.constant dense<0.000000e+00> : vector<2x8x8xf32>
    %477 = tpu.matmul %472, %474, %cst_187 {dimension_numbers = #tpu.dot_dimension_numbers<[2], [2], [1], [1], [0, 0, 0, 1, 1, 1], [0], [0]>} : vector<2x8x8xbf16>, vector<2x8x8xbf16>, vector<2x8x8xf32> -> vector<2x8x8xf32>
    "tpu.trace_stop"() : () -> ()
    %cst_188 = arith.constant dense<0xFF800000> : vector<2x8xf32>
    %478 = vector.multi_reduction <maximumf>, %477, %cst_188 [2] : vector<2x8x8xf32> to vector<2x8xf32>
    %479 = vector.shape_cast %478 : vector<2x8xf32> to vector<2x8x1xf32>
    %480 = vector.broadcast %479 : vector<2x8x1xf32> to vector<2x8x8xf32>
    %481 = arith.subf %477, %480 : vector<2x8x8xf32>
    %482 = math.exp %481 : vector<2x8x8xf32>
    %cst_189 = arith.constant dense<0.000000e+00> : vector<2x8xf32>
    %483 = vector.multi_reduction <add>, %482, %cst_189 [2] : vector<2x8x8xf32> to vector<2x8xf32>
    %484 = vector.shape_cast %483 : vector<2x8xf32> to vector<2x8x1xf32>
    %485 = vector.broadcast %484 : vector<2x8x1xf32> to vector<2x8x8xf32>
    %486 = arith.divf %482, %485 : vector<2x8x8xf32>
    %487 = arith.truncf %486 : vector<2x8x8xf32> to vector<2x8x8xbf16>
    "tpu.trace_start"() <{level = 10 : i32, message = "bnm,bmd->bnd"}> : () -> ()
    %cst_190 = arith.constant dense<0.000000e+00> : vector<2x8x8xf32>
    %488 = tpu.matmul %487, %476, %cst_190 {dimension_numbers = #tpu.dot_dimension_numbers<[2], [1], [1], [2], [0, 0, 0, 1, 1, 2], [0], [0]>} : vector<2x8x8xbf16>, vector<2x8x8xbf16>, vector<2x8x8xf32> -> vector<2x8x8xf32>
    "tpu.trace_stop"() : () -> ()
    %489 = vector.extract_strided_slice %432 {offsets = [0, 0, 24], sizes = [2, 8, 8], strides = [1, 1, 1]} : vector<2x8x32xf32> to vector<2x8x8xf32>
    %490 = arith.truncf %489 : vector<2x8x8xf32> to vector<2x8x8xbf16>
    %491 = vector.extract_strided_slice %433 {offsets = [0, 0, 24], sizes = [2, 8, 8], strides = [1, 1, 1]} : vector<2x8x32xf32> to vector<2x8x8xf32>
    %492 = arith.truncf %491 : vector<2x8x8xf32> to vector<2x8x8xbf16>
    %493 = vector.extract_strided_slice %434 {offsets = [0, 0, 24], sizes = [2, 8, 8], strides = [1, 1, 1]} : vector<2x8x32xf32> to vector<2x8x8xf32>
    %494 = arith.truncf %493 : vector<2x8x8xf32> to vector<2x8x8xbf16>
    "tpu.trace_start"() <{level = 10 : i32, message = "bnd,bmd->bnm"}> : () -> ()
    %cst_191 = arith.constant dense<0.000000e+00> : vector<2x8x8xf32>
    %495 = tpu.matmul %490, %492, %cst_191 {dimension_numbers = #tpu.dot_dimension_numbers<[2], [2], [1], [1], [0, 0, 0, 1, 1, 1], [0], [0]>} : vector<2x8x8xbf16>, vector<2x8x8xbf16>, vector<2x8x8xf32> -> vector<2x8x8xf32>
    "tpu.trace_stop"() : () -> ()
    %cst_192 = arith.constant dense<0xFF800000> : vector<2x8xf32>
    %496 = vector.multi_reduction <maximumf>, %495, %cst_192 [2] : vector<2x8x8xf32> to vector<2x8xf32>
    %497 = vector.shape_cast %496 : vector<2x8xf32> to vector<2x8x1xf32>
    %498 = vector.broadcast %497 : vector<2x8x1xf32> to vector<2x8x8xf32>
    %499 = arith.subf %495, %498 : vector<2x8x8xf32>
    %500 = math.exp %499 : vector<2x8x8xf32>
    %cst_193 = arith.constant dense<0.000000e+00> : vector<2x8xf32>
    %501 = vector.multi_reduction <add>, %500, %cst_193 [2] : vector<2x8x8xf32> to vector<2x8xf32>
    %502 = vector.shape_cast %501 : vector<2x8xf32> to vector<2x8x1xf32>
    %503 = vector.broadcast %502 : vector<2x8x1xf32> to vector<2x8x8xf32>
    %504 = arith.divf %500, %503 : vector<2x8x8xf32>
    %505 = arith.truncf %504 : vector<2x8x8xf32> to vector<2x8x8xbf16>
    "tpu.trace_start"() <{level = 10 : i32, message = "bnm,bmd->bnd"}> : () -> ()
    %cst_194 = arith.constant dense<0.000000e+00> : vector<2x8x8xf32>
    %506 = tpu.matmul %505, %494, %cst_194 {dimension_numbers = #tpu.dot_dimension_numbers<[2], [1], [1], [2], [0, 0, 0, 1, 1, 2], [0], [0]>} : vector<2x8x8xbf16>, vector<2x8x8xbf16>, vector<2x8x8xf32> -> vector<2x8x8xf32>
    "tpu.trace_stop"() : () -> ()
    %507 = tpu.concatenate %452, %470, %488, %506 in 2 : vector<2x8x8xf32>, vector<2x8x8xf32>, vector<2x8x8xf32>, vector<2x8x8xf32> -> vector<2x8x32xf32>
    %508 = vector.shape_cast %507 : vector<2x8x32xf32> to vector<16x32xf32>
    %c1_195 = arith.constant 1 : index
    %c0_196 = arith.constant 0 : index
    %c0_197 = arith.constant 0 : index
    %509 = vector.load %arg23[%c1_195, %c0_196, %c0_197] : memref<2x32x32xbf16, #tpu.memory_space<vmem>>, vector<1x32x32xbf16>
    %510 = vector.shape_cast %509 : vector<1x32x32xbf16> to vector<32x32xbf16>
    %c1_198 = arith.constant 1 : index
    %c0_199 = arith.constant 0 : index
    %c0_200 = arith.constant 0 : index
    %511 = vector.load %arg24[%c1_198, %c0_199, %c0_200] : memref<2x1x32xf32, #tpu.memory_space<vmem>>, vector<1x1x32xf32>
    %512 = vector.shape_cast %511 : vector<1x1x32xf32> to vector<1x32xf32>
    %513 = arith.truncf %508 : vector<16x32xf32> to vector<16x32xbf16>
    %cst_201 = arith.constant dense<0.000000e+00> : vector<16x32xf32>
    %514 = tpu.matmul %513, %510, %cst_201 {dimension_numbers = #tpu.dot_dimension_numbers<[1], [0], [0], [1], [0, 0, 1, 1], [], []>} : vector<16x32xbf16>, vector<32x32xbf16>, vector<16x32xf32> -> vector<16x32xf32>
    %515 = vector.broadcast %512 : vector<1x32xf32> to vector<16x32xf32>
    %516 = arith.addf %514, %515 : vector<16x32xf32>
    %517 = arith.addf %394, %516 : vector<16x32xf32>
    %c1_202 = arith.constant 1 : index
    %c0_203 = arith.constant 0 : index
    %c0_204 = arith.constant 0 : index
    %518 = vector.load %arg25[%c1_202, %c0_203, %c0_204] : memref<2x1x32xf32, #tpu.memory_space<vmem>>, vector<1x1x32xf32>
    %519 = vector.shape_cast %518 : vector<1x1x32xf32> to vector<1x32xf32>
    %c1_205 = arith.constant 1 : index
    %c0_206 = arith.constant 0 : index
    %c0_207 = arith.constant 0 : index
    %520 = vector.load %arg26[%c1_205, %c0_206, %c0_207] : memref<2x1x32xf32, #tpu.memory_space<vmem>>, vector<1x1x32xf32>
    %521 = vector.shape_cast %520 : vector<1x1x32xf32> to vector<1x32xf32>
    %c1_208 = arith.constant 1 : index
    %c0_209 = arith.constant 0 : index
    %c0_210 = arith.constant 0 : index
    %522 = vector.load %arg27[%c1_208, %c0_209, %c0_210] : memref<2x32x32xbf16, #tpu.memory_space<vmem>>, vector<1x32x32xbf16>
    %523 = vector.shape_cast %522 : vector<1x32x32xbf16> to vector<32x32xbf16>
    %c1_211 = arith.constant 1 : index
    %c0_212 = arith.constant 0 : index
    %c0_213 = arith.constant 0 : index
    %524 = vector.load %arg28[%c1_211, %c0_212, %c0_213] : memref<2x1x32xf32, #tpu.memory_space<vmem>>, vector<1x1x32xf32>
    %525 = vector.shape_cast %524 : vector<1x1x32xf32> to vector<1x32xf32>
    %c1_214 = arith.constant 1 : index
    %c0_215 = arith.constant 0 : index
    %c0_216 = arith.constant 0 : index
    %526 = vector.load %arg29[%c1_214, %c0_215, %c0_216] : memref<2x32x32xbf16, #tpu.memory_space<vmem>>, vector<1x32x32xbf16>
    %527 = vector.shape_cast %526 : vector<1x32x32xbf16> to vector<32x32xbf16>
    %c1_217 = arith.constant 1 : index
    %c0_218 = arith.constant 0 : index
    %c0_219 = arith.constant 0 : index
    %528 = vector.load %arg30[%c1_217, %c0_218, %c0_219] : memref<2x1x32xf32, #tpu.memory_space<vmem>>, vector<1x1x32xf32>
    %529 = vector.shape_cast %528 : vector<1x1x32xf32> to vector<1x32xf32>
    %cst_220 = arith.constant dense<0.000000e+00> : vector<16xf32>
    %530 = vector.multi_reduction <add>, %517, %cst_220 [1] : vector<16x32xf32> to vector<16xf32>
    %531 = vector.shape_cast %530 : vector<16xf32> to vector<16x1xf32>
    %cst_221 = arith.constant 3.200000e+01 : f32
    %532 = vector.broadcast %cst_221 : f32 to vector<16x1xf32>
    %533 = arith.divf %531, %532 : vector<16x1xf32>
    %534 = arith.mulf %517, %517 : vector<16x32xf32>
    %cst_222 = arith.constant dense<0.000000e+00> : vector<16xf32>
    %535 = vector.multi_reduction <add>, %534, %cst_222 [1] : vector<16x32xf32> to vector<16xf32>
    %536 = vector.shape_cast %535 : vector<16xf32> to vector<16x1xf32>
    %cst_223 = arith.constant 3.200000e+01 : f32
    %537 = vector.broadcast %cst_223 : f32 to vector<16x1xf32>
    %538 = arith.divf %536, %537 : vector<16x1xf32>
    %539 = arith.mulf %533, %533 : vector<16x1xf32>
    %540 = arith.subf %538, %539 : vector<16x1xf32>
    %541 = vector.broadcast %533 : vector<16x1xf32> to vector<16x32xf32>
    %542 = arith.subf %517, %541 : vector<16x32xf32>
    %cst_224 = arith.constant 9.99999974E-6 : f32
    %543 = vector.broadcast %cst_224 : f32 to vector<16x1xf32>
    %544 = arith.addf %540, %543 : vector<16x1xf32>
    %545 = math.rsqrt %544 : vector<16x1xf32>
    %546 = vector.broadcast %545 : vector<16x1xf32> to vector<16x32xf32>
    %547 = arith.mulf %542, %546 : vector<16x32xf32>
    %548 = vector.broadcast %519 : vector<1x32xf32> to vector<16x32xf32>
    %549 = arith.mulf %547, %548 : vector<16x32xf32>
    %550 = vector.broadcast %521 : vector<1x32xf32> to vector<16x32xf32>
    %551 = arith.addf %549, %550 : vector<16x32xf32>
    %552 = arith.truncf %551 : vector<16x32xf32> to vector<16x32xbf16>
    %cst_225 = arith.constant dense<0.000000e+00> : vector<16x32xf32>
    %553 = tpu.matmul %552, %523, %cst_225 {dimension_numbers = #tpu.dot_dimension_numbers<[1], [0], [0], [1], [0, 0, 1, 1], [], []>} : vector<16x32xbf16>, vector<32x32xbf16>, vector<16x32xf32> -> vector<16x32xf32>
    %554 = vector.broadcast %525 : vector<1x32xf32> to vector<16x32xf32>
    %555 = arith.addf %553, %554 : vector<16x32xf32>
    %556 = arith.mulf %555, %555 : vector<16x32xf32>
    %557 = arith.mulf %555, %556 : vector<16x32xf32>
    %cst_226 = arith.constant 4.471500e-02 : f32
    %558 = vector.broadcast %cst_226 : f32 to vector<16x32xf32>
    %559 = arith.mulf %558, %557 : vector<16x32xf32>
    %560 = arith.addf %555, %559 : vector<16x32xf32>
    %cst_227 = arith.constant 0.797884583 : f32
    %561 = vector.broadcast %cst_227 : f32 to vector<16x32xf32>
    %562 = arith.mulf %561, %560 : vector<16x32xf32>
    %563 = math.tanh %562 : vector<16x32xf32>
    %cst_228 = arith.constant 1.000000e+00 : f32
    %564 = vector.broadcast %cst_228 : f32 to vector<16x32xf32>
    %565 = arith.addf %564, %563 : vector<16x32xf32>
    %cst_229 = arith.constant 5.000000e-01 : f32
    %566 = vector.broadcast %cst_229 : f32 to vector<16x32xf32>
    %567 = arith.mulf %566, %565 : vector<16x32xf32>
    %568 = arith.mulf %555, %567 : vector<16x32xf32>
    %569 = arith.truncf %568 : vector<16x32xf32> to vector<16x32xbf16>
    %cst_230 = arith.constant dense<0.000000e+00> : vector<16x32xf32>
    %570 = tpu.matmul %569, %527, %cst_230 {dimension_numbers = #tpu.dot_dimension_numbers<[1], [0], [0], [1], [0, 0, 1, 1], [], []>} : vector<16x32xbf16>, vector<32x32xbf16>, vector<16x32xf32> -> vector<16x32xf32>
    %571 = vector.broadcast %529 : vector<1x32xf32> to vector<16x32xf32>
    %572 = arith.addf %570, %571 : vector<16x32xf32>
    %573 = arith.addf %517, %572 : vector<16x32xf32>
    %c0_231 = arith.constant 0 : index
    %c0_232 = arith.constant 0 : index
    %c0_233 = arith.constant 0 : index
    %574 = vector.load %arg19[%c0_231, %c0_232, %c0_233] : memref<2x1x32xf32, #tpu.memory_space<vmem>>, vector<1x1x32xf32>
    %575 = vector.shape_cast %574 : vector<1x1x32xf32> to vector<1x32xf32>
    %c0_234 = arith.constant 0 : index
    %c0_235 = arith.constant 0 : index
    %c0_236 = arith.constant 0 : index
    %576 = vector.load %arg20[%c0_234, %c0_235, %c0_236] : memref<2x1x32xf32, #tpu.memory_space<vmem>>, vector<1x1x32xf32>
    %577 = vector.shape_cast %576 : vector<1x1x32xf32> to vector<1x32xf32>
    %cst_237 = arith.constant dense<0.000000e+00> : vector<16xf32>
    %578 = vector.multi_reduction <add>, %573, %cst_237 [1] : vector<16x32xf32> to vector<16xf32>
    %579 = vector.shape_cast %578 : vector<16xf32> to vector<16x1xf32>
    %cst_238 = arith.constant 3.200000e+01 : f32
    %580 = vector.broadcast %cst_238 : f32 to vector<16x1xf32>
    %581 = arith.divf %579, %580 : vector<16x1xf32>
    %582 = arith.mulf %573, %573 : vector<16x32xf32>
    %cst_239 = arith.constant dense<0.000000e+00> : vector<16xf32>
    %583 = vector.multi_reduction <add>, %582, %cst_239 [1] : vector<16x32xf32> to vector<16xf32>
    %584 = vector.shape_cast %583 : vector<16xf32> to vector<16x1xf32>
    %cst_240 = arith.constant 3.200000e+01 : f32
    %585 = vector.broadcast %cst_240 : f32 to vector<16x1xf32>
    %586 = arith.divf %584, %585 : vector<16x1xf32>
    %587 = arith.mulf %581, %581 : vector<16x1xf32>
    %588 = arith.subf %586, %587 : vector<16x1xf32>
    %589 = vector.broadcast %581 : vector<16x1xf32> to vector<16x32xf32>
    %590 = arith.subf %573, %589 : vector<16x32xf32>
    %cst_241 = arith.constant 9.99999974E-6 : f32
    %591 = vector.broadcast %cst_241 : f32 to vector<16x1xf32>
    %592 = arith.addf %588, %591 : vector<16x1xf32>
    %593 = math.rsqrt %592 : vector<16x1xf32>
    %594 = vector.broadcast %593 : vector<16x1xf32> to vector<16x32xf32>
    %595 = arith.mulf %590, %594 : vector<16x32xf32>
    %596 = vector.broadcast %575 : vector<1x32xf32> to vector<16x32xf32>
    %597 = arith.mulf %595, %596 : vector<16x32xf32>
    %598 = vector.broadcast %577 : vector<1x32xf32> to vector<16x32xf32>
    %599 = arith.addf %597, %598 : vector<16x32xf32>
    %c0_242 = arith.constant 0 : index
    %c0_243 = arith.constant 0 : index
    %c0_244 = arith.constant 0 : index
    %600 = vector.load %arg21[%c0_242, %c0_243, %c0_244] : memref<2x32x96xbf16, #tpu.memory_space<vmem>>, vector<1x32x96xbf16>
    %601 = vector.shape_cast %600 : vector<1x32x96xbf16> to vector<32x96xbf16>
    %c0_245 = arith.constant 0 : index
    %c0_246 = arith.constant 0 : index
    %c0_247 = arith.constant 0 : index
    %602 = vector.load %arg22[%c0_245, %c0_246, %c0_247] : memref<2x1x96xf32, #tpu.memory_space<vmem>>, vector<1x1x96xf32>
    %603 = vector.shape_cast %602 : vector<1x1x96xf32> to vector<1x96xf32>
    %604 = arith.truncf %599 : vector<16x32xf32> to vector<16x32xbf16>
    %cst_248 = arith.constant dense<0.000000e+00> : vector<16x96xf32>
    %605 = tpu.matmul %604, %601, %cst_248 {dimension_numbers = #tpu.dot_dimension_numbers<[1], [0], [0], [1], [0, 0, 1, 1], [], []>} : vector<16x32xbf16>, vector<32x96xbf16>, vector<16x96xf32> -> vector<16x96xf32>
    %606 = vector.broadcast %603 : vector<1x96xf32> to vector<16x96xf32>
    %607 = arith.addf %605, %606 : vector<16x96xf32>
    %608 = vector.extract_strided_slice %607 {offsets = [0, 0], sizes = [16, 32], strides = [1, 1]} : vector<16x96xf32> to vector<16x32xf32>
    %609 = vector.extract_strided_slice %607 {offsets = [0, 32], sizes = [16, 32], strides = [1, 1]} : vector<16x96xf32> to vector<16x32xf32>
    %610 = vector.extract_strided_slice %607 {offsets = [0, 64], sizes = [16, 32], strides = [1, 1]} : vector<16x96xf32> to vector<16x32xf32>
    %611 = vector.shape_cast %608 : vector<16x32xf32> to vector<2x8x32xf32>
    %612 = vector.shape_cast %609 : vector<16x32xf32> to vector<2x8x32xf32>
    %613 = vector.shape_cast %610 : vector<16x32xf32> to vector<2x8x32xf32>
    %614 = vector.extract_strided_slice %611 {offsets = [0, 0, 0], sizes = [2, 8, 8], strides = [1, 1, 1]} : vector<2x8x32xf32> to vector<2x8x8xf32>
    %615 = arith.truncf %614 : vector<2x8x8xf32> to vector<2x8x8xbf16>
    %616 = vector.extract_strided_slice %612 {offsets = [0, 0, 0], sizes = [2, 8, 8], strides = [1, 1, 1]} : vector<2x8x32xf32> to vector<2x8x8xf32>
    %617 = arith.truncf %616 : vector<2x8x8xf32> to vector<2x8x8xbf16>
    %618 = vector.extract_strided_slice %613 {offsets = [0, 0, 0], sizes = [2, 8, 8], strides = [1, 1, 1]} : vector<2x8x32xf32> to vector<2x8x8xf32>
    %619 = arith.truncf %618 : vector<2x8x8xf32> to vector<2x8x8xbf16>
    "tpu.trace_start"() <{level = 10 : i32, message = "bnd,bmd->bnm"}> : () -> ()
    %cst_249 = arith.constant dense<0.000000e+00> : vector<2x8x8xf32>
    %620 = tpu.matmul %615, %617, %cst_249 {dimension_numbers = #tpu.dot_dimension_numbers<[2], [2], [1], [1], [0, 0, 0, 1, 1, 1], [0], [0]>} : vector<2x8x8xbf16>, vector<2x8x8xbf16>, vector<2x8x8xf32> -> vector<2x8x8xf32>
    "tpu.trace_stop"() : () -> ()
    %cst_250 = arith.constant dense<0xFF800000> : vector<2x8xf32>
    %621 = vector.multi_reduction <maximumf>, %620, %cst_250 [2] : vector<2x8x8xf32> to vector<2x8xf32>
    %622 = vector.shape_cast %621 : vector<2x8xf32> to vector<2x8x1xf32>
    %623 = vector.broadcast %622 : vector<2x8x1xf32> to vector<2x8x8xf32>
    %624 = arith.subf %620, %623 : vector<2x8x8xf32>
    %625 = math.exp %624 : vector<2x8x8xf32>
    %cst_251 = arith.constant dense<0.000000e+00> : vector<2x8xf32>
    %626 = vector.multi_reduction <add>, %625, %cst_251 [2] : vector<2x8x8xf32> to vector<2x8xf32>
    %627 = vector.shape_cast %626 : vector<2x8xf32> to vector<2x8x1xf32>
    %628 = vector.broadcast %627 : vector<2x8x1xf32> to vector<2x8x8xf32>
    %629 = arith.divf %625, %628 : vector<2x8x8xf32>
    %630 = arith.truncf %629 : vector<2x8x8xf32> to vector<2x8x8xbf16>
    "tpu.trace_start"() <{level = 10 : i32, message = "bnm,bmd->bnd"}> : () -> ()
    %cst_252 = arith.constant dense<0.000000e+00> : vector<2x8x8xf32>
    %631 = tpu.matmul %630, %619, %cst_252 {dimension_numbers = #tpu.dot_dimension_numbers<[2], [1], [1], [2], [0, 0, 0, 1, 1, 2], [0], [0]>} : vector<2x8x8xbf16>, vector<2x8x8xbf16>, vector<2x8x8xf32> -> vector<2x8x8xf32>
    "tpu.trace_stop"() : () -> ()
    %632 = vector.extract_strided_slice %611 {offsets = [0, 0, 8], sizes = [2, 8, 8], strides = [1, 1, 1]} : vector<2x8x32xf32> to vector<2x8x8xf32>
    %633 = arith.truncf %632 : vector<2x8x8xf32> to vector<2x8x8xbf16>
    %634 = vector.extract_strided_slice %612 {offsets = [0, 0, 8], sizes = [2, 8, 8], strides = [1, 1, 1]} : vector<2x8x32xf32> to vector<2x8x8xf32>
    %635 = arith.truncf %634 : vector<2x8x8xf32> to vector<2x8x8xbf16>
    %636 = vector.extract_strided_slice %613 {offsets = [0, 0, 8], sizes = [2, 8, 8], strides = [1, 1, 1]} : vector<2x8x32xf32> to vector<2x8x8xf32>
    %637 = arith.truncf %636 : vector<2x8x8xf32> to vector<2x8x8xbf16>
    "tpu.trace_start"() <{level = 10 : i32, message = "bnd,bmd->bnm"}> : () -> ()
    %cst_253 = arith.constant dense<0.000000e+00> : vector<2x8x8xf32>
    %638 = tpu.matmul %633, %635, %cst_253 {dimension_numbers = #tpu.dot_dimension_numbers<[2], [2], [1], [1], [0, 0, 0, 1, 1, 1], [0], [0]>} : vector<2x8x8xbf16>, vector<2x8x8xbf16>, vector<2x8x8xf32> -> vector<2x8x8xf32>
    "tpu.trace_stop"() : () -> ()
    %cst_254 = arith.constant dense<0xFF800000> : vector<2x8xf32>
    %639 = vector.multi_reduction <maximumf>, %638, %cst_254 [2] : vector<2x8x8xf32> to vector<2x8xf32>
    %640 = vector.shape_cast %639 : vector<2x8xf32> to vector<2x8x1xf32>
    %641 = vector.broadcast %640 : vector<2x8x1xf32> to vector<2x8x8xf32>
    %642 = arith.subf %638, %641 : vector<2x8x8xf32>
    %643 = math.exp %642 : vector<2x8x8xf32>
    %cst_255 = arith.constant dense<0.000000e+00> : vector<2x8xf32>
    %644 = vector.multi_reduction <add>, %643, %cst_255 [2] : vector<2x8x8xf32> to vector<2x8xf32>
    %645 = vector.shape_cast %644 : vector<2x8xf32> to vector<2x8x1xf32>
    %646 = vector.broadcast %645 : vector<2x8x1xf32> to vector<2x8x8xf32>
    %647 = arith.divf %643, %646 : vector<2x8x8xf32>
    %648 = arith.truncf %647 : vector<2x8x8xf32> to vector<2x8x8xbf16>
    "tpu.trace_start"() <{level = 10 : i32, message = "bnm,bmd->bnd"}> : () -> ()
    %cst_256 = arith.constant dense<0.000000e+00> : vector<2x8x8xf32>
    %649 = tpu.matmul %648, %637, %cst_256 {dimension_numbers = #tpu.dot_dimension_numbers<[2], [1], [1], [2], [0, 0, 0, 1, 1, 2], [0], [0]>} : vector<2x8x8xbf16>, vector<2x8x8xbf16>, vector<2x8x8xf32> -> vector<2x8x8xf32>
    "tpu.trace_stop"() : () -> ()
    %650 = vector.extract_strided_slice %611 {offsets = [0, 0, 16], sizes = [2, 8, 8], strides = [1, 1, 1]} : vector<2x8x32xf32> to vector<2x8x8xf32>
    %651 = arith.truncf %650 : vector<2x8x8xf32> to vector<2x8x8xbf16>
    %652 = vector.extract_strided_slice %612 {offsets = [0, 0, 16], sizes = [2, 8, 8], strides = [1, 1, 1]} : vector<2x8x32xf32> to vector<2x8x8xf32>
    %653 = arith.truncf %652 : vector<2x8x8xf32> to vector<2x8x8xbf16>
    %654 = vector.extract_strided_slice %613 {offsets = [0, 0, 16], sizes = [2, 8, 8], strides = [1, 1, 1]} : vector<2x8x32xf32> to vector<2x8x8xf32>
    %655 = arith.truncf %654 : vector<2x8x8xf32> to vector<2x8x8xbf16>
    "tpu.trace_start"() <{level = 10 : i32, message = "bnd,bmd->bnm"}> : () -> ()
    %cst_257 = arith.constant dense<0.000000e+00> : vector<2x8x8xf32>
    %656 = tpu.matmul %651, %653, %cst_257 {dimension_numbers = #tpu.dot_dimension_numbers<[2], [2], [1], [1], [0, 0, 0, 1, 1, 1], [0], [0]>} : vector<2x8x8xbf16>, vector<2x8x8xbf16>, vector<2x8x8xf32> -> vector<2x8x8xf32>
    "tpu.trace_stop"() : () -> ()
    %cst_258 = arith.constant dense<0xFF800000> : vector<2x8xf32>
    %657 = vector.multi_reduction <maximumf>, %656, %cst_258 [2] : vector<2x8x8xf32> to vector<2x8xf32>
    %658 = vector.shape_cast %657 : vector<2x8xf32> to vector<2x8x1xf32>
    %659 = vector.broadcast %658 : vector<2x8x1xf32> to vector<2x8x8xf32>
    %660 = arith.subf %656, %659 : vector<2x8x8xf32>
    %661 = math.exp %660 : vector<2x8x8xf32>
    %cst_259 = arith.constant dense<0.000000e+00> : vector<2x8xf32>
    %662 = vector.multi_reduction <add>, %661, %cst_259 [2] : vector<2x8x8xf32> to vector<2x8xf32>
    %663 = vector.shape_cast %662 : vector<2x8xf32> to vector<2x8x1xf32>
    %664 = vector.broadcast %663 : vector<2x8x1xf32> to vector<2x8x8xf32>
    %665 = arith.divf %661, %664 : vector<2x8x8xf32>
    %666 = arith.truncf %665 : vector<2x8x8xf32> to vector<2x8x8xbf16>
    "tpu.trace_start"() <{level = 10 : i32, message = "bnm,bmd->bnd"}> : () -> ()
    %cst_260 = arith.constant dense<0.000000e+00> : vector<2x8x8xf32>
    %667 = tpu.matmul %666, %655, %cst_260 {dimension_numbers = #tpu.dot_dimension_numbers<[2], [1], [1], [2], [0, 0, 0, 1, 1, 2], [0], [0]>} : vector<2x8x8xbf16>, vector<2x8x8xbf16>, vector<2x8x8xf32> -> vector<2x8x8xf32>
    "tpu.trace_stop"() : () -> ()
    %668 = vector.extract_strided_slice %611 {offsets = [0, 0, 24], sizes = [2, 8, 8], strides = [1, 1, 1]} : vector<2x8x32xf32> to vector<2x8x8xf32>
    %669 = arith.truncf %668 : vector<2x8x8xf32> to vector<2x8x8xbf16>
    %670 = vector.extract_strided_slice %612 {offsets = [0, 0, 24], sizes = [2, 8, 8], strides = [1, 1, 1]} : vector<2x8x32xf32> to vector<2x8x8xf32>
    %671 = arith.truncf %670 : vector<2x8x8xf32> to vector<2x8x8xbf16>
    %672 = vector.extract_strided_slice %613 {offsets = [0, 0, 24], sizes = [2, 8, 8], strides = [1, 1, 1]} : vector<2x8x32xf32> to vector<2x8x8xf32>
    %673 = arith.truncf %672 : vector<2x8x8xf32> to vector<2x8x8xbf16>
    "tpu.trace_start"() <{level = 10 : i32, message = "bnd,bmd->bnm"}> : () -> ()
    %cst_261 = arith.constant dense<0.000000e+00> : vector<2x8x8xf32>
    %674 = tpu.matmul %669, %671, %cst_261 {dimension_numbers = #tpu.dot_dimension_numbers<[2], [2], [1], [1], [0, 0, 0, 1, 1, 1], [0], [0]>} : vector<2x8x8xbf16>, vector<2x8x8xbf16>, vector<2x8x8xf32> -> vector<2x8x8xf32>
    "tpu.trace_stop"() : () -> ()
    %cst_262 = arith.constant dense<0xFF800000> : vector<2x8xf32>
    %675 = vector.multi_reduction <maximumf>, %674, %cst_262 [2] : vector<2x8x8xf32> to vector<2x8xf32>
    %676 = vector.shape_cast %675 : vector<2x8xf32> to vector<2x8x1xf32>
    %677 = vector.broadcast %676 : vector<2x8x1xf32> to vector<2x8x8xf32>
    %678 = arith.subf %674, %677 : vector<2x8x8xf32>
    %679 = math.exp %678 : vector<2x8x8xf32>
    %cst_263 = arith.constant dense<0.000000e+00> : vector<2x8xf32>
    %680 = vector.multi_reduction <add>, %679, %cst_263 [2] : vector<2x8x8xf32> to vector<2x8xf32>
    %681 = vector.shape_cast %680 : vector<2x8xf32> to vector<2x8x1xf32>
    %682 = vector.broadcast %681 : vector<2x8x1xf32> to vector<2x8x8xf32>
    %683 = arith.divf %679, %682 : vector<2x8x8xf32>
    %684 = arith.truncf %683 : vector<2x8x8xf32> to vector<2x8x8xbf16>
    "tpu.trace_start"() <{level = 10 : i32, message = "bnm,bmd->bnd"}> : () -> ()
    %cst_264 = arith.constant dense<0.000000e+00> : vector<2x8x8xf32>
    %685 = tpu.matmul %684, %673, %cst_264 {dimension_numbers = #tpu.dot_dimension_numbers<[2], [1], [1], [2], [0, 0, 0, 1, 1, 2], [0], [0]>} : vector<2x8x8xbf16>, vector<2x8x8xbf16>, vector<2x8x8xf32> -> vector<2x8x8xf32>
    "tpu.trace_stop"() : () -> ()
    %686 = tpu.concatenate %631, %649, %667, %685 in 2 : vector<2x8x8xf32>, vector<2x8x8xf32>, vector<2x8x8xf32>, vector<2x8x8xf32> -> vector<2x8x32xf32>
    %687 = vector.shape_cast %686 : vector<2x8x32xf32> to vector<16x32xf32>
    %c0_265 = arith.constant 0 : index
    %c0_266 = arith.constant 0 : index
    %c0_267 = arith.constant 0 : index
    %688 = vector.load %arg23[%c0_265, %c0_266, %c0_267] : memref<2x32x32xbf16, #tpu.memory_space<vmem>>, vector<1x32x32xbf16>
    %689 = vector.shape_cast %688 : vector<1x32x32xbf16> to vector<32x32xbf16>
    %c0_268 = arith.constant 0 : index
    %c0_269 = arith.constant 0 : index
    %c0_270 = arith.constant 0 : index
    %690 = vector.load %arg24[%c0_268, %c0_269, %c0_270] : memref<2x1x32xf32, #tpu.memory_space<vmem>>, vector<1x1x32xf32>
    %691 = vector.shape_cast %690 : vector<1x1x32xf32> to vector<1x32xf32>
    %692 = arith.truncf %687 : vector<16x32xf32> to vector<16x32xbf16>
    %cst_271 = arith.constant dense<0.000000e+00> : vector<16x32xf32>
    %693 = tpu.matmul %692, %689, %cst_271 {dimension_numbers = #tpu.dot_dimension_numbers<[1], [0], [0], [1], [0, 0, 1, 1], [], []>} : vector<16x32xbf16>, vector<32x32xbf16>, vector<16x32xf32> -> vector<16x32xf32>
    %694 = vector.broadcast %691 : vector<1x32xf32> to vector<16x32xf32>
    %695 = arith.addf %693, %694 : vector<16x32xf32>
    %696 = arith.addf %573, %695 : vector<16x32xf32>
    %c0_272 = arith.constant 0 : index
    %c0_273 = arith.constant 0 : index
    %c0_274 = arith.constant 0 : index
    %697 = vector.load %arg25[%c0_272, %c0_273, %c0_274] : memref<2x1x32xf32, #tpu.memory_space<vmem>>, vector<1x1x32xf32>
    %698 = vector.shape_cast %697 : vector<1x1x32xf32> to vector<1x32xf32>
    %c0_275 = arith.constant 0 : index
    %c0_276 = arith.constant 0 : index
    %c0_277 = arith.constant 0 : index
    %699 = vector.load %arg26[%c0_275, %c0_276, %c0_277] : memref<2x1x32xf32, #tpu.memory_space<vmem>>, vector<1x1x32xf32>
    %700 = vector.shape_cast %699 : vector<1x1x32xf32> to vector<1x32xf32>
    %c0_278 = arith.constant 0 : index
    %c0_279 = arith.constant 0 : index
    %c0_280 = arith.constant 0 : index
    %701 = vector.load %arg27[%c0_278, %c0_279, %c0_280] : memref<2x32x32xbf16, #tpu.memory_space<vmem>>, vector<1x32x32xbf16>
    %702 = vector.shape_cast %701 : vector<1x32x32xbf16> to vector<32x32xbf16>
    %c0_281 = arith.constant 0 : index
    %c0_282 = arith.constant 0 : index
    %c0_283 = arith.constant 0 : index
    %703 = vector.load %arg28[%c0_281, %c0_282, %c0_283] : memref<2x1x32xf32, #tpu.memory_space<vmem>>, vector<1x1x32xf32>
    %704 = vector.shape_cast %703 : vector<1x1x32xf32> to vector<1x32xf32>
    %c0_284 = arith.constant 0 : index
    %c0_285 = arith.constant 0 : index
    %c0_286 = arith.constant 0 : index
    %705 = vector.load %arg29[%c0_284, %c0_285, %c0_286] : memref<2x32x32xbf16, #tpu.memory_space<vmem>>, vector<1x32x32xbf16>
    %706 = vector.shape_cast %705 : vector<1x32x32xbf16> to vector<32x32xbf16>
    %c0_287 = arith.constant 0 : index
    %c0_288 = arith.constant 0 : index
    %c0_289 = arith.constant 0 : index
    %707 = vector.load %arg30[%c0_287, %c0_288, %c0_289] : memref<2x1x32xf32, #tpu.memory_space<vmem>>, vector<1x1x32xf32>
    %708 = vector.shape_cast %707 : vector<1x1x32xf32> to vector<1x32xf32>
    %cst_290 = arith.constant dense<0.000000e+00> : vector<16xf32>
    %709 = vector.multi_reduction <add>, %696, %cst_290 [1] : vector<16x32xf32> to vector<16xf32>
    %710 = vector.shape_cast %709 : vector<16xf32> to vector<16x1xf32>
    %cst_291 = arith.constant 3.200000e+01 : f32
    %711 = vector.broadcast %cst_291 : f32 to vector<16x1xf32>
    %712 = arith.divf %710, %711 : vector<16x1xf32>
    %713 = arith.mulf %696, %696 : vector<16x32xf32>
    %cst_292 = arith.constant dense<0.000000e+00> : vector<16xf32>
    %714 = vector.multi_reduction <add>, %713, %cst_292 [1] : vector<16x32xf32> to vector<16xf32>
    %715 = vector.shape_cast %714 : vector<16xf32> to vector<16x1xf32>
    %cst_293 = arith.constant 3.200000e+01 : f32
    %716 = vector.broadcast %cst_293 : f32 to vector<16x1xf32>
    %717 = arith.divf %715, %716 : vector<16x1xf32>
    %718 = arith.mulf %712, %712 : vector<16x1xf32>
    %719 = arith.subf %717, %718 : vector<16x1xf32>
    %720 = vector.broadcast %712 : vector<16x1xf32> to vector<16x32xf32>
    %721 = arith.subf %696, %720 : vector<16x32xf32>
    %cst_294 = arith.constant 9.99999974E-6 : f32
    %722 = vector.broadcast %cst_294 : f32 to vector<16x1xf32>
    %723 = arith.addf %719, %722 : vector<16x1xf32>
    %724 = math.rsqrt %723 : vector<16x1xf32>
    %725 = vector.broadcast %724 : vector<16x1xf32> to vector<16x32xf32>
    %726 = arith.mulf %721, %725 : vector<16x32xf32>
    %727 = vector.broadcast %698 : vector<1x32xf32> to vector<16x32xf32>
    %728 = arith.mulf %726, %727 : vector<16x32xf32>
    %729 = vector.broadcast %700 : vector<1x32xf32> to vector<16x32xf32>
    %730 = arith.addf %728, %729 : vector<16x32xf32>
    %731 = arith.truncf %730 : vector<16x32xf32> to vector<16x32xbf16>
    %cst_295 = arith.constant dense<0.000000e+00> : vector<16x32xf32>
    %732 = tpu.matmul %731, %702, %cst_295 {dimension_numbers = #tpu.dot_dimension_numbers<[1], [0], [0], [1], [0, 0, 1, 1], [], []>} : vector<16x32xbf16>, vector<32x32xbf16>, vector<16x32xf32> -> vector<16x32xf32>
    %733 = vector.broadcast %704 : vector<1x32xf32> to vector<16x32xf32>
    %734 = arith.addf %732, %733 : vector<16x32xf32>
    %735 = arith.mulf %734, %734 : vector<16x32xf32>
    %736 = arith.mulf %734, %735 : vector<16x32xf32>
    %cst_296 = arith.constant 4.471500e-02 : f32
    %737 = vector.broadcast %cst_296 : f32 to vector<16x32xf32>
    %738 = arith.mulf %737, %736 : vector<16x32xf32>
    %739 = arith.addf %734, %738 : vector<16x32xf32>
    %cst_297 = arith.constant 0.797884583 : f32
    %740 = vector.broadcast %cst_297 : f32 to vector<16x32xf32>
    %741 = arith.mulf %740, %739 : vector<16x32xf32>
    %742 = math.tanh %741 : vector<16x32xf32>
    %cst_298 = arith.constant 1.000000e+00 : f32
    %743 = vector.broadcast %cst_298 : f32 to vector<16x32xf32>
    %744 = arith.addf %743, %742 : vector<16x32xf32>
    %cst_299 = arith.constant 5.000000e-01 : f32
    %745 = vector.broadcast %cst_299 : f32 to vector<16x32xf32>
    %746 = arith.mulf %745, %744 : vector<16x32xf32>
    %747 = arith.mulf %734, %746 : vector<16x32xf32>
    %748 = arith.truncf %747 : vector<16x32xf32> to vector<16x32xbf16>
    %cst_300 = arith.constant dense<0.000000e+00> : vector<16x32xf32>
    %749 = tpu.matmul %748, %706, %cst_300 {dimension_numbers = #tpu.dot_dimension_numbers<[1], [0], [0], [1], [0, 0, 1, 1], [], []>} : vector<16x32xbf16>, vector<32x32xbf16>, vector<16x32xf32> -> vector<16x32xf32>
    %750 = vector.broadcast %708 : vector<1x32xf32> to vector<16x32xf32>
    %751 = arith.addf %749, %750 : vector<16x32xf32>
    %752 = arith.addf %696, %751 : vector<16x32xf32>
    %c1_301 = arith.constant 1 : index
    %c0_302 = arith.constant 0 : index
    %c0_303 = arith.constant 0 : index
    %753 = vector.load %arg19[%c1_301, %c0_302, %c0_303] : memref<2x1x32xf32, #tpu.memory_space<vmem>>, vector<1x1x32xf32>
    %754 = vector.shape_cast %753 : vector<1x1x32xf32> to vector<1x32xf32>
    %c1_304 = arith.constant 1 : index
    %c0_305 = arith.constant 0 : index
    %c0_306 = arith.constant 0 : index
    %755 = vector.load %arg20[%c1_304, %c0_305, %c0_306] : memref<2x1x32xf32, #tpu.memory_space<vmem>>, vector<1x1x32xf32>
    %756 = vector.shape_cast %755 : vector<1x1x32xf32> to vector<1x32xf32>
    %cst_307 = arith.constant dense<0.000000e+00> : vector<16xf32>
    %757 = vector.multi_reduction <add>, %752, %cst_307 [1] : vector<16x32xf32> to vector<16xf32>
    %758 = vector.shape_cast %757 : vector<16xf32> to vector<16x1xf32>
    %cst_308 = arith.constant 3.200000e+01 : f32
    %759 = vector.broadcast %cst_308 : f32 to vector<16x1xf32>
    %760 = arith.divf %758, %759 : vector<16x1xf32>
    %761 = arith.mulf %752, %752 : vector<16x32xf32>
    %cst_309 = arith.constant dense<0.000000e+00> : vector<16xf32>
    %762 = vector.multi_reduction <add>, %761, %cst_309 [1] : vector<16x32xf32> to vector<16xf32>
    %763 = vector.shape_cast %762 : vector<16xf32> to vector<16x1xf32>
    %cst_310 = arith.constant 3.200000e+01 : f32
    %764 = vector.broadcast %cst_310 : f32 to vector<16x1xf32>
    %765 = arith.divf %763, %764 : vector<16x1xf32>
    %766 = arith.mulf %760, %760 : vector<16x1xf32>
    %767 = arith.subf %765, %766 : vector<16x1xf32>
    %768 = vector.broadcast %760 : vector<16x1xf32> to vector<16x32xf32>
    %769 = arith.subf %752, %768 : vector<16x32xf32>
    %cst_311 = arith.constant 9.99999974E-6 : f32
    %770 = vector.broadcast %cst_311 : f32 to vector<16x1xf32>
    %771 = arith.addf %767, %770 : vector<16x1xf32>
    %772 = math.rsqrt %771 : vector<16x1xf32>
    %773 = vector.broadcast %772 : vector<16x1xf32> to vector<16x32xf32>
    %774 = arith.mulf %769, %773 : vector<16x32xf32>
    %775 = vector.broadcast %754 : vector<1x32xf32> to vector<16x32xf32>
    %776 = arith.mulf %774, %775 : vector<16x32xf32>
    %777 = vector.broadcast %756 : vector<1x32xf32> to vector<16x32xf32>
    %778 = arith.addf %776, %777 : vector<16x32xf32>
    %c1_312 = arith.constant 1 : index
    %c0_313 = arith.constant 0 : index
    %c0_314 = arith.constant 0 : index
    %779 = vector.load %arg21[%c1_312, %c0_313, %c0_314] : memref<2x32x96xbf16, #tpu.memory_space<vmem>>, vector<1x32x96xbf16>
    %780 = vector.shape_cast %779 : vector<1x32x96xbf16> to vector<32x96xbf16>
    %c1_315 = arith.constant 1 : index
    %c0_316 = arith.constant 0 : index
    %c0_317 = arith.constant 0 : index
    %781 = vector.load %arg22[%c1_315, %c0_316, %c0_317] : memref<2x1x96xf32, #tpu.memory_space<vmem>>, vector<1x1x96xf32>
    %782 = vector.shape_cast %781 : vector<1x1x96xf32> to vector<1x96xf32>
    %783 = arith.truncf %778 : vector<16x32xf32> to vector<16x32xbf16>
    %cst_318 = arith.constant dense<0.000000e+00> : vector<16x96xf32>
    %784 = tpu.matmul %783, %780, %cst_318 {dimension_numbers = #tpu.dot_dimension_numbers<[1], [0], [0], [1], [0, 0, 1, 1], [], []>} : vector<16x32xbf16>, vector<32x96xbf16>, vector<16x96xf32> -> vector<16x96xf32>
    %785 = vector.broadcast %782 : vector<1x96xf32> to vector<16x96xf32>
    %786 = arith.addf %784, %785 : vector<16x96xf32>
    %787 = vector.extract_strided_slice %786 {offsets = [0, 0], sizes = [16, 32], strides = [1, 1]} : vector<16x96xf32> to vector<16x32xf32>
    %788 = vector.extract_strided_slice %786 {offsets = [0, 32], sizes = [16, 32], strides = [1, 1]} : vector<16x96xf32> to vector<16x32xf32>
    %789 = vector.extract_strided_slice %786 {offsets = [0, 64], sizes = [16, 32], strides = [1, 1]} : vector<16x96xf32> to vector<16x32xf32>
    %790 = vector.shape_cast %787 : vector<16x32xf32> to vector<2x8x32xf32>
    %791 = vector.shape_cast %788 : vector<16x32xf32> to vector<2x8x32xf32>
    %792 = vector.shape_cast %789 : vector<16x32xf32> to vector<2x8x32xf32>
    %793 = vector.extract_strided_slice %790 {offsets = [0, 0, 0], sizes = [2, 8, 8], strides = [1, 1, 1]} : vector<2x8x32xf32> to vector<2x8x8xf32>
    %794 = arith.truncf %793 : vector<2x8x8xf32> to vector<2x8x8xbf16>
    %795 = vector.extract_strided_slice %791 {offsets = [0, 0, 0], sizes = [2, 8, 8], strides = [1, 1, 1]} : vector<2x8x32xf32> to vector<2x8x8xf32>
    %796 = arith.truncf %795 : vector<2x8x8xf32> to vector<2x8x8xbf16>
    %797 = vector.extract_strided_slice %792 {offsets = [0, 0, 0], sizes = [2, 8, 8], strides = [1, 1, 1]} : vector<2x8x32xf32> to vector<2x8x8xf32>
    %798 = arith.truncf %797 : vector<2x8x8xf32> to vector<2x8x8xbf16>
    "tpu.trace_start"() <{level = 10 : i32, message = "bnd,bmd->bnm"}> : () -> ()
    %cst_319 = arith.constant dense<0.000000e+00> : vector<2x8x8xf32>
    %799 = tpu.matmul %794, %796, %cst_319 {dimension_numbers = #tpu.dot_dimension_numbers<[2], [2], [1], [1], [0, 0, 0, 1, 1, 1], [0], [0]>} : vector<2x8x8xbf16>, vector<2x8x8xbf16>, vector<2x8x8xf32> -> vector<2x8x8xf32>
    "tpu.trace_stop"() : () -> ()
    %cst_320 = arith.constant dense<0xFF800000> : vector<2x8xf32>
    %800 = vector.multi_reduction <maximumf>, %799, %cst_320 [2] : vector<2x8x8xf32> to vector<2x8xf32>
    %801 = vector.shape_cast %800 : vector<2x8xf32> to vector<2x8x1xf32>
    %802 = vector.broadcast %801 : vector<2x8x1xf32> to vector<2x8x8xf32>
    %803 = arith.subf %799, %802 : vector<2x8x8xf32>
    %804 = math.exp %803 : vector<2x8x8xf32>
    %cst_321 = arith.constant dense<0.000000e+00> : vector<2x8xf32>
    %805 = vector.multi_reduction <add>, %804, %cst_321 [2] : vector<2x8x8xf32> to vector<2x8xf32>
    %806 = vector.shape_cast %805 : vector<2x8xf32> to vector<2x8x1xf32>
    %807 = vector.broadcast %806 : vector<2x8x1xf32> to vector<2x8x8xf32>
    %808 = arith.divf %804, %807 : vector<2x8x8xf32>
    %809 = arith.truncf %808 : vector<2x8x8xf32> to vector<2x8x8xbf16>
    "tpu.trace_start"() <{level = 10 : i32, message = "bnm,bmd->bnd"}> : () -> ()
    %cst_322 = arith.constant dense<0.000000e+00> : vector<2x8x8xf32>
    %810 = tpu.matmul %809, %798, %cst_322 {dimension_numbers = #tpu.dot_dimension_numbers<[2], [1], [1], [2], [0, 0, 0, 1, 1, 2], [0], [0]>} : vector<2x8x8xbf16>, vector<2x8x8xbf16>, vector<2x8x8xf32> -> vector<2x8x8xf32>
    "tpu.trace_stop"() : () -> ()
    %811 = vector.extract_strided_slice %790 {offsets = [0, 0, 8], sizes = [2, 8, 8], strides = [1, 1, 1]} : vector<2x8x32xf32> to vector<2x8x8xf32>
    %812 = arith.truncf %811 : vector<2x8x8xf32> to vector<2x8x8xbf16>
    %813 = vector.extract_strided_slice %791 {offsets = [0, 0, 8], sizes = [2, 8, 8], strides = [1, 1, 1]} : vector<2x8x32xf32> to vector<2x8x8xf32>
    %814 = arith.truncf %813 : vector<2x8x8xf32> to vector<2x8x8xbf16>
    %815 = vector.extract_strided_slice %792 {offsets = [0, 0, 8], sizes = [2, 8, 8], strides = [1, 1, 1]} : vector<2x8x32xf32> to vector<2x8x8xf32>
    %816 = arith.truncf %815 : vector<2x8x8xf32> to vector<2x8x8xbf16>
    "tpu.trace_start"() <{level = 10 : i32, message = "bnd,bmd->bnm"}> : () -> ()
    %cst_323 = arith.constant dense<0.000000e+00> : vector<2x8x8xf32>
    %817 = tpu.matmul %812, %814, %cst_323 {dimension_numbers = #tpu.dot_dimension_numbers<[2], [2], [1], [1], [0, 0, 0, 1, 1, 1], [0], [0]>} : vector<2x8x8xbf16>, vector<2x8x8xbf16>, vector<2x8x8xf32> -> vector<2x8x8xf32>
    "tpu.trace_stop"() : () -> ()
    %cst_324 = arith.constant dense<0xFF800000> : vector<2x8xf32>
    %818 = vector.multi_reduction <maximumf>, %817, %cst_324 [2] : vector<2x8x8xf32> to vector<2x8xf32>
    %819 = vector.shape_cast %818 : vector<2x8xf32> to vector<2x8x1xf32>
    %820 = vector.broadcast %819 : vector<2x8x1xf32> to vector<2x8x8xf32>
    %821 = arith.subf %817, %820 : vector<2x8x8xf32>
    %822 = math.exp %821 : vector<2x8x8xf32>
    %cst_325 = arith.constant dense<0.000000e+00> : vector<2x8xf32>
    %823 = vector.multi_reduction <add>, %822, %cst_325 [2] : vector<2x8x8xf32> to vector<2x8xf32>
    %824 = vector.shape_cast %823 : vector<2x8xf32> to vector<2x8x1xf32>
    %825 = vector.broadcast %824 : vector<2x8x1xf32> to vector<2x8x8xf32>
    %826 = arith.divf %822, %825 : vector<2x8x8xf32>
    %827 = arith.truncf %826 : vector<2x8x8xf32> to vector<2x8x8xbf16>
    "tpu.trace_start"() <{level = 10 : i32, message = "bnm,bmd->bnd"}> : () -> ()
    %cst_326 = arith.constant dense<0.000000e+00> : vector<2x8x8xf32>
    %828 = tpu.matmul %827, %816, %cst_326 {dimension_numbers = #tpu.dot_dimension_numbers<[2], [1], [1], [2], [0, 0, 0, 1, 1, 2], [0], [0]>} : vector<2x8x8xbf16>, vector<2x8x8xbf16>, vector<2x8x8xf32> -> vector<2x8x8xf32>
    "tpu.trace_stop"() : () -> ()
    %829 = vector.extract_strided_slice %790 {offsets = [0, 0, 16], sizes = [2, 8, 8], strides = [1, 1, 1]} : vector<2x8x32xf32> to vector<2x8x8xf32>
    %830 = arith.truncf %829 : vector<2x8x8xf32> to vector<2x8x8xbf16>
    %831 = vector.extract_strided_slice %791 {offsets = [0, 0, 16], sizes = [2, 8, 8], strides = [1, 1, 1]} : vector<2x8x32xf32> to vector<2x8x8xf32>
    %832 = arith.truncf %831 : vector<2x8x8xf32> to vector<2x8x8xbf16>
    %833 = vector.extract_strided_slice %792 {offsets = [0, 0, 16], sizes = [2, 8, 8], strides = [1, 1, 1]} : vector<2x8x32xf32> to vector<2x8x8xf32>
    %834 = arith.truncf %833 : vector<2x8x8xf32> to vector<2x8x8xbf16>
    "tpu.trace_start"() <{level = 10 : i32, message = "bnd,bmd->bnm"}> : () -> ()
    %cst_327 = arith.constant dense<0.000000e+00> : vector<2x8x8xf32>
    %835 = tpu.matmul %830, %832, %cst_327 {dimension_numbers = #tpu.dot_dimension_numbers<[2], [2], [1], [1], [0, 0, 0, 1, 1, 1], [0], [0]>} : vector<2x8x8xbf16>, vector<2x8x8xbf16>, vector<2x8x8xf32> -> vector<2x8x8xf32>
    "tpu.trace_stop"() : () -> ()
    %cst_328 = arith.constant dense<0xFF800000> : vector<2x8xf32>
    %836 = vector.multi_reduction <maximumf>, %835, %cst_328 [2] : vector<2x8x8xf32> to vector<2x8xf32>
    %837 = vector.shape_cast %836 : vector<2x8xf32> to vector<2x8x1xf32>
    %838 = vector.broadcast %837 : vector<2x8x1xf32> to vector<2x8x8xf32>
    %839 = arith.subf %835, %838 : vector<2x8x8xf32>
    %840 = math.exp %839 : vector<2x8x8xf32>
    %cst_329 = arith.constant dense<0.000000e+00> : vector<2x8xf32>
    %841 = vector.multi_reduction <add>, %840, %cst_329 [2] : vector<2x8x8xf32> to vector<2x8xf32>
    %842 = vector.shape_cast %841 : vector<2x8xf32> to vector<2x8x1xf32>
    %843 = vector.broadcast %842 : vector<2x8x1xf32> to vector<2x8x8xf32>
    %844 = arith.divf %840, %843 : vector<2x8x8xf32>
    %845 = arith.truncf %844 : vector<2x8x8xf32> to vector<2x8x8xbf16>
    "tpu.trace_start"() <{level = 10 : i32, message = "bnm,bmd->bnd"}> : () -> ()
    %cst_330 = arith.constant dense<0.000000e+00> : vector<2x8x8xf32>
    %846 = tpu.matmul %845, %834, %cst_330 {dimension_numbers = #tpu.dot_dimension_numbers<[2], [1], [1], [2], [0, 0, 0, 1, 1, 2], [0], [0]>} : vector<2x8x8xbf16>, vector<2x8x8xbf16>, vector<2x8x8xf32> -> vector<2x8x8xf32>
    "tpu.trace_stop"() : () -> ()
    %847 = vector.extract_strided_slice %790 {offsets = [0, 0, 24], sizes = [2, 8, 8], strides = [1, 1, 1]} : vector<2x8x32xf32> to vector<2x8x8xf32>
    %848 = arith.truncf %847 : vector<2x8x8xf32> to vector<2x8x8xbf16>
    %849 = vector.extract_strided_slice %791 {offsets = [0, 0, 24], sizes = [2, 8, 8], strides = [1, 1, 1]} : vector<2x8x32xf32> to vector<2x8x8xf32>
    %850 = arith.truncf %849 : vector<2x8x8xf32> to vector<2x8x8xbf16>
    %851 = vector.extract_strided_slice %792 {offsets = [0, 0, 24], sizes = [2, 8, 8], strides = [1, 1, 1]} : vector<2x8x32xf32> to vector<2x8x8xf32>
    %852 = arith.truncf %851 : vector<2x8x8xf32> to vector<2x8x8xbf16>
    "tpu.trace_start"() <{level = 10 : i32, message = "bnd,bmd->bnm"}> : () -> ()
    %cst_331 = arith.constant dense<0.000000e+00> : vector<2x8x8xf32>
    %853 = tpu.matmul %848, %850, %cst_331 {dimension_numbers = #tpu.dot_dimension_numbers<[2], [2], [1], [1], [0, 0, 0, 1, 1, 1], [0], [0]>} : vector<2x8x8xbf16>, vector<2x8x8xbf16>, vector<2x8x8xf32> -> vector<2x8x8xf32>
    "tpu.trace_stop"() : () -> ()
    %cst_332 = arith.constant dense<0xFF800000> : vector<2x8xf32>
    %854 = vector.multi_reduction <maximumf>, %853, %cst_332 [2] : vector<2x8x8xf32> to vector<2x8xf32>
    %855 = vector.shape_cast %854 : vector<2x8xf32> to vector<2x8x1xf32>
    %856 = vector.broadcast %855 : vector<2x8x1xf32> to vector<2x8x8xf32>
    %857 = arith.subf %853, %856 : vector<2x8x8xf32>
    %858 = math.exp %857 : vector<2x8x8xf32>
    %cst_333 = arith.constant dense<0.000000e+00> : vector<2x8xf32>
    %859 = vector.multi_reduction <add>, %858, %cst_333 [2] : vector<2x8x8xf32> to vector<2x8xf32>
    %860 = vector.shape_cast %859 : vector<2x8xf32> to vector<2x8x1xf32>
    %861 = vector.broadcast %860 : vector<2x8x1xf32> to vector<2x8x8xf32>
    %862 = arith.divf %858, %861 : vector<2x8x8xf32>
    %863 = arith.truncf %862 : vector<2x8x8xf32> to vector<2x8x8xbf16>
    "tpu.trace_start"() <{level = 10 : i32, message = "bnm,bmd->bnd"}> : () -> ()
    %cst_334 = arith.constant dense<0.000000e+00> : vector<2x8x8xf32>
    %864 = tpu.matmul %863, %852, %cst_334 {dimension_numbers = #tpu.dot_dimension_numbers<[2], [1], [1], [2], [0, 0, 0, 1, 1, 2], [0], [0]>} : vector<2x8x8xbf16>, vector<2x8x8xbf16>, vector<2x8x8xf32> -> vector<2x8x8xf32>
    "tpu.trace_stop"() : () -> ()
    %865 = tpu.concatenate %810, %828, %846, %864 in 2 : vector<2x8x8xf32>, vector<2x8x8xf32>, vector<2x8x8xf32>, vector<2x8x8xf32> -> vector<2x8x32xf32>
    %866 = vector.shape_cast %865 : vector<2x8x32xf32> to vector<16x32xf32>
    %c1_335 = arith.constant 1 : index
    %c0_336 = arith.constant 0 : index
    %c0_337 = arith.constant 0 : index
    %867 = vector.load %arg23[%c1_335, %c0_336, %c0_337] : memref<2x32x32xbf16, #tpu.memory_space<vmem>>, vector<1x32x32xbf16>
    %868 = vector.shape_cast %867 : vector<1x32x32xbf16> to vector<32x32xbf16>
    %c1_338 = arith.constant 1 : index
    %c0_339 = arith.constant 0 : index
    %c0_340 = arith.constant 0 : index
    %869 = vector.load %arg24[%c1_338, %c0_339, %c0_340] : memref<2x1x32xf32, #tpu.memory_space<vmem>>, vector<1x1x32xf32>
    %870 = vector.shape_cast %869 : vector<1x1x32xf32> to vector<1x32xf32>
    %871 = arith.truncf %866 : vector<16x32xf32> to vector<16x32xbf16>
    %cst_341 = arith.constant dense<0.000000e+00> : vector<16x32xf32>
    %872 = tpu.matmul %871, %868, %cst_341 {dimension_numbers = #tpu.dot_dimension_numbers<[1], [0], [0], [1], [0, 0, 1, 1], [], []>} : vector<16x32xbf16>, vector<32x32xbf16>, vector<16x32xf32> -> vector<16x32xf32>
    %873 = vector.broadcast %870 : vector<1x32xf32> to vector<16x32xf32>
    %874 = arith.addf %872, %873 : vector<16x32xf32>
    %875 = arith.addf %752, %874 : vector<16x32xf32>
    %c1_342 = arith.constant 1 : index
    %c0_343 = arith.constant 0 : index
    %c0_344 = arith.constant 0 : index
    %876 = vector.load %arg25[%c1_342, %c0_343, %c0_344] : memref<2x1x32xf32, #tpu.memory_space<vmem>>, vector<1x1x32xf32>
    %877 = vector.shape_cast %876 : vector<1x1x32xf32> to vector<1x32xf32>
    %c1_345 = arith.constant 1 : index
    %c0_346 = arith.constant 0 : index
    %c0_347 = arith.constant 0 : index
    %878 = vector.load %arg26[%c1_345, %c0_346, %c0_347] : memref<2x1x32xf32, #tpu.memory_space<vmem>>, vector<1x1x32xf32>
    %879 = vector.shape_cast %878 : vector<1x1x32xf32> to vector<1x32xf32>
    %c1_348 = arith.constant 1 : index
    %c0_349 = arith.constant 0 : index
    %c0_350 = arith.constant 0 : index
    %880 = vector.load %arg27[%c1_348, %c0_349, %c0_350] : memref<2x32x32xbf16, #tpu.memory_space<vmem>>, vector<1x32x32xbf16>
    %881 = vector.shape_cast %880 : vector<1x32x32xbf16> to vector<32x32xbf16>
    %c1_351 = arith.constant 1 : index
    %c0_352 = arith.constant 0 : index
    %c0_353 = arith.constant 0 : index
    %882 = vector.load %arg28[%c1_351, %c0_352, %c0_353] : memref<2x1x32xf32, #tpu.memory_space<vmem>>, vector<1x1x32xf32>
    %883 = vector.shape_cast %882 : vector<1x1x32xf32> to vector<1x32xf32>
    %c1_354 = arith.constant 1 : index
    %c0_355 = arith.constant 0 : index
    %c0_356 = arith.constant 0 : index
    %884 = vector.load %arg29[%c1_354, %c0_355, %c0_356] : memref<2x32x32xbf16, #tpu.memory_space<vmem>>, vector<1x32x32xbf16>
    %885 = vector.shape_cast %884 : vector<1x32x32xbf16> to vector<32x32xbf16>
    %c1_357 = arith.constant 1 : index
    %c0_358 = arith.constant 0 : index
    %c0_359 = arith.constant 0 : index
    %886 = vector.load %arg30[%c1_357, %c0_358, %c0_359] : memref<2x1x32xf32, #tpu.memory_space<vmem>>, vector<1x1x32xf32>
    %887 = vector.shape_cast %886 : vector<1x1x32xf32> to vector<1x32xf32>
    %cst_360 = arith.constant dense<0.000000e+00> : vector<16xf32>
    %888 = vector.multi_reduction <add>, %875, %cst_360 [1] : vector<16x32xf32> to vector<16xf32>
    %889 = vector.shape_cast %888 : vector<16xf32> to vector<16x1xf32>
    %cst_361 = arith.constant 3.200000e+01 : f32
    %890 = vector.broadcast %cst_361 : f32 to vector<16x1xf32>
    %891 = arith.divf %889, %890 : vector<16x1xf32>
    %892 = arith.mulf %875, %875 : vector<16x32xf32>
    %cst_362 = arith.constant dense<0.000000e+00> : vector<16xf32>
    %893 = vector.multi_reduction <add>, %892, %cst_362 [1] : vector<16x32xf32> to vector<16xf32>
    %894 = vector.shape_cast %893 : vector<16xf32> to vector<16x1xf32>
    %cst_363 = arith.constant 3.200000e+01 : f32
    %895 = vector.broadcast %cst_363 : f32 to vector<16x1xf32>
    %896 = arith.divf %894, %895 : vector<16x1xf32>
    %897 = arith.mulf %891, %891 : vector<16x1xf32>
    %898 = arith.subf %896, %897 : vector<16x1xf32>
    %899 = vector.broadcast %891 : vector<16x1xf32> to vector<16x32xf32>
    %900 = arith.subf %875, %899 : vector<16x32xf32>
    %cst_364 = arith.constant 9.99999974E-6 : f32
    %901 = vector.broadcast %cst_364 : f32 to vector<16x1xf32>
    %902 = arith.addf %898, %901 : vector<16x1xf32>
    %903 = math.rsqrt %902 : vector<16x1xf32>
    %904 = vector.broadcast %903 : vector<16x1xf32> to vector<16x32xf32>
    %905 = arith.mulf %900, %904 : vector<16x32xf32>
    %906 = vector.broadcast %877 : vector<1x32xf32> to vector<16x32xf32>
    %907 = arith.mulf %905, %906 : vector<16x32xf32>
    %908 = vector.broadcast %879 : vector<1x32xf32> to vector<16x32xf32>
    %909 = arith.addf %907, %908 : vector<16x32xf32>
    %910 = arith.truncf %909 : vector<16x32xf32> to vector<16x32xbf16>
    %cst_365 = arith.constant dense<0.000000e+00> : vector<16x32xf32>
    %911 = tpu.matmul %910, %881, %cst_365 {dimension_numbers = #tpu.dot_dimension_numbers<[1], [0], [0], [1], [0, 0, 1, 1], [], []>} : vector<16x32xbf16>, vector<32x32xbf16>, vector<16x32xf32> -> vector<16x32xf32>
    %912 = vector.broadcast %883 : vector<1x32xf32> to vector<16x32xf32>
    %913 = arith.addf %911, %912 : vector<16x32xf32>
    %914 = arith.mulf %913, %913 : vector<16x32xf32>
    %915 = arith.mulf %913, %914 : vector<16x32xf32>
    %cst_366 = arith.constant 4.471500e-02 : f32
    %916 = vector.broadcast %cst_366 : f32 to vector<16x32xf32>
    %917 = arith.mulf %916, %915 : vector<16x32xf32>
    %918 = arith.addf %913, %917 : vector<16x32xf32>
    %cst_367 = arith.constant 0.797884583 : f32
    %919 = vector.broadcast %cst_367 : f32 to vector<16x32xf32>
    %920 = arith.mulf %919, %918 : vector<16x32xf32>
    %921 = math.tanh %920 : vector<16x32xf32>
    %cst_368 = arith.constant 1.000000e+00 : f32
    %922 = vector.broadcast %cst_368 : f32 to vector<16x32xf32>
    %923 = arith.addf %922, %921 : vector<16x32xf32>
    %cst_369 = arith.constant 5.000000e-01 : f32
    %924 = vector.broadcast %cst_369 : f32 to vector<16x32xf32>
    %925 = arith.mulf %924, %923 : vector<16x32xf32>
    %926 = arith.mulf %913, %925 : vector<16x32xf32>
    %927 = arith.truncf %926 : vector<16x32xf32> to vector<16x32xbf16>
    %cst_370 = arith.constant dense<0.000000e+00> : vector<16x32xf32>
    %928 = tpu.matmul %927, %885, %cst_370 {dimension_numbers = #tpu.dot_dimension_numbers<[1], [0], [0], [1], [0, 0, 1, 1], [], []>} : vector<16x32xbf16>, vector<32x32xbf16>, vector<16x32xf32> -> vector<16x32xf32>
    %929 = vector.broadcast %887 : vector<1x32xf32> to vector<16x32xf32>
    %930 = arith.addf %928, %929 : vector<16x32xf32>
    %931 = arith.addf %875, %930 : vector<16x32xf32>
    %932 = vector.shape_cast %931 : vector<16x32xf32> to vector<2x8x32xf32>
    %933 = vector.extract_strided_slice %932 {offsets = [0, 0, 0], sizes = [2, 1, 32], strides = [1, 1, 1]} : vector<2x8x32xf32> to vector<2x1x32xf32>
    %934 = vector.shape_cast %933 : vector<2x1x32xf32> to vector<2x32xf32>
    %935 = vector.extract_strided_slice %932 {offsets = [0, 1, 0], sizes = [2, 1, 32], strides = [1, 1, 1]} : vector<2x8x32xf32> to vector<2x1x32xf32>
    %936 = vector.shape_cast %935 : vector<2x1x32xf32> to vector<2x32xf32>
    %937 = vector.extract_strided_slice %932 {offsets = [0, 2, 0], sizes = [2, 1, 32], strides = [1, 1, 1]} : vector<2x8x32xf32> to vector<2x1x32xf32>
    %938 = vector.shape_cast %937 : vector<2x1x32xf32> to vector<2x32xf32>
    %939 = vector.extract_strided_slice %932 {offsets = [0, 3, 0], sizes = [2, 1, 32], strides = [1, 1, 1]} : vector<2x8x32xf32> to vector<2x1x32xf32>
    %940 = vector.shape_cast %939 : vector<2x1x32xf32> to vector<2x32xf32>
    %941 = vector.extract_strided_slice %932 {offsets = [0, 4, 0], sizes = [2, 1, 32], strides = [1, 1, 1]} : vector<2x8x32xf32> to vector<2x1x32xf32>
    %942 = vector.shape_cast %941 : vector<2x1x32xf32> to vector<2x32xf32>
    %943 = vector.extract_strided_slice %932 {offsets = [0, 5, 0], sizes = [2, 1, 32], strides = [1, 1, 1]} : vector<2x8x32xf32> to vector<2x1x32xf32>
    %944 = vector.shape_cast %943 : vector<2x1x32xf32> to vector<2x32xf32>
    %945 = vector.extract_strided_slice %932 {offsets = [0, 6, 0], sizes = [2, 1, 32], strides = [1, 1, 1]} : vector<2x8x32xf32> to vector<2x1x32xf32>
    %946 = vector.shape_cast %945 : vector<2x1x32xf32> to vector<2x32xf32>
    %947 = vector.extract_strided_slice %932 {offsets = [0, 7, 0], sizes = [2, 1, 32], strides = [1, 1, 1]} : vector<2x8x32xf32> to vector<2x1x32xf32>
    %948 = vector.shape_cast %947 : vector<2x1x32xf32> to vector<2x32xf32>
    %949 = tpu.concatenate %934, %936, %938, %940, %942, %944, %946, %948 in 1 : vector<2x32xf32>, vector<2x32xf32>, vector<2x32xf32>, vector<2x32xf32>, vector<2x32xf32>, vector<2x32xf32>, vector<2x32xf32>, vector<2x32xf32> -> vector<2x256xf32>
    %950 = vector.shape_cast %949 : vector<2x256xf32> to vector<2x1x256xf32>
    %c0_371 = arith.constant 0 : index
    %c0_372 = arith.constant 0 : index
    %c0_373 = arith.constant 0 : index
    %951 = vector.load %arg31[%c0_371, %c0_372, %c0_373] : memref<2x1x256xf32, #tpu.memory_space<vmem>>, vector<2x1x256xf32>
    tpu.vector_store %arg31[%c0_371, %c0_372, %c0_373], %950 {strides = array<i32>} : memref<2x1x256xf32, #tpu.memory_space<vmem>>, vector<2x1x256xf32>,
    return
  }
  func.func @transform_0(%arg0: i32) -> (i32, i32, i32) {
    %c0_i32 = arith.constant 0 : i32
    %c0_i32_0 = arith.constant 0 : i32
    %c0_i32_1 = arith.constant 0 : i32
    return %arg0, %c0_i32, %c0_i32_0 : i32, i32, i32
  }
  func.func @transform_1(%arg0: i32) -> (i32, i32, i32) {
    %c0_i32 = arith.constant 0 : i32
    %c0_i32_0 = arith.constant 0 : i32
    %c0_i32_1 = arith.constant 0 : i32
    return %arg0, %c0_i32, %c0_i32_0 : i32, i32, i32
  }
  func.func @transform_2(%arg0: i32) -> (i32, i32, i32) {
    %c0_i32 = arith.constant 0 : i32
    %c0_i32_0 = arith.constant 0 : i32
    %c0_i32_1 = arith.constant 0 : i32
    %c0_i32_2 = arith.constant 0 : i32
    return %c0_i32, %c0_i32_0, %c0_i32_1 : i32, i32, i32
  }
  func.func @transform_3(%arg0: i32) -> (i32, i32, i32) {
    %c0_i32 = arith.constant 0 : i32
    %c0_i32_0 = arith.constant 0 : i32
    %c0_i32_1 = arith.constant 0 : i32
    %c0_i32_2 = arith.constant 0 : i32
    return %c0_i32, %c0_i32_0, %c0_i32_1 : i32, i32, i32
  }
  func.func @transform_4(%arg0: i32) -> (i32, i32, i32) {
    %c0_i32 = arith.constant 0 : i32
    %c0_i32_0 = arith.constant 0 : i32
    %c0_i32_1 = arith.constant 0 : i32
    %c0_i32_2 = arith.constant 0 : i32
    return %c0_i32, %c0_i32_0, %c0_i32_1 : i32, i32, i32
  }
  func.func @transform_5(%arg0: i32) -> (i32, i32, i32) {
    %c0_i32 = arith.constant 0 : i32
    %c0_i32_0 = arith.constant 0 : i32
    %c0_i32_1 = arith.constant 0 : i32
    %c0_i32_2 = arith.constant 0 : i32
    return %c0_i32, %c0_i32_0, %c0_i32_1 : i32, i32, i32
  }
  func.func @transform_6(%arg0: i32) -> (i32, i32, i32) {
    %c0_i32 = arith.constant 0 : i32
    %c0_i32_0 = arith.constant 0 : i32
    %c0_i32_1 = arith.constant 0 : i32
    %c0_i32_2 = arith.constant 0 : i32
    return %c0_i32, %c0_i32_0, %c0_i32_1 : i32, i32, i32
  }
  func.func @transform_7(%arg0: i32) -> (i32, i32, i32) {
    %c0_i32 = arith.constant 0 : i32
    %c0_i32_0 = arith.constant 0 : i32
    %c0_i32_1 = arith.constant 0 : i32
    %c0_i32_2 = arith.constant 0 : i32
    return %c0_i32, %c0_i32_0, %c0_i32_1 : i32, i32, i32
  }
  func.func @transform_8(%arg0: i32) -> (i32, i32, i32) {
    %c0_i32 = arith.constant 0 : i32
    %c0_i32_0 = arith.constant 0 : i32
    %c0_i32_1 = arith.constant 0 : i32
    %c0_i32_2 = arith.constant 0 : i32
    return %c0_i32, %c0_i32_0, %c0_i32_1 : i32, i32, i32
  }
  func.func @transform_9(%arg0: i32) -> (i32, i32, i32) {
    %c0_i32 = arith.constant 0 : i32
    %c0_i32_0 = arith.constant 0 : i32
    %c0_i32_1 = arith.constant 0 : i32
    %c0_i32_2 = arith.constant 0 : i32
    return %c0_i32, %c0_i32_0, %c0_i32_1 : i32, i32, i32
  }
  func.func @transform_10(%arg0: i32) -> (i32, i32, i32) {
    %c0_i32 = arith.constant 0 : i32
    %c0_i32_0 = arith.constant 0 : i32
    %c0_i32_1 = arith.constant 0 : i32
    %c0_i32_2 = arith.constant 0 : i32
    return %c0_i32, %c0_i32_0, %c0_i32_1 : i32, i32, i32
  }
  func.func @transform_11(%arg0: i32) -> (i32, i32, i32) {
    %c0_i32 = arith.constant 0 : i32
    %c0_i32_0 = arith.constant 0 : i32
    %c0_i32_1 = arith.constant 0 : i32
    %c0_i32_2 = arith.constant 0 : i32
    return %c0_i32, %c0_i32_0, %c0_i32_1 : i32, i32, i32
  }
  func.func @transform_12(%arg0: i32) -> (i32, i32, i32) {
    %c0_i32 = arith.constant 0 : i32
    %c0_i32_0 = arith.constant 0 : i32
    %c0_i32_1 = arith.constant 0 : i32
    %c0_i32_2 = arith.constant 0 : i32
    return %c0_i32, %c0_i32_0, %c0_i32_1 : i32, i32, i32
  }
  func.func @transform_13(%arg0: i32) -> (i32, i32, i32) {
    %c0_i32 = arith.constant 0 : i32
    %c0_i32_0 = arith.constant 0 : i32
    %c0_i32_1 = arith.constant 0 : i32
    %c0_i32_2 = arith.constant 0 : i32
    return %c0_i32, %c0_i32_0, %c0_i32_1 : i32, i32, i32
  }
  func.func @transform_14(%arg0: i32) -> (i32, i32, i32) {
    %c0_i32 = arith.constant 0 : i32
    %c0_i32_0 = arith.constant 0 : i32
    %c0_i32_1 = arith.constant 0 : i32
    %c0_i32_2 = arith.constant 0 : i32
    return %c0_i32, %c0_i32_0, %c0_i32_1 : i32, i32, i32
  }
  func.func @transform_15(%arg0: i32) -> (i32, i32, i32) {
    %c0_i32 = arith.constant 0 : i32
    %c0_i32_0 = arith.constant 0 : i32
    %c0_i32_1 = arith.constant 0 : i32
    %c0_i32_2 = arith.constant 0 : i32
    return %c0_i32, %c0_i32_0, %c0_i32_1 : i32, i32, i32
  }
  func.func @transform_16(%arg0: i32) -> (i32, i32, i32) {
    %c0_i32 = arith.constant 0 : i32
    %c0_i32_0 = arith.constant 0 : i32
    %c0_i32_1 = arith.constant 0 : i32
    %c0_i32_2 = arith.constant 0 : i32
    return %c0_i32, %c0_i32_0, %c0_i32_1 : i32, i32, i32
  }
  func.func @transform_17(%arg0: i32) -> (i32, i32, i32) {
    %c0_i32 = arith.constant 0 : i32
    %c0_i32_0 = arith.constant 0 : i32
    %c0_i32_1 = arith.constant 0 : i32
    %c0_i32_2 = arith.constant 0 : i32
    return %c0_i32, %c0_i32_0, %c0_i32_1 : i32, i32, i32
  }
  func.func @transform_18(%arg0: i32) -> (i32, i32, i32) {
    %c0_i32 = arith.constant 0 : i32
    %c0_i32_0 = arith.constant 0 : i32
    %c0_i32_1 = arith.constant 0 : i32
    %c0_i32_2 = arith.constant 0 : i32
    return %c0_i32, %c0_i32_0, %c0_i32_1 : i32, i32, i32
  }
  func.func @transform_19(%arg0: i32) -> (i32, i32, i32) {
    %c0_i32 = arith.constant 0 : i32
    %c0_i32_0 = arith.constant 0 : i32
    %c0_i32_1 = arith.constant 0 : i32
    %c0_i32_2 = arith.constant 0 : i32
    return %c0_i32, %c0_i32_0, %c0_i32_1 : i32, i32, i32
  }
  func.func @transform_20(%arg0: i32) -> (i32, i32, i32) {
    %c0_i32 = arith.constant 0 : i32
    %c0_i32_0 = arith.constant 0 : i32
    %c0_i32_1 = arith.constant 0 : i32
    %c0_i32_2 = arith.constant 0 : i32
    return %c0_i32, %c0_i32_0, %c0_i32_1 : i32, i32, i32
  }
  func.func @transform_21(%arg0: i32) -> (i32, i32, i32) {
    %c0_i32 = arith.constant 0 : i32
    %c0_i32_0 = arith.constant 0 : i32
    %c0_i32_1 = arith.constant 0 : i32
    %c0_i32_2 = arith.constant 0 : i32
    return %c0_i32, %c0_i32_0, %c0_i32_1 : i32, i32, i32
  }
  func.func @transform_22(%arg0: i32) -> (i32, i32, i32) {
    %c0_i32 = arith.constant 0 : i32
    %c0_i32_0 = arith.constant 0 : i32
    %c0_i32_1 = arith.constant 0 : i32
    %c0_i32_2 = arith.constant 0 : i32
    return %c0_i32, %c0_i32_0, %c0_i32_1 : i32, i32, i32
  }
  func.func @transform_23(%arg0: i32) -> (i32, i32, i32) {
    %c0_i32 = arith.constant 0 : i32
    %c0_i32_0 = arith.constant 0 : i32
    %c0_i32_1 = arith.constant 0 : i32
    %c0_i32_2 = arith.constant 0 : i32
    return %c0_i32, %c0_i32_0, %c0_i32_1 : i32, i32, i32
  }
  func.func @transform_24(%arg0: i32) -> (i32, i32, i32) {
    %c0_i32 = arith.constant 0 : i32
    %c0_i32_0 = arith.constant 0 : i32
    %c0_i32_1 = arith.constant 0 : i32
    %c0_i32_2 = arith.constant 0 : i32
    return %c0_i32, %c0_i32_0, %c0_i32_1 : i32, i32, i32
  }
  func.func @transform_25(%arg0: i32) -> (i32, i32, i32) {
    %c0_i32 = arith.constant 0 : i32
    %c0_i32_0 = arith.constant 0 : i32
    %c0_i32_1 = arith.constant 0 : i32
    %c0_i32_2 = arith.constant 0 : i32
    return %c0_i32, %c0_i32_0, %c0_i32_1 : i32, i32, i32
  }
  func.func @transform_26(%arg0: i32) -> (i32, i32, i32) {
    %c0_i32 = arith.constant 0 : i32
    %c0_i32_0 = arith.constant 0 : i32
    %c0_i32_1 = arith.constant 0 : i32
    %c0_i32_2 = arith.constant 0 : i32
    return %c0_i32, %c0_i32_0, %c0_i32_1 : i32, i32, i32
  }
  func.func @transform_27(%arg0: i32) -> (i32, i32, i32) {
    %c0_i32 = arith.constant 0 : i32
    %c0_i32_0 = arith.constant 0 : i32
    %c0_i32_1 = arith.constant 0 : i32
    %c0_i32_2 = arith.constant 0 : i32
    return %c0_i32, %c0_i32_0, %c0_i32_1 : i32, i32, i32
  }
  func.func @transform_28(%arg0: i32) -> (i32, i32, i32) {
    %c0_i32 = arith.constant 0 : i32
    %c0_i32_0 = arith.constant 0 : i32
    %c0_i32_1 = arith.constant 0 : i32
    %c0_i32_2 = arith.constant 0 : i32
    return %c0_i32, %c0_i32_0, %c0_i32_1 : i32, i32, i32
  }
  func.func @transform_29(%arg0: i32) -> (i32, i32, i32) {
    %c0_i32 = arith.constant 0 : i32
    %c0_i32_0 = arith.constant 0 : i32
    %c0_i32_1 = arith.constant 0 : i32
    %c0_i32_2 = arith.constant 0 : i32
    return %c0_i32, %c0_i32_0, %c0_i32_1 : i32, i32, i32
  }
  func.func @transform_30(%arg0: i32) -> (i32, i32, i32) {
    %c0_i32 = arith.constant 0 : i32
    %c0_i32_0 = arith.constant 0 : i32
    %c0_i32_1 = arith.constant 0 : i32
    return %arg0, %c0_i32, %c0_i32_0 : i32, i32, i32
  }
}

</mosaic_0001>

<bundles_post_ra>
// kernel: tpu_custom_call.1
= control target key start
LH: loop header
LB: loop body
LE: loop exit
PB: predicated region body
PF: predicated region fallthrough
CT: control target
= control target key end

     0   :  { %s6429_s6 = smov 1   ;;  %s6430_s10 = smov 2   ;;  %s7830_s0 = inlined_call_operand.smem [shape: u32[31], index: -1, kind: input, shape index: {}] }
   0x1   :  { %s6509_s5 = sld [smem:[%s7830_s0]]   ;;  %s6431_s14 = smov 3  }
   0x2   :  { %s6514_s9 = sld [smem:[%s7830_s0 + %s6429_s6]]   ;;  %s6432_s18 = smov 4  }
   0x3   :  { %s6519_s13 = sld [smem:[%s7830_s0 + %s6430_s10]]   ;;  %s6433_s22 = smov 5  }
   0x4   :  { %s6524_s17 = sld [smem:[%s7830_s0 + %s6431_s14]]   ;;  %s6434_s26 = smov 6  }
   0x5   :  { %s6529_s21 = sld [smem:[%s7830_s0 + %s6432_s18]]   ;;  %s6435_s30 = smov 7  }
   0x6   :  { %s6534_s25 = sld [smem:[%s7830_s0 + %s6433_s22]]   ;;  %s6436_s4 = smov 8  }
   0x7   :  { %s6539_s29 = sld [smem:[%s7830_s0 + %s6434_s26]]   ;;  %s6437_s10 = smov 9  }
   0x8   :  { %s6544_s3 = sld [smem:[%s7830_s0 + %s6435_s30]]   ;;  %s6438_s15 = smov 10  }
   0x9   :  { %s6549_s8 = sld [smem:[%s7830_s0 + %s6436_s4]]   ;;  %s6439_s20 = smov 11  }
   0xa   :  { %s6554_s14 = sld [smem:[%s7830_s0 + %s6437_s10]]   ;;  %s6440_s26 = smov 12  }
   0xb   :  { %s6559_s19 = sld [smem:[%s7830_s0 + %s6438_s15]]   ;;  %s6441_s1 = smov 13  }
   0xc   :  { %s6564_s24 = sld [smem:[%s7830_s0 + %s6439_s20]]   ;;  %s6442_s7 = smov 14  }
   0xd   :  { %s6569_s30 = sld [smem:[%s7830_s0 + %s6440_s26]]   ;;  %s6443_s15 = smov 15  }
   0xe   :  { %s6574_s6 = sld [smem:[%s7830_s0 + %s6441_s1]]   ;;  %s6444_s22 = smov 16  }
   0xf   :  { %7844 = sst [smem:[#allocation51_spill]] %s6549_s8  ;;  %s6445_s28 = smov 17  }
  0x10   :  { %s6579_s12 = sld [smem:[%s7830_s0 + %s6442_s7]]   ;;  %s6446_s7 = smov 18  }
  0x11   :  { %7845 = sst [smem:[#allocation52_spill]] %s6559_s19 }
  0x12   :  { %s6584_s20 = sld [smem:[%s7830_s0 + %s6443_s15]]   ;;  %s6447_s15 = smov 19  }
  0x13   :  { %7846 = sst [smem:[#allocation53_spill]] %s6569_s30 }
  0x14   :  { %s6589_s27 = sld [smem:[%s7830_s0 + %s6444_s22]]   ;;  %s6448_s22 = smov 20  }
  0x15   :  { %s6594_s4 = sld [smem:[%s7830_s0 + %s6445_s28]]   ;;  %s6449_s28 = smov 21  }
  0x16   :  { %7847 = sst [smem:[#allocation54_spill]] %s6579_s12 }
  0x17   :  { %s6599_s12 = sld [smem:[%s7830_s0 + %s6446_s7]]   ;;  %s6450_s7 = smov 22  }
  0x18   :  { %s6604_s30 = sld [smem:[%s7830_s0 + %s6447_s15]]   ;;  %s6451_s15 = smov 23  }
  0x19   :  { %s6614_s19 = sld [smem:[%s7830_s0 + %s6449_s28]]   ;;  %s6453_s28 = smov 25  }
  0x1a   :  { %7848 = sst [smem:[#allocation55_spill]] %s6589_s27 }
  0x1b   :  { %s6609_s27 = sld [smem:[%s7830_s0 + %s6448_s22]]   ;;  %s6452_s22 = smov 24  }
  0x1d   :  { %7849 = sst [smem:[#allocation56_spill]] %s6599_s12 }
  0x1e   :  { %7850 = sst [smem:[#allocation57_spill]] %s6604_s30 }
  0x1f   :  { %7852 = sst [smem:[#allocation59_spill]] %s6614_s19 }
  0x20   :  { %s6619_s12 = sld [smem:[%s7830_s0 + %s6450_s7]]   ;;  %s6454_s7 = smov 26  }
  0x21   :  { %7851 = sst [smem:[#allocation58_spill]] %s6609_s27 }
  0x22   :  { %s6624_s30 = sld [smem:[%s7830_s0 + %s6451_s15]]   ;;  %s6455_s15 = smov 27  }
  0x23   :  { %s6629_s27 = sld [smem:[%s7830_s0 + %s6452_s22]]   ;;  %s6456_s22 = smov 28  }
  0x24   :  { %s6634_s19 = sld [smem:[%s7830_s0 + %s6453_s28]]   ;;  %s6457_s28 = smov 29  }
  0x25   :  { %s6639_s8 = sld [smem:[%s7830_s0 + %s6454_s7]]   ;;  %s6458_s7 = smov 30  }
  0x28   :  { %7853 = sst [smem:[#allocation60_spill]] %s6624_s30 }
  0x29   :  { %7854 = sst [smem:[#allocation61_spill]] %s6629_s27 }
  0x2a   :  { %7855 = sst [smem:[#allocation62_spill]] %s6634_s19 }
  0x2b   :  { %7856 = sst [smem:[#allocation63_spill]] %s6639_s8 }
  0x2c   :  { %s6644_s30 = sld [smem:[%s7830_s0 + %s6455_s15]]  }
  0x2d   :  { %s6649_s27 = sld [smem:[%s7830_s0 + %s6456_s22]]  }
  0x2e   :  { %s6654_s19 = sld [smem:[%s7830_s0 + %s6457_s28]]  }
  0x2f   :  { %s6659_s8 = sld [smem:[%s7830_s0 + %s6458_s7]]  }
  0x30   :  { %66 = vsyncpa [#allocation3], 0 }
  0x31   :  { %67 = vsyncpa [#allocation6], 0 }
  0x32   :  { %68 = vsyncpa [#allocation9], 0 }
  0x33   :  { %69 = vsyncpa [#allocation12], 0 }
  0x34   :  { %70 = vsyncpa [#allocation15], 0 }
  0x35   :  { %71 = vsyncpa [#allocation18], 0 }
  0x36   :  { %72 = vsyncpa [#allocation21], 0 }
  0x37   :  { %73 = vsyncpa [#allocation24], 0 }
  0x38   :  { %74 = vsyncpa [#allocation27], 0 }
  0x39   :  { %75 = vsyncpa [#allocation30], 0 }
  0x3a   :  { %76 = vsyncpa [#allocation33], 0 }
  0x3b   :  { %77 = vsyncpa [#allocation36], 0 }
  0x3c   :  { %78 = vsyncpa [#allocation4], 0  ;;  %s96_s15 = sshll.u32 %s6514_s9, 4  ;;  %s6459_s0 = smov [#allocation5]   ;;  %s97_s15 = int_to_ptr.hbm [resolvable:$true] %s96_s15 }
  0x3d   :  { %s98_s16 = sshll.u32 %s6459_s0, 4  ;;  %s121_s18 = sshll.u32 %s6524_s17, 4  ;;  %s99_s16 = int_to_ptr.vmem [resolvable:$true] %s98_s16  ;;  %s122_s18 = int_to_ptr.hbm [resolvable:$true] %s121_s18 }
  0x3e   :  { %s5851_s22 = sshra.s32 %s97_s15, 4  ;;  %s5855_s26 = scalar_lea.hbm %s6514_s9, 16  ;;  %s5852_s22 = int_to_ptr.hbm [resolvable:$true] %s5851_s22 }
  0x3f   :  { %s5853_s23 = scalar_lea.hbm %s5852_s22, 16  ;;  %p5856_p1 = scmp.lt.s32.totalorder %s5852_s22, %s6514_s9 }
  0x40   :  { %p5854_p0 = scmp.ne.s32.totalorder %s5852_s22, %s5853_s23  ;;  %p5857_p2 = scmp.lt.s32.totalorder %s5855_s26, %s5853_s23 }
  0x42   :  { %p5858_p3 = por %p5857_p2, %p5856_p1 }
  0x44   :  { %p5859_p4 = pnand %p5858_p3, %p5854_p0 }
  0x46   :  { %5862 = shalt.err (!%p5859_p4)
}
  0x47   :  { %s6460_s28 = smov 128   ;;  %s6461_s1 = smov 8  }
  0x48   :  { %104 = dma.hbm_to_vmem [thread:$0]  %s97_s15, 256, %s99_s16, [#allocation6], %s6460_s28, %s6460_s28, %s6461_s1  }
  0x49   :  { %s6462_s2 = smov [#allocation8]   ;;  %s143_s10 = sshll.u32 %s6534_s25, 4  ;;  %s144_s10 = int_to_ptr.hbm [resolvable:$true] %s143_s10 }
  0x4a   :  { %s123_s7 = sshll.u32 %s6462_s2, 4  ;;  %s5875_s9 = sshra.s32 %s122_s18, 4  ;;  %s124_s7 = int_to_ptr.vmem [resolvable:$true] %s123_s7  ;;  %s5876_s9 = int_to_ptr.hbm [resolvable:$true] %s5875_s9 }
  0x4b   :  { %s5877_s11 = scalar_lea.hbm %s5876_s9, 1  ;;  %s5879_s0 = scalar_lea.hbm %s6524_s17, 1 }
  0x4c   :  { %p5878_p5 = scmp.ne.s32.totalorder %s5876_s9, %s5877_s11  ;;  %p5880_p6 = scmp.lt.s32.totalorder %s5876_s9, %s6524_s17 }
  0x4d   :  { %p5881_p7 = scmp.lt.s32.totalorder %s5879_s0, %s5877_s11 }
  0x4f   :  { %p5882_p8 = por %p5881_p7, %p5880_p6 }
  0x51   :  { %p5883_p9 = pnand %p5882_p8, %p5878_p5 }
  0x53   :  { %5886 = shalt.err (!%p5883_p9)
}
  0x54   :  { %126 = dma.hbm_to_vmem [thread:$0]  %s122_s18, 16, %s124_s7, [#allocation9]  }
  0x55   :  { %s167_s15 = sshll.u32 %s6544_s3, 4  ;;  %s6463_s16 = smov [#allocation11]   ;;  %s168_s15 = int_to_ptr.hbm [resolvable:$true] %s167_s15 }
  0x56   :  { %s145_s22 = sshll.u32 %s6463_s16, 4  ;;  %s5899_s23 = sshra.s32 %s144_s10, 4  ;;  %s146_s22 = int_to_ptr.vmem [resolvable:$true] %s145_s22  ;;  %s5900_s23 = int_to_ptr.hbm [resolvable:$true] %s5899_s23 }
  0x57   :  { %s5901_s26 = scalar_lea.hbm %s5900_s23, 1  ;;  %s5903_s2 = scalar_lea.hbm %s6534_s25, 1 }
  0x58   :  { %p5902_p10 = scmp.ne.s32.totalorder %s5900_s23, %s5901_s26  ;;  %p5904_p11 = scmp.lt.s32.totalorder %s5900_s23, %s6534_s25 }
  0x59   :  { %p5905_p12 = scmp.lt.s32.totalorder %s5903_s2, %s5901_s26 }
  0x5b   :  { %p5906_p13 = por %p5905_p12, %p5904_p11 }
  0x5d   :  { %p5907_p0 = pnand %p5906_p13, %p5902_p10 }
  0x5f   :  { %5910 = shalt.err (!%p5907_p0)
}
  0x60   :  { %148 = dma.hbm_to_vmem [thread:$0]  %s144_s10, 16, %s146_s22, [#allocation12]  }
  0x61   :  { %s6464_s17 = smov [#allocation14]   ;;  %s191_s7 = sshll.u32 %s6554_s14, 4  ;;  %s192_s7 = int_to_ptr.hbm [resolvable:$true] %s191_s7 }
  0x62   :  { %s169_s18 = sshll.u32 %s6464_s17, 4  ;;  %s5923_s9 = sshra.s32 %s168_s15, 4  ;;  %s170_s18 = int_to_ptr.vmem [resolvable:$true] %s169_s18  ;;  %s5924_s9 = int_to_ptr.hbm [resolvable:$true] %s5923_s9 }
  0x63   :  { %s5925_s11 = scalar_lea.hbm %s5924_s9, 1  ;;  %s5927_s0 = scalar_lea.hbm %s6544_s3, 1 }
  0x64   :  { %p5926_p1 = scmp.ne.s32.totalorder %s5924_s9, %s5925_s11  ;;  %p5928_p2 = scmp.lt.s32.totalorder %s5924_s9, %s6544_s3 }
  0x65   :  { %p5929_p3 = scmp.lt.s32.totalorder %s5927_s0, %s5925_s11 }
  0x67   :  { %p5930_p4 = por %p5929_p3, %p5928_p2 }
  0x69   :  { %p5931_p5 = pnand %p5930_p4, %p5926_p1 }
  0x6b   :  { %5934 = shalt.err (!%p5931_p5)
}
  0x6c   :  { %172 = dma.hbm_to_vmem [thread:$0]  %s168_s15, 16, %s170_s18, [#allocation15]  }
  0x6d   :  { %s215_s25 = sshll.u32 %s6564_s24, 4  ;;  %s6465_s10 = smov [#allocation17]   ;;  %s216_s25 = int_to_ptr.hbm [resolvable:$true] %s215_s25 }
  0x6e   :  { %s193_s16 = sshll.u32 %s6465_s10, 4  ;;  %s5947_s22 = sshra.s32 %s192_s7, 4  ;;  %s194_s16 = int_to_ptr.vmem [resolvable:$true] %s193_s16  ;;  %s5948_s22 = int_to_ptr.hbm [resolvable:$true] %s5947_s22 }
  0x6f   :  { %s5949_s23 = scalar_lea.hbm %s5948_s22, 1  ;;  %s5951_s26 = scalar_lea.hbm %s6554_s14, 1 }
  0x70   :  { %p5950_p6 = scmp.ne.s32.totalorder %s5948_s22, %s5949_s23  ;;  %p5952_p7 = scmp.lt.s32.totalorder %s5948_s22, %s6554_s14 }
  0x71   :  { %p5953_p8 = scmp.lt.s32.totalorder %s5951_s26, %s5949_s23 }
  0x73   :  { %p5954_p9 = por %p5953_p8, %p5952_p7 }
  0x75   :  { %p5955_p10 = pnand %p5954_p9, %p5950_p6 }
  0x77   :  { %5958 = shalt.err (!%p5955_p10)
}
  0x78   :  { %196 = dma.hbm_to_vmem [thread:$0]  %s192_s7, 16, %s194_s16, [#allocation18]  }
  0x79   :  { %s6466_s3 = smov [#allocation20]   ;;  %s237_s2 = sshll.u32 %s6574_s6, 4  ;;  %s238_s2 = int_to_ptr.hbm [resolvable:$true] %s237_s2 }
  0x7a   :  { %s217_s15 = sshll.u32 %s6466_s3, 4  ;;  %s5971_s17 = sshra.s32 %s216_s25, 4  ;;  %s218_s15 = int_to_ptr.vmem [resolvable:$true] %s217_s15  ;;  %s5972_s17 = int_to_ptr.hbm [resolvable:$true] %s5971_s17 }
  0x7b   :  { %s5973_s18 = scalar_lea.hbm %s5972_s17, 1  ;;  %s5975_s9 = scalar_lea.hbm %s6564_s24, 1 }
  0x7c   :  { %p5974_p11 = scmp.ne.s32.totalorder %s5972_s17, %s5973_s18  ;;  %p5976_p12 = scmp.lt.s32.totalorder %s5972_s17, %s6564_s24 }
  0x7d   :  { %p5977_p13 = scmp.lt.s32.totalorder %s5975_s9, %s5973_s18 }
  0x7f   :  { %p5978_p0 = por %p5977_p13, %p5976_p12 }
  0x81   :  { %p5979_p1 = pnand %p5978_p0, %p5974_p11 }
  0x83   :  { %5982 = shalt.err (!%p5979_p1)
}
  0x84   :  { %220 = dma.hbm_to_vmem [thread:$0]  %s216_s25, 16, %s218_s15, [#allocation21]  }
  0x85   :  { %s261_s14 = sshll.u32 %s6584_s20, 4  ;;  %s6467_s7 = smov [#allocation23]   ;;  %s262_s14 = int_to_ptr.hbm [resolvable:$true] %s261_s14 }
  0x86   :  { %s239_s11 = sshll.u32 %s6467_s7, 4  ;;  %s5995_s0 = sshra.s32 %s238_s2, 4  ;;  %s240_s11 = int_to_ptr.vmem [resolvable:$true] %s239_s11  ;;  %s5996_s0 = int_to_ptr.hbm [resolvable:$true] %s5995_s0 }
  0x87   :  { %s5997_s10 = scalar_lea.hbm %s5996_s0, 1  ;;  %s5999_s16 = scalar_lea.hbm %s6574_s6, 1 }
  0x88   :  { %p5998_p2 = scmp.ne.s32.totalorder %s5996_s0, %s5997_s10  ;;  %p6000_p3 = scmp.lt.s32.totalorder %s5996_s0, %s6574_s6 }
  0x89   :  { %p6001_p4 = scmp.lt.s32.totalorder %s5999_s16, %s5997_s10 }
  0x8b   :  { %p6002_p5 = por %p6001_p4, %p6000_p3 }
  0x8d   :  { %p6003_p6 = pnand %p6002_p5, %p5998_p2 }
  0x8f   :  { %6006 = shalt.err (!%p6003_p6)
}
  0x90   :  { %242 = dma.hbm_to_vmem [thread:$0]  %s238_s2, 16, %s240_s11, [#allocation24]  }
  0x91   :  { %s6468_s24 = smov [#allocation26]   ;;  %s285_s22 = sshll.u32 %s6594_s4, 4  ;;  %s286_s22 = int_to_ptr.hbm [resolvable:$true] %s285_s22 }
  0x92   :  { %s263_s25 = sshll.u32 %s6468_s24, 4  ;;  %s6019_s23 = sshra.s32 %s262_s14, 4  ;;  %s264_s25 = int_to_ptr.vmem [resolvable:$true] %s263_s25  ;;  %s6020_s23 = int_to_ptr.hbm [resolvable:$true] %s6019_s23 }
  0x93   :  { %s6021_s26 = scalar_lea.hbm %s6020_s23, 1  ;;  %s6023_s3 = scalar_lea.hbm %s6584_s20, 1 }
  0x94   :  { %p6022_p7 = scmp.ne.s32.totalorder %s6020_s23, %s6021_s26  ;;  %p6024_p8 = scmp.lt.s32.totalorder %s6020_s23, %s6584_s20 }
  0x95   :  { %p6025_p9 = scmp.lt.s32.totalorder %s6023_s3, %s6021_s26 }
  0x97   :  { %p6026_p10 = por %p6025_p9, %p6024_p8 }
  0x99   :  { %p6027_p11 = pnand %p6026_p10, %p6022_p7 }
  0x9b   :  { %6030 = shalt.err (!%p6027_p11)
}
  0x9c   :  { %266 = dma.hbm_to_vmem [thread:$0]  %s262_s14, 16, %s264_s25, [#allocation27]  }
  0x9d   :  { %s6469_s6 = smov [#allocation29]   ;;  %s314_s2 = sshll.u32 %s6619_s12, 4  ;;  %s315_s2 = int_to_ptr.hbm [resolvable:$true] %s314_s2 }
  0x9e   :  { %s287_s15 = sshll.u32 %s6469_s6, 4  ;;  %s6043_s17 = sshra.s32 %s286_s22, 4  ;;  %s288_s15 = int_to_ptr.vmem [resolvable:$true] %s287_s15  ;;  %s6044_s17 = int_to_ptr.hbm [resolvable:$true] %s6043_s17 }
  0x9f   :  { %s6045_s18 = scalar_lea.hbm %s6044_s17, 1  ;;  %s6047_s9 = scalar_lea.hbm %s6594_s4, 1 }
  0xa0   :  { %p6046_p12 = scmp.ne.s32.totalorder %s6044_s17, %s6045_s18  ;;  %p6048_p13 = scmp.lt.s32.totalorder %s6044_s17, %s6594_s4 }
  0xa1   :  { %p6049_p0 = scmp.lt.s32.totalorder %s6047_s9, %s6045_s18 }
  0xa3   :  { %p6050_p1 = por %p6049_p0, %p6048_p13 }
  0xa5   :  { %p6051_p2 = pnand %p6050_p1, %p6046_p12 }
  0xa7   :  { %6054 = shalt.err (!%p6051_p2)
}
  0xa8   :  { %290 = dma.hbm_to_vmem [thread:$0]  %s286_s22, 16, %s288_s15, [#allocation30]  }
  0xa9   :  { %s6470_s20 = smov [#allocation32]   ;;  %s83_s7 = sshll.u32 %s6509_s5, 4  ;;  %s6693_s7 = int_to_ptr.hbm [resolvable:$true] %s83_s7 }
  0xaa   :  { %s316_s14 = sshll.u32 %s6470_s20, 4  ;;  %s6067_s11 = sshra.s32 %s315_s2, 4  ;;  %s317_s14 = int_to_ptr.vmem [resolvable:$true] %s316_s14  ;;  %s6068_s11 = int_to_ptr.hbm [resolvable:$true] %s6067_s11 }
  0xab   :  { %s6069_s0 = scalar_lea.hbm %s6068_s11, 32  ;;  %s6071_s4 = scalar_lea.hbm %s6619_s12, 32 }
  0xac   :  { %p6070_p3 = scmp.ne.s32.totalorder %s6068_s11, %s6069_s0  ;;  %p6072_p4 = scmp.lt.s32.totalorder %s6068_s11, %s6619_s12 }
  0xad   :  { %p6073_p5 = scmp.lt.s32.totalorder %s6071_s4, %s6069_s0 }
  0xaf   :  { %p6074_p6 = por %p6073_p5, %p6072_p4 }
  0xb1   :  { %p6075_p7 = pnand %p6074_p6, %p6070_p3 }
  0xb3   :  { %6078 = shalt.err (!%p6075_p7)
}
  0xb4   :  { %s6471_s10 = smov 64   ;;  %s6472_s16 = smov 4  }
  0xb5   :  { %322 = dma.hbm_to_vmem [thread:$0]  %s315_s2, 512, %s317_s14, [#allocation33], %s6471_s10, %s6471_s10, %s6472_s16  }
  0xb6   :  { %s110_s24 = sshll.u32 %s6519_s13, 4  ;;  %s6473_s25 = smov [#allocation2]   ;;  %s111_s24 = int_to_ptr.hbm [resolvable:$true] %s110_s24 }
  0xb7   :  { %s85_s22 = sshll.u32 %s6473_s25, 4  ;;  %s6091_s12 = sshra.s32 %s6693_s7, 4  ;;  %s86_s22 = int_to_ptr.vmem [resolvable:$true] %s85_s22  ;;  %s6092_s12 = int_to_ptr.hbm [resolvable:$true] %s6091_s12 }
  0xb8   :  { %s6093_s23 = scalar_lea.hbm %s6092_s12, 16  ;;  %s6095_s26 = scalar_lea.hbm %s6509_s5, 16 }
  0xb9   :  { %p6094_p8 = scmp.ne.s32.totalorder %s6092_s12, %s6093_s23  ;;  %p6096_p9 = scmp.lt.s32.totalorder %s6092_s12, %s6509_s5 }
  0xba   :  { %p6097_p10 = scmp.lt.s32.totalorder %s6095_s26, %s6093_s23 }
  0xbc   :  { %p6098_p11 = por %p6097_p10, %p6096_p9 }
  0xbe   :  { %p6099_p12 = pnand %p6098_p11, %p6094_p8 }
  0xc0   :  { %6102 = shalt.err (!%p6099_p12)
}
  0xc1   :  { %91 = dma.hbm_to_vmem [thread:$0]  %s6693_s7, 256, %s86_s22, [#allocation3], %s6460_s28, %s6460_s28, %s6461_s1  }
  0xc2   :  { %s6474_s3 = smov [#allocation7]   ;;  %s132_s15 = sshll.u32 %s6529_s21, 4  ;;  %s133_s15 = int_to_ptr.hbm [resolvable:$true] %s132_s15 }
  0xc3   :  { %s112_s6 = sshll.u32 %s6474_s3, 4  ;;  %s6115_s2 = sshra.s32 %s111_s24, 4  ;;  %s113_s6 = int_to_ptr.vmem [resolvable:$true] %s112_s6  ;;  %s6116_s2 = int_to_ptr.hbm [resolvable:$true] %s6115_s2 }
  0xc4   :  { %s6117_s5 = scalar_lea.hbm %s6116_s2, 1  ;;  %s6119_s17 = scalar_lea.hbm %s6519_s13, 1 }
  0xc5   :  { %p6118_p13 = scmp.ne.s32.totalorder %s6116_s2, %s6117_s5  ;;  %p6120_p0 = scmp.lt.s32.totalorder %s6116_s2, %s6519_s13 }
  0xc6   :  { %p6121_p1 = scmp.lt.s32.totalorder %s6119_s17, %s6117_s5 }
  0xc8   :  { %p6122_p2 = por %p6121_p1, %p6120_p0 }
  0xca   :  { %p6123_p3 = pnand %p6122_p2, %p6118_p13 }
  0xcc   :  { %6126 = shalt.err (!%p6123_p3)
}
  0xcd   :  { %115 = dma.hbm_to_vmem [thread:$0]  %s111_s24, 16, %s113_s6, [#allocation6]  }
  0xce   :  { %s153_s28 = sshll.u32 %s6539_s29, 4  ;;  %s6475_s18 = smov [#allocation10]   ;;  %s6712_s28 = int_to_ptr.hbm [resolvable:$true] %s153_s28 }
  0xcf   :  { %s134_s9 = sshll.u32 %s6475_s18, 4  ;;  %s6139_s20 = sshra.s32 %s133_s15, 4  ;;  %s135_s9 = int_to_ptr.vmem [resolvable:$true] %s134_s9  ;;  %s6140_s20 = int_to_ptr.hbm [resolvable:$true] %s6139_s20 }
  0xd0   :  { %s6141_s14 = scalar_lea.hbm %s6140_s20, 1  ;;  %s6143_s7 = scalar_lea.hbm %s6529_s21, 1 }
  0xd1   :  { %p6142_p4 = scmp.ne.s32.totalorder %s6140_s20, %s6141_s14  ;;  %p6144_p5 = scmp.lt.s32.totalorder %s6140_s20, %s6529_s21 }
  0xd2   :  { %p6145_p6 = scmp.lt.s32.totalorder %s6143_s7, %s6141_s14 }
  0xd4   :  { %p6146_p7 = por %p6145_p6, %p6144_p5 }
  0xd6   :  { %p6147_p8 = pnand %p6146_p7, %p6142_p4 }
  0xd8   :  { %6150 = shalt.err (!%p6147_p8)
}
  0xd9   :  { %137 = dma.hbm_to_vmem [thread:$0]  %s133_s15, 16, %s135_s9, [#allocation9]  }
  0xda   :  { %s7857_s13 = sld [smem:[#allocation51_spill]]  ;;  %s6476_s11 = smov [#allocation13]  }
  0xdb   :  { %s155_s0 = sshll.u32 %s6476_s11, 4  ;;  %s6163_s24 = sshra.s32 %s6712_s28, 4  ;;  %s156_s0 = int_to_ptr.vmem [resolvable:$true] %s155_s0  ;;  %s6164_s24 = int_to_ptr.hbm [resolvable:$true] %s6163_s24 }
  0xdc   :  { %s6165_s25 = scalar_lea.hbm %s6164_s24, 16  ;;  %s6167_s21 = scalar_lea.hbm %s6539_s29, 16 }
  0xdd   :  { %p6166_p9 = scmp.ne.s32.totalorder %s6164_s24, %s6165_s25  ;;  %p6168_p10 = scmp.lt.s32.totalorder %s6164_s24, %s6539_s29 }
  0xde   :  { %p6169_p11 = scmp.lt.s32.totalorder %s6167_s21, %s6165_s25 }
  0xe0   :  { %s177_s4 = sshll.u32 %s7857_s13, 4  ;;  %p6170_p12 = por %p6169_p11, %p6168_p10  ;;  %s6717_s4 = int_to_ptr.hbm [resolvable:$true] %s177_s4 }
  0xe2   :  { %p6171_p13 = pnand %p6170_p12, %p6166_p9 }
  0xe4   :  { %6174 = shalt.err (!%p6171_p13)
}
  0xe5   :  { %s7858_s22 = sld [smem:[#allocation52_spill]]  ;;  %s6477_s23 = smov [#allocation16]  }
  0xe6   :  { %161 = dma.hbm_to_vmem [thread:$0]  %s6712_s28, 256, %s156_s0, [#allocation12], %s6471_s10, %s6471_s10, %s6472_s16  }
  0xe7   :  { %s179_s26 = sshll.u32 %s6477_s23, 4  ;;  %s6187_s29 = sshra.s32 %s6717_s4, 4  ;;  %s180_s26 = int_to_ptr.vmem [resolvable:$true] %s179_s26  ;;  %s6188_s29 = int_to_ptr.hbm [resolvable:$true] %s6187_s29 }
  0xe8   :  { %s6189_s3 = scalar_lea.hbm %s6188_s29, 16  ;;  %s6191_s6 = scalar_lea.hbm %s7857_s13, 16 }
  0xe9   :  { %p6190_p0 = scmp.ne.s32.totalorder %s6188_s29, %s6189_s3  ;;  %p6192_p1 = scmp.lt.s32.totalorder %s6188_s29, %s7857_s13 }
  0xea   :  { %p6193_p2 = scmp.lt.s32.totalorder %s6191_s6, %s6189_s3 }
  0xeb   :  { %s201_s12 = sshll.u32 %s7858_s22, 4  ;;  %s6727_s12 = int_to_ptr.hbm [resolvable:$true] %s201_s12 }
  0xec   :  { %p6194_p3 = por %p6193_p2, %p6192_p1 }
  0xee   :  { %p6195_p4 = pnand %p6194_p3, %p6190_p0 }
  0xf0   :  { %6198 = shalt.err (!%p6195_p4)
}
  0xf1   :  { %s7859_s15 = sld [smem:[#allocation53_spill]]  ;;  %s6478_s2 = smov [#allocation19]  }
  0xf2   :  { %185 = dma.hbm_to_vmem [thread:$0]  %s6717_s4, 256, %s180_s26, [#allocation15], %s6471_s10, %s6471_s10, %s6472_s16  }
  0xf3   :  { %s203_s5 = sshll.u32 %s6478_s2, 4  ;;  %s6211_s28 = sshra.s32 %s6727_s12, 4  ;;  %s204_s5 = int_to_ptr.vmem [resolvable:$true] %s203_s5  ;;  %s6212_s28 = int_to_ptr.hbm [resolvable:$true] %s6211_s28 }
  0xf4   :  { %s6213_s18 = scalar_lea.hbm %s6212_s28, 16  ;;  %s6215_s9 = scalar_lea.hbm %s7858_s22, 16 }
  0xf5   :  { %p6214_p5 = scmp.ne.s32.totalorder %s6212_s28, %s6213_s18  ;;  %p6216_p6 = scmp.lt.s32.totalorder %s6212_s28, %s7858_s22 }
  0xf6   :  { %p6217_p7 = scmp.lt.s32.totalorder %s6215_s9, %s6213_s18 }
  0xf7   :  { %s226_s17 = sshll.u32 %s7859_s15, 4  ;;  %s227_s17 = int_to_ptr.hbm [resolvable:$true] %s226_s17 }
  0xf8   :  { %p6218_p8 = por %p6217_p7, %p6216_p6 }
  0xfa   :  { %p6219_p9 = pnand %p6218_p8, %p6214_p5 }
  0xfc   :  { %6222 = shalt.err (!%p6219_p9)
}
  0xfd   :  { %s7860_s20 = sld [smem:[#allocation54_spill]]  ;;  %s6479_s7 = smov [#allocation22]  }
  0xfe   :  { %209 = dma.hbm_to_vmem [thread:$0]  %s6727_s12, 256, %s204_s5, [#allocation18], %s6471_s10, %s6471_s10, %s6472_s16  }
  0xff   :  { %s228_s13 = sshll.u32 %s6479_s7, 4  ;;  %s6235_s11 = sshra.s32 %s227_s17, 4  ;;  %s229_s13 = int_to_ptr.vmem [resolvable:$true] %s228_s13  ;;  %s6236_s11 = int_to_ptr.hbm [resolvable:$true] %s6235_s11 }
 0x100   :  { %s6237_s0 = scalar_lea.hbm %s6236_s11, 1  ;;  %s6239_s4 = scalar_lea.hbm %s7859_s15, 1 }
 0x101   :  { %p6238_p10 = scmp.ne.s32.totalorder %s6236_s11, %s6237_s0  ;;  %p6240_p11 = scmp.lt.s32.totalorder %s6236_s11, %s7859_s15 }
 0x102   :  { %p6241_p12 = scmp.lt.s32.totalorder %s6239_s4, %s6237_s0 }
 0x103   :  { %s247_s14 = sshll.u32 %s7860_s20, 4  ;;  %s6745_s14 = int_to_ptr.hbm [resolvable:$true] %s247_s14 }
 0x104   :  { %p6242_p13 = por %p6241_p12, %p6240_p11 }
 0x106   :  { %p6243_p0 = pnand %p6242_p13, %p6238_p10 }
 0x108   :  { %6246 = shalt.err (!%p6243_p0)
}
 0x109   :  { %231 = dma.hbm_to_vmem [thread:$0]  %s227_s17, 16, %s229_s13, [#allocation21]  }
 0x10a   :  { %s7861_s24 = sld [smem:[#allocation55_spill]]  ;;  %s6480_s25 = smov [#allocation25]  }
 0x10b   :  { %s249_s21 = sshll.u32 %s6480_s25, 4  ;;  %s6259_s12 = sshra.s32 %s6745_s14, 4  ;;  %s250_s21 = int_to_ptr.vmem [resolvable:$true] %s249_s21  ;;  %s6260_s12 = int_to_ptr.hbm [resolvable:$true] %s6259_s12 }
 0x10c   :  { %s6261_s23 = scalar_lea.hbm %s6260_s12, 16  ;;  %s6263_s26 = scalar_lea.hbm %s7860_s20, 16 }
 0x10d   :  { %p6262_p1 = scmp.ne.s32.totalorder %s6260_s12, %s6261_s23  ;;  %p6264_p2 = scmp.lt.s32.totalorder %s6260_s12, %s7860_s20 }
 0x10e   :  { %p6265_p3 = scmp.lt.s32.totalorder %s6263_s26, %s6261_s23 }
 0x110   :  { %s271_s22 = sshll.u32 %s7861_s24, 4  ;;  %p6266_p4 = por %p6265_p3, %p6264_p2  ;;  %s6750_s22 = int_to_ptr.hbm [resolvable:$true] %s271_s22 }
 0x112   :  { %p6267_p5 = pnand %p6266_p4, %p6262_p1 }
 0x114   :  { %6270 = shalt.err (!%p6267_p5)
}
 0x115   :  { %s7862_s29 = sld [smem:[#allocation58_spill]]  ;;  %s6481_s6 = smov [#allocation28]  }
 0x116   :  { %255 = dma.hbm_to_vmem [thread:$0]  %s6745_s14, 256, %s250_s21, [#allocation24], %s6471_s10, %s6471_s10, %s6472_s16  }
 0x117   :  { %s273_s15 = sshll.u32 %s6481_s6, 4  ;;  %s6283_s2 = sshra.s32 %s6750_s22, 4  ;;  %s274_s15 = int_to_ptr.vmem [resolvable:$true] %s273_s15  ;;  %s6284_s2 = int_to_ptr.hbm [resolvable:$true] %s6283_s2 }
 0x118   :  { %s6285_s5 = scalar_lea.hbm %s6284_s2, 16  ;;  %s6287_s17 = scalar_lea.hbm %s7861_s24, 16 }
 0x119   :  { %p6286_p6 = scmp.ne.s32.totalorder %s6284_s2, %s6285_s5  ;;  %p6288_p7 = scmp.lt.s32.totalorder %s6284_s2, %s7861_s24 }
 0x11a   :  { %p6289_p8 = scmp.lt.s32.totalorder %s6287_s17, %s6285_s5 }
 0x11b   :  { %s299_s3 = sshll.u32 %s7862_s29, 4  ;;  %s6760_s3 = int_to_ptr.hbm [resolvable:$true] %s299_s3 }
 0x11c   :  { %p6290_p9 = por %p6289_p8, %p6288_p7 }
 0x11e   :  { %p6291_p10 = pnand %p6290_p9, %p6286_p6 }
 0x120   :  { %6294 = shalt.err (!%p6291_p10)
}
 0x121   :  { %s7863_s28 = sld [smem:[#allocation63_spill]]  ;;  %s6482_s18 = smov [#allocation31]  }
 0x122   :  { %279 = dma.hbm_to_vmem [thread:$0]  %s6750_s22, 256, %s274_s15, [#allocation27], %s6471_s10, %s6471_s10, %s6472_s16  }
 0x123   :  { %s301_s9 = sshll.u32 %s6482_s18, 4  ;;  %s6307_s14 = sshra.s32 %s6760_s3, 4  ;;  %s302_s9 = int_to_ptr.vmem [resolvable:$true] %s301_s9  ;;  %s6308_s14 = int_to_ptr.hbm [resolvable:$true] %s6307_s14 }
 0x124   :  { %s6309_s7 = scalar_lea.hbm %s6308_s14, 32  ;;  %s6311_s13 = scalar_lea.hbm %s7862_s29, 32 }
 0x125   :  { %p6310_p11 = scmp.ne.s32.totalorder %s6308_s14, %s6309_s7  ;;  %p6312_p12 = scmp.lt.s32.totalorder %s6308_s14, %s7862_s29 }
 0x126   :  { %p6313_p13 = scmp.lt.s32.totalorder %s6311_s13, %s6309_s7 }
 0x127   :  { %s333_s20 = sshll.u32 %s7863_s28, 4  ;;  %s6770_s20 = int_to_ptr.hbm [resolvable:$true] %s333_s20 }
 0x128   :  { %p6314_p0 = por %p6313_p13, %p6312_p12 }
 0x12a   :  { %p6315_p1 = pnand %p6314_p0, %p6310_p11 }
 0x12c   :  { %6318 = shalt.err (!%p6315_p1)
}
 0x12d   :  { %307 = dma.hbm_to_vmem [thread:$0]  %s6760_s3, 512, %s302_s9, [#allocation30], %s6471_s10, %s6471_s10, %s6472_s16  }
 0x12e   :  { %s348_s11 = sshll.u32 %s6649_s27, 4  ;;  %s6483_s0 = smov [#allocation34]   ;;  %s6780_s11 = int_to_ptr.hbm [resolvable:$true] %s348_s11 }
 0x12f   :  { %s335_s4 = sshll.u32 %s6483_s0, 4  ;;  %s6331_s24 = sshra.s32 %s6770_s20, 4  ;;  %s336_s4 = int_to_ptr.vmem [resolvable:$true] %s335_s4  ;;  %s6332_s24 = int_to_ptr.hbm [resolvable:$true] %s6331_s24 }
 0x130   :  { %s6333_s25 = scalar_lea.hbm %s6332_s24, 32  ;;  %s6335_s21 = scalar_lea.hbm %s7863_s28, 32 }
 0x131   :  { %p6334_p2 = scmp.ne.s32.totalorder %s6332_s24, %s6333_s25  ;;  %p6336_p3 = scmp.lt.s32.totalorder %s6332_s24, %s7863_s28 }
 0x132   :  { %p6337_p4 = scmp.lt.s32.totalorder %s6335_s21, %s6333_s25 }
 0x134   :  { %p6338_p5 = por %p6337_p4, %p6336_p3 }
 0x136   :  { %p6339_p6 = pnand %p6338_p5, %p6334_p2 }
 0x138   :  { %6342 = shalt.err (!%p6339_p6)
}
 0x139   :  { %341 = dma.hbm_to_vmem [thread:$0]  %s6770_s20, 512, %s336_s4, [#allocation33], %s6471_s10, %s6471_s10, %s6472_s16  }
 0x13a   :  { %s6484_s22 = smov [#allocation35]   ;;  %s6355_s23 = sshra.s32 %s6780_s11, 4  ;;  %s6356_s23 = int_to_ptr.hbm [resolvable:$true] %s6355_s23 }
 0x13b   :  { %s350_s12 = sshll.u32 %s6484_s22, 4  ;;  %s6357_s26 = scalar_lea.hbm %s6356_s23, 32  ;;  %s351_s12 = int_to_ptr.vmem [resolvable:$true] %s350_s12 }
 0x13c   :  { %p6358_p7 = scmp.ne.s32.totalorder %s6356_s23, %s6357_s26  ;;  %s6359_s29 = scalar_lea.hbm %s6649_s27, 32 }
 0x13d   :  { %p6360_p8 = scmp.lt.s32.totalorder %s6356_s23, %s6649_s27  ;;  %p6361_p9 = scmp.lt.s32.totalorder %s6359_s29, %s6357_s26 }
 0x13f   :  { %p6362_p10 = por %p6361_p9, %p6360_p8 }
 0x141   :  { %p6363_p11 = pnand %p6362_p10, %p6358_p7 }
 0x143   :  { %6366 = shalt.err (!%p6363_p11)
}
 0x144   :  { %356 = dma.hbm_to_vmem [thread:$0]  %s6780_s11, 512, %s351_s12, [#allocation36], %s6471_s10, %s6471_s10, %s6472_s16  }
 0x145   :  { %6403 = dma.done.wait [#allocation3], 256  }
 0x146   :  { %6404 = vsyncadd [#allocation3], 4294967040 }
 0x147   :  { %6405 = dma.done.wait [#allocation6], 272  }
 0x148   :  { %6406 = vsyncadd [#allocation6], 4294967024 }
 0x149   :  { %6407 = dma.done.wait [#allocation9], 32  }
 0x14a   :  { %6408 = vsyncadd [#allocation9], 4294967264 }
 0x14b   :  { %6409 = dma.done.wait [#allocation12], 272  }
 0x14c   :  { %6410 = vsyncadd [#allocation12], 4294967024 }
 0x14d   :  { %6411 = dma.done.wait [#allocation15], 272  }
 0x14e   :  { %6412 = vsyncadd [#allocation15], 4294967024 }
 0x14f   :  { %6413 = dma.done.wait [#allocation18], 272  }
 0x150   :  { %6414 = vsyncadd [#allocation18], 4294967024 }
 0x151   :  { %6415 = dma.done.wait [#allocation21], 32  }
 0x152   :  { %6416 = vsyncadd [#allocation21], 4294967264 }
 0x153   :  { %6417 = dma.done.wait [#allocation24], 272  }
 0x154   :  { %6418 = vsyncadd [#allocation24], 4294967024 }
 0x155   :  { %6419 = dma.done.wait [#allocation27], 272  }
 0x156   :  { %6420 = vsyncadd [#allocation27], 4294967024 }
 0x157   :  { %6421 = dma.done.wait [#allocation30], 528  }
 0x158   :  { %6422 = vsyncadd [#allocation30], 4294966768 }
 0x159   :  { %6423 = dma.done.wait [#allocation33], 1024  }
 0x15a   :  { %6424 = vsyncadd [#allocation33], 4294966272 }
 0x15b   :  { %6425 = dma.done.wait [#allocation36], 512  }
 0x15c   :  { %6426 = vsyncadd [#allocation36], 4294966784  ;;  %vm454_vm0 = vcmask 261120   ;;  %v6796_v0 = vld [vmem:[#allocation5] sm:$0xff]  ;;  %v6798_v1 = vld [vmem:[#allocation5 + $0x8] sm:$0xff]  ;;  %v6485_v16 = vmov 32.0  }
 0x15d   :  { %v6800_v2 = vld [vmem:[#allocation2] sm:$0xff]  ;;  %v522_v3 = vsel %vm454_vm0, %v6796_v0, 0.0  ;;  %v530_v4 = vmul.f32 %v6796_v0, %v6796_v0  ;;  %v6808_v6 = vld [vmem:[#allocation2 + $0x8] sm:$0xff]  ;;  %v531_v7 = vmul.f32 %v6798_v1, %v6798_v1  ;;  %v525_v10 = vsel %vm454_vm0, %v6798_v1, 0.0  ;;  %v5392_v37 = vld [vmem:[#allocation13 + $0x8] sm:$0xff]  ;;  %s6486_s27 = smov 120  }
 0x15e   :  { %v455_v5 = vsel %vm454_vm0, %v6800_v2, 0.0  ;;  %523 = vadd.xlane.f32.xlu0 %v522_v3  ;;  %v470_v8 = vmul.f32 %v6800_v2, %v6800_v2  ;;  %v458_v11 = vsel %vm454_vm0, %v6808_v6, 0.0  ;;  %v471_v14 = vmul.f32 %v6808_v6, %v6808_v6  ;;  %v5394_v27 = vld [vmem:[#allocation16 + $0x8] sm:$0xff]  ;;  %v5393_v31 = vld [vmem:[#allocation16] sm:$0xff]  ;;  %610 = vmatpush.bf16.msra.mxu0 %v5392_v37  ;;  %s6487_s16 = smov 112   ;;  %s6488_s3 = smov 104  }
 0x15f   :  { %456 = vadd.xlane.f32.xlu2 %v455_v5  ;;  %v532_v9 = vsel %vm454_vm0, %v530_v4, 0.0  ;;  %v535_v12 = vsel %vm454_vm0, %v531_v7, 0.0  ;;  %5623 = vrcp.f32 %v6485_v16  ;;  %648 = vmatpush.bf16.msra.mxu1 %v5394_v27  ;;  %v5391_v40 = vld [vmem:[#allocation13] sm:$0xff]  ;;  %vm660_vm14 = vcmask 64512   ;;  %s6489_s6 = smov 96   ;;  %s6490_s15 = smov 88  }
 0x160   :  { %533 = vadd.xlane.f32.xlu1 %v532_v9  ;;  %v472_v13 = vsel %vm454_vm0, %v470_v8, 0.0  ;;  %v475_v15 = vsel %vm454_vm0, %v471_v14, 0.0  ;;  %s6491_s2 = smov 80   ;;  %s6492_s5 = smov 72  }
 0x161   :  { %s6493_s17 = smov 16   ;;  %s6494_s28 = smov 24  }
 0x162   :  { %611 = vmatpush.bf16.msra.mxu0 %v5391_v40  ;;  %s7864_s18 = sld [smem:[#allocation56_spill]]  ;;  %s6495_s14 = smov 56  }
 0x163   :  { %649 = vmatpush.bf16.msra.mxu1 %v5393_v31  ;;  %s7865_s9 = sld [smem:[#allocation57_spill]]  ;;  %s6496_s7 = smov 40  }
 0x164   :  { %s7866_s20 = sld [smem:[#allocation59_spill]]  ;;  %s6497_s13 = smov 48  }
 0x165   :  { %v5624_v17 = vpop.eup %5623  ;;  %s7867_s11 = sld [smem:[#allocation60_spill]]  ;;  %s6395_s21 = scalar_lea.hbm %s6659_s8, 4 }
 0x166   :  { %526 = vadd.xlane.f32.xlu0 %v525_v10  ;;  %v462_v18 = vmul.f32 32.0, %v5624_v17  ;;  %vm466_vm1 = vweird.f32 %v5624_v17  ;;  %s7868_s0 = sld [smem:[#allocation61_spill]] }
 0x167   :  { %459 = vadd.xlane.f32.xlu2 %v458_v11  ;;  %s7869_s4 = sld [smem:[#allocation62_spill]] }
 0x168   :  { %536 = vadd.xlane.f32.xlu1 %v535_v12  ;;  %v463_v19 = vsub.f32 1.0, %v462_v18  ;;  %v5580_v12 = vld [vmem:[#allocation10] ss:$0 sm:$0xff] }
 0x16a   :  { %v464_v20 = vmul.f32 %v5624_v17, %v463_v19 }
 0x16c   :  { %v465_v21 = vadd.f32 %v5624_v17, %v464_v20 }
 0x16e   :  { %473 = vadd.xlane.f32.xlu0 %v472_v13  ;;  %v6824_v22 = vsel %vm466_vm1, %v5624_v17, %v465_v21 }
 0x170   :  { %476 = vadd.xlane.f32.xlu1 %v475_v15 }
 0x1d1   :  { %v524_v23 = vpop.xlane.xlu0 %523 }
 0x1d2   :  { %v457_v24 = vpop.xlane.xlu2 %456  ;;  %v528_v25 = vmul.f32 %v524_v23, %v6824_v22  ;;  %v5581_v23 = vld [vmem:[#allocation11] ss:$0 sm:$0xff] }
 0x1d3   :  { %v534_v26 = vpop.xlane.xlu1 %533  ;;  %v6831_v41 = vmul.f32 %v6824_v22, %v457_v24 }
 0x1d4   :  { %v540_v28 = vmul.f32 %v528_v25, %v528_v25  ;;  %v538_v29 = vmul.f32 %v534_v26, %v6824_v22  ;;  %v544_v7 = vsub.f32 %v6796_v0, %v528_v25 }
 0x1d5   :  { %v480_v48 = vmul.f32 %v6831_v41, %v6831_v41 }
 0x1d6   :  { %v542_v30 = vsub.f32 %v538_v29, %v540_v28  ;;  %v484_v28 = vsub.f32 %v6800_v2, %v6831_v41 }
 0x1d8   :  { %v546_v32 = vadd.f32 1e-05, %v542_v30  ;;  %v5582_v30 = vld [vmem:[#allocation7] ss:$0 sm:$0xff] }
 0x1d9   :  { %v527_v33 = vpop.xlane.xlu0 %526 }
 0x1da   :  { %5625 = vrsqrt.f32 %v546_v32  ;;  %v529_v34 = vmul.f32 %v527_v33, %v6824_v22  ;;  %v460_v36 = vpop.xlane.xlu2 %459  ;;  %vm554_vm3 = vweird.f32 %v546_v32 }
 0x1db   :  { %v537_v35 = vpop.xlane.xlu1 %536  ;;  %v6834_v43 = vmul.f32 %v6824_v22, %v460_v36 }
 0x1dc   :  { %v541_v38 = vmul.f32 %v529_v34, %v529_v34  ;;  %v539_v39 = vmul.f32 %v537_v35, %v6824_v22  ;;  %v545_v16 = vsub.f32 %v6798_v1, %v529_v34 }
 0x1dd   :  { %v481_v50 = vmul.f32 %v6834_v43, %v6834_v43  ;;  %v485_v33 = vsub.f32 %v6808_v6, %v6834_v43 }
 0x1de   :  { %v543_v42 = vsub.f32 %v539_v39, %v541_v38  ;;  %v5583_v39 = vld [vmem:[#allocation8] ss:$0 sm:$0xff] }
 0x1e0   :  { %v5626_v44 = vpop.eup %5625  ;;  %v547_v45 = vadd.f32 1e-05, %v543_v42 }
 0x1e1   :  { %v549_v46 = vmul.f32 %v5626_v44, %v546_v32  ;;  %v474_v47 = vpop.xlane.xlu0 %473  ;;  %vm555_vm2 = vweird.f32 %v5626_v44 }
 0x1e2   :  { %5627 = vrsqrt.f32 %v547_v45  ;;  %v478_v49 = vmul.f32 %v474_v47, %v6824_v22  ;;  %vm556_vm4 = vmor %vm554_vm3, %vm555_vm2  ;;  %vm564_vm6 = vweird.f32 %v547_v45 }
 0x1e3   :  { %v550_v51 = vmul.f32 %v5626_v44, %v549_v46  ;;  %v477_v52 = vpop.xlane.xlu1 %476 }
 0x1e4   :  { %v482_v53 = vsub.f32 %v478_v49, %v480_v48  ;;  %v479_v54 = vmul.f32 %v477_v52, %v6824_v22  ;;  %v5585_v48 = vld [vmem:[#allocation14] ss:$0 sm:$0xff] }
 0x1e5   :  { %v551_v55 = vmul.f32 0.5, %v550_v51 }
 0x1e6   :  { %v486_v56 = vadd.f32 1e-05, %v482_v53  ;;  %v483_v57 = vsub.f32 %v479_v54, %v481_v50 }
 0x1e7   :  { %v552_v58 = vsub.f32 1.5, %v551_v55 }
 0x1e8   :  { %v5628_v59 = vpop.eup %5627  ;;  %5629 = vrsqrt.f32 %v486_v56  ;;  %v487_v60 = vadd.f32 1e-05, %v483_v57  ;;  %vm494_vm9 = vweird.f32 %v486_v56 }
 0x1e9   :  { %v553_v61 = vmul.f32 %v5626_v44, %v552_v58  ;;  %v559_v62 = vmul.f32 %v5628_v59, %v547_v45  ;;  %vm565_vm5 = vweird.f32 %v5628_v59 }
 0x1ea   :  { %5631 = vrsqrt.f32 %v487_v60  ;;  %vm566_vm7 = vmor %vm564_vm6, %vm565_vm5  ;;  %vm504_vm12 = vweird.f32 %v487_v60 }
 0x1eb   :  { %v560_v63 = vmul.f32 %v5628_v59, %v559_v62  ;;  %v557_v4 = vsel %vm556_vm4, %v5626_v44, %v553_v61  ;;  %v5584_v44 = vld [vmem:[#allocation17] ss:$0 sm:$0xff]  ;;  %vm757_vm4 = vcmask 1043456  }
 0x1ec   :  { %v568_v11 = vmul.f32 %v557_v4, %v544_v7 }
 0x1ed   :  { %v561_v3 = vmul.f32 0.5, %v560_v63 }
 0x1ee   :  { %v5630_v5 = vpop.eup %5629  ;;  %v573_v21 = vmul.f32 %v5580_v12, %v568_v11 }
 0x1ef   :  { %v562_v8 = vsub.f32 1.5, %v561_v3  ;;  %v489_v9 = vmul.f32 %v5630_v5, %v486_v56  ;;  %vm495_vm8 = vweird.f32 %v5630_v5 }
 0x1f0   :  { %v5632_v10 = vpop.eup %5631  ;;  %vm496_vm11 = vmor %vm494_vm9, %vm495_vm8  ;;  %v578_v1 = vadd.f32 %v5581_v23, %v573_v21 }
 0x1f1   :  { %v563_v13 = vmul.f32 %v5628_v59, %v562_v8  ;;  %v490_v14 = vmul.f32 %v5630_v5, %v489_v9  ;;  %v499_v15 = vmul.f32 %v5632_v10, %v487_v60  ;;  %vm505_vm10 = vweird.f32 %v5632_v10 }
 0x1f2   :  { %vm506_vm13 = vmor %vm504_vm12, %vm505_vm10 }
 0x1f3   :  { %v491_v17 = vmul.f32 0.5, %v490_v14  ;;  %v500_v18 = vmul.f32 %v5632_v10, %v499_v15  ;;  %v567_v19 = vsel %vm566_vm7, %v5628_v59, %v563_v13 }
 0x1f4   :  { %v569_v20 = vmul.f32 %v567_v19, %v545_v16 }
 0x1f5   :  { %v492_v0 = vsub.f32 1.5, %v491_v17  ;;  %v501_v24 = vmul.f32 0.5, %v500_v18 }
 0x1f6   :  { %v574_v25 = vmul.f32 %v5580_v12, %v569_v20 }
 0x1f7   :  { %v493_v26 = vmul.f32 %v5630_v5, %v492_v0  ;;  %v502_v27 = vsub.f32 1.5, %v501_v24 }
 0x1f8   :  { %v579_v29 = vadd.f32 %v5581_v23, %v574_v25 }
 0x1f9   :  { %v503_v31 = vmul.f32 %v5632_v10, %v502_v27  ;;  %v497_v32 = vsel %vm496_vm11, %v5630_v5, %v493_v26 }
 0x1fa   :  { %v623_v34 = vpack.c.bf16 %v579_v29, %v578_v1  ;;  %v508_v35 = vmul.f32 %v497_v32, %v484_v28 }
 0x1fb   :  { %v507_v36 = vsel %vm506_vm13, %v5632_v10, %v503_v31 }
 0x1fc   :  { %5123 = vmatmul.msk.bf16.vlgmr.msra.gmra.mxu1 %vm454_vm0, %v623_v34  ;;  %v509_v37 = vmul.f32 %v507_v36, %v485_v33  ;;  %v513_v38 = vmul.f32 %v5582_v30, %v508_v35 }
 0x1fe   :  { %v514_v2 = vmul.f32 %v5582_v30, %v509_v37  ;;  %v518_v40 = vadd.f32 %v5583_v39, %v513_v38 }
 0x200   :  { %v519_v41 = vadd.f32 %v5583_v39, %v514_v2 }
 0x202   :  { %v585_v42 = vpack.c.bf16 %v519_v41, %v518_v40 }
 0x204   :  { %5114 = vmatmul.msk.bf16.vlgmr.msra.gmra.mxu0 %vm454_vm0, %v585_v42 }
 0x279   :  { %v651_v45 = vpop.f32.mrf.mxu1 }
 0x27a   :  { %v652_v46 = vadd.f32 %v5584_v44, %v651_v45 }
 0x27c   :  { %v658_v6 = vpack.c.bf16 %v652_v46, %v652_v46 }
 0x27e   :  { %v750_v43 = vunpack.c.l.b16 %v658_v6  ;;  %v665_v47 = vsel %vm660_vm14, %v658_v6, 0 }
 0x27f   :  { %674 = vmatpush.bf16.xpose.msra.mxu2 %v665_v47 }
 0x280   :  { %v6851_v49 = vpack.c.b16 %v750_v43, %v750_v43 }
 0x281   :  { %v613_v50 = vpop.f32.mrf.mxu0  ;;  %v653_v51 = vpop.f32.mrf.mxu1 }
 0x282   :  { %v614_v52 = vadd.f32 %v5585_v48, %v613_v50  ;;  %v654_v53 = vadd.f32 %v5584_v44, %v653_v51  ;;  %803 = vrot.lane.b32.xlu2 %v6851_v49, %s6486_s27 }
 0x284   :  { %v656_v54 = vpack.c.bf16 %v614_v52, %v614_v52  ;;  %v659_v55 = vpack.c.bf16 %v654_v53, %v654_v53 }
 0x286   :  { %v799_v56 = vunpack.c.l.b16 %v656_v54  ;;  %5124 = vmatmul.msk.bf16.vlgmr.msra.gmra.mxu2 %vm660_vm14, %v656_v54  ;;  %v684_v57 = vsel %vm660_vm14, %v659_v55, 0  ;;  %v775_v58 = vunpack.c.l.b16 %v659_v55 }
 0x287   :  { %693 = vmatpush.bf16.xpose.msra.mxu3 %v684_v57 }
 0x288   :  { %v800_v59 = vpack.c.b16 %v799_v56, %v799_v56  ;;  %v6857_v60 = vpack.c.b16 %v775_v58, %v775_v58 }
 0x289   :  { %v615_v61 = vpop.f32.mrf.mxu0 }
 0x28a   :  { %v616_v62 = vadd.f32 %v5585_v48, %v615_v61  ;;  %829 = vrot.lane.b32.xlu0 %v6857_v60, %s6486_s27  ;;  %801 = vrot.lane.b32.xlu1 %v800_v59, %s6486_s27 }
 0x28c   :  { %v657_v63 = vpack.c.bf16 %v616_v62, %v616_v62 }
 0x28e   :  { %v825_v3 = vunpack.c.l.b16 %v657_v63  ;;  %5125 = vmatmul.msk.bf16.vlgmr.msra.gmra.mxu3 %vm660_vm14, %v657_v63 }
 0x290   :  { %v826_v4 = vpack.c.b16 %v825_v3, %v825_v3 }
 0x292   :  { %944 = vrot.lane.b32.xlu0 %v6851_v49, %s6487_s16  ;;  %827 = vrot.lane.b32.xlu2 %v826_v4, %s6486_s27 }
 0x293   :  { %942 = vrot.lane.b32.xlu1 %v800_v59, %s6487_s16 }
 0x29a   :  { %965 = vrot.lane.b32.xlu0 %v826_v4, %s6487_s16  ;;  %967 = vrot.lane.b32.xlu2 %v6857_v60, %s6487_s16 }
 0x29b   :  { %1105 = vrot.lane.b32.xlu1 %v6857_v60, %s6488_s3 }
 0x2a2   :  { %1082 = vrot.lane.b32.xlu2 %v6851_v49, %s6488_s3  ;;  %1080 = vrot.lane.b32.xlu0 %v800_v59, %s6488_s3 }
 0x2aa   :  { %1103 = vrot.lane.b32.xlu2 %v826_v4, %s6488_s3 }
 0x2dc   :  { %v804_v5 = vpop.permute.xlu2 %803 }
 0x2dd   :  { %v809_v7 = vsel %vm660_vm14, %v804_v5, 0 }
 0x2de   :  { %818 = vmatpush.bf16.xpose.msrb.mxu2 %v809_v7 }
 0x2ec   :  { %v828_v8 = vpop.permute.xlu2 %827 }
 0x2f4   :  { %v968_v9 = vpop.permute.xlu2 %967 }
 0x2f5   :  { %v973_v13 = vsel %vm660_vm14, %v968_v9, 0 }
 0x2fc   :  { %v830_v10 = vpop.permute.xlu0 %829  ;;  %v802_v11 = vpop.permute.xlu1 %801 }
 0x2fd   :  { %5128 = vmatmul.msk.bf16.vlgmr.msrb.gmra.mxu2 %vm660_vm14, %v802_v11  ;;  %v835_v12 = vsel %vm660_vm14, %v830_v10, 0  ;;  %v1083_v14 = vpop.permute.xlu2 %1082 }
 0x2fe   :  { %844 = vmatpush.bf16.xpose.msrb.mxu3 %v835_v12  ;;  %v1088_v18 = vsel %vm660_vm14, %v1083_v14, 0 }
 0x304   :  { %v945_v15 = vpop.permute.xlu0 %944 }
 0x305   :  { %v950_v16 = vsel %vm660_vm14, %v945_v15, 0  ;;  %v943_v17 = vpop.permute.xlu1 %942  ;;  %5129 = vmatmul.msk.bf16.vlgmr.msrb.gmra.mxu3 %vm660_vm14, %v828_v8  ;;  %v1104_v1 = vpop.permute.xlu2 %1103 }
 0x306   :  { %982 = vmatpush.bf16.xpose.msra.mxu3 %v973_v13  ;;  %959 = vmatpush.bf16.xpose.msra.mxu2 %v950_v16 }
 0x309   :  { %v676_v19 = vpop.f32.mrf.mxu2 }
 0x30a   :  { %v699_v20 = vsel %vm660_vm14, %v676_v19, -inf }
 0x30b   :  { %700 = vmax.xlane.f32.xlu1 %v699_v20 }
 0x30c   :  { %v966_v25 = vpop.permute.xlu0 %965 }
 0x30d   :  { %v1106_v21 = vpop.permute.xlu1 %1105  ;;  %5132 = vmatmul.msk.bf16.vlgmr.msra.gmra.mxu2 %vm660_vm14, %v943_v17 }
 0x30e   :  { %1097 = vmatpush.bf16.xpose.msrb.mxu2 %v1088_v18  ;;  %v1111_v23 = vsel %vm660_vm14, %v1106_v21, 0 }
 0x30f   :  { %1120 = vmatpush.bf16.xpose.msrb.mxu3 %v1111_v23 }
 0x311   :  { %v678_v0 = vpop.f32.mrf.mxu2  ;;  %v695_v24 = vpop.f32.mrf.mxu3 }
 0x312   :  { %v702_v26 = vsel %vm660_vm14, %v695_v24, -inf }
 0x313   :  { %703 = vmax.xlane.f32.xlu0 %v702_v26 }
 0x314   :  { %v1081_v28 = vpop.permute.xlu0 %1080 }
 0x315   :  { %5133 = vmatmul.msk.bf16.vlgmr.msra.gmra.mxu3 %vm660_vm14, %v966_v25 }
 0x319   :  { %v697_v27 = vpop.f32.mrf.mxu3 }
 0x31d   :  { %5136 = vmatmul.msk.bf16.vlgmr.msrb.gmra.mxu2 %vm660_vm14, %v1081_v28 }
 0x325   :  { %5137 = vmatmul.msk.bf16.vlgmr.msrb.gmra.mxu3 %vm660_vm14, %v1104_v1 }
 0x37e   :  { %v701_v29 = vpop.xlane.xlu1 %700 }
 0x37f   :  { %v705_v30 = vsub.f32 %v676_v19, %v701_v29 }
 0x380   :  { %v820_v31 = vpop.f32.mrf.mxu2 }
 0x381   :  { %v707_v32 = vmul.f32 1.442695, %v705_v30  ;;  %v850_v33 = vsel %vm660_vm14, %v820_v31, -inf }
 0x382   :  { %851 = vmax.xlane.f32.xlu2 %v850_v33 }
 0x383   :  { %5633 = vpow2.f32 %v707_v32 }
 0x386   :  { %v704_v34 = vpop.xlane.xlu0 %703 }
 0x387   :  { %v706_v35 = vsub.f32 %v695_v24, %v704_v34 }
 0x388   :  { %v822_v36 = vpop.f32.mrf.mxu2  ;;  %v846_v37 = vpop.f32.mrf.mxu3 }
 0x389   :  { %v6891_v38 = vpop.eup %5633  ;;  %v709_v39 = vmul.f32 1.442695, %v706_v35  ;;  %v853_v2 = vsel %vm660_vm14, %v846_v37, -inf }
 0x38a   :  { %854 = vmax.xlane.f32.xlu1 %v853_v2  ;;  %v711_v40 = vsel %vm660_vm14, %v6891_v38, 0.0 }
 0x38b   :  { %5635 = vpow2.f32 %v709_v39  ;;  %712 = vadd.xlane.f32.xlu2 %v711_v40 }
 0x390   :  { %v848_v41 = vpop.f32.mrf.mxu3  ;;  %v961_v42 = vpop.f32.mrf.mxu2 }
 0x391   :  { %v6896_v44 = vpop.eup %5635  ;;  %v988_v45 = vsel %vm660_vm14, %v961_v42, -inf }
 0x392   :  { %989 = vmax.xlane.f32.xlu0 %v988_v45  ;;  %v714_v46 = vsel %vm660_vm14, %v6896_v44, 0.0 }
 0x393   :  { %715 = vadd.xlane.f32.xlu1 %v714_v46 }
 0x398   :  { %v963_v6 = vpop.f32.mrf.mxu2  ;;  %v984_v43 = vpop.f32.mrf.mxu3 }
 0x399   :  { %v991_v47 = vsel %vm660_vm14, %v984_v43, -inf }
 0x39a   :  { %992 = vmax.xlane.f32.xlu2 %v991_v47 }
 0x3a0   :  { %v986_v48 = vpop.f32.mrf.mxu3  ;;  %v1099_v50 = vpop.f32.mrf.mxu2 }
 0x3a1   :  { %v1126_v51 = vsel %vm660_vm14, %v1099_v50, -inf }
 0x3a2   :  { %1127 = vmax.xlane.f32.xlu1 %v1126_v51 }
 0x3a6   :  { %777 = vrot.lane.b32.xlu0 %v6857_v60, %s6489_s6 }
 0x3a8   :  { %v1101_v52 = vpop.f32.mrf.mxu2  ;;  %v6905_v53 = vpop.f32.mrf.mxu3 }
 0x3a9   :  { %v1129_v55 = vsel %vm660_vm14, %v6905_v53, -inf }
 0x3b0   :  { %v1124_v54 = vpop.f32.mrf.mxu3 }
 0x3b2   :  { %900 = vrot.lane.b32.xlu2 %v6851_v49, %s6490_s15 }
 0x3bb   :  { %752 = vrot.lane.b32.xlu1 %v6851_v49, %s6489_s6 }
 0x3d0   :  { %1130 = vmax.xlane.f32.xlu0 %v1129_v55 }
 0x3f5   :  { %v852_v56 = vpop.xlane.xlu2 %851 }
 0x3f6   :  { %v856_v57 = vsub.f32 %v820_v31, %v852_v56 }
 0x3f8   :  { %v858_v58 = vmul.f32 1.442695, %v856_v57 }
 0x3fa   :  { %5637 = vpow2.f32 %v858_v58 }
 0x3fd   :  { %v855_v59 = vpop.xlane.xlu1 %854 }
 0x3fe   :  { %v857_v61 = vsub.f32 %v846_v37, %v855_v59  ;;  %v713_v4 = vpop.xlane.xlu2 %712 }
 0x3ff   :  { %vm722_vm6 = vweird.f32 %v713_v4 }
 0x400   :  { %v6913_v62 = vpop.eup %5637  ;;  %v860_v63 = vmul.f32 1.442695, %v857_v61 }
 0x401   :  { %v862_v3 = vsel %vm660_vm14, %v6913_v62, 0.0 }
 0x402   :  { %5639 = vpow2.f32 %v860_v63  ;;  %863 = vadd.xlane.f32.xlu0 %v862_v3 }
 0x405   :  { %v990_v5 = vpop.xlane.xlu0 %989 }
 0x406   :  { %v994_v7 = vsub.f32 %v961_v42, %v990_v5  ;;  %v716_v8 = vpop.xlane.xlu1 %715  ;;  %v728_v42 = vand.u32 2147483648, %v713_v4 }
 0x407   :  { %5641 = vrcp.f32 %v716_v8  ;;  %v743_v19 = vand.u32 2147483648, %v716_v8  ;;  %v741_v23 = vand.u32 2147483647, %v716_v8  ;;  %vm737_vm1 = vweird.f32 %v716_v8 }
 0x408   :  { %v6917_v9 = vpop.eup %5639  ;;  %v996_v10 = vmul.f32 1.442695, %v994_v7  ;;  %v729_v46 = vor.u32 1.1754944e-38, %v728_v42 }
 0x409   :  { %v865_v11 = vsel %vm660_vm14, %v6917_v9, 0.0  ;;  %v744_v25 = vor.u32 1.1754944e-38, %v743_v19  ;;  %vm742_vm3 = vcmp.eq.f32.partialorder %v741_v23, 8.507059e+37 }
 0x40a   :  { %5643 = vpow2.f32 %v996_v10  ;;  %866 = vadd.xlane.f32.xlu2 %v865_v11 }
 0x40b   :  { %5645 = vrcp.f32 %v713_v4 }
 0x40d   :  { %v5642_v12 = vpop.eup %5641  ;;  %v993_v13 = vpop.xlane.xlu2 %992 }
 0x40e   :  { %v733_v14 = vmul.f32 %v5642_v12, %v716_v8  ;;  %v995_v15 = vsub.f32 %v984_v43, %v993_v13  ;;  %vm738_vm15 = vweird.f32 %v5642_v12 }
 0x40f   :  { %vm739_vm2 = vmor %vm737_vm1, %vm738_vm15 }
 0x410   :  { %v6921_v16 = vpop.eup %5643  ;;  %v734_v17 = vsub.f32 1.0, %v733_v14  ;;  %v998_v18 = vmul.f32 1.442695, %v995_v15 }
 0x411   :  { %v1000_v20 = vsel %vm660_vm14, %v6921_v16, 0.0  ;;  %v5646_v0 = vpop.eup %5645 }
 0x412   :  { %v735_v21 = vmul.f32 %v5642_v12, %v734_v17  ;;  %5647 = vpow2.f32 %v998_v18  ;;  %1001 = vadd.xlane.f32.xlu2 %v1000_v20  ;;  %v718_v27 = vmul.f32 %v5646_v0, %v713_v4  ;;  %vm723_vm5 = vweird.f32 %v5646_v0 }
 0x413   :  { %vm724_vm7 = vmor %vm722_vm6, %vm723_vm5 }
 0x414   :  { %v736_v24 = vadd.f32 %v5642_v12, %v735_v21  ;;  %v719_v36 = vsub.f32 1.0, %v718_v27 }
 0x415   :  { %v1128_v26 = vpop.xlane.xlu1 %1127  ;;  %v901_v43 = vpop.permute.xlu2 %900 }
 0x416   :  { %v1132_v28 = vsub.f32 %v1099_v50, %v1128_v26  ;;  %921 = vrot.lane.b32.xlu0 %v6857_v60, %s6490_s15  ;;  %v740_v1 = vsel %vm739_vm2, %v5642_v12, %v736_v24  ;;  %v720_v39 = vmul.f32 %v5646_v0, %v719_v36  ;;  %v906_v51 = vsel %vm757_vm4, %v901_v43, 0 }
 0x417   :  { %v745_v29 = vsel %vm742_vm3, %v744_v25, %v740_v1 }
 0x418   :  { %v6927_v30 = vpop.eup %5647  ;;  %v1134_v31 = vmul.f32 1.442695, %v1132_v28  ;;  %v778_v32 = vpop.permute.xlu0 %777  ;;  %v746_v33 = vmul.f32 %v6896_v44, %v745_v29  ;;  %v721_v41 = vadd.f32 %v5646_v0, %v720_v39  ;;  %v726_v44 = vand.u32 2147483647, %v713_v4 }
 0x419   :  { %v783_v34 = vsel %vm757_vm4, %v778_v32, 0  ;;  %v1003_v35 = vsel %vm660_vm14, %v6927_v30, 0.0 }
 0x41a   :  { %5649 = vpow2.f32 %v1134_v31  ;;  %792 = vmatpush.bf16.msrb.mxu1 %v783_v34  ;;  %1004 = vadd.xlane.f32.xlu2 %v1003_v35  ;;  %v748_v37 = vpack.c.bf16 %v746_v33, %v746_v33  ;;  %v725_v45 = vsel %vm724_vm7, %v5646_v0, %v721_v41  ;;  %vm727_vm8 = vcmp.eq.f32.partialorder %v726_v44, 8.507059e+37 }
 0x41b   :  { %v730_v6 = vsel %vm727_vm8, %v729_v46, %v725_v45 }
 0x41c   :  { %v731_v47 = vmul.f32 %v6891_v38, %v730_v6 }
 0x41d   :  { %5127 = vmatmul.msk.bf16.vlgmr.msrb.gmra.mxu1 %vm660_vm14, %v748_v37 }
 0x41e   :  { %v747_v52 = vpack.c.bf16 %v731_v47, %v731_v47 }
 0x420   :  { %v6934_v2 = vpop.eup %5649 }
 0x421   :  { %v1138_v40 = vsel %vm660_vm14, %v6934_v2, 0.0 }
 0x422   :  { %1139 = vadd.xlane.f32.xlu1 %v1138_v40 }
 0x42d   :  { %v753_v48 = vpop.permute.xlu1 %752 }
 0x42e   :  { %v759_v50 = vsel %vm757_vm4, %v753_v48, 0 }
 0x42f   :  { %768 = vmatpush.bf16.msrb.mxu0 %v759_v50 }
 0x432   :  { %5126 = vmatmul.msk.bf16.vlgmr.msrb.gmra.mxu0 %vm660_vm14, %v747_v52  ;;  %1038 = vrot.lane.b32.xlu2 %v6851_v49, %s6491_s2 }
 0x433   :  { %915 = vmatpush.bf16.msra.mxu0 %v906_v51 }
 0x43a   :  { %1059 = vrot.lane.b32.xlu2 %v6857_v60, %s6491_s2 }
 0x43b   :  { %1197 = vrot.lane.b32.xlu1 %v6857_v60, %s6492_s5 }
 0x442   :  { %1176 = vrot.lane.b32.xlu2 %v6851_v49, %s6492_s5 }
 0x443   :  { %v1131_v38 = vpop.xlane.xlu0 %1130 }
 0x444   :  { %v1133_v54 = vsub.f32 %v6905_v53, %v1131_v38 }
 0x446   :  { %v1136_v55 = vmul.f32 1.442695, %v1133_v54 }
 0x448   :  { %5651 = vpow2.f32 %v1136_v55 }
 0x44e   :  { %v6951_v56 = vpop.eup %5651 }
 0x44f   :  { %v1141_v57 = vsel %vm660_vm14, %v6951_v56, 0.0 }
 0x450   :  { %1142 = vadd.xlane.f32.xlu0 %v1141_v57 }
 0x475   :  { %v864_v58 = vpop.xlane.xlu0 %863 }
 0x476   :  { %5653 = vrcp.f32 %v864_v58  ;;  %v879_v49 = vand.u32 2147483648, %v864_v58  ;;  %v877_v4 = vand.u32 2147483647, %v864_v58  ;;  %vm873_vm10 = vweird.f32 %v864_v58 }
 0x478   :  { %v880_v8 = vor.u32 1.1754944e-38, %v879_v49  ;;  %vm878_vm12 = vcmp.eq.f32.partialorder %v877_v4, 8.507059e+37 }
 0x47c   :  { %v5654_v59 = vpop.eup %5653 }
 0x47d   :  { %v869_v61 = vmul.f32 %v5654_v59, %v864_v58  ;;  %v867_v63 = vpop.xlane.xlu2 %866  ;;  %vm874_vm9 = vweird.f32 %v5654_v59 }
 0x47e   :  { %5655 = vrcp.f32 %v867_v63  ;;  %vm875_vm11 = vmor %vm873_vm10, %vm874_vm9  ;;  %v894_v18 = vand.u32 2147483648, %v867_v63  ;;  %v892_v20 = vand.u32 2147483647, %v867_v63  ;;  %vm888_vm15 = vweird.f32 %v867_v63 }
 0x47f   :  { %v870_v60 = vsub.f32 1.0, %v869_v61 }
 0x480   :  { %v895_v25 = vor.u32 1.1754944e-38, %v894_v18  ;;  %vm893_vm2 = vcmp.eq.f32.partialorder %v892_v20, 8.507059e+37 }
 0x481   :  { %v871_v3 = vmul.f32 %v5654_v59, %v870_v60 }
 0x483   :  { %v872_v53 = vadd.f32 %v5654_v59, %v871_v3 }
 0x484   :  { %v5656_v5 = vpop.eup %5655 }
 0x485   :  { %v876_v7 = vsel %vm875_vm11, %v5654_v59, %v872_v53  ;;  %v884_v10 = vmul.f32 %v5656_v5, %v867_v63  ;;  %v1002_v11 = vpop.xlane.xlu2 %1001  ;;  %vm889_vm13 = vweird.f32 %v5656_v5 }
 0x486   :  { %5657 = vrcp.f32 %v1002_v11  ;;  %v881_v13 = vsel %vm878_vm12, %v880_v8, %v876_v7  ;;  %vm890_vm1 = vmor %vm888_vm15, %vm889_vm13  ;;  %v1017_v31 = vand.u32 2147483648, %v1002_v11  ;;  %v1015_v32 = vand.u32 2147483647, %v1002_v11 }
 0x487   :  { %v885_v12 = vsub.f32 1.0, %v884_v10  ;;  %v882_v15 = vmul.f32 %v6913_v62, %v881_v13  ;;  %vm1011_vm5 = vweird.f32 %v1002_v11 }
 0x488   :  { %v922_v14 = vpop.permute.xlu0 %921  ;;  %v1018_v37 = vor.u32 1.1754944e-38, %v1017_v31  ;;  %vm1016_vm7 = vcmp.eq.f32.partialorder %v1015_v32, 8.507059e+37 }
 0x489   :  { %v886_v17 = vmul.f32 %v5656_v5, %v885_v12  ;;  %v927_v19 = vsel %vm757_vm4, %v922_v14, 0  ;;  %v898_v21 = vpack.c.bf16 %v882_v15, %v882_v15 }
 0x48a   :  { %936 = vmatpush.bf16.msra.mxu1 %v927_v19 }
 0x48b   :  { %v887_v23 = vadd.f32 %v5656_v5, %v886_v17  ;;  %5130 = vmatmul.msk.bf16.vlgmr.msra.gmra.mxu0 %vm660_vm14, %v898_v21 }
 0x48c   :  { %v5658_v0 = vpop.eup %5657 }
 0x48d   :  { %v891_v24 = vsel %vm890_vm1, %v5656_v5, %v887_v23  ;;  %v1007_v26 = vmul.f32 %v5658_v0, %v1002_v11  ;;  %v1005_v27 = vpop.xlane.xlu2 %1004  ;;  %vm1012_vm3 = vweird.f32 %v5658_v0 }
 0x48e   :  { %5659 = vrcp.f32 %v1005_v27  ;;  %v896_v28 = vsel %vm893_vm2, %v895_v25, %v891_v24  ;;  %vm1013_vm6 = vmor %vm1011_vm5, %vm1012_vm3  ;;  %v1032_v45 = vand.u32 2147483648, %v1005_v27  ;;  %v1030_v43 = vand.u32 2147483647, %v1005_v27 }
 0x48f   :  { %v1008_v62 = vsub.f32 1.0, %v1007_v26  ;;  %v897_v1 = vmul.f32 %v6917_v9, %v896_v28  ;;  %vm1026_vm9 = vweird.f32 %v1005_v27 }
 0x490   :  { %v1033_v52 = vor.u32 1.1754944e-38, %v1032_v45  ;;  %vm1031_vm11 = vcmp.eq.f32.partialorder %v1030_v43, 8.507059e+37 }
 0x491   :  { %v1009_v29 = vmul.f32 %v5658_v0, %v1008_v62  ;;  %v899_v33 = vpack.c.bf16 %v897_v1, %v897_v1 }
 0x493   :  { %v1010_v34 = vadd.f32 %v5658_v0, %v1009_v29  ;;  %5131 = vmatmul.msk.bf16.vlgmr.msra.gmra.mxu1 %vm660_vm14, %v899_v33 }
 0x494   :  { %v5660_v35 = vpop.eup %5659 }
 0x495   :  { %v1014_v36 = vsel %vm1013_vm6, %v5658_v0, %v1010_v34  ;;  %v1022_v39 = vmul.f32 %v5660_v35, %v1005_v27  ;;  %v1140_v40 = vpop.xlane.xlu1 %1139  ;;  %v1039_v41 = vpop.permute.xlu2 %1038  ;;  %vm1027_vm8 = vweird.f32 %v5660_v35 }
 0x496   :  { %5661 = vrcp.f32 %v1140_v40  ;;  %v1044_v9 = vsel %vm757_vm4, %v1039_v41, 0  ;;  %v1019_v44 = vsel %vm1016_vm7, %v1018_v37, %v1014_v36  ;;  %vm1028_vm10 = vmor %vm1026_vm9, %vm1027_vm8  ;;  %v1155_v61 = vand.u32 2147483648, %v1140_v40 }
 0x497   :  { %v1023_v42 = vsub.f32 1.0, %v1022_v39  ;;  %1053 = vmatpush.bf16.msrb.mxu0 %v1044_v9  ;;  %v1020_v46 = vmul.f32 %v6921_v16, %v1019_v44  ;;  %v1153_v60 = vand.u32 2147483647, %v1140_v40  ;;  %vm1149_vm13 = vweird.f32 %v1140_v40  ;;  %v5396_v9 = vld [vmem:[#allocation19 + $0x8] sm:$0xff]  ;;  %v5395_v44 = vld [vmem:[#allocation19] sm:$0xff] }
 0x498   :  { %v1156_v53 = vor.u32 1.1754944e-38, %v1155_v61  ;;  %1280 = vmatpush.bf16.msra.mxu2 %v5396_v9  ;;  %vm1244_vm7 = vcmask 130048   ;;  %vm1247_vm8 = vcmask 195584  }
 0x499   :  { %v1024_v6 = vmul.f32 %v5660_v35, %v1023_v42  ;;  %v1036_v48 = vpack.c.bf16 %v1020_v46, %v1020_v46  ;;  %vm1154_vm1 = vcmp.eq.f32.partialorder %v1153_v60, 8.507059e+37 }
 0x49a   :  { %v6962_v47 = vpop.f32.mrf.mxu1 }
 0x49b   :  { %v1025_v50 = vadd.f32 %v5660_v35, %v1024_v6  ;;  %5134 = vmatmul.msk.bf16.vlgmr.msrb.gmra.mxu0 %vm660_vm14, %v1036_v48 }
 0x49c   :  { %v5662_v51 = vpop.eup %5661  ;;  %1281 = vmatpush.bf16.msra.mxu2 %v5395_v44 }
 0x49d   :  { %v1029_v38 = vsel %vm1028_vm10, %v5660_v35, %v1025_v50  ;;  %v1145_v54 = vmul.f32 %v5662_v51, %v1140_v40  ;;  %v1060_v55 = vpop.permute.xlu2 %1059  ;;  %vm1150_vm12 = vweird.f32 %v5662_v51 }
 0x49e   :  { %v1065_v57 = vsel %vm757_vm4, %v1060_v55, 0  ;;  %v1034_v16 = vsel %vm1031_vm11, %v1033_v52, %v1029_v38  ;;  %vm1151_vm15 = vmor %vm1149_vm13, %vm1150_vm12 }
 0x49f   :  { %v1146_v58 = vsub.f32 1.0, %v1145_v54  ;;  %1074 = vmatpush.bf16.msrb.mxu1 %v1065_v57  ;;  %v1035_v59 = vmul.f32 %v6927_v30, %v1034_v16 }
 0x4a1   :  { %v1147_v63 = vmul.f32 %v5662_v51, %v1146_v58  ;;  %v1037_v3 = vpack.c.bf16 %v1035_v59, %v1035_v59 }
 0x4a2   :  { %v796_v49 = vpop.f32.mrf.mxu1 }
 0x4a3   :  { %v1148_v4 = vadd.f32 %v5662_v51, %v1147_v63  ;;  %5135 = vmatmul.msk.bf16.vlgmr.msrb.gmra.mxu1 %vm660_vm14, %v1037_v3  ;;  %v5586_v63 = vld [vmem:[#allocation20] ss:$0 sm:$0xff]  ;;  %v5849_v49 = vld [vmem:[#allocation2] sm:$0xff] }
 0x4a5   :  { %v1152_v5 = vsel %vm1151_vm15, %v5662_v51, %v1148_v4  ;;  %v1177_v7 = vpop.permute.xlu2 %1176 }
 0x4a6   :  { %v1182_v8 = vsel %vm757_vm4, %v1177_v7, 0  ;;  %v1157_v10 = vsel %vm1154_vm1, %v1156_v53, %v1152_v5 }
 0x4a7   :  { %1191 = vmatpush.bf16.msra.mxu0 %v1182_v8  ;;  %v1158_v30 = vmul.f32 %v6934_v2, %v1157_v10  ;;  %v5850_v10 = vld [vmem:[#allocation2 + $0x8] sm:$0xff] }
 0x4a9   :  { %v1174_v11 = vpack.c.bf16 %v1158_v30, %v1158_v30 }
 0x4ab   :  { %5138 = vmatmul.msk.bf16.vlgmr.msra.gmra.mxu0 %vm660_vm14, %v1174_v11 }
 0x4ad   :  { %v1198_v12 = vpop.permute.xlu1 %1197 }
 0x4ae   :  { %v1203_v13 = vsel %vm757_vm4, %v1198_v12, 0 }
 0x4af   :  { %v770_v14 = vpop.f32.mrf.mxu0  ;;  %1212 = vmatpush.bf16.msra.mxu1 %v1203_v13 }
 0x4b7   :  { %v772_v15 = vpop.f32.mrf.mxu0 }
 0x4c3   :  { %v1143_v17 = vpop.xlane.xlu0 %1142 }
 0x4c4   :  { %5663 = vrcp.f32 %v1143_v17  ;;  %v1170_v21 = vand.u32 2147483648, %v1143_v17  ;;  %v1168_v0 = vand.u32 2147483647, %v1143_v17  ;;  %vm1164_vm3 = vweird.f32 %v1143_v17 }
 0x4c6   :  { %v1171_v2 = vor.u32 1.1754944e-38, %v1170_v21  ;;  %vm1169_vm6 = vcmp.eq.f32.partialorder %v1168_v0, 8.507059e+37 }
 0x4ca   :  { %v5664_v18 = vpop.eup %5663 }
 0x4cb   :  { %v1160_v19 = vmul.f32 %v5664_v18, %v1143_v17  ;;  %vm1165_vm2 = vweird.f32 %v5664_v18 }
 0x4cc   :  { %vm1166_vm5 = vmor %vm1164_vm3, %vm1165_vm2 }
 0x4cd   :  { %v1161_v20 = vsub.f32 1.0, %v1160_v19 }
 0x4cf   :  { %v1162_v23 = vmul.f32 %v5664_v18, %v1161_v20  ;;  %v5398_v20 = vld [vmem:[#allocation25 + $0x8] sm:$0xff] }
 0x4d0   :  { %1385 = vmatpush.bf16.msra.mxu3 %v5398_v20 }
 0x4d1   :  { %v1163_v24 = vadd.f32 %v5664_v18, %v1162_v23  ;;  %v5397_v23 = vld [vmem:[#allocation25] sm:$0xff] }
 0x4d3   :  { %v1167_v25 = vsel %vm1166_vm5, %v5664_v18, %v1163_v24 }
 0x4d4   :  { %v1172_v26 = vsel %vm1169_vm6, %v1171_v2, %v1167_v25  ;;  %1386 = vmatpush.bf16.msra.mxu3 %v5397_v23 }
 0x4d5   :  { %v1173_v27 = vmul.f32 %v6951_v56, %v1172_v26 }
 0x4d7   :  { %v1175_v62 = vpack.c.bf16 %v1173_v27, %v1173_v27 }
 0x4d9   :  { %5139 = vmatmul.msk.bf16.vlgmr.msra.gmra.mxu1 %vm660_vm14, %v1175_v62 }
 0x508   :  { %v917_v28 = vpop.f32.mrf.mxu0 }
 0x510   :  { %v919_v1 = vpop.f32.mrf.mxu0  ;;  %v938_v29 = vpop.f32.mrf.mxu1 }
 0x511   :  { %v5505_v31 = vpack.i.bf16 %v938_v29, %v917_v28 }
 0x513   :  { %5506 = vrot.lane.b32.xlu2 %v5505_v31, %s6461_s1 }
 0x518   :  { %v940_v32 = vpop.f32.mrf.mxu1  ;;  %v1055_v33 = vpop.f32.mrf.mxu0 }
 0x520   :  { %v1057_v34 = vpop.f32.mrf.mxu0  ;;  %v1076_v35 = vpop.f32.mrf.mxu1 }
 0x521   :  { %v5510_v36 = vpack.i.bf16 %v1076_v35, %v1055_v33 }
 0x523   :  { %5511 = vrot.lane.b32.xlu0 %v5510_v36, %s6493_s17 }
 0x528   :  { %v1078_v37 = vpop.f32.mrf.mxu1  ;;  %v1193_v39 = vpop.f32.mrf.mxu0 }
 0x530   :  { %v1195_v56 = vpop.f32.mrf.mxu0 }
 0x556   :  { %v1214_v40 = vpop.f32.mrf.mxu1 }
 0x557   :  { %v5515_v41 = vpack.i.bf16 %v1214_v40, %v1193_v39 }
 0x559   :  { %5516 = vrot.lane.b32.xlu2 %v5515_v41, %s6494_s28 }
 0x55e   :  { %v1216_v42 = vpop.f32.mrf.mxu1 }
 0x55f   :  { %v5587_v42 = vld [vmem:[#allocation22] ss:$0 sm:$0xff] }
 0x56d   :  { %v5507_v45 = vpop.permute.xlu2 %5506 }
 0x56e   :  { %v5509_v6 = vunpack.i.h.bf16 %v5507_v45  ;;  %v5508_v43 = vunpack.i.l.bf16 %v5507_v45 }
 0x570   :  { %v1243_v52 = vsel %vm660_vm14, %v6962_v47, %v5509_v6  ;;  %v1242_v38 = vsel %vm660_vm14, %v770_v14, %v5508_v43 }
 0x595   :  { %v5512_v46 = vpop.permute.xlu0 %5511 }
 0x596   :  { %v5514_v48 = vunpack.i.h.bf16 %v5512_v46  ;;  %v5513_v50 = vunpack.i.l.bf16 %v5512_v46 }
 0x598   :  { %v1245_v57 = vsel %vm1244_vm7, %v1242_v38, %v5513_v50  ;;  %v1246_v16 = vsel %vm1244_vm7, %v1243_v52, %v5514_v48  ;;  %v5588_v48 = vld [vmem:[#allocation23] ss:$0 sm:$0xff] }
 0x5b3   :  { %v5517_v51 = vpop.permute.xlu2 %5516 }
 0x5b4   :  { %v5519_v54 = vunpack.i.h.bf16 %v5517_v51  ;;  %v5518_v55 = vunpack.i.l.bf16 %v5517_v51 }
 0x5b6   :  { %v1248_v58 = vsel %vm1247_vm8, %v1245_v57, %v5518_v55  ;;  %v1249_v59 = vsel %vm1247_vm8, %v1246_v16, %v5519_v54  ;;  %v5400_v54 = vld [vmem:[#allocation28 + $0x8] sm:$0xff]  ;;  %v5589_v55 = vld [vmem:[#allocation26] ss:$0 sm:$0xff]  ;;  %v5399_v16 = vld [vmem:[#allocation28] sm:$0xff] }
 0x5b7   :  { %v1255_v61 = vpack.c.bf16 %v1249_v59, %v1248_v58  ;;  %1436 = vmatpush.bf16.msrb.mxu0 %v5400_v54 }
 0x5b9   :  { %5148 = vmatmul.msk.bf16.vlgmr.msra.gmra.mxu2 %vm454_vm0, %v1255_v61 }
 0x5bb   :  { %1437 = vmatpush.bf16.msrb.mxu0 %v5399_v16 }
 0x63c   :  { %v1283_v60 = vpop.f32.mrf.mxu2 }
 0x63d   :  { %v1284_v3 = vadd.f32 %v5586_v63, %v1283_v60 }
 0x63f   :  { %v6985_v47 = vadd.f32 %v5849_v49, %v1284_v3 }
 0x641   :  { %v1302_v4 = vsel %vm454_vm0, %v6985_v47, 0.0  ;;  %v1310_v53 = vmul.f32 %v6985_v47, %v6985_v47 }
 0x642   :  { %1303 = vadd.xlane.f32.xlu2 %v1302_v4 }
 0x643   :  { %v1312_v5 = vsel %vm454_vm0, %v1310_v53, 0.0 }
 0x644   :  { %v1285_v7 = vpop.f32.mrf.mxu2  ;;  %1313 = vadd.xlane.f32.xlu0 %v1312_v5 }
 0x645   :  { %v1286_v8 = vadd.f32 %v5586_v63, %v1285_v7 }
 0x647   :  { %v6992_v30 = vadd.f32 %v5850_v10, %v1286_v8 }
 0x649   :  { %v1305_v11 = vsel %vm454_vm0, %v6992_v30, 0.0  ;;  %v1311_v12 = vmul.f32 %v6992_v30, %v6992_v30 }
 0x64a   :  { %1306 = vadd.xlane.f32.xlu1 %v1305_v11 }
 0x64b   :  { %v1315_v13 = vsel %vm454_vm0, %v1311_v12, 0.0 }
 0x64c   :  { %1316 = vadd.xlane.f32.xlu2 %v1315_v13 }
 0x6b5   :  { %v1304_v14 = vpop.xlane.xlu2 %1303 }
 0x6b6   :  { %v1308_v15 = vmul.f32 %v1304_v14, %v6824_v22 }
 0x6b7   :  { %v1314_v17 = vpop.xlane.xlu0 %1313 }
 0x6b8   :  { %v1320_v18 = vmul.f32 %v1308_v15, %v1308_v15  ;;  %v1318_v19 = vmul.f32 %v1314_v17, %v6824_v22  ;;  %v1324_v40 = vsub.f32 %v6985_v47, %v1308_v15 }
 0x6ba   :  { %v1322_v21 = vsub.f32 %v1318_v19, %v1320_v18 }
 0x6bc   :  { %v1326_v0 = vadd.f32 1e-05, %v1322_v21  ;;  %v5590_v21 = vld [vmem:[#allocation29] ss:$0 sm:$0xff] }
 0x6bd   :  { %v1307_v24 = vpop.xlane.xlu1 %1306 }
 0x6be   :  { %5665 = vrsqrt.f32 %v1326_v0  ;;  %v1309_v2 = vmul.f32 %v1307_v24, %v6824_v22  ;;  %vm1334_vm10 = vweird.f32 %v1326_v0 }
 0x6bf   :  { %v1317_v25 = vpop.xlane.xlu2 %1316 }
 0x6c0   :  { %v1321_v26 = vmul.f32 %v1309_v2, %v1309_v2  ;;  %v1319_v27 = vmul.f32 %v1317_v25, %v6824_v22  ;;  %v1325_v45 = vsub.f32 %v6992_v30, %v1309_v2 }
 0x6c2   :  { %v1323_v62 = vsub.f32 %v1319_v27, %v1321_v26 }
 0x6c4   :  { %v5666_v28 = vpop.eup %5665  ;;  %v1327_v1 = vadd.f32 1e-05, %v1323_v62 }
 0x6c5   :  { %v1329_v29 = vmul.f32 %v5666_v28, %v1326_v0  ;;  %vm1335_vm9 = vweird.f32 %v5666_v28 }
 0x6c6   :  { %5667 = vrsqrt.f32 %v1327_v1  ;;  %vm1336_vm11 = vmor %vm1334_vm10, %vm1335_vm9  ;;  %vm1344_vm13 = vweird.f32 %v1327_v1 }
 0x6c7   :  { %v1330_v31 = vmul.f32 %v5666_v28, %v1329_v29 }
 0x6c9   :  { %v1331_v32 = vmul.f32 0.5, %v1330_v31 }
 0x6cb   :  { %v1332_v33 = vsub.f32 1.5, %v1331_v32 }
 0x6cc   :  { %v5668_v34 = vpop.eup %5667 }
 0x6cd   :  { %v1333_v35 = vmul.f32 %v5666_v28, %v1332_v33  ;;  %v1339_v36 = vmul.f32 %v5668_v34, %v1327_v1  ;;  %vm1345_vm12 = vweird.f32 %v5668_v34 }
 0x6ce   :  { %vm1346_vm15 = vmor %vm1344_vm13, %vm1345_vm12 }
 0x6cf   :  { %v1340_v37 = vmul.f32 %v5668_v34, %v1339_v36  ;;  %v1337_v39 = vsel %vm1336_vm11, %v5666_v28, %v1333_v35  ;;  %v5402_v36 = vld [vmem:[#allocation31 + $0x8] sm:$0xff] }
 0x6d0   :  { %v1348_v9 = vmul.f32 %v1337_v39, %v1324_v40  ;;  %1536 = vmatpush.bf16.msrb.mxu1 %v5402_v36 }
 0x6d1   :  { %v1341_v56 = vmul.f32 0.5, %v1340_v37  ;;  %v5401_v37 = vld [vmem:[#allocation31] sm:$0xff] }
 0x6d2   :  { %v1353_v6 = vmul.f32 %v5587_v42, %v1348_v9 }
 0x6d3   :  { %v1342_v41 = vsub.f32 1.5, %v1341_v56 }
 0x6d4   :  { %v1358_v51 = vadd.f32 %v5588_v48, %v1353_v6  ;;  %1537 = vmatpush.bf16.msrb.mxu1 %v5401_v37 }
 0x6d5   :  { %v1343_v44 = vmul.f32 %v5668_v34, %v1342_v41 }
 0x6d7   :  { %v1347_v46 = vsel %vm1346_vm15, %v5668_v34, %v1343_v44 }
 0x6d8   :  { %v1349_v43 = vmul.f32 %v1347_v46, %v1325_v45 }
 0x6da   :  { %v1354_v50 = vmul.f32 %v5587_v42, %v1349_v43 }
 0x6dc   :  { %v1359_v52 = vadd.f32 %v5588_v48, %v1354_v50 }
 0x6de   :  { %v1360_v38 = vpack.c.bf16 %v1359_v52, %v1358_v51 }
 0x6e0   :  { %5157 = vmatmul.msk.bf16.vlgmr.msra.gmra.mxu3 %vm454_vm0, %v1360_v38 }
 0x763   :  { %v1388_v57 = vpop.f32.mrf.mxu3 }
 0x764   :  { %v1389_v58 = vadd.f32 %v5589_v55, %v1388_v57 }
 0x766   :  { %v1393_v59 = vmul.f32 %v1389_v58, %v1389_v58 }
 0x768   :  { %v1395_v61 = vmul.f32 %v1393_v59, %v1389_v58  ;;  %v5591_v59 = vld [vmem:[%s7864_s18] ss:$0 sm:$0xff] }
 0x76a   :  { %v1397_v63 = vmul.f32 0.044715, %v1395_v61 }
 0x76b   :  { %v1390_v60 = vpop.f32.mrf.mxu3 }
 0x76c   :  { %v1399_v3 = vadd.f32 %v1397_v63, %v1389_v58  ;;  %v1391_v49 = vadd.f32 %v5589_v55, %v1390_v60 }
 0x76e   :  { %v1401_v4 = vmul.f32 0.7978846, %v1399_v3  ;;  %v1394_v53 = vmul.f32 %v1391_v49, %v1391_v49 }
 0x770   :  { %v1396_v5 = vmul.f32 %v1394_v53, %v1391_v49  ;;  %5669 = vtanh.f32 %v1401_v4  ;;  %v5592_v53 = vld [vmem:[%s7865_s9] ss:$0 sm:$0xff] }
 0x772   :  { %v1398_v7 = vmul.f32 0.044715, %v1396_v5 }
 0x774   :  { %v1400_v8 = vadd.f32 %v1398_v7, %v1391_v49 }
 0x776   :  { %v1402_v10 = vmul.f32 0.7978846, %v1400_v8  ;;  %v5670_v11 = vpop.eup %5669 }
 0x777   :  { %v1405_v12 = vadd.f32 1.0, %v5670_v11  ;;  %v5593_v11 = vld [vmem:[%s7866_s20] ss:$0 sm:$0xff] }
 0x778   :  { %5671 = vtanh.f32 %v1402_v10 }
 0x779   :  { %v1407_v14 = vmul.f32 0.5, %v1405_v12 }
 0x77b   :  { %v1409_v18 = vmul.f32 %v1407_v14, %v1389_v58 }
 0x77e   :  { %v5672_v13 = vpop.eup %5671 }
 0x77f   :  { %v1406_v15 = vadd.f32 1.0, %v5672_v13 }
 0x781   :  { %v1408_v17 = vmul.f32 0.5, %v1406_v15 }
 0x783   :  { %v1410_v19 = vmul.f32 %v1408_v17, %v1391_v49 }
 0x785   :  { %v1411_v20 = vpack.c.bf16 %v1410_v19, %v1409_v18 }
 0x787   :  { %5166 = vmatmul.msk.bf16.vlgmr.msrb.gmra.mxu0 %vm454_vm0, %v1411_v20 }
 0x804   :  { %v1439_v23 = vpop.f32.mrf.mxu0 }
 0x805   :  { %v1440_v0 = vadd.f32 %v5590_v21, %v1439_v23 }
 0x807   :  { %v7008_v24 = vadd.f32 %v1440_v0, %v6985_v47 }
 0x809   :  { %v1448_v2 = vsel %vm454_vm0, %v7008_v24, 0.0  ;;  %v1456_v25 = vmul.f32 %v7008_v24, %v7008_v24 }
 0x80a   :  { %1449 = vadd.xlane.f32.xlu1 %v1448_v2 }
 0x80b   :  { %v1458_v26 = vsel %vm454_vm0, %v1456_v25, 0.0 }
 0x80c   :  { %v1441_v27 = vpop.f32.mrf.mxu0  ;;  %1459 = vadd.xlane.f32.xlu2 %v1458_v26 }
 0x80d   :  { %v1442_v62 = vadd.f32 %v5590_v21, %v1441_v27 }
 0x80f   :  { %v7016_v28 = vadd.f32 %v1442_v62, %v6992_v30 }
 0x811   :  { %v1451_v1 = vsel %vm454_vm0, %v7016_v28, 0.0  ;;  %v1457_v47 = vmul.f32 %v7016_v28, %v7016_v28 }
 0x812   :  { %1452 = vadd.xlane.f32.xlu0 %v1451_v1 }
 0x813   :  { %v1461_v29 = vsel %vm454_vm0, %v1457_v47, 0.0 }
 0x814   :  { %1462 = vadd.xlane.f32.xlu1 %v1461_v29 }
 0x87d   :  { %v1450_v31 = vpop.xlane.xlu1 %1449 }
 0x87e   :  { %v1454_v32 = vmul.f32 %v1450_v31, %v6824_v22 }
 0x87f   :  { %v1460_v33 = vpop.xlane.xlu2 %1459 }
 0x880   :  { %v1466_v34 = vmul.f32 %v1454_v32, %v1454_v32  ;;  %v1464_v35 = vmul.f32 %v1460_v33, %v6824_v22  ;;  %v1470_v16 = vsub.f32 %v7008_v24, %v1454_v32 }
 0x882   :  { %v1468_v30 = vsub.f32 %v1464_v35, %v1466_v34 }
 0x884   :  { %v1472_v39 = vadd.f32 1e-05, %v1468_v30 }
 0x885   :  { %v1453_v56 = vpop.xlane.xlu0 %1452 }
 0x886   :  { %5673 = vrsqrt.f32 %v1472_v39  ;;  %v1455_v40 = vmul.f32 %v1453_v56, %v6824_v22  ;;  %vm1480_vm2 = vweird.f32 %v1472_v39 }
 0x887   :  { %v1463_v41 = vpop.xlane.xlu1 %1462 }
 0x888   :  { %v1467_v42 = vmul.f32 %v1455_v40, %v1455_v40  ;;  %v1465_v9 = vmul.f32 %v1463_v41, %v6824_v22  ;;  %v1471_v60 = vsub.f32 %v7016_v28, %v1455_v40 }
 0x88a   :  { %v1469_v44 = vsub.f32 %v1465_v9, %v1467_v42 }
 0x88c   :  { %v5674_v45 = vpop.eup %5673  ;;  %v1473_v46 = vadd.f32 1e-05, %v1469_v44 }
 0x88d   :  { %v1475_v6 = vmul.f32 %v5674_v45, %v1472_v39  ;;  %vm1481_vm1 = vweird.f32 %v5674_v45 }
 0x88e   :  { %5675 = vrsqrt.f32 %v1473_v46  ;;  %vm1482_vm3 = vmor %vm1480_vm2, %vm1481_vm1  ;;  %vm1490_vm6 = vweird.f32 %v1473_v46 }
 0x88f   :  { %v1476_v43 = vmul.f32 %v5674_v45, %v1475_v6 }
 0x891   :  { %v1477_v48 = vmul.f32 0.5, %v1476_v43 }
 0x893   :  { %v1478_v50 = vsub.f32 1.5, %v1477_v48 }
 0x894   :  { %v5676_v51 = vpop.eup %5675 }
 0x895   :  { %v1479_v52 = vmul.f32 %v5674_v45, %v1478_v50  ;;  %v1485_v38 = vmul.f32 %v5676_v51, %v1473_v46  ;;  %vm1491_vm5 = vweird.f32 %v5676_v51 }
 0x896   :  { %vm1492_vm9 = vmor %vm1490_vm6, %vm1491_vm5 }
 0x897   :  { %v1486_v54 = vmul.f32 %v5676_v51, %v1485_v38  ;;  %v1483_v55 = vsel %vm1482_vm3, %v5674_v45, %v1479_v52 }
 0x898   :  { %v1494_v61 = vmul.f32 %v1483_v55, %v1470_v16 }
 0x899   :  { %v1487_v57 = vmul.f32 0.5, %v1486_v54 }
 0x89a   :  { %v1499_v49 = vmul.f32 %v5591_v59, %v1494_v61 }
 0x89b   :  { %v1488_v58 = vsub.f32 1.5, %v1487_v57 }
 0x89c   :  { %v1504_v7 = vadd.f32 %v5592_v53, %v1499_v49 }
 0x89d   :  { %v1489_v63 = vmul.f32 %v5676_v51, %v1488_v58 }
 0x89f   :  { %v1493_v3 = vsel %vm1492_vm9, %v5676_v51, %v1489_v63 }
 0x8a0   :  { %v1495_v4 = vmul.f32 %v1493_v3, %v1471_v60 }
 0x8a2   :  { %v1500_v5 = vmul.f32 %v5591_v59, %v1495_v4 }
 0x8a4   :  { %v1505_v8 = vadd.f32 %v5592_v53, %v1500_v5 }
 0x8a6   :  { %v1511_v10 = vpack.c.bf16 %v1505_v8, %v1504_v7 }
 0x8a8   :  { %5175 = vmatmul.msk.bf16.vlgmr.msrb.gmra.mxu1 %vm454_vm0, %v1511_v10 }
 0x925   :  { %v1539_v12 = vpop.f32.mrf.mxu1 }
 0x926   :  { %v1540_v13 = vadd.f32 %v5593_v11, %v1539_v12 }
 0x928   :  { %v1544_v14 = vpack.c.bf16 %v1540_v13, %v1540_v13 }
 0x92a   :  { %v1547_v15 = vunpack.c.l.b16 %v1544_v14 }
 0x92c   :  { %v7033_v17 = vpack.c.b16 %v1547_v15, %v1547_v15 }
 0x92d   :  { %v1541_v18 = vpop.f32.mrf.mxu1 }
 0x92e   :  { %v1542_v19 = vadd.f32 %v5593_v11, %v1541_v18  ;;  %1688 = vrot.lane.b32.xlu1 %v7033_v17, %s6490_s15  ;;  %1549 = vrot.lane.b32.xlu0 %v7033_v17, %s6489_s6 }
 0x930   :  { %v1545_v20 = vpack.c.bf16 %v1542_v19, %v1542_v19 }
 0x932   :  { %v1571_v21 = vunpack.c.l.b16 %v1545_v20 }
 0x934   :  { %v7039_v23 = vpack.c.b16 %v1571_v21, %v1571_v21 }
 0x936   :  { %1573 = vrot.lane.b32.xlu2 %v7039_v23, %s6489_s6  ;;  %1826 = vrot.lane.b32.xlu1 %v7033_v17, %s6491_s2 }
 0x937   :  { %1711 = vrot.lane.b32.xlu0 %v7039_v23, %s6490_s15 }
 0x93e   :  { %1686 = vrot.lane.b32.xlu2 %v7033_v17, %s6486_s27  ;;  %1847 = vrot.lane.b32.xlu1 %v7039_v23, %s6487_s16 }
 0x93f   :  { %1709 = vrot.lane.b32.xlu0 %v7039_v23, %s6486_s27 }
 0x946   :  { %1849 = vrot.lane.b32.xlu2 %v7039_v23, %s6491_s2  ;;  %1962 = vrot.lane.b32.xlu1 %v7033_v17, %s6488_s3 }
 0x947   :  { %1824 = vrot.lane.b32.xlu0 %v7033_v17, %s6487_s16 }
 0x94e   :  { %1964 = vrot.lane.b32.xlu2 %v7033_v17, %s6492_s5 }
 0x94f   :  { %1987 = vrot.lane.b32.xlu0 %v7039_v23, %s6492_s5 }
 0x956   :  { %1985 = vrot.lane.b32.xlu2 %v7039_v23, %s6488_s3 }
 0x990   :  { %v1574_v0 = vpop.permute.xlu2 %1573 }
 0x991   :  { %v1579_v2 = vsel %vm660_vm14, %v1574_v0, 0 }
 0x992   :  { %1588 = vmatpush.bf16.xpose.msrb.mxu3 %v1579_v2 }
 0x998   :  { %v1687_v25 = vpop.permute.xlu2 %1686 }
 0x999   :  { %5177 = vmatmul.msk.bf16.vlgmr.msrb.gmra.mxu3 %vm660_vm14, %v1545_v20 }
 0x9a0   :  { %v1689_v26 = vpop.permute.xlu1 %1688  ;;  %v1550_v62 = vpop.permute.xlu0 %1549 }
 0x9a1   :  { %v1694_v27 = vsel %vm660_vm14, %v1689_v26, 0  ;;  %v1555_v1 = vsel %vm660_vm14, %v1550_v62, 0  ;;  %v1850_v47 = vpop.permute.xlu2 %1849 }
 0x9a2   :  { %1564 = vmatpush.bf16.xpose.msrb.mxu2 %v1555_v1  ;;  %v1855_v34 = vsel %vm660_vm14, %v1850_v47, 0 }
 0x9a8   :  { %v1827_v29 = vpop.permute.xlu1 %1826 }
 0x9a9   :  { %v1832_v31 = vsel %vm660_vm14, %v1827_v29, 0  ;;  %v1712_v32 = vpop.permute.xlu0 %1711  ;;  %5176 = vmatmul.msk.bf16.vlgmr.msrb.gmra.mxu2 %vm660_vm14, %v1544_v14  ;;  %v1965_v36 = vpop.permute.xlu2 %1964 }
 0x9aa   :  { %1703 = vmatpush.bf16.xpose.msra.mxu2 %v1694_v27  ;;  %v1717_v33 = vsel %vm660_vm14, %v1712_v32, 0  ;;  %v1970_v37 = vsel %vm660_vm14, %v1965_v36, 0 }
 0x9ab   :  { %1726 = vmatpush.bf16.xpose.msra.mxu3 %v1717_v33 }
 0x9b0   :  { %v1848_v39 = vpop.permute.xlu1 %1847 }
 0x9b1   :  { %v1710_v35 = vpop.permute.xlu0 %1709  ;;  %v1986_v41 = vpop.permute.xlu2 %1985 }
 0x9b2   :  { %1841 = vmatpush.bf16.xpose.msrb.mxu2 %v1832_v31  ;;  %5181 = vmatmul.msk.bf16.vlgmr.msra.gmra.mxu3 %vm660_vm14, %v1710_v35 }
 0x9b3   :  { %1864 = vmatpush.bf16.xpose.msrb.mxu3 %v1855_v34 }
 0x9b8   :  { %v1963_v42 = vpop.permute.xlu1 %1962 }
 0x9b9   :  { %v1825_v30 = vpop.permute.xlu0 %1824  ;;  %5180 = vmatmul.msk.bf16.vlgmr.msra.gmra.mxu2 %vm660_vm14, %v1687_v25 }
 0x9ba   :  { %1979 = vmatpush.bf16.xpose.msra.mxu2 %v1970_v37 }
 0x9c1   :  { %v1988_v56 = vpop.permute.xlu0 %1987 }
 0x9c2   :  { %v1993_v40 = vsel %vm660_vm14, %v1988_v56, 0  ;;  %5185 = vmatmul.msk.bf16.vlgmr.msrb.gmra.mxu3 %vm660_vm14, %v1848_v39 }
 0x9c3   :  { %2002 = vmatpush.bf16.xpose.msra.mxu3 %v1993_v40 }
 0x9c9   :  { %5184 = vmatmul.msk.bf16.vlgmr.msrb.gmra.mxu2 %vm660_vm14, %v1825_v30 }
 0x9d2   :  { %5189 = vmatmul.msk.bf16.vlgmr.msra.gmra.mxu3 %vm660_vm14, %v1986_v41 }
 0x9d9   :  { %5188 = vmatmul.msk.bf16.vlgmr.msra.gmra.mxu2 %vm660_vm14, %v1963_v42 }
 0xa1c   :  { %v1590_v9 = vpop.f32.mrf.mxu3 }
 0xa1d   :  { %v1597_v44 = vsel %vm660_vm14, %v1590_v9, -inf }
 0xa1e   :  { %1598 = vmax.xlane.f32.xlu1 %v1597_v44 }
 0xa24   :  { %v1592_v45 = vpop.f32.mrf.mxu3 }
 0xa2c   :  { %v1566_v46 = vpop.f32.mrf.mxu2 }
 0xa2d   :  { %v1594_v6 = vsel %vm660_vm14, %v1566_v46, -inf }
 0xa2e   :  { %1595 = vmax.xlane.f32.xlu0 %v1594_v6 }
 0xa34   :  { %v1568_v43 = vpop.f32.mrf.mxu2 }
 0xa35   :  { %v7083_v48 = vpop.f32.mrf.mxu3 }
 0xa36   :  { %v1735_v50 = vsel %vm660_vm14, %v7083_v48, -inf }
 0xa37   :  { %1736 = vmax.xlane.f32.xlu0 %v1735_v50 }
 0xa3c   :  { %v1705_v51 = vpop.f32.mrf.mxu2 }
 0xa3d   :  { %v1730_v52 = vpop.f32.mrf.mxu3  ;;  %v1732_v38 = vsel %vm660_vm14, %v1705_v51, -inf }
 0xa3e   :  { %1733 = vmax.xlane.f32.xlu2 %v1732_v38 }
 0xa44   :  { %v1707_v54 = vpop.f32.mrf.mxu2 }
 0xa45   :  { %v7088_v55 = vpop.f32.mrf.mxu3 }
 0xa46   :  { %v1873_v57 = vsel %vm660_vm14, %v7088_v55, -inf }
 0xa47   :  { %1874 = vmax.xlane.f32.xlu1 %v1873_v57 }
 0xa4b   :  { %1644 = vrot.lane.b32.xlu0 %v7033_v17, %s6471_s10 }
 0xa4c   :  { %v1843_v16 = vpop.f32.mrf.mxu2 }
 0xa4d   :  { %v1868_v58 = vpop.f32.mrf.mxu3  ;;  %v1870_v59 = vsel %vm660_vm14, %v1843_v16, -inf }
 0xa4e   :  { %1871 = vmax.xlane.f32.xlu2 %v1870_v59 }
 0xa54   :  { %v1845_v61 = vpop.f32.mrf.mxu2 }
 0xa55   :  { %v2004_v63 = vpop.f32.mrf.mxu3 }
 0xa56   :  { %v2011_v60 = vsel %vm660_vm14, %v2004_v63, -inf }
 0xa57   :  { %2012 = vmax.xlane.f32.xlu2 %v2011_v60 }
 0xa5c   :  { %v1981_v3 = vpop.f32.mrf.mxu2 }
 0xa5d   :  { %v2006_v49 = vpop.f32.mrf.mxu3  ;;  %v2008_v53 = vsel %vm660_vm14, %v1981_v3, -inf }
 0xa64   :  { %v1983_v4 = vpop.f32.mrf.mxu2 }
 0xa75   :  { %2009 = vmax.xlane.f32.xlu0 %v2008_v53 }
 0xa91   :  { %v1599_v5 = vpop.xlane.xlu1 %1598 }
 0xa92   :  { %v1601_v7 = vsub.f32 %v1590_v9, %v1599_v5 }
 0xa94   :  { %v1604_v8 = vmul.f32 1.442695, %v1601_v7 }
 0xa96   :  { %5677 = vpow2.f32 %v1604_v8 }
 0xa9c   :  { %v7097_v10 = vpop.eup %5677 }
 0xa9d   :  { %v1609_v11 = vsel %vm660_vm14, %v7097_v10, 0.0 }
 0xa9e   :  { %1610 = vadd.xlane.f32.xlu0 %v1609_v11 }
 0xaa1   :  { %v1596_v12 = vpop.xlane.xlu0 %1595 }
 0xaa2   :  { %v1600_v13 = vsub.f32 %v1566_v46, %v1596_v12 }
 0xaa4   :  { %v1602_v14 = vmul.f32 1.442695, %v1600_v13 }
 0xaa6   :  { %5679 = vpow2.f32 %v1602_v14 }
 0xaaa   :  { %v1737_v21 = vpop.xlane.xlu0 %1736 }
 0xaab   :  { %v1739_v33 = vsub.f32 %v7083_v48, %v1737_v21 }
 0xaac   :  { %v7101_v15 = vpop.eup %5679 }
 0xaad   :  { %v1606_v18 = vsel %vm660_vm14, %v7101_v15, 0.0  ;;  %v1742_v34 = vmul.f32 1.442695, %v1739_v33 }
 0xaae   :  { %1607 = vadd.xlane.f32.xlu1 %v1606_v18 }
 0xab1   :  { %v1734_v19 = vpop.xlane.xlu2 %1733 }
 0xab2   :  { %1782 = vrot.lane.b32.xlu0 %v7033_v17, %s6495_s14  ;;  %v1738_v20 = vsub.f32 %v1705_v51, %v1734_v19 }
 0xab4   :  { %v1740_v0 = vmul.f32 1.442695, %v1738_v20 }
 0xab6   :  { %5681 = vpow2.f32 %v1740_v0 }
 0xaba   :  { %v1875_v37 = vpop.xlane.xlu1 %1874 }
 0xabb   :  { %v1877_v40 = vsub.f32 %v7088_v55, %v1875_v37 }
 0xabc   :  { %v7107_v2 = vpop.eup %5681 }
 0xabd   :  { %v1645_v25 = vpop.permute.xlu0 %1644  ;;  %v1744_v27 = vsel %vm660_vm14, %v7107_v2, 0.0  ;;  %v1880_v9 = vmul.f32 1.442695, %v1877_v40 }
 0xabe   :  { %v1650_v26 = vsel %vm757_vm4, %v1645_v25, 0  ;;  %1745 = vadd.xlane.f32.xlu2 %v1744_v27 }
 0xabf   :  { %1659 = vmatpush.bf16.msra.mxu0 %v1650_v26 }
 0xac1   :  { %v1872_v62 = vpop.xlane.xlu2 %1871 }
 0xac2   :  { %v1876_v35 = vsub.f32 %v1843_v16, %v1872_v62 }
 0xac4   :  { %v1878_v30 = vmul.f32 1.442695, %v1876_v35 }
 0xac7   :  { %1803 = vrot.lane.b32.xlu1 %v7039_v23, %s6495_s14 }
 0xaca   :  { %v2013_v1 = vpop.xlane.xlu2 %2012 }
 0xacb   :  { %v2015_v47 = vsub.f32 %v2004_v63, %v2013_v1 }
 0xacd   :  { %v2018_v29 = vmul.f32 1.442695, %v2015_v47 }
 0xacf   :  { %5683 = vpow2.f32 %v2018_v29 }
 0xad0   :  { %5685 = vpow2.f32 %v1742_v34 }
 0xad1   :  { %5687 = vpow2.f32 %v1878_v30 }
 0xad5   :  { %v7116_v31 = vpop.eup %5683 }
 0xad6   :  { %1665 = vrot.lane.b32.xlu2 %v7039_v23, %s6471_s10  ;;  %v2023_v32 = vsel %vm660_vm14, %v7116_v31, 0.0  ;;  %v7121_v39 = vpop.eup %5685 }
 0xad7   :  { %v1747_v41 = vsel %vm660_vm14, %v7121_v39, 0.0  ;;  %v7126_v44 = vpop.eup %5687 }
 0xad8   :  { %v1882_v45 = vsel %vm660_vm14, %v7126_v44, 0.0 }
 0xadc   :  { %2024 = vadd.xlane.f32.xlu0 %v2023_v32 }
 0xae8   :  { %v2010_v36 = vpop.xlane.xlu0 %2009 }
 0xae9   :  { %v2014_v56 = vsub.f32 %v1981_v3, %v2010_v36 }
 0xaeb   :  { %v2016_v42 = vmul.f32 1.442695, %v2014_v56 }
 0xaed   :  { %5689 = vpow2.f32 %v2016_v42 }
 0xaee   :  { %5691 = vpow2.f32 %v1880_v9 }
 0xaf1   :  { %1748 = vadd.xlane.f32.xlu1 %v1747_v41 }
 0xaf3   :  { %v7130_v46 = vpop.eup %5689 }
 0xaf4   :  { %v7132_v6 = vpop.eup %5691  ;;  %v2020_v43 = vsel %vm660_vm14, %v7130_v46, 0.0 }
 0xaf5   :  { %v1885_v48 = vsel %vm660_vm14, %v7132_v6, 0.0 }
 0xaf9   :  { %1883 = vadd.xlane.f32.xlu1 %v1882_v45 }
 0xaff   :  { %2021 = vadd.xlane.f32.xlu2 %v2020_v43 }
 0xb01   :  { %1886 = vadd.xlane.f32.xlu1 %v1885_v48 }
 0xb11   :  { %v1611_v50 = vpop.xlane.xlu0 %1610 }
 0xb12   :  { %5693 = vrcp.f32 %v1611_v50  ;;  %v1638_v4 = vand.u32 2147483648, %v1611_v50  ;;  %vm1632_vm13 = vweird.f32 %v1611_v50  ;;  %v1636_v53 = vand.u32 2147483647, %v1611_v50 }
 0xb14   :  { %vm1637_vm3 = vcmp.eq.f32.partialorder %v1636_v53, 8.507059e+37 }
 0xb17   :  { %2079 = vrot.lane.b32.xlu2 %v7039_v23, %s6496_s7 }
 0xb18   :  { %v5694_v51 = vpop.eup %5693 }
 0xb19   :  { %v1628_v38 = vmul.f32 %v5694_v51, %v1611_v50  ;;  %vm1633_vm11 = vweird.f32 %v5694_v51 }
 0xb1a   :  { %1920 = vrot.lane.b32.xlu1 %v7033_v17, %s6497_s13  ;;  %vm1634_vm1 = vmor %vm1632_vm13, %vm1633_vm11 }
 0xb1b   :  { %v1629_v57 = vsub.f32 1.0, %v1628_v38 }
 0xb1d   :  { %v1630_v59 = vmul.f32 %v5694_v51, %v1629_v57 }
 0xb1f   :  { %v1631_v3 = vadd.f32 %v5694_v51, %v1630_v59 }
 0xb21   :  { %v1608_v52 = vpop.xlane.xlu1 %1607  ;;  %v1635_v11 = vsel %vm1634_vm1, %v5694_v51, %v1631_v3 }
 0xb22   :  { %5695 = vrcp.f32 %v1608_v52  ;;  %1941 = vrot.lane.b32.xlu1 %v7039_v23, %s6497_s13  ;;  %v1623_v60 = vand.u32 2147483648, %v1608_v52  ;;  %v1621_v49 = vand.u32 2147483647, %v1608_v52  ;;  %vm1617_vm12 = vweird.f32 %v1608_v52 }
 0xb24   :  { %v1783_v54 = vpop.permute.xlu0 %1782  ;;  %v1624_v7 = vor.u32 1.1754944e-38, %v1623_v60  ;;  %vm1622_vm2 = vcmp.eq.f32.partialorder %v1621_v49, 8.507059e+37 }
 0xb25   :  { %v1788_v55 = vsel %vm757_vm4, %v1783_v54, 0 }
 0xb26   :  { %1797 = vmatpush.bf16.msrb.mxu0 %v1788_v55 }
 0xb28   :  { %v5696_v16 = vpop.eup %5695 }
 0xb29   :  { %v1613_v58 = vmul.f32 %v5696_v16, %v1608_v52  ;;  %vm1618_vm10 = vweird.f32 %v5696_v16 }
 0xb2a   :  { %2058 = vrot.lane.b32.xlu1 %v7033_v17, %s6496_s7  ;;  %vm1619_vm15 = vmor %vm1617_vm12, %vm1618_vm10  ;;  %v1639_v17 = vor.u32 1.1754944e-38, %v1638_v4 }
 0xb2b   :  { %v1614_v61 = vsub.f32 1.0, %v1613_v58 }
 0xb2c   :  { %v1640_v14 = vsel %vm1637_vm3, %v1639_v17, %v1635_v11 }
 0xb2d   :  { %v1615_v63 = vmul.f32 %v5696_v16, %v1614_v61  ;;  %v1641_v20 = vmul.f32 %v7097_v10, %v1640_v14 }
 0xb2f   :  { %v1616_v23 = vadd.f32 %v5696_v16, %v1615_v63  ;;  %v1643_v47 = vpack.c.bf16 %v1641_v20, %v1641_v20 }
 0xb31   :  { %v1620_v5 = vsel %vm1619_vm15, %v5696_v16, %v1616_v23  ;;  %v1746_v8 = vpop.xlane.xlu2 %1745 }
 0xb32   :  { %5697 = vrcp.f32 %v1746_v8  ;;  %v1625_v12 = vsel %vm1622_vm2, %v1624_v7, %v1620_v5  ;;  %v1761_v1 = vand.u32 2147483648, %v1746_v8  ;;  %v1759_v29 = vand.u32 2147483647, %v1746_v8 }
 0xb33   :  { %v1626_v13 = vmul.f32 %v7101_v15, %v1625_v12  ;;  %vm1755_vm6 = vweird.f32 %v1746_v8 }
 0xb34   :  { %v1762_v10 = vor.u32 1.1754944e-38, %v1761_v1  ;;  %vm1760_vm10 = vcmp.eq.f32.partialorder %v1759_v29, 8.507059e+37 }
 0xb35   :  { %v1642_v18 = vpack.c.bf16 %v1626_v13, %v1626_v13 }
 0xb37   :  { %5178 = vmatmul.msk.bf16.vlgmr.msra.gmra.mxu0 %vm660_vm14, %v1642_v18 }
 0xb38   :  { %v5698_v19 = vpop.eup %5697 }
 0xb39   :  { %v1751_v21 = vmul.f32 %v5698_v19, %v1746_v8  ;;  %v1666_v0 = vpop.permute.xlu2 %1665  ;;  %v1804_v25 = vpop.permute.xlu1 %1803  ;;  %vm1756_vm5 = vweird.f32 %v5698_v19 }
 0xb3a   :  { %v1671_v26 = vsel %vm757_vm4, %v1666_v0, 0  ;;  %v1809_v27 = vsel %vm757_vm4, %v1804_v25, 0  ;;  %vm1757_vm9 = vmor %vm1755_vm6, %vm1756_vm5 }
 0xb3b   :  { %v1752_v62 = vsub.f32 1.0, %v1751_v21  ;;  %1680 = vmatpush.bf16.msra.mxu1 %v1671_v26 }
 0xb3d   :  { %v1753_v15 = vmul.f32 %v5698_v19, %v1752_v62 }
 0xb3e   :  { %5179 = vmatmul.msk.bf16.vlgmr.msra.gmra.mxu1 %vm660_vm14, %v1643_v47 }
 0xb3f   :  { %1818 = vmatpush.bf16.msrb.mxu1 %v1809_v27  ;;  %v1754_v32 = vadd.f32 %v5698_v19, %v1753_v15 }
 0xb41   :  { %v1758_v33 = vsel %vm1757_vm9, %v5698_v19, %v1754_v32 }
 0xb42   :  { %v1763_v34 = vsel %vm1760_vm10, %v1762_v10, %v1758_v33 }
 0xb43   :  { %v1764_v35 = vmul.f32 %v7107_v2, %v1763_v34 }
 0xb45   :  { %v1780_v36 = vpack.c.bf16 %v1764_v35, %v1764_v35 }
 0xb47   :  { %5182 = vmatmul.msk.bf16.vlgmr.msrb.gmra.mxu0 %vm660_vm14, %v1780_v36 }
 0xb4f   :  { %v7157_v63 = vpop.xlane.xlu0 %2024 }
 0xb64   :  { %v1749_v30 = vpop.xlane.xlu1 %1748 }
 0xb65   :  { %5699 = vrcp.f32 %v1749_v30  ;;  %v1776_v9 = vand.u32 2147483648, %v1749_v30  ;;  %v1774_v45 = vand.u32 2147483647, %v1749_v30  ;;  %vm1770_vm12 = vweird.f32 %v1749_v30 }
 0xb67   :  { %v1777_v2 = vor.u32 1.1754944e-38, %v1776_v9  ;;  %vm1775_vm15 = vcmp.eq.f32.partialorder %v1774_v45, 8.507059e+37 }
 0xb6b   :  { %v5700_v37 = vpop.eup %5699 }
 0xb6c   :  { %v1766_v56 = vmul.f32 %v5700_v37, %v1749_v30  ;;  %v1884_v40 = vpop.xlane.xlu1 %1883  ;;  %vm1771_vm11 = vweird.f32 %v5700_v37 }
 0xb6d   :  { %5701 = vrcp.f32 %v1884_v40  ;;  %vm1772_vm13 = vmor %vm1770_vm12, %vm1771_vm11  ;;  %v1899_v4 = vand.u32 2147483648, %v1884_v40  ;;  %vm1893_vm2 = vweird.f32 %v1884_v40  ;;  %v1897_v23 = vand.u32 2147483647, %v1884_v40 }
 0xb6e   :  { %v1767_v41 = vsub.f32 1.0, %v1766_v56 }
 0xb6f   :  { %v1900_v7 = vor.u32 1.1754944e-38, %v1899_v4  ;;  %vm1898_vm5 = vcmp.eq.f32.partialorder %v1897_v23, 8.507059e+37 }
 0xb70   :  { %v1768_v42 = vmul.f32 %v5700_v37, %v1767_v41  ;;  %v2050_v41 = vand.u32 2147483647, %v7157_v63 }
 0xb72   :  { %v1769_v43 = vadd.f32 %v5700_v37, %v1768_v42  ;;  %v2022_v57 = vpop.xlane.xlu2 %2021 }
 0xb73   :  { %v5702_v48 = vpop.eup %5701  ;;  %v2037_v15 = vand.u32 2147483648, %v2022_v57 }
 0xb74   :  { %v1773_v50 = vsel %vm1772_vm13, %v5700_v37, %v1769_v43  ;;  %v1887_v51 = vpop.xlane.xlu1 %1886  ;;  %v1889_v52 = vmul.f32 %v5702_v48, %v1884_v40  ;;  %vm1894_vm1 = vweird.f32 %v5702_v48  ;;  %vm2031_vm13 = vweird.f32 %v2022_v57 }
 0xb75   :  { %5703 = vrcp.f32 %v1887_v51  ;;  %v1778_v38 = vsel %vm1775_vm15, %v1777_v2, %v1773_v50  ;;  %vm1895_vm3 = vmor %vm1893_vm2, %vm1894_vm1  ;;  %v1914_v13 = vand.u32 2147483648, %v1887_v51  ;;  %vm1908_vm9 = vweird.f32 %v1887_v51 }
 0xb76   :  { %v1779_v54 = vmul.f32 %v7121_v39, %v1778_v38  ;;  %v1890_v55 = vsub.f32 1.0, %v1889_v52  ;;  %5705 = vrcp.f32 %v2022_v57  ;;  %v1912_v14 = vand.u32 2147483647, %v1887_v51 }
 0xb77   :  { %5707 = vrcp.f32 %v7157_v63  ;;  %v1915_v26 = vor.u32 1.1754944e-38, %v1914_v13  ;;  %v2038_v36 = vor.u32 1.1754944e-38, %v2037_v15  ;;  %v5594_v15 = vld [vmem:[%s7867_s11] ss:$0 sm:$0xff] }
 0xb78   :  { %v1781_v16 = vpack.c.bf16 %v1779_v54, %v1779_v54  ;;  %v1891_v59 = vmul.f32 %v5702_v48, %v1890_v55  ;;  %vm1913_vm11 = vcmp.eq.f32.partialorder %v1912_v14, 8.507059e+37 }
 0xb7a   :  { %5183 = vmatmul.msk.bf16.vlgmr.msrb.gmra.mxu1 %vm660_vm14, %v1781_v16  ;;  %v1892_v60 = vadd.f32 %v5702_v48, %v1891_v59  ;;  %v2080_v29 = vpop.permute.xlu2 %2079 }
 0xb7b   :  { %v5704_v58 = vpop.eup %5703  ;;  %v2085_v30 = vsel %vm757_vm4, %v2080_v29, 0 }
 0xb7c   :  { %v1904_v61 = vmul.f32 %v5704_v58, %v1887_v51  ;;  %v5706_v49 = vpop.eup %5705  ;;  %v1896_v39 = vsel %vm1895_vm3, %v5702_v48, %v1892_v60  ;;  %vm1909_vm6 = vweird.f32 %v5704_v58  ;;  %vm2046_vm3 = vweird.f32 %v7157_v63 }
 0xb7d   :  { %v2027_v53 = vmul.f32 %v5706_v49, %v2022_v57  ;;  %v1901_v8 = vsel %vm1898_vm5, %v1900_v7, %v1896_v39  ;;  %v5708_v12 = vpop.eup %5707  ;;  %vm1910_vm10 = vmor %vm1908_vm9, %vm1909_vm6  ;;  %vm2032_vm12 = vweird.f32 %v5706_v49  ;;  %vm2051_vm6 = vcmp.eq.f32.partialorder %v2050_v41, 8.507059e+37  ;;  %v5404_v7 = vld [vmem:[#allocation32 + $0x8] sm:$0xff] }
 0xb7e   :  { %v1905_v3 = vsub.f32 1.0, %v1904_v61  ;;  %v1902_v18 = vmul.f32 %v7126_v44, %v1901_v8  ;;  %v2042_v20 = vmul.f32 %v5708_v12, %v7157_v63  ;;  %v2035_v44 = vand.u32 2147483647, %v2022_v57  ;;  %vm2033_vm15 = vmor %vm2031_vm13, %vm2032_vm12  ;;  %2160 = vmatpush.bf16.msrb.mxu2 %v5404_v7  ;;  %v5403_v8 = vld [vmem:[#allocation32] sm:$0xff] }
 0xb7f   :  { %v2028_v11 = vsub.f32 1.0, %v2027_v53  ;;  %vm2047_vm2 = vweird.f32 %v5708_v12 }
 0xb80   :  { %v1906_v5 = vmul.f32 %v5704_v58, %v1905_v3  ;;  %v1918_v27 = vpack.c.bf16 %v1902_v18, %v1902_v18  ;;  %v2043_v1 = vsub.f32 1.0, %v2042_v20  ;;  %vm2036_vm1 = vcmp.eq.f32.partialorder %v2035_v44, 8.507059e+37  ;;  %vm2048_vm5 = vmor %vm2046_vm3, %vm2047_vm2 }
 0xb81   :  { %v2029_v21 = vmul.f32 %v5706_v49, %v2028_v11 }
 0xb82   :  { %v1907_v17 = vadd.f32 %v5704_v58, %v1906_v5  ;;  %v2044_v33 = vmul.f32 %v5708_v12, %v2043_v1  ;;  %2161 = vmatpush.bf16.msrb.mxu2 %v5403_v8 }
 0xb83   :  { %v2030_v47 = vadd.f32 %v5706_v49, %v2029_v21 }
 0xb84   :  { %v1911_v0 = vsel %vm1910_vm10, %v5704_v58, %v1907_v17  ;;  %v2045_v40 = vadd.f32 %v5708_v12, %v2044_v33 }
 0xb85   :  { %v1916_v62 = vsel %vm1913_vm11, %v1915_v26, %v1911_v0  ;;  %v2034_v34 = vsel %vm2033_vm15, %v5706_v49, %v2030_v47 }
 0xb86   :  { %v1917_v32 = vmul.f32 %v7132_v6, %v1916_v62  ;;  %v2039_v56 = vsel %vm2036_vm1, %v2038_v36, %v2034_v34  ;;  %v2052_v6 = vand.u32 2147483648, %v7157_v63  ;;  %v2049_v45 = vsel %vm2048_vm5, %v5708_v12, %v2045_v40 }
 0xb87   :  { %v2040_v42 = vmul.f32 %v7130_v46, %v2039_v56 }
 0xb88   :  { %v1919_v37 = vpack.c.bf16 %v1917_v32, %v1917_v32  ;;  %v2053_v48 = vor.u32 1.1754944e-38, %v2052_v6 }
 0xb89   :  { %v2056_v50 = vpack.c.bf16 %v2040_v42, %v2040_v42 }
 0xb8a   :  { %v2054_v2 = vsel %vm2051_vm6, %v2053_v48, %v2049_v45  ;;  %v5406_v45 = vld [vmem:[#allocation34 + $0x8] sm:$0xff] }
 0xb8b   :  { %v2055_v51 = vmul.f32 %v7116_v31, %v2054_v2  ;;  %2265 = vmatpush.bf16.msrb.mxu3 %v5406_v45 }
 0xb8c   :  { %v1921_v19 = vpop.permute.xlu1 %1920 }
 0xb8d   :  { %v1926_v25 = vsel %vm757_vm4, %v1921_v19, 0  ;;  %v2057_v52 = vpack.c.bf16 %v2055_v51, %v2055_v51 }
 0xb8e   :  { %1935 = vmatpush.bf16.msra.mxu0 %v1926_v25 }
 0xb91   :  { %5186 = vmatmul.msk.bf16.vlgmr.msra.gmra.mxu0 %vm660_vm14, %v1918_v27 }
 0xb94   :  { %v1942_v10 = vpop.permute.xlu1 %1941 }
 0xb95   :  { %v1947_v35 = vsel %vm757_vm4, %v1942_v10, 0 }
 0xb96   :  { %1956 = vmatpush.bf16.msra.mxu1 %v1947_v35 }
 0xb99   :  { %5187 = vmatmul.msk.bf16.vlgmr.msra.gmra.mxu1 %vm660_vm14, %v1919_v37 }
 0xb9a   :  { %2094 = vmatpush.bf16.msrb.mxu1 %v2085_v30 }
 0xb9c   :  { %v2059_v9 = vpop.permute.xlu1 %2058 }
 0xb9d   :  { %v2064_v43 = vsel %vm757_vm4, %v2059_v9, 0 }
 0xb9e   :  { %2073 = vmatpush.bf16.msrb.mxu0 %v2064_v43  ;;  %v5405_v43 = vld [vmem:[#allocation34] sm:$0xff] }
 0xb9f   :  { %2266 = vmatpush.bf16.msrb.mxu3 %v5405_v43 }
 0xba1   :  { %5190 = vmatmul.msk.bf16.vlgmr.msrb.gmra.mxu0 %vm660_vm14, %v2056_v50 }
 0xba9   :  { %5191 = vmatmul.msk.bf16.vlgmr.msrb.gmra.mxu1 %vm660_vm14, %v2057_v52 }
 0xbb4   :  { %v1661_v38 = vpop.f32.mrf.mxu0 }
 0xbbb   :  { %v1682_v54 = vpop.f32.mrf.mxu1 }
 0xbbc   :  { %v1663_v46 = vpop.f32.mrf.mxu0 }
 0xbc3   :  { %v1684_v55 = vpop.f32.mrf.mxu1 }
 0xbc4   :  { %v1799_v57 = vpop.f32.mrf.mxu0 }
 0xbcc   :  { %v1801_v16 = vpop.f32.mrf.mxu0 }
 0xbf7   :  { %v1820_v58 = vpop.f32.mrf.mxu1 }
 0xbf8   :  { %v5520_v59 = vpack.i.bf16 %v1820_v58, %v1799_v57 }
 0xbfa   :  { %5521 = vrot.lane.b32.xlu1 %v5520_v59, %s6461_s1 }
 0xbff   :  { %v1822_v61 = vpop.f32.mrf.mxu1 }
 0xc0e   :  { %v1937_v63 = vpop.f32.mrf.mxu0 }
 0xc16   :  { %v1939_v60 = vpop.f32.mrf.mxu0  ;;  %v1958_v3 = vpop.f32.mrf.mxu1 }
 0xc17   :  { %v5525_v49 = vpack.i.bf16 %v1958_v3, %v1937_v63 }
 0xc19   :  { %5526 = vrot.lane.b32.xlu0 %v5525_v49, %s6493_s17 }
 0xc1e   :  { %v1960_v31 = vpop.f32.mrf.mxu1  ;;  %v2075_v4 = vpop.f32.mrf.mxu0 }
 0xc26   :  { %v2077_v23 = vpop.f32.mrf.mxu0  ;;  %v2096_v39 = vpop.f32.mrf.mxu1 }
 0xc27   :  { %v5530_v53 = vpack.i.bf16 %v2096_v39, %v2075_v4  ;;  %v5595_v39 = vld [vmem:[%s7868_s0] ss:$0 sm:$0xff] }
 0xc29   :  { %5531 = vrot.lane.b32.xlu1 %v5530_v53, %s6494_s28 }
 0xc2e   :  { %v2098_v5 = vpop.f32.mrf.mxu1 }
 0xc6c   :  { %v5522_v11 = vpop.permute.xlu1 %5521 }
 0xc6d   :  { %v5524_v12 = vunpack.i.h.bf16 %v5522_v11  ;;  %v5523_v13 = vunpack.i.l.bf16 %v5522_v11 }
 0xc6f   :  { %v2125_v20 = vsel %vm660_vm14, %v1682_v54, %v5524_v12  ;;  %v2124_v21 = vsel %vm660_vm14, %v1661_v38, %v5523_v13  ;;  %v5596_v12 = vld [vmem:[%s7869_s4] ss:$0 sm:$0xff] }
 0xc8b   :  { %v5527_v17 = vpop.permute.xlu0 %5526 }
 0xc8c   :  { %v5529_v14 = vunpack.i.h.bf16 %v5527_v17  ;;  %v5528_v18 = vunpack.i.l.bf16 %v5527_v17 }
 0xc8e   :  { %v2127_v26 = vsel %vm1244_vm7, %v2125_v20, %v5529_v14  ;;  %v2126_v27 = vsel %vm1244_vm7, %v2124_v21, %v5528_v18  ;;  %v5408_v20 = vld [vmem:[#allocation35 + $0x8] sm:$0xff]  ;;  %v5597_v21 = vld [vmem:[%s6644_s30] ss:$0 sm:$0xff] }
 0xc8f   :  { %2316 = vmatpush.bf16.msra.mxu0 %v5408_v20 }
 0xc9b   :  { %v5532_v19 = vpop.permute.xlu1 %5531 }
 0xc9c   :  { %v5534_v0 = vunpack.i.h.bf16 %v5532_v19  ;;  %v5533_v25 = vunpack.i.l.bf16 %v5532_v19 }
 0xc9e   :  { %v2128_v62 = vsel %vm1247_vm8, %v2126_v27, %v5533_v25  ;;  %v2129_v1 = vsel %vm1247_vm8, %v2127_v26, %v5534_v0  ;;  %v5407_v25 = vld [vmem:[#allocation35] sm:$0xff] }
 0xc9f   :  { %v2135_v47 = vpack.c.bf16 %v2129_v1, %v2128_v62  ;;  %2317 = vmatpush.bf16.msra.mxu0 %v5407_v25 }
 0xca1   :  { %5200 = vmatmul.msk.bf16.vlgmr.msrb.gmra.mxu2 %vm454_vm0, %v2135_v47 }
 0xd24   :  { %v2163_v44 = vpop.f32.mrf.mxu2 }
 0xd25   :  { %v2164_v29 = vadd.f32 %v5594_v15, %v2163_v44 }
 0xd27   :  { %v7188_v32 = vadd.f32 %v2164_v29, %v7008_v24 }
 0xd29   :  { %v2182_v10 = vsel %vm454_vm0, %v7188_v32, 0.0  ;;  %v2190_v33 = vmul.f32 %v7188_v32, %v7188_v32 }
 0xd2a   :  { %2183 = vadd.xlane.f32.xlu1 %v2182_v10 }
 0xd2b   :  { %v2192_v34 = vsel %vm454_vm0, %v2190_v33, 0.0 }
 0xd2c   :  { %v2165_v35 = vpop.f32.mrf.mxu2  ;;  %2193 = vadd.xlane.f32.xlu2 %v2192_v34 }
 0xd2d   :  { %v2166_v36 = vadd.f32 %v5594_v15, %v2165_v35 }
 0xd2f   :  { %v7196_v30 = vadd.f32 %v2166_v36, %v7016_v28 }
 0xd31   :  { %v2185_v37 = vsel %vm454_vm0, %v7196_v30, 0.0  ;;  %v2191_v24 = vmul.f32 %v7196_v30, %v7196_v30 }
 0xd32   :  { %2186 = vadd.xlane.f32.xlu0 %v2185_v37 }
 0xd33   :  { %v2195_v56 = vsel %vm454_vm0, %v2191_v24, 0.0 }
 0xd34   :  { %2196 = vadd.xlane.f32.xlu1 %v2195_v56 }
 0xd9d   :  { %v2184_v40 = vpop.xlane.xlu1 %2183 }
 0xd9e   :  { %v2188_v6 = vmul.f32 %v2184_v40, %v6824_v22 }
 0xd9f   :  { %v2194_v41 = vpop.xlane.xlu2 %2193 }
 0xda0   :  { %v2200_v42 = vmul.f32 %v2188_v6, %v2188_v6  ;;  %v2198_v9 = vmul.f32 %v2194_v41, %v6824_v22  ;;  %v2204_v4 = vsub.f32 %v7188_v32, %v2188_v6 }
 0xda2   :  { %v2202_v28 = vsub.f32 %v2198_v9, %v2200_v42 }
 0xda4   :  { %v2206_v48 = vadd.f32 1e-05, %v2202_v28  ;;  %v5598_v28 = vld [vmem:[%s6654_s19] ss:$0 sm:$0xff] }
 0xda5   :  { %v2187_v50 = vpop.xlane.xlu0 %2186 }
 0xda6   :  { %5709 = vrsqrt.f32 %v2206_v48  ;;  %v2189_v2 = vmul.f32 %v2187_v50, %v6824_v22  ;;  %vm2214_vm10 = vweird.f32 %v2206_v48 }
 0xda7   :  { %v2197_v51 = vpop.xlane.xlu1 %2196 }
 0xda8   :  { %v2201_v52 = vmul.f32 %v2189_v2, %v2189_v2  ;;  %v2199_v38 = vmul.f32 %v2197_v51, %v6824_v22  ;;  %v2205_v7 = vsub.f32 %v7196_v30, %v2189_v2 }
 0xdaa   :  { %v2203_v54 = vsub.f32 %v2199_v38, %v2201_v52 }
 0xdac   :  { %v5710_v46 = vpop.eup %5709  ;;  %v2207_v55 = vadd.f32 1e-05, %v2203_v54 }
 0xdad   :  { %v2209_v57 = vmul.f32 %v5710_v46, %v2206_v48  ;;  %vm2215_vm9 = vweird.f32 %v5710_v46 }
 0xdae   :  { %5711 = vrsqrt.f32 %v2207_v55  ;;  %vm2216_vm11 = vmor %vm2214_vm10, %vm2215_vm9  ;;  %vm2224_vm13 = vweird.f32 %v2207_v55 }
 0xdaf   :  { %v2210_v16 = vmul.f32 %v5710_v46, %v2209_v57 }
 0xdb1   :  { %v2211_v58 = vmul.f32 0.5, %v2210_v16 }
 0xdb3   :  { %v2212_v59 = vsub.f32 1.5, %v2211_v58 }
 0xdb4   :  { %v5712_v61 = vpop.eup %5711 }
 0xdb5   :  { %v2213_v63 = vmul.f32 %v5710_v46, %v2212_v59  ;;  %v2219_v60 = vmul.f32 %v5712_v61, %v2207_v55  ;;  %vm2225_vm12 = vweird.f32 %v5712_v61 }
 0xdb6   :  { %vm2226_vm15 = vmor %vm2224_vm13, %vm2225_vm12 }
 0xdb7   :  { %v2220_v3 = vmul.f32 %v5712_v61, %v2219_v60  ;;  %v2217_v49 = vsel %vm2216_vm11, %v5710_v46, %v2213_v63  ;;  %v5410_v60 = vld [vmem:[#allocation31 + $0x18] sm:$0xff] }
 0xdb8   :  { %v2228_v53 = vmul.f32 %v2217_v49, %v2204_v4  ;;  %2420 = vmatpush.bf16.msra.mxu1 %v5410_v60 }
 0xdb9   :  { %v2221_v31 = vmul.f32 0.5, %v2220_v3  ;;  %v5409_v3 = vld [vmem:[#allocation31 + $0x10] sm:$0xff] }
 0xdba   :  { %v2233_v11 = vmul.f32 %v5595_v39, %v2228_v53 }
 0xdbb   :  { %v2222_v23 = vsub.f32 1.5, %v2221_v31 }
 0xdbc   :  { %v2238_v14 = vadd.f32 %v5596_v12, %v2233_v11  ;;  %2421 = vmatpush.bf16.msra.mxu1 %v5409_v3 }
 0xdbd   :  { %v2223_v5 = vmul.f32 %v5712_v61, %v2222_v23 }
 0xdbf   :  { %v2227_v8 = vsel %vm2226_vm15, %v5712_v61, %v2223_v5 }
 0xdc0   :  { %v2229_v17 = vmul.f32 %v2227_v8, %v2205_v7 }
 0xdc2   :  { %v2234_v13 = vmul.f32 %v5595_v39, %v2229_v17 }
 0xdc4   :  { %v2239_v18 = vadd.f32 %v5596_v12, %v2234_v13 }
 0xdc6   :  { %v2240_v19 = vpack.c.bf16 %v2239_v18, %v2238_v14 }
 0xdc8   :  { %5209 = vmatmul.msk.bf16.vlgmr.msrb.gmra.mxu3 %vm454_vm0, %v2240_v19 }
 0xe4b   :  { %v2268_v0 = vpop.f32.mrf.mxu3 }
 0xe4c   :  { %v2269_v26 = vadd.f32 %v5597_v21, %v2268_v0 }
 0xe4e   :  { %v2273_v27 = vmul.f32 %v2269_v26, %v2269_v26 }
 0xe50   :  { %v2275_v62 = vmul.f32 %v2273_v27, %v2269_v26  ;;  %v5599_v27 = vld [vmem:[%s7864_s18 + $0x1] ss:$0 sm:$0xff] }
 0xe52   :  { %v2277_v1 = vmul.f32 0.044715, %v2275_v62 }
 0xe53   :  { %v2270_v47 = vpop.f32.mrf.mxu3 }
 0xe54   :  { %v2279_v15 = vadd.f32 %v2277_v1, %v2269_v26  ;;  %v2271_v44 = vadd.f32 %v5597_v21, %v2270_v47 }
 0xe56   :  { %v2281_v29 = vmul.f32 0.7978846, %v2279_v15  ;;  %v2274_v10 = vmul.f32 %v2271_v44, %v2271_v44 }
 0xe58   :  { %v2276_v33 = vmul.f32 %v2274_v10, %v2271_v44  ;;  %5713 = vtanh.f32 %v2281_v29  ;;  %v5600_v10 = vld [vmem:[%s7865_s9 + $0x1] ss:$0 sm:$0xff] }
 0xe5a   :  { %v2278_v34 = vmul.f32 0.044715, %v2276_v33 }
 0xe5c   :  { %v2280_v35 = vadd.f32 %v2278_v34, %v2271_v44 }
 0xe5e   :  { %v2282_v36 = vmul.f32 0.7978846, %v2280_v35  ;;  %v5714_v37 = vpop.eup %5713 }
 0xe5f   :  { %v2285_v24 = vadd.f32 1.0, %v5714_v37  ;;  %v5601_v37 = vld [vmem:[%s7866_s20 + $0x1] ss:$0 sm:$0xff] }
 0xe60   :  { %5715 = vtanh.f32 %v2282_v36 }
 0xe61   :  { %v2287_v40 = vmul.f32 0.5, %v2285_v24 }
 0xe63   :  { %v2289_v42 = vmul.f32 %v2287_v40, %v2269_v26 }
 0xe66   :  { %v5716_v56 = vpop.eup %5715 }
 0xe67   :  { %v2286_v6 = vadd.f32 1.0, %v5716_v56 }
 0xe69   :  { %v2288_v41 = vmul.f32 0.5, %v2286_v6 }
 0xe6b   :  { %v2290_v9 = vmul.f32 %v2288_v41, %v2271_v44 }
 0xe6d   :  { %v2291_v45 = vpack.c.bf16 %v2290_v9, %v2289_v42 }
 0xe6f   :  { %5218 = vmatmul.msk.bf16.vlgmr.msra.gmra.mxu0 %vm454_vm0, %v2291_v45 }
 0xeec   :  { %v2319_v43 = vpop.f32.mrf.mxu0 }
 0xeed   :  { %v2320_v48 = vadd.f32 %v5598_v28, %v2319_v43 }
 0xeef   :  { %v7216_v50 = vadd.f32 %v2320_v48, %v7188_v32 }
 0xef1   :  { %v2330_v2 = vsel %vm454_vm0, %v7216_v50, 0.0  ;;  %v2338_v51 = vmul.f32 %v7216_v50, %v7216_v50 }
 0xef2   :  { %2331 = vadd.xlane.f32.xlu0 %v2330_v2 }
 0xef3   :  { %v2340_v52 = vsel %vm454_vm0, %v2338_v51, 0.0 }
 0xef4   :  { %v2321_v38 = vpop.f32.mrf.mxu0  ;;  %2341 = vadd.xlane.f32.xlu1 %v2340_v52 }
 0xef5   :  { %v2322_v54 = vadd.f32 %v5598_v28, %v2321_v38 }
 0xef7   :  { %v7224_v46 = vadd.f32 %v2322_v54, %v7196_v30 }
 0xef9   :  { %v2333_v55 = vsel %vm454_vm0, %v7224_v46, 0.0  ;;  %v2339_v32 = vmul.f32 %v7224_v46, %v7224_v46 }
 0xefa   :  { %2334 = vadd.xlane.f32.xlu2 %v2333_v55 }
 0xefb   :  { %v2343_v57 = vsel %vm454_vm0, %v2339_v32, 0.0 }
 0xefc   :  { %2344 = vadd.xlane.f32.xlu0 %v2343_v57 }
 0xf65   :  { %v2332_v16 = vpop.xlane.xlu0 %2331 }
 0xf66   :  { %v2336_v58 = vmul.f32 %v2332_v16, %v6824_v22 }
 0xf67   :  { %v2342_v59 = vpop.xlane.xlu1 %2341 }
 0xf68   :  { %v2348_v61 = vmul.f32 %v2336_v58, %v2336_v58  ;;  %v2346_v63 = vmul.f32 %v2342_v59, %v6824_v22  ;;  %v2352_v25 = vsub.f32 %v7216_v50, %v2336_v58 }
 0xf6a   :  { %v2350_v30 = vsub.f32 %v2346_v63, %v2348_v61 }
 0xf6c   :  { %v2354_v49 = vadd.f32 1e-05, %v2350_v30 }
 0xf6d   :  { %v2335_v31 = vpop.xlane.xlu2 %2334 }
 0xf6e   :  { %5717 = vrsqrt.f32 %v2354_v49  ;;  %v2337_v4 = vmul.f32 %v2335_v31, %v6824_v22  ;;  %vm2362_vm2 = vweird.f32 %v2354_v49 }
 0xf6f   :  { %v2345_v23 = vpop.xlane.xlu0 %2344 }
 0xf70   :  { %v2349_v39 = vmul.f32 %v2337_v4, %v2337_v4  ;;  %v2347_v53 = vmul.f32 %v2345_v23, %v6824_v22  ;;  %v2353_v47 = vsub.f32 %v7224_v46, %v2337_v4 }
 0xf72   :  { %v2351_v5 = vsub.f32 %v2347_v53, %v2349_v39 }
 0xf74   :  { %v5718_v7 = vpop.eup %5717  ;;  %v2355_v8 = vadd.f32 1e-05, %v2351_v5 }
 0xf75   :  { %v2357_v11 = vmul.f32 %v5718_v7, %v2354_v49  ;;  %vm2363_vm1 = vweird.f32 %v5718_v7 }
 0xf76   :  { %5719 = vrsqrt.f32 %v2355_v8  ;;  %vm2364_vm3 = vmor %vm2362_vm2, %vm2363_vm1  ;;  %vm2372_vm6 = vweird.f32 %v2355_v8 }
 0xf77   :  { %v2358_v17 = vmul.f32 %v5718_v7, %v2357_v11 }
 0xf79   :  { %v2359_v12 = vmul.f32 0.5, %v2358_v17 }
 0xf7b   :  { %v2360_v13 = vsub.f32 1.5, %v2359_v12 }
 0xf7c   :  { %v5720_v14 = vpop.eup %5719 }
 0xf7d   :  { %v2361_v18 = vmul.f32 %v5718_v7, %v2360_v13  ;;  %v2367_v19 = vmul.f32 %v5720_v14, %v2355_v8  ;;  %vm2373_vm5 = vweird.f32 %v5720_v14 }
 0xf7e   :  { %vm2374_vm9 = vmor %vm2372_vm6, %vm2373_vm5 }
 0xf7f   :  { %v2368_v20 = vmul.f32 %v5720_v14, %v2367_v19  ;;  %v2365_v21 = vsel %vm2364_vm3, %v5718_v7, %v2361_v18 }
 0xf80   :  { %v2376_v62 = vmul.f32 %v2365_v21, %v2352_v25 }
 0xf81   :  { %v2369_v0 = vmul.f32 0.5, %v2368_v20 }
 0xf82   :  { %v2381_v44 = vmul.f32 %v5599_v27, %v2376_v62 }
 0xf83   :  { %v2370_v26 = vsub.f32 1.5, %v2369_v0 }
 0xf84   :  { %v2386_v34 = vadd.f32 %v5600_v10, %v2381_v44 }
 0xf85   :  { %v2371_v1 = vmul.f32 %v5720_v14, %v2370_v26 }
 0xf87   :  { %v2375_v15 = vsel %vm2374_vm9, %v5720_v14, %v2371_v1 }
 0xf88   :  { %v2377_v29 = vmul.f32 %v2375_v15, %v2353_v47 }
 0xf8a   :  { %v2382_v33 = vmul.f32 %v5599_v27, %v2377_v29 }
 0xf8c   :  { %v2387_v35 = vadd.f32 %v5600_v10, %v2382_v33 }
 0xf8e   :  { %v2395_v36 = vpack.c.bf16 %v2387_v35, %v2386_v34 }
 0xf90   :  { %5230 = vmatmul.msk.bf16.vlgmr.msra.gmra.mxu1 %vm454_vm0, %v2395_v36 }
0x100d   :  { %v2423_v24 = vpop.f32.mrf.mxu1 }
0x100e   :  { %v2424_v56 = vadd.f32 %v5601_v37, %v2423_v24 }
0x1010   :  { %v2428_v40 = vpack.c.bf16 %v2424_v56, %v2424_v56 }
0x1012   :  { %v2431_v6 = vunpack.c.l.b16 %v2428_v40 }
0x1014   :  { %v7241_v41 = vpack.c.b16 %v2431_v6, %v2431_v6 }
0x1015   :  { %v2425_v42 = vpop.f32.mrf.mxu1 }
0x1016   :  { %v2426_v9 = vadd.f32 %v5601_v37, %v2425_v42  ;;  %2572 = vrot.lane.b32.xlu0 %v7241_v41, %s6490_s15  ;;  %2433 = vrot.lane.b32.xlu2 %v7241_v41, %s6489_s6 }
0x1018   :  { %v2429_v45 = vpack.c.bf16 %v2426_v9, %v2426_v9 }
0x101a   :  { %v2455_v28 = vunpack.c.l.b16 %v2429_v45 }
0x101c   :  { %v7247_v43 = vpack.c.b16 %v2455_v28, %v2455_v28 }
0x101e   :  { %2457 = vrot.lane.b32.xlu1 %v7247_v43, %s6489_s6  ;;  %2570 = vrot.lane.b32.xlu0 %v7241_v41, %s6486_s27 }
0x101f   :  { %2595 = vrot.lane.b32.xlu2 %v7247_v43, %s6490_s15 }
0x1026   :  { %2593 = vrot.lane.b32.xlu1 %v7247_v43, %s6486_s27  ;;  %2733 = vrot.lane.b32.xlu0 %v7247_v43, %s6491_s2 }
0x1027   :  { %2710 = vrot.lane.b32.xlu2 %v7241_v41, %s6491_s2 }
0x102e   :  { %2708 = vrot.lane.b32.xlu1 %v7241_v41, %s6487_s16  ;;  %2848 = vrot.lane.b32.xlu0 %v7241_v41, %s6492_s5 }
0x102f   :  { %2731 = vrot.lane.b32.xlu2 %v7247_v43, %s6487_s16 }
0x1036   :  { %2871 = vrot.lane.b32.xlu1 %v7247_v43, %s6492_s5  ;;  %2869 = vrot.lane.b32.xlu0 %v7247_v43, %s6488_s3 }
0x1037   :  { %2846 = vrot.lane.b32.xlu2 %v7241_v41, %s6488_s3 }
0x1070   :  { %v2434_v48 = vpop.permute.xlu2 %2433 }
0x1071   :  { %v2439_v2 = vsel %vm660_vm14, %v2434_v48, 0 }
0x1072   :  { %2448 = vmatpush.bf16.xpose.msra.mxu2 %v2439_v2 }
0x1079   :  { %5231 = vmatmul.msk.bf16.vlgmr.msra.gmra.mxu2 %vm660_vm14, %v2428_v40  ;;  %v2596_v51 = vpop.permute.xlu2 %2595 }
0x107a   :  { %v2601_v58 = vsel %vm660_vm14, %v2596_v51, 0 }
0x1081   :  { %v2711_v52 = vpop.permute.xlu2 %2710 }
0x1082   :  { %v2716_v55 = vsel %vm660_vm14, %v2711_v52, 0 }
0x1088   :  { %v2573_v38 = vpop.permute.xlu0 %2572 }
0x1089   :  { %v2578_v54 = vsel %vm660_vm14, %v2573_v38, 0  ;;  %v2732_v49 = vpop.permute.xlu2 %2731 }
0x108a   :  { %2587 = vmatpush.bf16.xpose.msrb.mxu2 %v2578_v54 }
0x1090   :  { %v2458_v32 = vpop.permute.xlu1 %2457  ;;  %v2571_v57 = vpop.permute.xlu0 %2570 }
0x1091   :  { %v2463_v16 = vsel %vm660_vm14, %v2458_v32, 0  ;;  %5235 = vmatmul.msk.bf16.vlgmr.msrb.gmra.mxu2 %vm660_vm14, %v2571_v57  ;;  %v2847_v23 = vpop.permute.xlu2 %2846 }
0x1092   :  { %2725 = vmatpush.bf16.xpose.msra.mxu2 %v2716_v55  ;;  %2472 = vmatpush.bf16.xpose.msra.mxu3 %v2463_v16 }
0x1098   :  { %v2594_v59 = vpop.permute.xlu1 %2593  ;;  %v2734_v61 = vpop.permute.xlu0 %2733 }
0x1099   :  { %v2739_v63 = vsel %vm660_vm14, %v2734_v61, 0  ;;  %5232 = vmatmul.msk.bf16.vlgmr.msra.gmra.mxu3 %vm660_vm14, %v2429_v45 }
0x109a   :  { %2610 = vmatpush.bf16.xpose.msrb.mxu3 %v2601_v58 }
0x10a0   :  { %v2709_v60 = vpop.permute.xlu1 %2708  ;;  %v2849_v30 = vpop.permute.xlu0 %2848 }
0x10a1   :  { %v2854_v3 = vsel %vm660_vm14, %v2849_v30, 0  ;;  %5239 = vmatmul.msk.bf16.vlgmr.msra.gmra.mxu2 %vm660_vm14, %v2709_v60 }
0x10a2   :  { %2748 = vmatpush.bf16.xpose.msra.mxu3 %v2739_v63  ;;  %2863 = vmatpush.bf16.xpose.msrb.mxu2 %v2854_v3 }
0x10a8   :  { %v2872_v31 = vpop.permute.xlu1 %2871  ;;  %v2870_v39 = vpop.permute.xlu0 %2869 }
0x10a9   :  { %v2877_v4 = vsel %vm660_vm14, %v2872_v31, 0  ;;  %5236 = vmatmul.msk.bf16.vlgmr.msrb.gmra.mxu3 %vm660_vm14, %v2594_v59 }
0x10aa   :  { %2886 = vmatpush.bf16.xpose.msrb.mxu3 %v2877_v4 }
0x10b1   :  { %5243 = vmatmul.msk.bf16.vlgmr.msrb.gmra.mxu2 %vm660_vm14, %v2847_v23 }
0x10b9   :  { %5240 = vmatmul.msk.bf16.vlgmr.msra.gmra.mxu3 %vm660_vm14, %v2732_v49 }
0x10c9   :  { %5244 = vmatmul.msk.bf16.vlgmr.msrb.gmra.mxu3 %vm660_vm14, %v2870_v39 }
0x10fc   :  { %v2450_v53 = vpop.f32.mrf.mxu2 }
0x10fd   :  { %v2478_v5 = vsel %vm660_vm14, %v2450_v53, -inf }
0x10fe   :  { %2479 = vmax.xlane.f32.xlu1 %v2478_v5 }
0x1104   :  { %v2452_v7 = vpop.f32.mrf.mxu2 }
0x1114   :  { %v2589_v8 = vpop.f32.mrf.mxu2 }
0x1115   :  { %v2616_v11 = vsel %vm660_vm14, %v2589_v8, -inf }
0x1116   :  { %2617 = vmax.xlane.f32.xlu0 %v2616_v11 }
0x111c   :  { %v2474_v17 = vpop.f32.mrf.mxu3  ;;  %v2591_v12 = vpop.f32.mrf.mxu2 }
0x111d   :  { %v2481_v13 = vsel %vm660_vm14, %v2474_v17, -inf }
0x111e   :  { %2482 = vmax.xlane.f32.xlu2 %v2481_v13 }
0x1124   :  { %v2476_v14 = vpop.f32.mrf.mxu3  ;;  %v2727_v18 = vpop.f32.mrf.mxu2 }
0x1125   :  { %v2754_v19 = vsel %vm660_vm14, %v2727_v18, -inf }
0x1126   :  { %2755 = vmax.xlane.f32.xlu2 %v2754_v19 }
0x112c   :  { %v2612_v20 = vpop.f32.mrf.mxu3  ;;  %v2729_v21 = vpop.f32.mrf.mxu2 }
0x112d   :  { %v2619_v0 = vsel %vm660_vm14, %v2612_v20, -inf }
0x112e   :  { %2620 = vmax.xlane.f32.xlu1 %v2619_v0 }
0x1134   :  { %v2614_v25 = vpop.f32.mrf.mxu3  ;;  %v7294_v26 = vpop.f32.mrf.mxu2 }
0x1135   :  { %v2892_v10 = vsel %vm660_vm14, %v7294_v26, -inf }
0x113c   :  { %v2750_v27 = vpop.f32.mrf.mxu3  ;;  %v2867_v62 = vpop.f32.mrf.mxu2 }
0x113d   :  { %v2757_v1 = vsel %vm660_vm14, %v2750_v27, -inf }
0x113e   :  { %2758 = vmax.xlane.f32.xlu0 %v2757_v1 }
0x1144   :  { %v2752_v47 = vpop.f32.mrf.mxu3 }
0x1147   :  { %2528 = vrot.lane.b32.xlu1 %v7241_v41, %s6471_s10 }
0x114c   :  { %v2888_v15 = vpop.f32.mrf.mxu3 }
0x114d   :  { %v2895_v44 = vsel %vm660_vm14, %v2888_v15, -inf }
0x114e   :  { %2896 = vmax.xlane.f32.xlu2 %v2895_v44 }
0x1154   :  { %v2890_v29 = vpop.f32.mrf.mxu3 }
0x1171   :  { %v2480_v33 = vpop.xlane.xlu1 %2479  ;;  %2893 = vmax.xlane.f32.xlu1 %v2892_v10 }
0x1172   :  { %v2484_v34 = vsub.f32 %v2450_v53, %v2480_v33 }
0x1174   :  { %v2486_v35 = vmul.f32 1.442695, %v2484_v34 }
0x1176   :  { %5721 = vpow2.f32 %v2486_v35 }
0x117c   :  { %v7302_v36 = vpop.eup %5721 }
0x117d   :  { %v2490_v37 = vsel %vm660_vm14, %v7302_v36, 0.0 }
0x117e   :  { %2491 = vadd.xlane.f32.xlu0 %v2490_v37 }
0x1189   :  { %v2618_v24 = vpop.xlane.xlu0 %2617 }
0x118a   :  { %v2622_v56 = vsub.f32 %v2589_v8, %v2618_v24 }
0x118c   :  { %v2624_v40 = vmul.f32 1.442695, %v2622_v56 }
0x118e   :  { %5723 = vpow2.f32 %v2624_v40 }
0x1191   :  { %v2483_v6 = vpop.xlane.xlu2 %2482 }
0x1192   :  { %v2485_v42 = vsub.f32 %v2474_v17, %v2483_v6  ;;  %2666 = vrot.lane.b32.xlu0 %v7241_v41, %s6495_s14 }
0x1194   :  { %v7308_v9 = vpop.eup %5723  ;;  %v2488_v45 = vmul.f32 1.442695, %v2485_v42 }
0x1195   :  { %v2628_v28 = vsel %vm660_vm14, %v7308_v9, 0.0 }
0x1196   :  { %5725 = vpow2.f32 %v2488_v45  ;;  %2629 = vadd.xlane.f32.xlu2 %v2628_v28 }
0x1199   :  { %v2756_v54 = vpop.xlane.xlu2 %2755 }
0x119a   :  { %v2760_v55 = vsub.f32 %v2727_v18, %v2756_v54 }
0x119c   :  { %v7312_v48 = vpop.eup %5725  ;;  %v2762_v32 = vmul.f32 1.442695, %v2760_v55 }
0x119d   :  { %v2493_v2 = vsel %vm660_vm14, %v7312_v48, 0.0 }
0x119e   :  { %2494 = vadd.xlane.f32.xlu1 %v2493_v2 }
0x11a1   :  { %v2621_v51 = vpop.xlane.xlu1 %2620 }
0x11a2   :  { %v2623_v52 = vsub.f32 %v2612_v20, %v2621_v51 }
0x11a4   :  { %v2626_v38 = vmul.f32 1.442695, %v2623_v52 }
0x11a6   :  { %5727 = vpow2.f32 %v2626_v38 }
0x11a7   :  { %5729 = vpow2.f32 %v2762_v32 }
0x11ac   :  { %v7320_v16 = vpop.eup %5727 }
0x11ad   :  { %v2631_v63 = vsel %vm660_vm14, %v7320_v16, 0.0  ;;  %v7325_v30 = vpop.eup %5729 }
0x11ae   :  { %2549 = vrot.lane.b32.xlu2 %v7247_v43, %s6471_s10  ;;  %v2766_v3 = vsel %vm660_vm14, %v7325_v30, 0.0 }
0x11b1   :  { %v2759_v57 = vpop.xlane.xlu0 %2758 }
0x11b2   :  { %v2761_v59 = vsub.f32 %v2750_v27, %v2759_v57 }
0x11b4   :  { %v2764_v60 = vmul.f32 1.442695, %v2761_v59 }
0x11b6   :  { %5731 = vpow2.f32 %v2764_v60 }
0x11b7   :  { %2687 = vrot.lane.b32.xlu1 %v7247_v43, %s6495_s14 }
0x11b9   :  { %v2529_v58 = vpop.permute.xlu1 %2528 }
0x11ba   :  { %v2534_v61 = vsel %vm757_vm4, %v2529_v58, 0 }
0x11bb   :  { %2543 = vmatpush.bf16.msrb.mxu0 %v2534_v61 }
0x11bc   :  { %2632 = vadd.xlane.f32.xlu0 %v2631_v63  ;;  %v7329_v49 = vpop.eup %5731 }
0x11bd   :  { %v2769_v31 = vsel %vm660_vm14, %v7329_v49, 0.0 }
0x11c1   :  { %v2897_v4 = vpop.xlane.xlu2 %2896 }
0x11c2   :  { %v2899_v23 = vsub.f32 %v2888_v15, %v2897_v4 }
0x11c4   :  { %2767 = vadd.xlane.f32.xlu0 %v2766_v3  ;;  %v2902_v39 = vmul.f32 1.442695, %v2899_v23 }
0x11c6   :  { %5733 = vpow2.f32 %v2902_v39 }
0x11cc   :  { %2770 = vadd.xlane.f32.xlu0 %v2769_v31  ;;  %v7333_v53 = vpop.eup %5733 }
0x11cd   :  { %v2907_v5 = vsel %vm660_vm14, %v7333_v53, 0.0 }
0x11e0   :  { %2804 = vrot.lane.b32.xlu0 %v7241_v41, %s6497_s13 }
0x11e1   :  { %2908 = vadd.xlane.f32.xlu1 %v2907_v5 }
0x11e4   :  { %v2894_v7 = vpop.xlane.xlu1 %2893 }
0x11e5   :  { %v2898_v8 = vsub.f32 %v7294_v26, %v2894_v7 }
0x11e7   :  { %v2900_v11 = vmul.f32 1.442695, %v2898_v8 }
0x11e8   :  { %2825 = vrot.lane.b32.xlu0 %v7247_v43, %s6497_s13 }
0x11e9   :  { %5735 = vpow2.f32 %v2900_v11 }
0x11ef   :  { %v7342_v17 = vpop.eup %5735 }
0x11f0   :  { %2942 = vrot.lane.b32.xlu0 %v7241_v41, %s6496_s7  ;;  %v2904_v12 = vsel %vm660_vm14, %v7342_v17, 0.0 }
0x11f1   :  { %v2492_v13 = vpop.xlane.xlu0 %2491  ;;  %2905 = vadd.xlane.f32.xlu2 %v2904_v12 }
0x11f2   :  { %5737 = vrcp.f32 %v2492_v13  ;;  %v2507_v20 = vand.u32 2147483648, %v2492_v13  ;;  %v2505_v0 = vand.u32 2147483647, %v2492_v13  ;;  %vm2501_vm11 = vweird.f32 %v2492_v13 }
0x11f4   :  { %v2508_v41 = vor.u32 1.1754944e-38, %v2507_v20  ;;  %vm2506_vm13 = vcmp.eq.f32.partialorder %v2505_v0, 8.507059e+37 }
0x11f8   :  { %v5738_v14 = vpop.eup %5737  ;;  %2963 = vrot.lane.b32.xlu0 %v7247_v43, %s6496_s7 }
0x11f9   :  { %v2497_v18 = vmul.f32 %v5738_v14, %v2492_v13  ;;  %vm2502_vm10 = vweird.f32 %v5738_v14 }
0x11fa   :  { %vm2503_vm12 = vmor %vm2501_vm11, %vm2502_vm10 }
0x11fb   :  { %v2498_v19 = vsub.f32 1.0, %v2497_v18 }
0x11fd   :  { %v2499_v21 = vmul.f32 %v5738_v14, %v2498_v19 }
0x11ff   :  { %v2500_v25 = vadd.f32 %v5738_v14, %v2499_v21 }
0x1201   :  { %v2504_v26 = vsel %vm2503_vm12, %v5738_v14, %v2500_v25 }
0x1202   :  { %v2509_v27 = vsel %vm2506_vm13, %v2508_v41, %v2504_v26 }
0x1203   :  { %v2510_v62 = vmul.f32 %v7302_v36, %v2509_v27 }
0x1204   :  { %v2667_v1 = vpop.permute.xlu0 %2666 }
0x1205   :  { %v2672_v47 = vsel %vm757_vm4, %v2667_v1, 0  ;;  %v2526_v15 = vpack.c.bf16 %v2510_v62, %v2510_v62 }
0x1206   :  { %2681 = vmatpush.bf16.msra.mxu0 %v2672_v47 }
0x1207   :  { %5233 = vmatmul.msk.bf16.vlgmr.msrb.gmra.mxu0 %vm660_vm14, %v2526_v15 }
0x1209   :  { %v2630_v43 = vpop.xlane.xlu2 %2629 }
0x120a   :  { %5739 = vrcp.f32 %v2630_v43  ;;  %v2645_v37 = vand.u32 2147483648, %v2630_v43  ;;  %v2643_v24 = vand.u32 2147483647, %v2630_v43  ;;  %vm2639_vm1 = vweird.f32 %v2630_v43 }
0x120c   :  { %v2646_v6 = vor.u32 1.1754944e-38, %v2645_v37  ;;  %vm2644_vm3 = vcmp.eq.f32.partialorder %v2643_v24, 8.507059e+37 }
0x1210   :  { %v5740_v44 = vpop.eup %5739 }
0x1211   :  { %v2635_v29 = vmul.f32 %v5740_v44, %v2630_v43  ;;  %v2495_v10 = vpop.xlane.xlu1 %2494  ;;  %v2550_v33 = vpop.permute.xlu2 %2549  ;;  %vm2640_vm15 = vweird.f32 %v5740_v44 }
0x1212   :  { %5741 = vrcp.f32 %v2495_v10  ;;  %v2555_v35 = vsel %vm757_vm4, %v2550_v33, 0  ;;  %vm2641_vm2 = vmor %vm2639_vm1, %vm2640_vm15  ;;  %v2522_v52 = vand.u32 2147483648, %v2495_v10  ;;  %v2520_v55 = vand.u32 2147483647, %v2495_v10 }
0x1213   :  { %v2636_v34 = vsub.f32 1.0, %v2635_v29  ;;  %2564 = vmatpush.bf16.msrb.mxu1 %v2555_v35  ;;  %vm2516_vm6 = vweird.f32 %v2495_v10 }
0x1214   :  { %v2523_v57 = vor.u32 1.1754944e-38, %v2522_v52  ;;  %vm2521_vm10 = vcmp.eq.f32.partialorder %v2520_v55, 8.507059e+37 }
0x1215   :  { %v2637_v36 = vmul.f32 %v5740_v44, %v2636_v34 }
0x1217   :  { %v2638_v56 = vadd.f32 %v5740_v44, %v2637_v36 }
0x1218   :  { %v5742_v40 = vpop.eup %5741 }
0x1219   :  { %v2642_v42 = vsel %vm2641_vm2, %v5740_v44, %v2638_v56  ;;  %v2512_v45 = vmul.f32 %v5742_v40, %v2495_v10  ;;  %vm2517_vm5 = vweird.f32 %v5742_v40 }
0x121a   :  { %v2647_v28 = vsel %vm2644_vm3, %v2646_v6, %v2642_v42  ;;  %vm2518_vm9 = vmor %vm2516_vm6, %vm2517_vm5 }
0x121b   :  { %v2648_v2 = vmul.f32 %v7308_v9, %v2647_v28  ;;  %v2513_v51 = vsub.f32 1.0, %v2512_v45 }
0x121d   :  { %v2664_v38 = vpack.c.bf16 %v2648_v2, %v2648_v2  ;;  %v2514_v54 = vmul.f32 %v5742_v40, %v2513_v51 }
0x121f   :  { %v2515_v32 = vadd.f32 %v5742_v40, %v2514_v54  ;;  %5237 = vmatmul.msk.bf16.vlgmr.msra.gmra.mxu0 %vm660_vm14, %v2664_v38 }
0x1221   :  { %v2519_v58 = vsel %vm2518_vm9, %v5742_v40, %v2515_v32 }
0x1222   :  { %v2524_v59 = vsel %vm2521_vm10, %v2523_v57, %v2519_v58 }
0x1223   :  { %v2525_v61 = vmul.f32 %v7312_v48, %v2524_v59 }
0x1225   :  { %v2527_v63 = vpack.c.bf16 %v2525_v61, %v2525_v61 }
0x1227   :  { %5234 = vmatmul.msk.bf16.vlgmr.msrb.gmra.mxu1 %vm660_vm14, %v2527_v63 }
0x1229   :  { %v2688_v9 = vpop.permute.xlu1 %2687 }
0x122a   :  { %v2693_v60 = vsel %vm757_vm4, %v2688_v9, 0 }
0x122b   :  { %2702 = vmatpush.bf16.msra.mxu1 %v2693_v60 }
0x122f   :  { %v2633_v3 = vpop.xlane.xlu0 %2632 }
0x1230   :  { %5743 = vrcp.f32 %v2633_v3  ;;  %v2660_v5 = vand.u32 2147483648, %v2633_v3  ;;  %v2658_v8 = vand.u32 2147483647, %v2633_v3  ;;  %vm2654_vm12 = vweird.f32 %v2633_v3 }
0x1232   :  { %v2661_v12 = vor.u32 1.1754944e-38, %v2660_v5  ;;  %vm2659_vm15 = vcmp.eq.f32.partialorder %v2658_v8, 8.507059e+37 }
0x1236   :  { %v5744_v31 = vpop.eup %5743 }
0x1237   :  { %v2650_v4 = vmul.f32 %v5744_v31, %v2633_v3  ;;  %v2768_v23 = vpop.xlane.xlu0 %2767  ;;  %vm2655_vm11 = vweird.f32 %v5744_v31 }
0x1238   :  { %5745 = vrcp.f32 %v2768_v23  ;;  %vm2656_vm13 = vmor %vm2654_vm12, %vm2655_vm11  ;;  %v2783_v62 = vand.u32 2147483648, %v2768_v23  ;;  %vm2777_vm2 = vweird.f32 %v2768_v23  ;;  %v2781_v1 = vand.u32 2147483647, %v2768_v23 }
0x1239   :  { %v2651_v39 = vsub.f32 1.0, %v2650_v4 }
0x123a   :  { %v2784_v44 = vor.u32 1.1754944e-38, %v2783_v62  ;;  %vm2782_vm5 = vcmp.eq.f32.partialorder %v2781_v1, 8.507059e+37 }
0x123b   :  { %v2652_v7 = vmul.f32 %v5744_v31, %v2651_v39 }
0x123d   :  { %v2653_v11 = vadd.f32 %v5744_v31, %v2652_v7 }
0x123e   :  { %v5746_v48 = vpop.eup %5745 }
0x123f   :  { %v2657_v13 = vsel %vm2656_vm13, %v5744_v31, %v2653_v11  ;;  %v2773_v14 = vmul.f32 %v5746_v48, %v2768_v23  ;;  %v2771_v18 = vpop.xlane.xlu0 %2770  ;;  %vm2778_vm1 = vweird.f32 %v5746_v48 }
0x1240   :  { %v2662_v19 = vsel %vm2659_vm15, %v2661_v12, %v2657_v13  ;;  %5747 = vrcp.f32 %v2771_v18  ;;  %vm2779_vm3 = vmor %vm2777_vm2, %vm2778_vm1  ;;  %v2798_v10 = vand.u32 2147483648, %v2771_v18  ;;  %vm2792_vm9 = vweird.f32 %v2771_v18 }
0x1241   :  { %v2663_v20 = vmul.f32 %v7320_v16, %v2662_v19  ;;  %v2774_v21 = vsub.f32 1.0, %v2773_v14  ;;  %v2796_v34 = vand.u32 2147483647, %v2771_v18 }
0x1242   :  { %v2799_v24 = vor.u32 1.1754944e-38, %v2798_v10 }
0x1243   :  { %v2665_v0 = vpack.c.bf16 %v2663_v20, %v2663_v20  ;;  %v2775_v25 = vmul.f32 %v5746_v48, %v2774_v21  ;;  %vm2797_vm11 = vcmp.eq.f32.partialorder %v2796_v34, 8.507059e+37  ;;  %v5411_v34 = vld [vmem:[#allocation32 + $0x10] sm:$0xff] }
0x1245   :  { %5238 = vmatmul.msk.bf16.vlgmr.msra.gmra.mxu1 %vm660_vm14, %v2665_v0  ;;  %v2776_v26 = vadd.f32 %v5746_v48, %v2775_v25 }
0x1246   :  { %v5748_v41 = vpop.eup %5747 }
0x1247   :  { %v2788_v27 = vmul.f32 %v5748_v41, %v2771_v18  ;;  %v2780_v15 = vsel %vm2779_vm3, %v5746_v48, %v2776_v26  ;;  %vm2793_vm6 = vweird.f32 %v5748_v41 }
0x1248   :  { %v2785_v29 = vsel %vm2782_vm5, %v2784_v44, %v2780_v15  ;;  %vm2794_vm10 = vmor %vm2792_vm9, %vm2793_vm6 }
0x1249   :  { %v2789_v47 = vsub.f32 1.0, %v2788_v27  ;;  %v2786_v33 = vmul.f32 %v7325_v30, %v2785_v29 }
0x124b   :  { %v2790_v43 = vmul.f32 %v5748_v41, %v2789_v47  ;;  %v2802_v40 = vpack.c.bf16 %v2786_v33, %v2786_v33  ;;  %v5412_v33 = vld [vmem:[#allocation32 + $0x18] sm:$0xff] }
0x124c   :  { %3046 = vmatpush.bf16.msra.mxu2 %v5412_v33 }
0x124d   :  { %v2791_v16 = vadd.f32 %v5748_v41, %v2790_v43 }
0x124f   :  { %v2795_v37 = vsel %vm2794_vm10, %v5748_v41, %v2791_v16 }
0x1250   :  { %v2800_v6 = vsel %vm2797_vm11, %v2799_v24, %v2795_v37  ;;  %3047 = vmatpush.bf16.msra.mxu2 %v5411_v34 }
0x1251   :  { %v2801_v42 = vmul.f32 %v7329_v49, %v2800_v6 }
0x1252   :  { %v2805_v35 = vpop.permute.xlu0 %2804 }
0x1253   :  { %v2810_v36 = vsel %vm757_vm4, %v2805_v35, 0  ;;  %v2803_v51 = vpack.c.bf16 %v2801_v42, %v2801_v42 }
0x1254   :  { %2819 = vmatpush.bf16.msrb.mxu0 %v2810_v36  ;;  %v2909_v56 = vpop.xlane.xlu1 %2908 }
0x1255   :  { %5749 = vrcp.f32 %v2909_v56  ;;  %v2936_v54 = vand.u32 2147483648, %v2909_v56  ;;  %v2934_v55 = vand.u32 2147483647, %v2909_v56  ;;  %vm2930_vm13 = vweird.f32 %v2909_v56 }
0x1257   :  { %5241 = vmatmul.msk.bf16.vlgmr.msrb.gmra.mxu0 %vm660_vm14, %v2802_v40  ;;  %v2937_v59 = vor.u32 1.1754944e-38, %v2936_v54  ;;  %vm2935_vm1 = vcmp.eq.f32.partialorder %v2934_v55, 8.507059e+37  ;;  %v5602_v55 = vld [vmem:[%s7867_s11 + $0x1] ss:$0 sm:$0xff] }
0x125a   :  { %v2826_v45 = vpop.permute.xlu0 %2825 }
0x125b   :  { %v5750_v30 = vpop.eup %5749  ;;  %v2831_v28 = vsel %vm757_vm4, %v2826_v45, 0 }
0x125c   :  { %v2926_v2 = vmul.f32 %v5750_v30, %v2909_v56  ;;  %2840 = vmatpush.bf16.msrb.mxu1 %v2831_v28  ;;  %vm2931_vm12 = vweird.f32 %v5750_v30 }
0x125d   :  { %vm2932_vm15 = vmor %vm2930_vm13, %vm2931_vm12 }
0x125e   :  { %v2927_v52 = vsub.f32 1.0, %v2926_v2 }
0x125f   :  { %5242 = vmatmul.msk.bf16.vlgmr.msrb.gmra.mxu1 %vm660_vm14, %v2803_v51 }
0x1260   :  { %v2928_v38 = vmul.f32 %v5750_v30, %v2927_v52 }
0x1262   :  { %v2929_v32 = vadd.f32 %v5750_v30, %v2928_v38  ;;  %v2943_v57 = vpop.permute.xlu0 %2942 }
0x1263   :  { %v2948_v49 = vsel %vm757_vm4, %v2943_v57, 0 }
0x1264   :  { %v2933_v58 = vsel %vm2932_vm15, %v5750_v30, %v2929_v32  ;;  %2957 = vmatpush.bf16.msra.mxu0 %v2948_v49  ;;  %v2906_v61 = vpop.xlane.xlu2 %2905 }
0x1265   :  { %5751 = vrcp.f32 %v2906_v61  ;;  %v2938_v63 = vsel %vm2935_vm1, %v2937_v59, %v2933_v58  ;;  %v2921_v5 = vand.u32 2147483648, %v2906_v61  ;;  %v2919_v8 = vand.u32 2147483647, %v2906_v61 }
0x1266   :  { %v2939_v9 = vmul.f32 %v7333_v53, %v2938_v63  ;;  %vm2915_vm3 = vweird.f32 %v2906_v61 }
0x1267   :  { %v2922_v48 = vor.u32 1.1754944e-38, %v2921_v5  ;;  %vm2920_vm6 = vcmp.eq.f32.partialorder %v2919_v8, 8.507059e+37  ;;  %v5414_v8 = vld [vmem:[#allocation34 + $0x18] sm:$0xff] }
0x1268   :  { %v2941_v23 = vpack.c.bf16 %v2939_v9, %v2939_v9  ;;  %3157 = vmatpush.bf16.msra.mxu3 %v5414_v8 }
0x126a   :  { %v2964_v60 = vpop.permute.xlu0 %2963 }
0x126b   :  { %v5752_v3 = vpop.eup %5751  ;;  %v2969_v31 = vsel %vm757_vm4, %v2964_v60, 0 }
0x126c   :  { %v2911_v4 = vmul.f32 %v5752_v3, %v2906_v61  ;;  %2978 = vmatpush.bf16.msra.mxu1 %v2969_v31  ;;  %vm2916_vm2 = vweird.f32 %v5752_v3 }
0x126d   :  { %vm2917_vm5 = vmor %vm2915_vm3, %vm2916_vm2 }
0x126e   :  { %v2912_v39 = vsub.f32 1.0, %v2911_v4 }
0x126f   :  { %5246 = vmatmul.msk.bf16.vlgmr.msra.gmra.mxu1 %vm660_vm14, %v2941_v23 }
0x1270   :  { %v2913_v7 = vmul.f32 %v5752_v3, %v2912_v39 }
0x1272   :  { %v2914_v11 = vadd.f32 %v5752_v3, %v2913_v7 }
0x1274   :  { %v2918_v12 = vsel %vm2917_vm5, %v5752_v3, %v2914_v11 }
0x1275   :  { %v2923_v53 = vsel %vm2920_vm6, %v2922_v48, %v2918_v12  ;;  %v5413_v48 = vld [vmem:[#allocation34 + $0x10] sm:$0xff] }
0x1276   :  { %v2924_v13 = vmul.f32 %v7342_v17, %v2923_v53  ;;  %3158 = vmatpush.bf16.msra.mxu3 %v5413_v48 }
0x1278   :  { %v2940_v14 = vpack.c.bf16 %v2924_v13, %v2924_v13 }
0x127a   :  { %5245 = vmatmul.msk.bf16.vlgmr.msra.gmra.mxu0 %vm660_vm14, %v2940_v14 }
0x1284   :  { %v2545_v18 = vpop.f32.mrf.mxu0 }
0x128c   :  { %v2547_v19 = vpop.f32.mrf.mxu0 }
0x129c   :  { %v2683_v20 = vpop.f32.mrf.mxu0 }
0x12a4   :  { %v2566_v21 = vpop.f32.mrf.mxu1  ;;  %v2685_v0 = vpop.f32.mrf.mxu0 }
0x12ac   :  { %v2568_v25 = vpop.f32.mrf.mxu1 }
0x12c2   :  { %v2704_v41 = vpop.f32.mrf.mxu1 }
0x12c3   :  { %v5535_v26 = vpack.i.bf16 %v2704_v41, %v2683_v20 }
0x12c5   :  { %5536 = vrot.lane.b32.xlu2 %v5535_v26, %s6461_s1 }
0x12ca   :  { %v2706_v27 = vpop.f32.mrf.mxu1 }
0x12d4   :  { %v2821_v62 = vpop.f32.mrf.mxu0 }
0x12dc   :  { %v2823_v1 = vpop.f32.mrf.mxu0  ;;  %v2842_v47 = vpop.f32.mrf.mxu1 }
0x12dd   :  { %v5540_v15 = vpack.i.bf16 %v2842_v47, %v2821_v62 }
0x12df   :  { %5541 = vrot.lane.b32.xlu1 %v5540_v15, %s6493_s17 }
0x12e4   :  { %v2844_v17 = vpop.f32.mrf.mxu1 }
0x12ec   :  { %v2980_v43 = vpop.f32.mrf.mxu1 }
0x12f4   :  { %v2982_v44 = vpop.f32.mrf.mxu1 }
0x12f7   :  { %v2959_v29 = vpop.f32.mrf.mxu0 }
0x12f8   :  { %v5545_v16 = vpack.i.bf16 %v2980_v43, %v2959_v29  ;;  %v5603_v29 = vld [vmem:[%s7868_s0 + $0x1] ss:$0 sm:$0xff] }
0x12fa   :  { %5546 = vrot.lane.b32.xlu0 %v5545_v16, %s6494_s28 }
0x12ff   :  { %v2961_v10 = vpop.f32.mrf.mxu0 }
0x131f   :  { %v5537_v35 = vpop.permute.xlu2 %5536 }
0x1320   :  { %v5539_v36 = vunpack.i.h.bf16 %v5537_v35  ;;  %v5538_v24 = vunpack.i.l.bf16 %v5537_v35  ;;  %v5604_v35 = vld [vmem:[%s7869_s4 + $0x1] ss:$0 sm:$0xff] }
0x1322   :  { %v3009_v42 = vsel %vm660_vm14, %v2566_v21, %v5539_v36  ;;  %v3008_v45 = vsel %vm660_vm14, %v2545_v18, %v5538_v24 }
0x1351   :  { %v5542_v37 = vpop.permute.xlu1 %5541 }
0x1352   :  { %v5544_v56 = vunpack.i.h.bf16 %v5542_v37  ;;  %v5543_v40 = vunpack.i.l.bf16 %v5542_v37 }
0x1354   :  { %v3010_v2 = vsel %vm1244_vm7, %v3008_v45, %v5543_v40  ;;  %v3011_v51 = vsel %vm1244_vm7, %v3009_v42, %v5544_v56  ;;  %v5416_v42 = vld [vmem:[#allocation35 + $0x18] sm:$0xff] }
0x1355   :  { %v5605_v45 = vld [vmem:[%s6644_s30 + $0x1] ss:$0 sm:$0xff]  ;;  %3208 = vmatpush.bf16.msrb.mxu0 %v5416_v42 }
0x136c   :  { %v5547_v6 = vpop.permute.xlu0 %5546 }
0x136d   :  { %v5549_v30 = vunpack.i.h.bf16 %v5547_v6  ;;  %v5548_v28 = vunpack.i.l.bf16 %v5547_v6 }
0x136f   :  { %v3012_v52 = vsel %vm1247_vm8, %v3010_v2, %v5548_v28  ;;  %v3013_v38 = vsel %vm1247_vm8, %v3011_v51, %v5549_v30  ;;  %v5415_v28 = vld [vmem:[#allocation35 + $0x10] sm:$0xff] }
0x1370   :  { %v3021_v54 = vpack.c.bf16 %v3013_v38, %v3012_v52  ;;  %3209 = vmatpush.bf16.msrb.mxu0 %v5415_v28 }
0x1372   :  { %5256 = vmatmul.msk.bf16.vlgmr.msra.gmra.mxu2 %vm454_vm0, %v3021_v54 }
0x13f5   :  { %v3049_v32 = vpop.f32.mrf.mxu2 }
0x13f6   :  { %v3050_v57 = vadd.f32 %v5602_v55, %v3049_v32 }
0x13f8   :  { %v7385_v49 = vadd.f32 %v3050_v57, %v7216_v50 }
0x13fa   :  { %v3074_v58 = vsel %vm454_vm0, %v7385_v49, 0.0  ;;  %v3082_v59 = vmul.f32 %v7385_v49, %v7385_v49 }
0x13fb   :  { %3075 = vadd.xlane.f32.xlu0 %v3074_v58 }
0x13fc   :  { %v3084_v61 = vsel %vm454_vm0, %v3082_v59, 0.0 }
0x13fd   :  { %v3051_v63 = vpop.f32.mrf.mxu2  ;;  %3085 = vadd.xlane.f32.xlu1 %v3084_v61 }
0x13fe   :  { %v3052_v9 = vadd.f32 %v5602_v55, %v3051_v63 }
0x1400   :  { %v7393_v60 = vadd.f32 %v3052_v9, %v7224_v46 }
0x1402   :  { %v3077_v3 = vsel %vm454_vm0, %v7393_v60, 0.0  ;;  %v3083_v50 = vmul.f32 %v7393_v60, %v7393_v60 }
0x1403   :  { %3078 = vadd.xlane.f32.xlu2 %v3077_v3 }
0x1404   :  { %v3087_v31 = vsel %vm454_vm0, %v3083_v50, 0.0 }
0x1405   :  { %3088 = vadd.xlane.f32.xlu0 %v3087_v31 }
0x146e   :  { %v3076_v4 = vpop.xlane.xlu0 %3075 }
0x146f   :  { %v3080_v23 = vmul.f32 %v3076_v4, %v6824_v22 }
0x1470   :  { %v3086_v39 = vpop.xlane.xlu1 %3085 }
0x1471   :  { %v3092_v5 = vmul.f32 %v3080_v23, %v3080_v23  ;;  %v3090_v7 = vmul.f32 %v3086_v39, %v6824_v22  ;;  %v3096_v43 = vsub.f32 %v7385_v49, %v3080_v23 }
0x1473   :  { %v3094_v46 = vsub.f32 %v3090_v7, %v3092_v5 }
0x1475   :  { %v3098_v11 = vadd.f32 1e-05, %v3094_v46  ;;  %v5606_v46 = vld [vmem:[%s6654_s19 + $0x1] ss:$0 sm:$0xff] }
0x1476   :  { %v3079_v12 = vpop.xlane.xlu2 %3078 }
0x1477   :  { %5753 = vrsqrt.f32 %v3098_v11  ;;  %v3081_v53 = vmul.f32 %v3079_v12, %v6824_v22  ;;  %vm3106_vm10 = vweird.f32 %v3098_v11 }
0x1478   :  { %v3089_v13 = vpop.xlane.xlu0 %3088 }
0x1479   :  { %v3093_v14 = vmul.f32 %v3081_v53, %v3081_v53  ;;  %v3091_v18 = vmul.f32 %v3089_v13, %v6824_v22  ;;  %v3097_v33 = vsub.f32 %v7393_v60, %v3081_v53 }
0x147b   :  { %v3095_v19 = vsub.f32 %v3091_v18, %v3093_v14 }
0x147d   :  { %v5754_v20 = vpop.eup %5753  ;;  %v3099_v21 = vadd.f32 1e-05, %v3095_v19 }
0x147e   :  { %v3101_v0 = vmul.f32 %v5754_v20, %v3098_v11  ;;  %vm3107_vm9 = vweird.f32 %v5754_v20 }
0x147f   :  { %5755 = vrsqrt.f32 %v3099_v21  ;;  %vm3108_vm11 = vmor %vm3106_vm10, %vm3107_vm9  ;;  %vm3116_vm13 = vweird.f32 %v3099_v21 }
0x1480   :  { %v3102_v25 = vmul.f32 %v5754_v20, %v3101_v0 }
0x1482   :  { %v3103_v41 = vmul.f32 0.5, %v3102_v25 }
0x1484   :  { %v3104_v26 = vsub.f32 1.5, %v3103_v41  ;;  %v5418_v41 = vld [vmem:[#allocation31 + $0x8] sm:$0xff] }
0x1485   :  { %v5756_v27 = vpop.eup %5755  ;;  %3308 = vmatpush.bf16.msrb.mxu1 %v5418_v41 }
0x1486   :  { %v3105_v62 = vmul.f32 %v5754_v20, %v3104_v26  ;;  %v3111_v1 = vmul.f32 %v5756_v27, %v3099_v21  ;;  %vm3117_vm12 = vweird.f32 %v5756_v27 }
0x1487   :  { %vm3118_vm15 = vmor %vm3116_vm13, %vm3117_vm12 }
0x1488   :  { %v3112_v47 = vmul.f32 %v5756_v27, %v3111_v1  ;;  %v3109_v15 = vsel %vm3108_vm11, %v5754_v20, %v3105_v62 }
0x1489   :  { %v3120_v16 = vmul.f32 %v3109_v15, %v3096_v43 }
0x148a   :  { %v3113_v17 = vmul.f32 0.5, %v3112_v47 }
0x148b   :  { %v3125_v37 = vmul.f32 %v5603_v29, %v3120_v16 }
0x148c   :  { %v3114_v44 = vsub.f32 1.5, %v3113_v17 }
0x148d   :  { %v3130_v56 = vadd.f32 %v5604_v35, %v3125_v37 }
0x148e   :  { %v3115_v10 = vmul.f32 %v5756_v27, %v3114_v44 }
0x1490   :  { %v3119_v34 = vsel %vm3118_vm15, %v5756_v27, %v3115_v10 }
0x1491   :  { %v3121_v36 = vmul.f32 %v3119_v34, %v3097_v33 }
0x1493   :  { %v3126_v24 = vmul.f32 %v5603_v29, %v3121_v36 }
0x1495   :  { %v3131_v40 = vadd.f32 %v5604_v35, %v3126_v24 }
0x1497   :  { %v3132_v6 = vpack.c.bf16 %v3131_v40, %v3130_v56 }
0x1499   :  { %5269 = vmatmul.msk.bf16.vlgmr.msra.gmra.mxu3 %vm454_vm0, %v3132_v6 }
0x151c   :  { %v3160_v30 = vpop.f32.mrf.mxu3 }
0x151d   :  { %v3161_v2 = vadd.f32 %v5605_v45, %v3160_v30 }
0x151f   :  { %v3165_v51 = vmul.f32 %v3161_v2, %v3161_v2 }
0x1521   :  { %v3167_v52 = vmul.f32 %v3165_v51, %v3161_v2 }
0x1523   :  { %v3169_v38 = vmul.f32 0.044715, %v3167_v52 }
0x1524   :  { %v3162_v54 = vpop.f32.mrf.mxu3 }
0x1525   :  { %v3171_v55 = vadd.f32 %v3169_v38, %v3161_v2  ;;  %v3163_v32 = vadd.f32 %v5605_v45, %v3162_v54 }
0x1527   :  { %v3173_v57 = vmul.f32 0.7978846, %v3171_v55  ;;  %v3166_v58 = vmul.f32 %v3163_v32, %v3163_v32 }
0x1529   :  { %v3168_v59 = vmul.f32 %v3166_v58, %v3163_v32  ;;  %5757 = vtanh.f32 %v3173_v57 }
0x152b   :  { %v3170_v61 = vmul.f32 0.044715, %v3168_v59 }
0x152d   :  { %v3172_v63 = vadd.f32 %v3170_v61, %v3163_v32 }
0x152f   :  { %v3174_v9 = vmul.f32 0.7978846, %v3172_v63  ;;  %v5758_v3 = vpop.eup %5757 }
0x1530   :  { %v3177_v50 = vadd.f32 1.0, %v5758_v3  ;;  %v5609_v3 = vld [vmem:[%s7866_s20] ss:$0 sm:$0xff] }
0x1531   :  { %5759 = vtanh.f32 %v3174_v9 }
0x1532   :  { %v3179_v4 = vmul.f32 0.5, %v3177_v50 }
0x1534   :  { %v3181_v5 = vmul.f32 %v3179_v4, %v3161_v2  ;;  %v5607_v2 = vld [vmem:[%s7864_s18] ss:$0 sm:$0xff] }
0x1537   :  { %v5760_v31 = vpop.eup %5759 }
0x1538   :  { %v3178_v23 = vadd.f32 1.0, %v5760_v31 }
0x153a   :  { %v3180_v39 = vmul.f32 0.5, %v3178_v23 }
0x153c   :  { %v3182_v7 = vmul.f32 %v3180_v39, %v3163_v32  ;;  %v5608_v32 = vld [vmem:[%s7865_s9] ss:$0 sm:$0xff] }
0x153e   :  { %v3183_v8 = vpack.c.bf16 %v3182_v7, %v3181_v5 }
0x1540   :  { %5278 = vmatmul.msk.bf16.vlgmr.msrb.gmra.mxu0 %vm454_vm0, %v3183_v8 }
0x15bd   :  { %v3211_v11 = vpop.f32.mrf.mxu0 }
0x15be   :  { %v3212_v48 = vadd.f32 %v5606_v46, %v3211_v11 }
0x15c0   :  { %v7413_v12 = vadd.f32 %v3212_v48, %v7385_v49 }
0x15c2   :  { %v3220_v53 = vsel %vm454_vm0, %v7413_v12, 0.0  ;;  %v3228_v18 = vmul.f32 %v7413_v12, %v7413_v12 }
0x15c3   :  { %3221 = vadd.xlane.f32.xlu0 %v3220_v53 }
0x15c4   :  { %v3230_v21 = vsel %vm454_vm0, %v3228_v18, 0.0 }
0x15c5   :  { %v3213_v13 = vpop.f32.mrf.mxu0 }
0x15c6   :  { %v3214_v14 = vadd.f32 %v5606_v46, %v3213_v13 }
0x15c8   :  { %v7420_v19 = vadd.f32 %v3214_v14, %v7393_v60  ;;  %v5417_v60 = vld [vmem:[#allocation31] sm:$0xff] }
0x15c9   :  { %3309 = vmatpush.bf16.msrb.mxu1 %v5417_v60 }
0x15ca   :  { %v3223_v20 = vsel %vm454_vm0, %v7420_v19, 0.0  ;;  %v3229_v49 = vmul.f32 %v7420_v19, %v7420_v19 }
0x15cb   :  { %3224 = vadd.xlane.f32.xlu2 %v3223_v20  ;;  %3231 = vadd.xlane.f32.xlu0 %v3230_v21 }
0x15cc   :  { %v3233_v0 = vsel %vm454_vm0, %v3229_v49, 0.0 }
0x15cd   :  { %3234 = vadd.xlane.f32.xlu1 %v3233_v0 }
0x1636   :  { %v3222_v25 = vpop.xlane.xlu0 %3221 }
0x1637   :  { %v3226_v26 = vmul.f32 %v3222_v25, %v6824_v22 }
0x1639   :  { %v3238_v1 = vmul.f32 %v3226_v26, %v3226_v26  ;;  %v3242_v28 = vsub.f32 %v7413_v12, %v3226_v26 }
0x163e   :  { %v3225_v27 = vpop.xlane.xlu2 %3224  ;;  %v3232_v62 = vpop.xlane.xlu0 %3231 }
0x163f   :  { %v3227_v47 = vmul.f32 %v3225_v27, %v6824_v22  ;;  %v3236_v15 = vmul.f32 %v3232_v62, %v6824_v22 }
0x1640   :  { %v3235_v17 = vpop.xlane.xlu1 %3234 }
0x1641   :  { %v3239_v43 = vmul.f32 %v3227_v47, %v3227_v47  ;;  %v3240_v44 = vsub.f32 %v3236_v15, %v3238_v1  ;;  %v3237_v29 = vmul.f32 %v3235_v17, %v6824_v22  ;;  %v3243_v38 = vsub.f32 %v7420_v19, %v3227_v47 }
0x1643   :  { %v3244_v16 = vadd.f32 1e-05, %v3240_v44  ;;  %v3241_v10 = vsub.f32 %v3237_v29, %v3239_v43 }
0x1645   :  { %5761 = vrsqrt.f32 %v3244_v16  ;;  %v3245_v33 = vadd.f32 1e-05, %v3241_v10  ;;  %vm3252_vm2 = vweird.f32 %v3244_v16 }
0x1647   :  { %5763 = vrsqrt.f32 %v3245_v33  ;;  %vm3262_vm6 = vweird.f32 %v3245_v33 }
0x164b   :  { %v5762_v34 = vpop.eup %5761 }
0x164c   :  { %v3247_v35 = vmul.f32 %v5762_v34, %v3244_v16  ;;  %vm3253_vm1 = vweird.f32 %v5762_v34 }
0x164d   :  { %v5764_v37 = vpop.eup %5763  ;;  %vm3254_vm5 = vmor %vm3252_vm2, %vm3253_vm1 }
0x164e   :  { %v3248_v36 = vmul.f32 %v5762_v34, %v3247_v35  ;;  %v3257_v24 = vmul.f32 %v5764_v37, %v3245_v33  ;;  %vm3263_vm3 = vweird.f32 %v5764_v37 }
0x164f   :  { %vm3264_vm9 = vmor %vm3262_vm6, %vm3263_vm3 }
0x1650   :  { %v3249_v56 = vmul.f32 0.5, %v3248_v36  ;;  %v3258_v40 = vmul.f32 %v5764_v37, %v3257_v24 }
0x1652   :  { %v3250_v6 = vsub.f32 1.5, %v3249_v56  ;;  %v3259_v42 = vmul.f32 0.5, %v3258_v40 }
0x1654   :  { %v3251_v45 = vmul.f32 %v5762_v34, %v3250_v6  ;;  %v3260_v30 = vsub.f32 1.5, %v3259_v42 }
0x1656   :  { %v3255_v51 = vsel %vm3254_vm5, %v5762_v34, %v3251_v45  ;;  %v3261_v52 = vmul.f32 %v5764_v37, %v3260_v30 }
0x1657   :  { %v3266_v54 = vmul.f32 %v3255_v51, %v3242_v28 }
0x1658   :  { %v3265_v55 = vsel %vm3264_vm9, %v5764_v37, %v3261_v52 }
0x1659   :  { %v3271_v57 = vmul.f32 %v5607_v2, %v3266_v54  ;;  %v3267_v58 = vmul.f32 %v3265_v55, %v3243_v38 }
0x165b   :  { %v3272_v59 = vmul.f32 %v5607_v2, %v3267_v58  ;;  %v3276_v61 = vadd.f32 %v5608_v32, %v3271_v57 }
0x165d   :  { %v3277_v63 = vadd.f32 %v5608_v32, %v3272_v59 }
0x165f   :  { %v3283_v9 = vpack.c.bf16 %v3277_v63, %v3276_v61 }
0x1661   :  { %5287 = vmatmul.msk.bf16.vlgmr.msrb.gmra.mxu1 %vm454_vm0, %v3283_v9 }
0x16de   :  { %v3311_v50 = vpop.f32.mrf.mxu1 }
0x16df   :  { %v3312_v31 = vadd.f32 %v5609_v3, %v3311_v50 }
0x16e1   :  { %v3316_v4 = vpack.c.bf16 %v3312_v31, %v3312_v31 }
0x16e3   :  { %v3319_v23 = vunpack.c.l.b16 %v3316_v4 }
0x16e5   :  { %v7438_v39 = vpack.c.b16 %v3319_v23, %v3319_v23 }
0x16e6   :  { %v3313_v5 = vpop.f32.mrf.mxu1 }
0x16e7   :  { %v3314_v7 = vadd.f32 %v5609_v3, %v3313_v5  ;;  %3460 = vrot.lane.b32.xlu1 %v7438_v39, %s6490_s15  ;;  %3321 = vrot.lane.b32.xlu2 %v7438_v39, %s6489_s6 }
0x16e9   :  { %v3317_v8 = vpack.c.bf16 %v3314_v7, %v3314_v7 }
0x16eb   :  { %v3343_v46 = vunpack.c.l.b16 %v3317_v8 }
0x16ed   :  { %v7444_v11 = vpack.c.b16 %v3343_v46, %v3343_v46 }
0x16ef   :  { %3345 = vrot.lane.b32.xlu0 %v7444_v11, %s6489_s6  ;;  %3598 = vrot.lane.b32.xlu1 %v7438_v39, %s6491_s2 }
0x16f0   :  { %3483 = vrot.lane.b32.xlu2 %v7444_v11, %s6490_s15 }
0x16f7   :  { %3458 = vrot.lane.b32.xlu0 %v7438_v39, %s6486_s27  ;;  %3619 = vrot.lane.b32.xlu1 %v7444_v11, %s6487_s16 }
0x16f8   :  { %3481 = vrot.lane.b32.xlu2 %v7444_v11, %s6486_s27 }
0x16ff   :  { %3621 = vrot.lane.b32.xlu0 %v7444_v11, %s6491_s2  ;;  %3734 = vrot.lane.b32.xlu1 %v7438_v39, %s6488_s3 }
0x1700   :  { %3596 = vrot.lane.b32.xlu2 %v7438_v39, %s6487_s16 }
0x1707   :  { %3736 = vrot.lane.b32.xlu0 %v7438_v39, %s6492_s5 }
0x1708   :  { %3759 = vrot.lane.b32.xlu2 %v7444_v11, %s6492_s5 }
0x170f   :  { %3757 = vrot.lane.b32.xlu0 %v7444_v11, %s6488_s3 }
0x1741   :  { %v3322_v48 = vpop.permute.xlu2 %3321 }
0x1742   :  { %v3327_v53 = vsel %vm660_vm14, %v3322_v48, 0 }
0x1743   :  { %3336 = vmatpush.bf16.xpose.msrb.mxu2 %v3327_v53 }
0x174a   :  { %5288 = vmatmul.msk.bf16.vlgmr.msrb.gmra.mxu2 %vm660_vm14, %v3316_v4  ;;  %v3484_v13 = vpop.permute.xlu2 %3483 }
0x174b   :  { %v3489_v25 = vsel %vm660_vm14, %v3484_v13, 0 }
0x1752   :  { %v3482_v41 = vpop.permute.xlu2 %3481 }
0x1759   :  { %v3461_v14 = vpop.permute.xlu1 %3460 }
0x175a   :  { %v3466_v18 = vsel %vm660_vm14, %v3461_v14, 0  ;;  %v3597_v60 = vpop.permute.xlu2 %3596 }
0x175b   :  { %3475 = vmatpush.bf16.xpose.msra.mxu2 %v3466_v18 }
0x1761   :  { %v3346_v20 = vpop.permute.xlu0 %3345  ;;  %v3599_v21 = vpop.permute.xlu1 %3598 }
0x1762   :  { %v3351_v49 = vsel %vm660_vm14, %v3346_v20, 0  ;;  %v3604_v0 = vsel %vm660_vm14, %v3599_v21, 0  ;;  %v3760_v1 = vpop.permute.xlu2 %3759 }
0x1763   :  { %3360 = vmatpush.bf16.xpose.msrb.mxu3 %v3351_v49  ;;  %3613 = vmatpush.bf16.xpose.msrb.mxu2 %v3604_v0  ;;  %v3765_v15 = vsel %vm660_vm14, %v3760_v1, 0 }
0x1769   :  { %v3459_v26 = vpop.permute.xlu0 %3458  ;;  %v3620_v43 = vpop.permute.xlu1 %3619 }
0x176a   :  { %5289 = vmatmul.msk.bf16.vlgmr.msrb.gmra.mxu3 %vm660_vm14, %v3317_v8  ;;  %5292 = vmatmul.msk.bf16.vlgmr.msra.gmra.mxu2 %vm660_vm14, %v3459_v26 }
0x176b   :  { %3498 = vmatpush.bf16.xpose.msra.mxu3 %v3489_v25 }
0x1771   :  { %v3622_v27 = vpop.permute.xlu0 %3621  ;;  %v3735_v44 = vpop.permute.xlu1 %3734 }
0x1772   :  { %v3627_v62 = vsel %vm660_vm14, %v3622_v27, 0 }
0x1773   :  { %3636 = vmatpush.bf16.xpose.msrb.mxu3 %v3627_v62 }
0x1779   :  { %v3737_v47 = vpop.permute.xlu0 %3736 }
0x177a   :  { %v3742_v17 = vsel %vm660_vm14, %v3737_v47, 0  ;;  %5293 = vmatmul.msk.bf16.vlgmr.msra.gmra.mxu3 %vm660_vm14, %v3482_v41  ;;  %5296 = vmatmul.msk.bf16.vlgmr.msrb.gmra.mxu2 %vm660_vm14, %v3597_v60 }
0x177b   :  { %3774 = vmatpush.bf16.xpose.msra.mxu3 %v3765_v15  ;;  %3751 = vmatpush.bf16.xpose.msra.mxu2 %v3742_v17 }
0x1781   :  { %v3758_v29 = vpop.permute.xlu0 %3757 }
0x178a   :  { %5297 = vmatmul.msk.bf16.vlgmr.msrb.gmra.mxu3 %vm660_vm14, %v3620_v43  ;;  %5300 = vmatmul.msk.bf16.vlgmr.msra.gmra.mxu2 %vm660_vm14, %v3735_v44 }
0x179a   :  { %5301 = vmatmul.msk.bf16.vlgmr.msra.gmra.mxu3 %vm660_vm14, %v3758_v29 }
0x17cd   :  { %v3338_v16 = vpop.f32.mrf.mxu2 }
0x17ce   :  { %v3366_v10 = vsel %vm660_vm14, %v3338_v16, -inf }
0x17cf   :  { %3367 = vmax.xlane.f32.xlu2 %v3366_v10 }
0x17d5   :  { %v3340_v33 = vpop.f32.mrf.mxu2 }
0x17ed   :  { %v3362_v34 = vpop.f32.mrf.mxu3  ;;  %v3477_v35 = vpop.f32.mrf.mxu2 }
0x17ee   :  { %v3369_v37 = vsel %vm660_vm14, %v3362_v34, -inf  ;;  %v3504_v36 = vsel %vm660_vm14, %v3477_v35, -inf }
0x17ef   :  { %3370 = vmax.xlane.f32.xlu1 %v3369_v37  ;;  %3505 = vmax.xlane.f32.xlu0 %v3504_v36 }
0x17f5   :  { %v3364_v24 = vpop.f32.mrf.mxu3  ;;  %v3479_v56 = vpop.f32.mrf.mxu2 }
0x17fd   :  { %v3500_v40 = vpop.f32.mrf.mxu3  ;;  %v3615_v6 = vpop.f32.mrf.mxu2 }
0x17fe   :  { %v3507_v42 = vsel %vm660_vm14, %v3500_v40, -inf  ;;  %v3642_v45 = vsel %vm660_vm14, %v3615_v6, -inf }
0x17ff   :  { %3508 = vmax.xlane.f32.xlu2 %v3507_v42  ;;  %3643 = vmax.xlane.f32.xlu1 %v3642_v45 }
0x1805   :  { %v3502_v30 = vpop.f32.mrf.mxu3  ;;  %v3617_v28 = vpop.f32.mrf.mxu2 }
0x180d   :  { %v3638_v2 = vpop.f32.mrf.mxu3  ;;  %v7491_v51 = vpop.f32.mrf.mxu2 }
0x180e   :  { %v3645_v52 = vsel %vm660_vm14, %v3638_v2, -inf  ;;  %v3780_v58 = vsel %vm660_vm14, %v7491_v51, -inf }
0x180f   :  { %3646 = vmax.xlane.f32.xlu0 %v3645_v52 }
0x1815   :  { %v3640_v38 = vpop.f32.mrf.mxu3  ;;  %v3755_v54 = vpop.f32.mrf.mxu2 }
0x1817   :  { %3416 = vrot.lane.b32.xlu2 %v7438_v39, %s6471_s10 }
0x181d   :  { %v3776_v55 = vpop.f32.mrf.mxu3 }
0x181e   :  { %v3783_v32 = vsel %vm660_vm14, %v3776_v55, -inf }
0x181f   :  { %3784 = vmax.xlane.f32.xlu1 %v3783_v32 }
0x1825   :  { %v3778_v57 = vpop.f32.mrf.mxu3 }
0x1840   :  { %3781 = vmax.xlane.f32.xlu2 %v3780_v58 }
0x1842   :  { %v3368_v59 = vpop.xlane.xlu2 %3367 }
0x1843   :  { %v3372_v61 = vsub.f32 %v3338_v16, %v3368_v59 }
0x1845   :  { %v3374_v63 = vmul.f32 1.442695, %v3372_v61 }
0x1847   :  { %5765 = vpow2.f32 %v3374_v63 }
0x184d   :  { %v7499_v9 = vpop.eup %5765 }
0x184e   :  { %v3378_v3 = vsel %vm660_vm14, %v7499_v9, 0.0 }
0x184f   :  { %3379 = vadd.xlane.f32.xlu0 %v3378_v3 }
0x1862   :  { %v3371_v50 = vpop.xlane.xlu1 %3370  ;;  %v3506_v31 = vpop.xlane.xlu0 %3505 }
0x1863   :  { %v3373_v4 = vsub.f32 %v3362_v34, %v3371_v50  ;;  %v3510_v23 = vsub.f32 %v3477_v35, %v3506_v31  ;;  %3554 = vrot.lane.b32.xlu0 %v7438_v39, %s6495_s14 }
0x1865   :  { %v3376_v5 = vmul.f32 1.442695, %v3373_v4  ;;  %v3512_v7 = vmul.f32 1.442695, %v3510_v23 }
0x1867   :  { %5767 = vpow2.f32 %v3376_v5 }
0x1868   :  { %5769 = vpow2.f32 %v3512_v7 }
0x186d   :  { %v7505_v8 = vpop.eup %5767 }
0x186e   :  { %v7507_v46 = vpop.eup %5769  ;;  %v3381_v48 = vsel %vm660_vm14, %v7505_v8, 0.0 }
0x186f   :  { %3382 = vadd.xlane.f32.xlu2 %v3381_v48  ;;  %v3516_v53 = vsel %vm660_vm14, %v7507_v46, 0.0 }
0x1870   :  { %3517 = vadd.xlane.f32.xlu1 %v3516_v53 }
0x1872   :  { %v3509_v13 = vpop.xlane.xlu2 %3508  ;;  %v3644_v49 = vpop.xlane.xlu1 %3643 }
0x1873   :  { %v3511_v18 = vsub.f32 %v3500_v40, %v3509_v13  ;;  %v3648_v0 = vsub.f32 %v3615_v6, %v3644_v49 }
0x1875   :  { %v3514_v21 = vmul.f32 1.442695, %v3511_v18  ;;  %v3650_v25 = vmul.f32 1.442695, %v3648_v0 }
0x1877   :  { %5771 = vpow2.f32 %v3514_v21 }
0x1878   :  { %5773 = vpow2.f32 %v3650_v25 }
0x187a   :  { %v3417_v14 = vpop.permute.xlu2 %3416 }
0x187b   :  { %v3422_v20 = vsel %vm757_vm4, %v3417_v14, 0 }
0x187c   :  { %3431 = vmatpush.bf16.msra.mxu0 %v3422_v20 }
0x187d   :  { %v7516_v26 = vpop.eup %5771 }
0x187e   :  { %v3519_v27 = vsel %vm660_vm14, %v7516_v26, 0.0  ;;  %v7522_v1 = vpop.eup %5773 }
0x187f   :  { %v3654_v47 = vsel %vm660_vm14, %v7522_v1, 0.0 }
0x1882   :  { %v3647_v41 = vpop.xlane.xlu0 %3646 }
0x1883   :  { %v3649_v60 = vsub.f32 %v3638_v2, %v3647_v41 }
0x1885   :  { %v3652_v62 = vmul.f32 1.442695, %v3649_v60 }
0x1887   :  { %3575 = vrot.lane.b32.xlu2 %v7444_v11, %s6495_s14  ;;  %5775 = vpow2.f32 %v3652_v62 }
0x1889   :  { %3437 = vrot.lane.b32.xlu1 %v7444_v11, %s6471_s10 }
0x188d   :  { %3520 = vadd.xlane.f32.xlu0 %v3519_v27  ;;  %v7526_v15 = vpop.eup %5775 }
0x188e   :  { %v3657_v43 = vsel %vm660_vm14, %v7526_v15, 0.0 }
0x1892   :  { %v3785_v17 = vpop.xlane.xlu1 %3784 }
0x1893   :  { %v3787_v44 = vsub.f32 %v3776_v55, %v3785_v17 }
0x1895   :  { %3655 = vadd.xlane.f32.xlu0 %v3654_v47  ;;  %v3790_v29 = vmul.f32 1.442695, %v3787_v44 }
0x1897   :  { %5777 = vpow2.f32 %v3790_v29 }
0x189d   :  { %3658 = vadd.xlane.f32.xlu0 %v3657_v43  ;;  %v7530_v16 = vpop.eup %5777 }
0x189e   :  { %v3795_v10 = vsel %vm660_vm14, %v7530_v16, 0.0 }
0x18b0   :  { %3796 = vadd.xlane.f32.xlu2 %v3795_v10 }
0x18b1   :  { %3692 = vrot.lane.b32.xlu0 %v7438_v39, %s6497_s13 }
0x18b3   :  { %v3782_v33 = vpop.xlane.xlu2 %3781 }
0x18b4   :  { %v3786_v34 = vsub.f32 %v7491_v51, %v3782_v33 }
0x18b6   :  { %v3788_v35 = vmul.f32 1.442695, %v3786_v34 }
0x18b8   :  { %5779 = vpow2.f32 %v3788_v35 }
0x18b9   :  { %3713 = vrot.lane.b32.xlu0 %v7444_v11, %s6497_s13 }
0x18be   :  { %v7539_v37 = vpop.eup %5779 }
0x18bf   :  { %v3792_v36 = vsel %vm660_vm14, %v7539_v37, 0.0 }
0x18c0   :  { %3793 = vadd.xlane.f32.xlu1 %v3792_v36 }
0x18c1   :  { %3830 = vrot.lane.b32.xlu0 %v7438_v39, %s6496_s7 }
0x18c2   :  { %v3380_v24 = vpop.xlane.xlu0 %3379 }
0x18c3   :  { %5781 = vrcp.f32 %v3380_v24  ;;  %v3395_v42 = vand.u32 2147483648, %v3380_v24  ;;  %v3393_v30 = vand.u32 2147483647, %v3380_v24  ;;  %vm3389_vm11 = vweird.f32 %v3380_v24 }
0x18c5   :  { %v3396_v2 = vor.u32 1.1754944e-38, %v3395_v42  ;;  %vm3394_vm13 = vcmp.eq.f32.partialorder %v3393_v30, 8.507059e+37 }
0x18c9   :  { %v5782_v56 = vpop.eup %5781  ;;  %3851 = vrot.lane.b32.xlu0 %v7444_v11, %s6496_s7 }
0x18ca   :  { %v3385_v40 = vmul.f32 %v5782_v56, %v3380_v24  ;;  %vm3390_vm10 = vweird.f32 %v5782_v56 }
0x18cb   :  { %vm3391_vm12 = vmor %vm3389_vm11, %vm3390_vm10 }
0x18cc   :  { %v3386_v6 = vsub.f32 1.0, %v3385_v40 }
0x18ce   :  { %v3387_v45 = vmul.f32 %v5782_v56, %v3386_v6 }
0x18d0   :  { %v3388_v28 = vadd.f32 %v5782_v56, %v3387_v45 }
0x18d2   :  { %v3392_v51 = vsel %vm3391_vm12, %v5782_v56, %v3388_v28 }
0x18d3   :  { %v3397_v52 = vsel %vm3394_vm13, %v3396_v2, %v3392_v51 }
0x18d4   :  { %v3398_v39 = vmul.f32 %v7499_v9, %v3397_v52 }
0x18d5   :  { %v3555_v38 = vpop.permute.xlu0 %3554 }
0x18d6   :  { %v3414_v54 = vpack.c.bf16 %v3398_v39, %v3398_v39  ;;  %v3560_v55 = vsel %vm757_vm4, %v3555_v38, 0 }
0x18d7   :  { %3569 = vmatpush.bf16.msrb.mxu0 %v3560_v55 }
0x18d8   :  { %5290 = vmatmul.msk.bf16.vlgmr.msra.gmra.mxu0 %vm660_vm14, %v3414_v54 }
0x18e2   :  { %v3383_v11 = vpop.xlane.xlu2 %3382 }
0x18e3   :  { %v3518_v32 = vpop.xlane.xlu1 %3517  ;;  %5783 = vrcp.f32 %v3383_v11  ;;  %v3410_v7 = vand.u32 2147483648, %v3383_v11  ;;  %vm3404_vm5 = vweird.f32 %v3383_v11  ;;  %v3408_v53 = vand.u32 2147483647, %v3383_v11 }
0x18e4   :  { %5785 = vrcp.f32 %v3518_v32  ;;  %v3533_v50 = vand.u32 2147483648, %v3518_v32  ;;  %v3531_v4 = vand.u32 2147483647, %v3518_v32  ;;  %vm3527_vm2 = vweird.f32 %v3518_v32 }
0x18e5   :  { %v3411_v21 = vor.u32 1.1754944e-38, %v3410_v7  ;;  %vm3409_vm10 = vcmp.eq.f32.partialorder %v3408_v53, 8.507059e+37 }
0x18e6   :  { %v3534_v48 = vor.u32 1.1754944e-38, %v3533_v50  ;;  %vm3532_vm6 = vcmp.eq.f32.partialorder %v3531_v4, 8.507059e+37 }
0x18e9   :  { %v5784_v57 = vpop.eup %5783 }
0x18ea   :  { %v5786_v58 = vpop.eup %5785  ;;  %v3400_v59 = vmul.f32 %v5784_v57, %v3383_v11  ;;  %vm3405_vm1 = vweird.f32 %v5784_v57  ;;  %v3576_v41 = vpop.permute.xlu2 %3575 }
0x18eb   :  { %v3523_v61 = vmul.f32 %v5786_v58, %v3518_v32  ;;  %vm3528_vm15 = vweird.f32 %v5786_v58  ;;  %vm3406_vm9 = vmor %vm3404_vm5, %vm3405_vm1  ;;  %v3581_v62 = vsel %vm757_vm4, %v3576_v41, 0 }
0x18ec   :  { %v3401_v63 = vsub.f32 1.0, %v3400_v59  ;;  %vm3529_vm3 = vmor %vm3527_vm2, %vm3528_vm15 }
0x18ed   :  { %v3524_v3 = vsub.f32 1.0, %v3523_v61 }
0x18ee   :  { %v3402_v31 = vmul.f32 %v5784_v57, %v3401_v63 }
0x18ef   :  { %v3525_v9 = vmul.f32 %v5786_v58, %v3524_v3 }
0x18f0   :  { %v3403_v23 = vadd.f32 %v5784_v57, %v3402_v31 }
0x18f1   :  { %v3526_v5 = vadd.f32 %v5786_v58, %v3525_v9 }
0x18f2   :  { %v3407_v18 = vsel %vm3406_vm9, %v5784_v57, %v3403_v23 }
0x18f3   :  { %v3530_v13 = vsel %vm3529_vm3, %v5786_v58, %v3526_v5  ;;  %v3412_v0 = vsel %vm3409_vm10, %v3411_v21, %v3407_v18 }
0x18f4   :  { %v3535_v14 = vsel %vm3532_vm6, %v3534_v48, %v3530_v13  ;;  %v3413_v25 = vmul.f32 %v7505_v8, %v3412_v0 }
0x18f5   :  { %v3536_v20 = vmul.f32 %v7507_v46, %v3535_v14 }
0x18f6   :  { %v3415_v47 = vpack.c.bf16 %v3413_v25, %v3413_v25 }
0x18f7   :  { %v3552_v49 = vpack.c.bf16 %v3536_v20, %v3536_v20 }
0x18f9   :  { %5294 = vmatmul.msk.bf16.vlgmr.msrb.gmra.mxu0 %vm660_vm14, %v3552_v49 }
0x18fb   :  { %v3438_v60 = vpop.permute.xlu1 %3437 }
0x18fc   :  { %v3443_v27 = vsel %vm757_vm4, %v3438_v60, 0 }
0x18fd   :  { %3452 = vmatpush.bf16.msra.mxu1 %v3443_v27 }
0x1900   :  { %5291 = vmatmul.msk.bf16.vlgmr.msra.gmra.mxu1 %vm660_vm14, %v3415_v47  ;;  %v3521_v46 = vpop.xlane.xlu0 %3520 }
0x1901   :  { %3590 = vmatpush.bf16.msrb.mxu1 %v3581_v62  ;;  %5787 = vrcp.f32 %v3521_v46  ;;  %v3548_v10 = vand.u32 2147483648, %v3521_v46  ;;  %v3546_v33 = vand.u32 2147483647, %v3521_v46  ;;  %vm3542_vm12 = vweird.f32 %v3521_v46 }
0x1903   :  { %v3549_v36 = vor.u32 1.1754944e-38, %v3548_v10  ;;  %vm3547_vm15 = vcmp.eq.f32.partialorder %v3546_v33, 8.507059e+37 }
0x1907   :  { %v5788_v17 = vpop.eup %5787 }
0x1908   :  { %v3538_v43 = vmul.f32 %v5788_v17, %v3521_v46  ;;  %v3656_v44 = vpop.xlane.xlu0 %3655  ;;  %vm3543_vm11 = vweird.f32 %v5788_v17 }
0x1909   :  { %5789 = vrcp.f32 %v3656_v44  ;;  %vm3544_vm13 = vmor %vm3542_vm12, %vm3543_vm11  ;;  %v3671_v39 = vand.u32 2147483648, %v3656_v44  ;;  %vm3665_vm2 = vweird.f32 %v3656_v44  ;;  %v3669_v38 = vand.u32 2147483647, %v3656_v44 }
0x190a   :  { %v3539_v29 = vsub.f32 1.0, %v3538_v43 }
0x190b   :  { %v3672_v32 = vor.u32 1.1754944e-38, %v3671_v39  ;;  %vm3670_vm5 = vcmp.eq.f32.partialorder %v3669_v38, 8.507059e+37 }
0x190c   :  { %v3540_v8 = vmul.f32 %v5788_v17, %v3539_v29 }
0x190e   :  { %v3541_v34 = vadd.f32 %v5788_v17, %v3540_v8 }
0x190f   :  { %v5790_v35 = vpop.eup %5789 }
0x1910   :  { %v3545_v24 = vsel %vm3544_vm13, %v5788_v17, %v3541_v34  ;;  %v3661_v56 = vmul.f32 %v5790_v35, %v3656_v44  ;;  %v3659_v40 = vpop.xlane.xlu0 %3658  ;;  %vm3666_vm1 = vweird.f32 %v5790_v35 }
0x1911   :  { %v3550_v6 = vsel %vm3547_vm15, %v3549_v36, %v3545_v24  ;;  %5791 = vrcp.f32 %v3659_v40  ;;  %vm3667_vm3 = vmor %vm3665_vm2, %vm3666_vm1  ;;  %v3686_v58 = vand.u32 2147483648, %v3659_v40  ;;  %vm3680_vm9 = vweird.f32 %v3659_v40 }
0x1912   :  { %v3551_v42 = vmul.f32 %v7516_v26, %v3550_v6  ;;  %v3662_v45 = vsub.f32 1.0, %v3661_v56  ;;  %v3684_v61 = vand.u32 2147483647, %v3659_v40 }
0x1913   :  { %v3687_v9 = vor.u32 1.1754944e-38, %v3686_v58 }
0x1914   :  { %v3553_v30 = vpack.c.bf16 %v3551_v42, %v3551_v42  ;;  %v3663_v28 = vmul.f32 %v5790_v35, %v3662_v45  ;;  %vm3685_vm11 = vcmp.eq.f32.partialorder %v3684_v61, 8.507059e+37  ;;  %v5419_v61 = vld [vmem:[#allocation32] sm:$0xff] }
0x1916   :  { %5295 = vmatmul.msk.bf16.vlgmr.msrb.gmra.mxu1 %vm660_vm14, %v3553_v30  ;;  %v3664_v51 = vadd.f32 %v5790_v35, %v3663_v28 }
0x1917   :  { %v5792_v2 = vpop.eup %5791 }
0x1918   :  { %v3676_v52 = vmul.f32 %v5792_v2, %v3659_v40  ;;  %v3668_v55 = vsel %vm3667_vm3, %v5790_v35, %v3664_v51  ;;  %vm3681_vm6 = vweird.f32 %v5792_v2 }
0x1919   :  { %v3673_v57 = vsel %vm3670_vm5, %v3672_v32, %v3668_v55  ;;  %vm3682_vm10 = vmor %vm3680_vm9, %vm3681_vm6 }
0x191a   :  { %v3677_v54 = vsub.f32 1.0, %v3676_v52  ;;  %v3674_v59 = vmul.f32 %v7522_v1, %v3673_v57 }
0x191c   :  { %v3678_v11 = vmul.f32 %v5792_v2, %v3677_v54  ;;  %v3690_v4 = vpack.c.bf16 %v3674_v59, %v3674_v59  ;;  %v5420_v59 = vld [vmem:[#allocation32 + $0x8] sm:$0xff] }
0x191d   :  { %3932 = vmatpush.bf16.msrb.mxu2 %v5420_v59 }
0x191e   :  { %v3679_v26 = vadd.f32 %v5792_v2, %v3678_v11 }
0x1920   :  { %v3683_v50 = vsel %vm3682_vm10, %v5792_v2, %v3679_v26 }
0x1921   :  { %v3688_v23 = vsel %vm3685_vm11, %v3687_v9, %v3683_v50  ;;  %3933 = vmatpush.bf16.msrb.mxu2 %v5419_v61 }
0x1922   :  { %v3689_v7 = vmul.f32 %v7526_v15, %v3688_v23 }
0x1923   :  { %v3693_v63 = vpop.permute.xlu0 %3692  ;;  %v3797_v3 = vpop.xlane.xlu2 %3796 }
0x1924   :  { %v3698_v31 = vsel %vm757_vm4, %v3693_v63, 0  ;;  %5793 = vrcp.f32 %v3797_v3  ;;  %v3691_v14 = vpack.c.bf16 %v3689_v7, %v3689_v7  ;;  %v3824_v21 = vand.u32 2147483648, %v3797_v3 }
0x1925   :  { %3707 = vmatpush.bf16.msra.mxu0 %v3698_v31  ;;  %vm3818_vm13 = vweird.f32 %v3797_v3  ;;  %v3822_v49 = vand.u32 2147483647, %v3797_v3 }
0x1926   :  { %v3825_v60 = vor.u32 1.1754944e-38, %v3824_v21  ;;  %v5610_v21 = vld [vmem:[%s7867_s11] ss:$0 sm:$0xff] }
0x1927   :  { %vm3823_vm1 = vcmp.eq.f32.partialorder %v3822_v49, 8.507059e+37 }
0x1928   :  { %5298 = vmatmul.msk.bf16.vlgmr.msra.gmra.mxu0 %vm660_vm14, %v3690_v4 }
0x192a   :  { %v5794_v5 = vpop.eup %5793 }
0x192b   :  { %v3814_v1 = vmul.f32 %v5794_v5, %v3797_v3  ;;  %v3714_v48 = vpop.permute.xlu0 %3713  ;;  %vm3819_vm12 = vweird.f32 %v5794_v5 }
0x192c   :  { %v3719_v53 = vsel %vm757_vm4, %v3714_v48, 0  ;;  %vm3820_vm15 = vmor %vm3818_vm13, %vm3819_vm12 }
0x192d   :  { %v3815_v13 = vsub.f32 1.0, %v3814_v1  ;;  %3728 = vmatpush.bf16.msra.mxu1 %v3719_v53 }
0x192f   :  { %v3816_v18 = vmul.f32 %v5794_v5, %v3815_v13 }
0x1930   :  { %5299 = vmatmul.msk.bf16.vlgmr.msra.gmra.mxu1 %vm660_vm14, %v3691_v14 }
0x1931   :  { %v3817_v20 = vadd.f32 %v5794_v5, %v3816_v18 }
0x1933   :  { %v3831_v0 = vpop.permute.xlu0 %3830  ;;  %v3794_v25 = vpop.xlane.xlu1 %3793  ;;  %v3821_v41 = vsel %vm3820_vm15, %v5794_v5, %v3817_v20 }
0x1934   :  { %v3836_v15 = vsel %vm757_vm4, %v3831_v0, 0  ;;  %5795 = vrcp.f32 %v3794_v25  ;;  %v3826_v27 = vsel %vm3823_vm1, %v3825_v60, %v3821_v41  ;;  %v3809_v10 = vand.u32 2147483648, %v3794_v25 }
0x1935   :  { %3845 = vmatpush.bf16.msrb.mxu0 %v3836_v15  ;;  %v3827_v47 = vmul.f32 %v7530_v16, %v3826_v27  ;;  %v3807_v33 = vand.u32 2147483647, %v3794_v25  ;;  %vm3803_vm3 = vweird.f32 %v3794_v25 }
0x1936   :  { %v3810_v35 = vor.u32 1.1754944e-38, %v3809_v10 }
0x1937   :  { %v3829_v29 = vpack.c.bf16 %v3827_v47, %v3827_v47  ;;  %vm3808_vm6 = vcmp.eq.f32.partialorder %v3807_v33, 8.507059e+37  ;;  %v5422_v33 = vld [vmem:[#allocation34 + $0x8] sm:$0xff] }
0x1938   :  { %4037 = vmatpush.bf16.msrb.mxu3 %v5422_v33 }
0x193a   :  { %v5796_v62 = vpop.eup %5795 }
0x193b   :  { %v3799_v46 = vmul.f32 %v5796_v62, %v3794_v25  ;;  %v3852_v17 = vpop.permute.xlu0 %3851  ;;  %vm3804_vm2 = vweird.f32 %v5796_v62 }
0x193c   :  { %v3857_v43 = vsel %vm757_vm4, %v3852_v17, 0  ;;  %vm3805_vm5 = vmor %vm3803_vm3, %vm3804_vm2 }
0x193d   :  { %v3800_v44 = vsub.f32 1.0, %v3799_v46  ;;  %3866 = vmatpush.bf16.msrb.mxu1 %v3857_v43 }
0x193f   :  { %v3801_v8 = vmul.f32 %v5796_v62, %v3800_v44 }
0x1940   :  { %5303 = vmatmul.msk.bf16.vlgmr.msrb.gmra.mxu1 %vm660_vm14, %v3829_v29 }
0x1941   :  { %v3802_v34 = vadd.f32 %v5796_v62, %v3801_v8 }
0x1943   :  { %v3806_v36 = vsel %vm3805_vm5, %v5796_v62, %v3802_v34 }
0x1944   :  { %v3811_v16 = vsel %vm3808_vm6, %v3810_v35, %v3806_v36  ;;  %v5421_v35 = vld [vmem:[#allocation34] sm:$0xff] }
0x1945   :  { %v3812_v24 = vmul.f32 %v7539_v37, %v3811_v16  ;;  %4038 = vmatpush.bf16.msrb.mxu3 %v5421_v35 }
0x1947   :  { %v3828_v56 = vpack.c.bf16 %v3812_v24, %v3812_v24 }
0x1949   :  { %5302 = vmatmul.msk.bf16.vlgmr.msrb.gmra.mxu0 %vm660_vm14, %v3828_v56 }
0x1955   :  { %v3433_v40 = vpop.f32.mrf.mxu0 }
0x195d   :  { %v3435_v6 = vpop.f32.mrf.mxu0 }
0x1976   :  { %v3571_v42 = vpop.f32.mrf.mxu0 }
0x197d   :  { %v3454_v45 = vpop.f32.mrf.mxu1 }
0x197e   :  { %v3573_v30 = vpop.f32.mrf.mxu0 }
0x1985   :  { %v3456_v28 = vpop.f32.mrf.mxu1 }
0x1993   :  { %v3592_v2 = vpop.f32.mrf.mxu1 }
0x1994   :  { %v5550_v51 = vpack.i.bf16 %v3592_v2, %v3571_v42 }
0x1996   :  { %5551 = vrot.lane.b32.xlu1 %v5550_v51, %s6461_s1 }
0x199b   :  { %v3594_v52 = vpop.f32.mrf.mxu1 }
0x19a5   :  { %v3709_v39 = vpop.f32.mrf.mxu0 }
0x19ad   :  { %v3711_v38 = vpop.f32.mrf.mxu0  ;;  %v3730_v54 = vpop.f32.mrf.mxu1 }
0x19ae   :  { %v5555_v55 = vpack.i.bf16 %v3730_v54, %v3709_v39 }
0x19b0   :  { %5556 = vrot.lane.b32.xlu0 %v5555_v55, %s6493_s17 }
0x19b5   :  { %v3732_v37 = vpop.f32.mrf.mxu1 }
0x19bd   :  { %v3868_v11 = vpop.f32.mrf.mxu1 }
0x19c5   :  { %v3870_v32 = vpop.f32.mrf.mxu1 }
0x19c6   :  { %v3847_v57 = vpop.f32.mrf.mxu0 }
0x19c7   :  { %v5560_v26 = vpack.i.bf16 %v3868_v11, %v3847_v57  ;;  %v5611_v57 = vld [vmem:[%s7868_s0] ss:$0 sm:$0xff] }
0x19c9   :  { %5561 = vrot.lane.b32.xlu2 %v5560_v26, %s6494_s28 }
0x19ce   :  { %v3849_v58 = vpop.f32.mrf.mxu0 }
0x1a08   :  { %v5552_v63 = vpop.permute.xlu1 %5551 }
0x1a09   :  { %v5554_v3 = vunpack.i.h.bf16 %v5552_v63  ;;  %v5553_v50 = vunpack.i.l.bf16 %v5552_v63  ;;  %v5612_v63 = vld [vmem:[%s7869_s4] ss:$0 sm:$0xff] }
0x1a0b   :  { %v3897_v5 = vsel %vm660_vm14, %v3454_v45, %v5554_v3  ;;  %v3896_v7 = vsel %vm660_vm14, %v3433_v40, %v5553_v50 }
0x1a22   :  { %v5557_v31 = vpop.permute.xlu0 %5556 }
0x1a23   :  { %v5559_v9 = vunpack.i.h.bf16 %v5557_v31  ;;  %v5558_v4 = vunpack.i.l.bf16 %v5557_v31  ;;  %v5562_v23 = vpop.permute.xlu2 %5561 }
0x1a24   :  { %v5564_v1 = vunpack.i.h.bf16 %v5562_v23  ;;  %v5563_v48 = vunpack.i.l.bf16 %v5562_v23 }
0x1a25   :  { %v3899_v53 = vsel %vm1244_vm7, %v3897_v5, %v5559_v9  ;;  %v3898_v13 = vsel %vm1244_vm7, %v3896_v7, %v5558_v4  ;;  %v5424_v5 = vld [vmem:[#allocation35 + $0x8] sm:$0xff]  ;;  %v5613_v7 = vld [vmem:[%s6644_s30] ss:$0 sm:$0xff] }
0x1a26   :  { %v3901_v14 = vsel %vm1247_vm8, %v3899_v53, %v5564_v1  ;;  %v3900_v18 = vsel %vm1247_vm8, %v3898_v13, %v5563_v48  ;;  %4088 = vmatpush.bf16.msra.mxu0 %v5424_v5  ;;  %v5423_v48 = vld [vmem:[#allocation35] sm:$0xff] }
0x1a27   :  { %v3907_v20 = vpack.c.bf16 %v3901_v14, %v3900_v18 }
0x1a29   :  { %5312 = vmatmul.msk.bf16.vlgmr.msrb.gmra.mxu2 %vm454_vm0, %v3907_v20 }
0x1a2a   :  { %4089 = vmatpush.bf16.msra.mxu0 %v5423_v48 }
0x1aac   :  { %v3935_v49 = vpop.f32.mrf.mxu2 }
0x1aad   :  { %v3936_v0 = vadd.f32 %v5610_v21, %v3935_v49 }
0x1aaf   :  { %v7582_v25 = vadd.f32 %v3936_v0, %v7413_v12 }
0x1ab1   :  { %v3954_v41 = vsel %vm454_vm0, %v7582_v25, 0.0  ;;  %v3962_v15 = vmul.f32 %v7582_v25, %v7582_v25 }
0x1ab2   :  { %3955 = vadd.xlane.f32.xlu0 %v3954_v41 }
0x1ab3   :  { %v3964_v60 = vsel %vm454_vm0, %v3962_v15, 0.0 }
0x1ab4   :  { %v3937_v27 = vpop.f32.mrf.mxu2  ;;  %3965 = vadd.xlane.f32.xlu2 %v3964_v60 }
0x1ab5   :  { %v3938_v62 = vadd.f32 %v5610_v21, %v3937_v27 }
0x1ab7   :  { %v7590_v47 = vadd.f32 %v3938_v62, %v7420_v19 }
0x1ab9   :  { %v3957_v46 = vsel %vm454_vm0, %v7590_v47, 0.0  ;;  %v3963_v12 = vmul.f32 %v7590_v47, %v7590_v47 }
0x1aba   :  { %3958 = vadd.xlane.f32.xlu1 %v3957_v46 }
0x1abb   :  { %v3967_v17 = vsel %vm454_vm0, %v3963_v12, 0.0 }
0x1abc   :  { %3968 = vadd.xlane.f32.xlu0 %v3967_v17 }
0x1b25   :  { %v3956_v43 = vpop.xlane.xlu0 %3955 }
0x1b26   :  { %v3960_v44 = vmul.f32 %v3956_v43, %v6824_v22 }
0x1b27   :  { %v3966_v29 = vpop.xlane.xlu2 %3965 }
0x1b28   :  { %v3972_v10 = vmul.f32 %v3960_v44, %v3960_v44  ;;  %v3970_v8 = vmul.f32 %v3966_v29, %v6824_v22  ;;  %v3976_v11 = vsub.f32 %v7582_v25, %v3960_v44 }
0x1b2a   :  { %v3974_v19 = vsub.f32 %v3970_v8, %v3972_v10 }
0x1b2c   :  { %v3978_v34 = vadd.f32 1e-05, %v3974_v19  ;;  %v5614_v19 = vld [vmem:[%s6654_s19] ss:$0 sm:$0xff] }
0x1b2d   :  { %v3959_v36 = vpop.xlane.xlu1 %3958 }
0x1b2e   :  { %5797 = vrsqrt.f32 %v3978_v34  ;;  %v3961_v16 = vmul.f32 %v3959_v36, %v6824_v22  ;;  %vm3986_vm10 = vweird.f32 %v3978_v34 }
0x1b2f   :  { %v3969_v24 = vpop.xlane.xlu0 %3968 }
0x1b30   :  { %v3973_v56 = vmul.f32 %v3961_v16, %v3961_v16  ;;  %v3971_v40 = vmul.f32 %v3969_v24, %v6824_v22  ;;  %v3977_v59 = vsub.f32 %v7590_v47, %v3961_v16 }
0x1b32   :  { %v3975_v6 = vsub.f32 %v3971_v40, %v3973_v56 }
0x1b34   :  { %v5798_v42 = vpop.eup %5797  ;;  %v3979_v45 = vadd.f32 1e-05, %v3975_v6 }
0x1b35   :  { %v3981_v30 = vmul.f32 %v5798_v42, %v3978_v34  ;;  %vm3987_vm9 = vweird.f32 %v5798_v42 }
0x1b36   :  { %5799 = vrsqrt.f32 %v3979_v45  ;;  %vm3988_vm11 = vmor %vm3986_vm10, %vm3987_vm9  ;;  %vm3996_vm13 = vweird.f32 %v3979_v45 }
0x1b37   :  { %v3982_v28 = vmul.f32 %v5798_v42, %v3981_v30 }
0x1b39   :  { %v3983_v2 = vmul.f32 0.5, %v3982_v28 }
0x1b3b   :  { %v3984_v51 = vsub.f32 1.5, %v3983_v2 }
0x1b3c   :  { %v5800_v52 = vpop.eup %5799 }
0x1b3d   :  { %v3985_v39 = vmul.f32 %v5798_v42, %v3984_v51  ;;  %v3991_v38 = vmul.f32 %v5800_v52, %v3979_v45  ;;  %vm3997_vm12 = vweird.f32 %v5800_v52 }
0x1b3e   :  { %vm3998_vm15 = vmor %vm3996_vm13, %vm3997_vm12 }
0x1b3f   :  { %v3992_v54 = vmul.f32 %v5800_v52, %v3991_v38  ;;  %v3989_v55 = vsel %vm3988_vm11, %v5798_v42, %v3985_v39  ;;  %v5426_v38 = vld [vmem:[#allocation31 + $0x18] sm:$0xff] }
0x1b40   :  { %v4000_v26 = vmul.f32 %v3989_v55, %v3976_v11  ;;  %4188 = vmatpush.bf16.msra.mxu1 %v5426_v38  ;;  %v5425_v55 = vld [vmem:[#allocation31 + $0x10] sm:$0xff] }
0x1b41   :  { %v3993_v37 = vmul.f32 0.5, %v3992_v54 }
0x1b42   :  { %v4005_v3 = vmul.f32 %v5611_v57, %v4000_v26 }
0x1b43   :  { %v3994_v32 = vsub.f32 1.5, %v3993_v37 }
0x1b44   :  { %v4010_v9 = vadd.f32 %v5612_v63, %v4005_v3  ;;  %4189 = vmatpush.bf16.msra.mxu1 %v5425_v55 }
0x1b45   :  { %v3995_v58 = vmul.f32 %v5800_v52, %v3994_v32 }
0x1b47   :  { %v3999_v61 = vsel %vm3998_vm15, %v5800_v52, %v3995_v58 }
0x1b48   :  { %v4001_v50 = vmul.f32 %v3999_v61, %v3977_v59 }
0x1b4a   :  { %v4006_v31 = vmul.f32 %v5611_v57, %v4001_v50 }
0x1b4c   :  { %v4011_v4 = vadd.f32 %v5612_v63, %v4006_v31 }
0x1b4e   :  { %v4012_v23 = vpack.c.bf16 %v4011_v4, %v4010_v9 }
0x1b50   :  { %5321 = vmatmul.msk.bf16.vlgmr.msrb.gmra.mxu3 %vm454_vm0, %v4012_v23 }
0x1bd3   :  { %v4040_v1 = vpop.f32.mrf.mxu3 }
0x1bd4   :  { %v4041_v53 = vadd.f32 %v5613_v7, %v4040_v1 }
0x1bd6   :  { %v4045_v13 = vmul.f32 %v4041_v53, %v4041_v53 }
0x1bd8   :  { %v4047_v14 = vmul.f32 %v4045_v13, %v4041_v53  ;;  %v5615_v13 = vld [vmem:[%s7864_s18 + $0x1] ss:$0 sm:$0xff] }
0x1bda   :  { %v4049_v18 = vmul.f32 0.044715, %v4047_v14 }
0x1bdb   :  { %v4042_v20 = vpop.f32.mrf.mxu3 }
0x1bdc   :  { %v4051_v21 = vadd.f32 %v4049_v18, %v4041_v53  ;;  %v4043_v49 = vadd.f32 %v5613_v7, %v4042_v20 }
0x1bde   :  { %v4053_v0 = vmul.f32 0.7978846, %v4051_v21  ;;  %v4046_v41 = vmul.f32 %v4043_v49, %v4043_v49 }
0x1be0   :  { %v4048_v15 = vmul.f32 %v4046_v41, %v4043_v49  ;;  %5801 = vtanh.f32 %v4053_v0 }
0x1be2   :  { %v4050_v60 = vmul.f32 0.044715, %v4048_v15 }
0x1be4   :  { %v4052_v27 = vadd.f32 %v4050_v60, %v4043_v49 }
0x1be6   :  { %v4054_v62 = vmul.f32 0.7978846, %v4052_v27  ;;  %v5802_v46 = vpop.eup %5801 }
0x1be7   :  { %v4057_v12 = vadd.f32 1.0, %v5802_v46  ;;  %v5617_v46 = vld [vmem:[%s7866_s20 + $0x1] ss:$0 sm:$0xff] }
0x1be8   :  { %5803 = vtanh.f32 %v4054_v62 }
0x1be9   :  { %v4059_v43 = vmul.f32 0.5, %v4057_v12 }
0x1beb   :  { %v4061_v10 = vmul.f32 %v4059_v43, %v4041_v53 }
0x1bee   :  { %v5804_v17 = vpop.eup %5803 }
0x1bef   :  { %v4058_v44 = vadd.f32 1.0, %v5804_v17 }
0x1bf1   :  { %v4060_v29 = vmul.f32 0.5, %v4058_v44 }
0x1bf3   :  { %v4062_v8 = vmul.f32 %v4060_v29, %v4043_v49  ;;  %v5616_v49 = vld [vmem:[%s7865_s9 + $0x1] ss:$0 sm:$0xff] }
0x1bf5   :  { %v4063_v33 = vpack.c.bf16 %v4062_v8, %v4061_v10 }
0x1bf7   :  { %5330 = vmatmul.msk.bf16.vlgmr.msra.gmra.mxu0 %vm454_vm0, %v4063_v33 }
0x1c74   :  { %v4091_v34 = vpop.f32.mrf.mxu0 }
0x1c75   :  { %v4092_v35 = vadd.f32 %v5614_v19, %v4091_v34 }
0x1c77   :  { %v7610_v36 = vadd.f32 %v4092_v35, %v7582_v25 }
0x1c79   :  { %v4100_v16 = vsel %vm454_vm0, %v7610_v36, 0.0  ;;  %v4108_v24 = vmul.f32 %v7610_v36, %v7610_v36 }
0x1c7a   :  { %4101 = vadd.xlane.f32.xlu0 %v4100_v16 }
0x1c7b   :  { %v4110_v56 = vsel %vm454_vm0, %v4108_v24, 0.0 }
0x1c7c   :  { %v4093_v40 = vpop.f32.mrf.mxu0  ;;  %4111 = vadd.xlane.f32.xlu2 %v4110_v56 }
0x1c7d   :  { %v4094_v6 = vadd.f32 %v5614_v19, %v4093_v40 }
0x1c7f   :  { %v7618_v42 = vadd.f32 %v4094_v6, %v7590_v47 }
0x1c81   :  { %v4103_v45 = vsel %vm454_vm0, %v7618_v42, 0.0  ;;  %v4109_v25 = vmul.f32 %v7618_v42, %v7618_v42 }
0x1c82   :  { %4104 = vadd.xlane.f32.xlu1 %v4103_v45 }
0x1c83   :  { %v4113_v30 = vsel %vm454_vm0, %v4109_v25, 0.0 }
0x1c84   :  { %4114 = vadd.xlane.f32.xlu0 %v4113_v30 }
0x1ced   :  { %v4102_v28 = vpop.xlane.xlu0 %4101 }
0x1cee   :  { %v4106_v2 = vmul.f32 %v4102_v28, %v6824_v22 }
0x1cef   :  { %v4112_v51 = vpop.xlane.xlu2 %4111 }
0x1cf0   :  { %v4118_v52 = vmul.f32 %v4106_v2, %v4106_v2  ;;  %v4116_v39 = vmul.f32 %v4112_v51, %v6824_v22  ;;  %v4122_v48 = vsub.f32 %v7610_v36, %v4106_v2 }
0x1cf2   :  { %v4120_v47 = vsub.f32 %v4116_v39, %v4118_v52 }
0x1cf4   :  { %v4124_v54 = vadd.f32 1e-05, %v4120_v47 }
0x1cf5   :  { %v4105_v37 = vpop.xlane.xlu1 %4104 }
0x1cf6   :  { %5805 = vrsqrt.f32 %v4124_v54  ;;  %v4107_v11 = vmul.f32 %v4105_v37, %v6824_v22  ;;  %vm4132_vm2 = vweird.f32 %v4124_v54 }
0x1cf7   :  { %v4115_v32 = vpop.xlane.xlu0 %4114 }
0x1cf8   :  { %v4119_v57 = vmul.f32 %v4107_v11, %v4107_v11  ;;  %v4117_v26 = vmul.f32 %v4115_v32, %v6824_v22  ;;  %v4123_v20 = vsub.f32 %v7618_v42, %v4107_v11 }
0x1cfa   :  { %v4121_v58 = vsub.f32 %v4117_v26, %v4119_v57 }
0x1cfc   :  { %v5806_v59 = vpop.eup %5805  ;;  %v4125_v61 = vadd.f32 1e-05, %v4121_v58 }
0x1cfd   :  { %v4127_v63 = vmul.f32 %v5806_v59, %v4124_v54  ;;  %vm4133_vm1 = vweird.f32 %v5806_v59 }
0x1cfe   :  { %5807 = vrsqrt.f32 %v4125_v61  ;;  %vm4134_vm3 = vmor %vm4132_vm2, %vm4133_vm1  ;;  %vm4142_vm6 = vweird.f32 %v4125_v61 }
0x1cff   :  { %v4128_v3 = vmul.f32 %v5806_v59, %v4127_v63 }
0x1d01   :  { %v4129_v50 = vmul.f32 0.5, %v4128_v3 }
0x1d03   :  { %v4130_v31 = vsub.f32 1.5, %v4129_v50 }
0x1d04   :  { %v5808_v9 = vpop.eup %5807 }
0x1d05   :  { %v4131_v4 = vmul.f32 %v5806_v59, %v4130_v31  ;;  %v4137_v23 = vmul.f32 %v5808_v9, %v4125_v61  ;;  %vm4143_vm5 = vweird.f32 %v5808_v9 }
0x1d06   :  { %vm4144_vm9 = vmor %vm4142_vm6, %vm4143_vm5 }
0x1d07   :  { %v4138_v5 = vmul.f32 %v5808_v9, %v4137_v23  ;;  %v4135_v7 = vsel %vm4134_vm3, %v5806_v59, %v4131_v4 }
0x1d08   :  { %v4146_v14 = vmul.f32 %v4135_v7, %v4122_v48 }
0x1d09   :  { %v4139_v1 = vmul.f32 0.5, %v4138_v5 }
0x1d0a   :  { %v4151_v0 = vmul.f32 %v5615_v13, %v4146_v14 }
0x1d0b   :  { %v4140_v53 = vsub.f32 1.5, %v4139_v1 }
0x1d0c   :  { %v4156_v60 = vadd.f32 %v5616_v49, %v4151_v0 }
0x1d0d   :  { %v4141_v18 = vmul.f32 %v5808_v9, %v4140_v53 }
0x1d0f   :  { %v4145_v21 = vsel %vm4144_vm9, %v5808_v9, %v4141_v18 }
0x1d10   :  { %v4147_v41 = vmul.f32 %v4145_v21, %v4123_v20 }
0x1d12   :  { %v4152_v15 = vmul.f32 %v5615_v13, %v4147_v41 }
0x1d14   :  { %v4157_v27 = vadd.f32 %v5616_v49, %v4152_v15 }
0x1d16   :  { %v4163_v62 = vpack.c.bf16 %v4157_v27, %v4156_v60 }
0x1d18   :  { %5342 = vmatmul.msk.bf16.vlgmr.msra.gmra.mxu1 %vm454_vm0, %v4163_v62 }
0x1d95   :  { %v4191_v12 = vpop.f32.mrf.mxu1 }
0x1d96   :  { %v4192_v17 = vadd.f32 %v5617_v46, %v4191_v12 }
0x1d98   :  { %v4196_v43 = vpack.c.bf16 %v4192_v17, %v4192_v17 }
0x1d9a   :  { %v4199_v44 = vunpack.c.l.b16 %v4196_v43 }
0x1d9c   :  { %v7635_v29 = vpack.c.b16 %v4199_v44, %v4199_v44 }
0x1d9d   :  { %v4193_v10 = vpop.f32.mrf.mxu1 }
0x1d9e   :  { %v4194_v8 = vadd.f32 %v5617_v46, %v4193_v10  ;;  %4340 = vrot.lane.b32.xlu0 %v7635_v29, %s6490_s15  ;;  %4201 = vrot.lane.b32.xlu1 %v7635_v29, %s6489_s6 }
0x1da0   :  { %v4197_v33 = vpack.c.bf16 %v4194_v8, %v4194_v8 }
0x1da2   :  { %v4223_v19 = vunpack.c.l.b16 %v4197_v33 }
0x1da4   :  { %v7641_v34 = vpack.c.b16 %v4223_v19, %v4223_v19 }
0x1da6   :  { %4225 = vrot.lane.b32.xlu2 %v7641_v34, %s6489_s6  ;;  %4363 = vrot.lane.b32.xlu0 %v7641_v34, %s6490_s15 }
0x1da7   :  { %4338 = vrot.lane.b32.xlu1 %v7635_v29, %s6486_s27 }
0x1dae   :  { %4361 = vrot.lane.b32.xlu2 %v7641_v34, %s6486_s27  ;;  %4478 = vrot.lane.b32.xlu0 %v7635_v29, %s6491_s2 }
0x1daf   :  { %4501 = vrot.lane.b32.xlu1 %v7641_v34, %s6491_s2 }
0x1db6   :  { %4476 = vrot.lane.b32.xlu2 %v7635_v29, %s6487_s16  ;;  %4499 = vrot.lane.b32.xlu0 %v7641_v34, %s6487_s16 }
0x1db7   :  { %4616 = vrot.lane.b32.xlu1 %v7635_v29, %s6492_s5 }
0x1dbe   :  { %4639 = vrot.lane.b32.xlu2 %v7641_v34, %s6492_s5  ;;  %4614 = vrot.lane.b32.xlu0 %v7635_v29, %s6488_s3 }
0x1dbf   :  { %4637 = vrot.lane.b32.xlu1 %v7641_v34, %s6488_s3 }
0x1e00   :  { %v4226_v35 = vpop.permute.xlu2 %4225 }
0x1e01   :  { %v4231_v16 = vsel %vm660_vm14, %v4226_v35, 0 }
0x1e02   :  { %4240 = vmatpush.bf16.xpose.msra.mxu3 %v4231_v16 }
0x1e08   :  { %v4362_v24 = vpop.permute.xlu2 %4361 }
0x1e09   :  { %5344 = vmatmul.msk.bf16.vlgmr.msra.gmra.mxu3 %vm660_vm14, %v4197_v33 }
0x1e10   :  { %v4341_v56 = vpop.permute.xlu0 %4340  ;;  %v4202_v6 = vpop.permute.xlu1 %4201 }
0x1e11   :  { %v4346_v40 = vsel %vm660_vm14, %v4341_v56, 0  ;;  %v4207_v45 = vsel %vm660_vm14, %v4202_v6, 0  ;;  %v4477_v25 = vpop.permute.xlu2 %4476 }
0x1e12   :  { %4216 = vmatpush.bf16.xpose.msra.mxu2 %v4207_v45 }
0x1e18   :  { %v4364_v30 = vpop.permute.xlu0 %4363 }
0x1e19   :  { %v4369_v28 = vsel %vm660_vm14, %v4364_v30, 0  ;;  %v4339_v2 = vpop.permute.xlu1 %4338  ;;  %5343 = vmatmul.msk.bf16.vlgmr.msra.gmra.mxu2 %vm660_vm14, %v4196_v43  ;;  %v4640_v51 = vpop.permute.xlu2 %4639 }
0x1e1a   :  { %4355 = vmatpush.bf16.xpose.msrb.mxu2 %v4346_v40  ;;  %4378 = vmatpush.bf16.xpose.msrb.mxu3 %v4369_v28  ;;  %v4645_v54 = vsel %vm660_vm14, %v4640_v51, 0 }
0x1e20   :  { %v4479_v52 = vpop.permute.xlu0 %4478 }
0x1e21   :  { %v4484_v39 = vsel %vm660_vm14, %v4479_v52, 0  ;;  %v4502_v38 = vpop.permute.xlu1 %4501  ;;  %5348 = vmatmul.msk.bf16.vlgmr.msrb.gmra.mxu3 %vm660_vm14, %v4362_v24 }
0x1e22   :  { %v4507_v47 = vsel %vm660_vm14, %v4502_v38, 0  ;;  %4493 = vmatpush.bf16.xpose.msra.mxu2 %v4484_v39 }
0x1e23   :  { %4516 = vmatpush.bf16.xpose.msra.mxu3 %v4507_v47 }
0x1e28   :  { %v4500_v11 = vpop.permute.xlu0 %4499 }
0x1e29   :  { %v4617_v55 = vpop.permute.xlu1 %4616  ;;  %5347 = vmatmul.msk.bf16.vlgmr.msrb.gmra.mxu2 %vm660_vm14, %v4339_v2 }
0x1e2a   :  { %v4622_v37 = vsel %vm660_vm14, %v4617_v55, 0 }
0x1e2b   :  { %4654 = vmatpush.bf16.xpose.msrb.mxu3 %v4645_v54  ;;  %4631 = vmatpush.bf16.xpose.msrb.mxu2 %v4622_v37 }
0x1e30   :  { %v4615_v57 = vpop.permute.xlu0 %4614 }
0x1e31   :  { %5352 = vmatmul.msk.bf16.vlgmr.msra.gmra.mxu3 %vm660_vm14, %v4500_v11  ;;  %v4638_v32 = vpop.permute.xlu1 %4637 }
0x1e39   :  { %5351 = vmatmul.msk.bf16.vlgmr.msra.gmra.mxu2 %vm660_vm14, %v4477_v25 }
0x1e41   :  { %5356 = vmatmul.msk.bf16.vlgmr.msrb.gmra.mxu3 %vm660_vm14, %v4638_v32 }
0x1e49   :  { %5355 = vmatmul.msk.bf16.vlgmr.msrb.gmra.mxu2 %vm660_vm14, %v4615_v57 }
0x1e8c   :  { %v4242_v26 = vpop.f32.mrf.mxu3 }
0x1e8d   :  { %v4249_v58 = vsel %vm660_vm14, %v4242_v26, -inf }
0x1e8e   :  { %4250 = vmax.xlane.f32.xlu0 %v4249_v58 }
0x1e94   :  { %v4244_v59 = vpop.f32.mrf.mxu3 }
0x1e9c   :  { %v4218_v61 = vpop.f32.mrf.mxu2 }
0x1e9d   :  { %v4246_v63 = vsel %vm660_vm14, %v4218_v61, -inf }
0x1e9e   :  { %4247 = vmax.xlane.f32.xlu2 %v4246_v63 }
0x1ea4   :  { %v4380_v3 = vpop.f32.mrf.mxu3  ;;  %v4220_v50 = vpop.f32.mrf.mxu2 }
0x1ea5   :  { %v4387_v31 = vsel %vm660_vm14, %v4380_v3, -inf }
0x1ea6   :  { %4388 = vmax.xlane.f32.xlu2 %v4387_v31 }
0x1eac   :  { %v4382_v9 = vpop.f32.mrf.mxu3  ;;  %v4357_v4 = vpop.f32.mrf.mxu2 }
0x1ead   :  { %v4384_v23 = vsel %vm660_vm14, %v4357_v4, -inf }
0x1eae   :  { %4385 = vmax.xlane.f32.xlu1 %v4384_v23 }
0x1eb4   :  { %v4518_v5 = vpop.f32.mrf.mxu3  ;;  %v4359_v7 = vpop.f32.mrf.mxu2 }
0x1eb5   :  { %v4525_v1 = vsel %vm660_vm14, %v4518_v5, -inf }
0x1eb6   :  { %4526 = vmax.xlane.f32.xlu1 %v4525_v1 }
0x1ebc   :  { %v4520_v48 = vpop.f32.mrf.mxu3  ;;  %v4495_v53 = vpop.f32.mrf.mxu2 }
0x1ebd   :  { %v4522_v13 = vsel %vm660_vm14, %v4495_v53, -inf }
0x1ebe   :  { %4296 = vrot.lane.b32.xlu2 %v7635_v29, %s6471_s10  ;;  %4523 = vmax.xlane.f32.xlu0 %v4522_v13 }
0x1ec4   :  { %v4656_v14 = vpop.f32.mrf.mxu3  ;;  %v4497_v18 = vpop.f32.mrf.mxu2 }
0x1ec5   :  { %v4663_v20 = vsel %vm660_vm14, %v4656_v14, -inf }
0x1ec6   :  { %4664 = vmax.xlane.f32.xlu0 %v4663_v20 }
0x1ecc   :  { %v4658_v21 = vpop.f32.mrf.mxu3  ;;  %v7692_v49 = vpop.f32.mrf.mxu2 }
0x1ecd   :  { %v4660_v41 = vsel %vm660_vm14, %v7692_v49, -inf }
0x1ecf   :  { %4434 = vrot.lane.b32.xlu1 %v7635_v29, %s6495_s14 }
0x1ed4   :  { %v4635_v0 = vpop.f32.mrf.mxu2 }
0x1eda   :  { %4317 = vrot.lane.b32.xlu0 %v7641_v34, %s6471_s10 }
0x1ee7   :  { %4661 = vmax.xlane.f32.xlu2 %v4660_v41 }
0x1f01   :  { %v4251_v15 = vpop.xlane.xlu0 %4250 }
0x1f02   :  { %v4253_v60 = vsub.f32 %v4242_v26, %v4251_v15 }
0x1f04   :  { %v4256_v27 = vmul.f32 1.442695, %v4253_v60 }
0x1f06   :  { %5809 = vpow2.f32 %v4256_v27 }
0x1f0c   :  { %v7700_v62 = vpop.eup %5809 }
0x1f0d   :  { %v4261_v46 = vsel %vm660_vm14, %v7700_v62, 0.0 }
0x1f0e   :  { %4262 = vadd.xlane.f32.xlu2 %v4261_v46 }
0x1f11   :  { %v4248_v12 = vpop.xlane.xlu2 %4247 }
0x1f12   :  { %v4252_v17 = vsub.f32 %v4218_v61, %v4248_v12 }
0x1f14   :  { %v4254_v43 = vmul.f32 1.442695, %v4252_v17 }
0x1f16   :  { %5811 = vpow2.f32 %v4254_v43 }
0x1f19   :  { %v4389_v44 = vpop.xlane.xlu2 %4388 }
0x1f1a   :  { %v4391_v10 = vsub.f32 %v4380_v3, %v4389_v44 }
0x1f1c   :  { %v7704_v8 = vpop.eup %5811  ;;  %v4394_v33 = vmul.f32 1.442695, %v4391_v10 }
0x1f1d   :  { %v4258_v19 = vsel %vm660_vm14, %v7704_v8, 0.0 }
0x1f1e   :  { %5813 = vpow2.f32 %v4394_v33  ;;  %4259 = vadd.xlane.f32.xlu1 %v4258_v19 }
0x1f21   :  { %v4297_v35 = vpop.permute.xlu2 %4296  ;;  %v4386_v16 = vpop.xlane.xlu1 %4385 }
0x1f22   :  { %v4302_v24 = vsel %vm757_vm4, %v4297_v35, 0  ;;  %v4390_v56 = vsub.f32 %v4357_v4, %v4386_v16 }
0x1f23   :  { %4311 = vmatpush.bf16.msrb.mxu0 %v4302_v24 }
0x1f24   :  { %v7709_v40 = vpop.eup %5813  ;;  %v4392_v6 = vmul.f32 1.442695, %v4390_v56 }
0x1f25   :  { %v4399_v45 = vsel %vm660_vm14, %v7709_v40, 0.0 }
0x1f26   :  { %4455 = vrot.lane.b32.xlu2 %v7641_v34, %s6495_s14  ;;  %5815 = vpow2.f32 %v4392_v6  ;;  %4400 = vadd.xlane.f32.xlu1 %v4399_v45 }
0x1f29   :  { %v4527_v28 = vpop.xlane.xlu1 %4526 }
0x1f2a   :  { %v4529_v52 = vsub.f32 %v4518_v5, %v4527_v28 }
0x1f2c   :  { %v7715_v25 = vpop.eup %5815  ;;  %v4532_v38 = vmul.f32 1.442695, %v4529_v52 }
0x1f2d   :  { %v4396_v30 = vsel %vm660_vm14, %v7715_v25, 0.0 }
0x1f2e   :  { %4397 = vadd.xlane.f32.xlu0 %v4396_v30 }
0x1f31   :  { %v4524_v2 = vpop.xlane.xlu0 %4523 }
0x1f32   :  { %v4528_v51 = vsub.f32 %v4495_v53, %v4524_v2 }
0x1f34   :  { %v4530_v39 = vmul.f32 1.442695, %v4528_v51 }
0x1f36   :  { %5817 = vpow2.f32 %v4530_v39 }
0x1f37   :  { %5819 = vpow2.f32 %v4532_v38 }
0x1f39   :  { %v4665_v47 = vpop.xlane.xlu0 %4664 }
0x1f3a   :  { %v4667_v55 = vsub.f32 %v4656_v14, %v4665_v47 }
0x1f3c   :  { %v7719_v54 = vpop.eup %5817  ;;  %v4670_v11 = vmul.f32 1.442695, %v4667_v55 }
0x1f3d   :  { %v4534_v37 = vsel %vm660_vm14, %v7719_v54, 0.0  ;;  %v7723_v57 = vpop.eup %5819 }
0x1f3e   :  { %4535 = vadd.xlane.f32.xlu1 %v4534_v37  ;;  %5821 = vpow2.f32 %v4670_v11  ;;  %v4537_v58 = vsel %vm660_vm14, %v7723_v57, 0.0 }
0x1f41   :  { %v4435_v32 = vpop.permute.xlu1 %4434 }
0x1f42   :  { %v4440_v26 = vsel %vm757_vm4, %v4435_v32, 0 }
0x1f43   :  { %4449 = vmatpush.bf16.msra.mxu0 %v4440_v26 }
0x1f44   :  { %v7728_v59 = vpop.eup %5821 }
0x1f45   :  { %v4675_v3 = vsel %vm660_vm14, %v7728_v59, 0.0 }
0x1f46   :  { %4538 = vadd.xlane.f32.xlu1 %v4537_v58 }
0x1f4c   :  { %v4318_v61 = vpop.permute.xlu0 %4317 }
0x1f4d   :  { %v4323_v63 = vsel %vm757_vm4, %v4318_v61, 0 }
0x1f4e   :  { %4332 = vmatpush.bf16.msrb.mxu1 %v4323_v63 }
0x1f4f   :  { %4676 = vadd.xlane.f32.xlu2 %v4675_v3 }
0x1f5a   :  { %v4662_v50 = vpop.xlane.xlu2 %4661 }
0x1f5b   :  { %v4666_v31 = vsub.f32 %v7692_v49, %v4662_v50 }
0x1f5d   :  { %v4668_v9 = vmul.f32 1.442695, %v4666_v31 }
0x1f5f   :  { %5823 = vpow2.f32 %v4668_v9  ;;  %4572 = vrot.lane.b32.xlu1 %v7635_v29, %s6497_s13 }
0x1f65   :  { %v7736_v4 = vpop.eup %5823 }
0x1f66   :  { %v4672_v23 = vsel %vm660_vm14, %v7736_v4, 0.0 }
0x1f67   :  { %4673 = vadd.xlane.f32.xlu0 %v4672_v23  ;;  %4593 = vrot.lane.b32.xlu1 %v7641_v34, %s6497_s13 }
0x1f6f   :  { %4710 = vrot.lane.b32.xlu1 %v7635_v29, %s6496_s7 }
0x1f7b   :  { %4731 = vrot.lane.b32.xlu0 %v7641_v34, %s6496_s7 }
0x1f81   :  { %v4263_v5 = vpop.xlane.xlu2 %4262 }
0x1f82   :  { %5825 = vrcp.f32 %v4263_v5  ;;  %v4290_v14 = vand.u32 2147483648, %v4263_v5  ;;  %v4288_v20 = vand.u32 2147483647, %v4263_v5  ;;  %vm4284_vm11 = vweird.f32 %v4263_v5 }
0x1f84   :  { %v4291_v29 = vor.u32 1.1754944e-38, %v4290_v14  ;;  %vm4289_vm13 = vcmp.eq.f32.partialorder %v4288_v20, 8.507059e+37 }
0x1f88   :  { %v5826_v7 = vpop.eup %5825 }
0x1f89   :  { %v4280_v1 = vmul.f32 %v5826_v7, %v4263_v5  ;;  %v4456_v48 = vpop.permute.xlu2 %4455  ;;  %vm4285_vm10 = vweird.f32 %v5826_v7 }
0x1f8a   :  { %v4461_v53 = vsel %vm757_vm4, %v4456_v48, 0  ;;  %vm4286_vm12 = vmor %vm4284_vm11, %vm4285_vm10 }
0x1f8b   :  { %v4281_v13 = vsub.f32 1.0, %v4280_v1  ;;  %4470 = vmatpush.bf16.msra.mxu1 %v4461_v53 }
0x1f8d   :  { %v4282_v18 = vmul.f32 %v5826_v7, %v4281_v13 }
0x1f8f   :  { %v4283_v21 = vadd.f32 %v5826_v7, %v4282_v18 }
0x1f91   :  { %v4287_v49 = vsel %vm4286_vm12, %v5826_v7, %v4283_v21  ;;  %v4260_v0 = vpop.xlane.xlu1 %4259 }
0x1f92   :  { %v4292_v34 = vsel %vm4289_vm13, %v4291_v29, %v4287_v49  ;;  %5827 = vrcp.f32 %v4260_v0  ;;  %v4275_v17 = vand.u32 2147483648, %v4260_v0  ;;  %v4273_v44 = vand.u32 2147483647, %v4260_v0 }
0x1f93   :  { %v4293_v41 = vmul.f32 %v7700_v62, %v4292_v34  ;;  %vm4269_vm1 = vweird.f32 %v4260_v0 }
0x1f94   :  { %v4276_v19 = vor.u32 1.1754944e-38, %v4275_v17  ;;  %vm4274_vm3 = vcmp.eq.f32.partialorder %v4273_v44, 8.507059e+37 }
0x1f95   :  { %v4295_v15 = vpack.c.bf16 %v4293_v41, %v4293_v41 }
0x1f97   :  { %5346 = vmatmul.msk.bf16.vlgmr.msrb.gmra.mxu1 %vm660_vm14, %v4295_v15 }
0x1f98   :  { %v5828_v60 = vpop.eup %5827 }
0x1f99   :  { %v4265_v27 = vmul.f32 %v5828_v60, %v4260_v0  ;;  %v4401_v46 = vpop.xlane.xlu1 %4400  ;;  %vm4270_vm15 = vweird.f32 %v5828_v60 }
0x1f9a   :  { %5829 = vrcp.f32 %v4401_v46  ;;  %vm4271_vm2 = vmor %vm4269_vm1, %vm4270_vm15  ;;  %v4428_v45 = vand.u32 2147483648, %v4401_v46  ;;  %v4426_v2 = vand.u32 2147483647, %v4401_v46  ;;  %vm4422_vm6 = vweird.f32 %v4401_v46 }
0x1f9b   :  { %v4266_v12 = vsub.f32 1.0, %v4265_v27 }
0x1f9c   :  { %v4429_v39 = vor.u32 1.1754944e-38, %v4428_v45  ;;  %vm4427_vm10 = vcmp.eq.f32.partialorder %v4426_v2, 8.507059e+37 }
0x1f9d   :  { %v4267_v43 = vmul.f32 %v5828_v60, %v4266_v12 }
0x1f9f   :  { %v4268_v10 = vadd.f32 %v5828_v60, %v4267_v43 }
0x1fa0   :  { %v5830_v33 = vpop.eup %5829 }
0x1fa1   :  { %v4272_v35 = vsel %vm4271_vm2, %v5828_v60, %v4268_v10  ;;  %v4418_v62 = vmul.f32 %v5830_v33, %v4401_v46  ;;  %v4398_v16 = vpop.xlane.xlu0 %4397  ;;  %vm4423_vm5 = vweird.f32 %v5830_v33 }
0x1fa2   :  { %v4277_v24 = vsel %vm4274_vm3, %v4276_v19, %v4272_v35  ;;  %5831 = vrcp.f32 %v4398_v16  ;;  %vm4424_vm9 = vmor %vm4422_vm6, %vm4423_vm5  ;;  %v4413_v11 = vand.u32 2147483648, %v4398_v16  ;;  %v4411_v58 = vand.u32 2147483647, %v4398_v16 }
0x1fa3   :  { %v4278_v56 = vmul.f32 %v7704_v8, %v4277_v24  ;;  %v4419_v6 = vsub.f32 1.0, %v4418_v62  ;;  %vm4407_vm12 = vweird.f32 %v4398_v16 }
0x1fa4   :  { %v4414_v63 = vor.u32 1.1754944e-38, %v4413_v11  ;;  %vm4412_vm15 = vcmp.eq.f32.partialorder %v4411_v58, 8.507059e+37 }
0x1fa5   :  { %v4294_v30 = vpack.c.bf16 %v4278_v56, %v4278_v56  ;;  %v4420_v28 = vmul.f32 %v5830_v33, %v4419_v6 }
0x1fa7   :  { %v4421_v51 = vadd.f32 %v5830_v33, %v4420_v28  ;;  %5345 = vmatmul.msk.bf16.vlgmr.msrb.gmra.mxu0 %vm660_vm14, %v4294_v30 }
0x1fa8   :  { %v5832_v52 = vpop.eup %5831 }
0x1fa9   :  { %v4425_v38 = vsel %vm4424_vm9, %v5830_v33, %v4421_v51  ;;  %v4403_v47 = vmul.f32 %v5832_v52, %v4398_v16  ;;  %vm4408_vm11 = vweird.f32 %v5832_v52 }
0x1faa   :  { %v4430_v55 = vsel %vm4427_vm10, %v4429_v39, %v4425_v38  ;;  %vm4409_vm13 = vmor %vm4407_vm12, %vm4408_vm11 }
0x1fab   :  { %v4431_v37 = vmul.f32 %v7709_v40, %v4430_v55  ;;  %v4404_v8 = vsub.f32 1.0, %v4403_v47 }
0x1fad   :  { %v4433_v32 = vpack.c.bf16 %v4431_v37, %v4431_v37  ;;  %v4405_v26 = vmul.f32 %v5832_v52, %v4404_v8 }
0x1faf   :  { %v4406_v61 = vadd.f32 %v5832_v52, %v4405_v26  ;;  %5350 = vmatmul.msk.bf16.vlgmr.msra.gmra.mxu1 %vm660_vm14, %v4433_v32 }
0x1fb1   :  { %v4410_v3 = vsel %vm4409_vm13, %v5832_v52, %v4406_v61  ;;  %v4536_v50 = vpop.xlane.xlu1 %4535 }
0x1fb2   :  { %v4415_v31 = vsel %vm4412_vm15, %v4414_v63, %v4410_v3  ;;  %5833 = vrcp.f32 %v4536_v50  ;;  %v4551_v20 = vand.u32 2147483648, %v4536_v50  ;;  %vm4545_vm2 = vweird.f32 %v4536_v50 }
0x1fb3   :  { %v4416_v9 = vmul.f32 %v7715_v25, %v4415_v31  ;;  %v4549_v21 = vand.u32 2147483647, %v4536_v50 }
0x1fb4   :  { %v4552_v34 = vor.u32 1.1754944e-38, %v4551_v20 }
0x1fb5   :  { %v4432_v40 = vpack.c.bf16 %v4416_v9, %v4416_v9  ;;  %vm4550_vm5 = vcmp.eq.f32.partialorder %v4549_v21, 8.507059e+37 }
0x1fb7   :  { %5349 = vmatmul.msk.bf16.vlgmr.msra.gmra.mxu0 %vm660_vm14, %v4432_v40 }
0x1fb8   :  { %v5834_v23 = vpop.eup %5833 }
0x1fb9   :  { %v4539_v5 = vpop.xlane.xlu1 %4538  ;;  %v4541_v7 = vmul.f32 %v5834_v23, %v4536_v50  ;;  %vm4546_vm1 = vweird.f32 %v5834_v23 }
0x1fba   :  { %5835 = vrcp.f32 %v4539_v5  ;;  %vm4547_vm3 = vmor %vm4545_vm2, %vm4546_vm1  ;;  %v4566_v15 = vand.u32 2147483648, %v4539_v5  ;;  %vm4560_vm9 = vweird.f32 %v4539_v5  ;;  %v4564_v27 = vand.u32 2147483647, %v4539_v5 }
0x1fbb   :  { %v4542_v1 = vsub.f32 1.0, %v4541_v7 }
0x1fbc   :  { %v4567_v44 = vor.u32 1.1754944e-38, %v4566_v15  ;;  %vm4565_vm11 = vcmp.eq.f32.partialorder %v4564_v27, 8.507059e+37  ;;  %v5428_v15 = vld [vmem:[#allocation32 + $0x18] sm:$0xff] }
0x1fbd   :  { %v4543_v53 = vmul.f32 %v5834_v23, %v4542_v1  ;;  %4812 = vmatpush.bf16.msra.mxu2 %v5428_v15 }
0x1fbf   :  { %v4544_v14 = vadd.f32 %v5834_v23, %v4543_v53 }
0x1fc0   :  { %v5836_v48 = vpop.eup %5835 }
0x1fc1   :  { %v4556_v13 = vmul.f32 %v5836_v48, %v4539_v5  ;;  %v4548_v29 = vsel %vm4547_vm3, %v5834_v23, %v4544_v14  ;;  %vm4561_vm6 = vweird.f32 %v5836_v48 }
0x1fc2   :  { %v4677_v49 = vpop.xlane.xlu2 %4676  ;;  %v4553_v0 = vsel %vm4550_vm5, %v4552_v34, %v4548_v29  ;;  %vm4562_vm10 = vmor %vm4560_vm9, %vm4561_vm6 }
0x1fc3   :  { %v4557_v18 = vsub.f32 1.0, %v4556_v13  ;;  %5837 = vrcp.f32 %v4677_v49  ;;  %v4554_v60 = vmul.f32 %v7719_v54, %v4553_v0  ;;  %v4704_v52 = vand.u32 2147483648, %v4677_v49 }
0x1fc4   :  { %vm4698_vm13 = vweird.f32 %v4677_v49 }
0x1fc5   :  { %v4558_v25 = vmul.f32 %v5836_v48, %v4557_v18  ;;  %v4570_v10 = vpack.c.bf16 %v4554_v60, %v4554_v60  ;;  %v4705_v8 = vor.u32 1.1754944e-38, %v4704_v52  ;;  %v5427_v60 = vld [vmem:[#allocation32 + $0x10] sm:$0xff] }
0x1fc6   :  { %4813 = vmatpush.bf16.msra.mxu2 %v5427_v60  ;;  %v5620_v60 = vld [vmem:[%s7869_s4 + $0x1] ss:$0 sm:$0xff] }
0x1fc7   :  { %v4559_v41 = vadd.f32 %v5836_v48, %v4558_v25 }
0x1fc9   :  { %v4563_v12 = vsel %vm4562_vm10, %v5836_v48, %v4559_v41  ;;  %v5838_v43 = vpop.eup %5837 }
0x1fca   :  { %v4568_v33 = vsel %vm4565_vm11, %v4567_v44, %v4563_v12  ;;  %v4694_v19 = vmul.f32 %v5838_v43, %v4677_v49  ;;  %vm4699_vm12 = vweird.f32 %v5838_v43  ;;  %vm4981_vm11 = vcmask 1041409  }
0x1fcb   :  { %v4569_v35 = vmul.f32 %v7723_v57, %v4568_v33  ;;  %v4702_v57 = vand.u32 2147483647, %v4677_v49  ;;  %vm4700_vm15 = vmor %vm4698_vm13, %vm4699_vm12  ;;  %vm5024_vm12 = vcmask 523264   ;;  %vm5026_vm13 = vcmask 785408  }
0x1fcc   :  { %v4695_v54 = vsub.f32 1.0, %v4694_v19 }
0x1fcd   :  { %v4571_v56 = vpack.c.bf16 %v4569_v35, %v4569_v35  ;;  %vm4703_vm2 = vcmp.eq.f32.partialorder %v4702_v57, 8.507059e+37 }
0x1fce   :  { %v4696_v6 = vmul.f32 %v5838_v43, %v4695_v54 }
0x1fd0   :  { %v4697_v28 = vadd.f32 %v5838_v43, %v4696_v6 }
0x1fd1   :  { %v4573_v46 = vpop.permute.xlu1 %4572 }
0x1fd2   :  { %v4578_v17 = vsel %vm757_vm4, %v4573_v46, 0  ;;  %v4701_v47 = vsel %vm4700_vm15, %v5838_v43, %v4697_v28  ;;  %vm5034_vm15 = vcmask 1040384  }
0x1fd3   :  { %4587 = vmatpush.bf16.msrb.mxu0 %v4578_v17  ;;  %v4706_v32 = vsel %vm4703_vm2, %v4705_v8, %v4701_v47 }
0x1fd4   :  { %v4707_v63 = vmul.f32 %v7728_v59, %v4706_v32 }
0x1fd6   :  { %5353 = vmatmul.msk.bf16.vlgmr.msrb.gmra.mxu0 %vm660_vm14, %v4570_v10  ;;  %v4709_v40 = vpack.c.bf16 %v4707_v63, %v4707_v63 }
0x1fd9   :  { %v4594_v62 = vpop.permute.xlu1 %4593 }
0x1fda   :  { %v4599_v16 = vsel %vm757_vm4, %v4594_v62, 0  ;;  %v4674_v24 = vpop.xlane.xlu0 %4673 }
0x1fdb   :  { %5839 = vrcp.f32 %v4674_v24  ;;  %4608 = vmatpush.bf16.msrb.mxu1 %v4599_v16  ;;  %v4689_v38 = vand.u32 2147483648, %v4674_v24  ;;  %v4687_v37 = vand.u32 2147483647, %v4674_v24  ;;  %vm4683_vm3 = vweird.f32 %v4674_v24 }
0x1fdd   :  { %v4690_v26 = vor.u32 1.1754944e-38, %v4689_v38  ;;  %vm4688_vm6 = vcmp.eq.f32.partialorder %v4687_v37, 8.507059e+37 }
0x1fde   :  { %5354 = vmatmul.msk.bf16.vlgmr.msrb.gmra.mxu1 %vm660_vm14, %v4571_v56 }
0x1fe1   :  { %v5840_v45 = vpop.eup %5839  ;;  %v4711_v30 = vpop.permute.xlu1 %4710 }
0x1fe2   :  { %v4679_v2 = vmul.f32 %v5840_v45, %v4674_v24  ;;  %v4716_v51 = vsel %vm757_vm4, %v4711_v30, 0  ;;  %vm4684_vm1 = vweird.f32 %v5840_v45 }
0x1fe3   :  { %4725 = vmatpush.bf16.msra.mxu0 %v4716_v51  ;;  %vm4685_vm5 = vmor %vm4683_vm3, %vm4684_vm1 }
0x1fe4   :  { %v4680_v39 = vsub.f32 1.0, %v4679_v2 }
0x1fe6   :  { %v4681_v55 = vmul.f32 %v5840_v45, %v4680_v39 }
0x1fe8   :  { %v4682_v11 = vadd.f32 %v5840_v45, %v4681_v55 }
0x1fea   :  { %v4686_v58 = vsel %vm4685_vm5, %v5840_v45, %v4682_v11  ;;  %v5618_v45 = vld [vmem:[%s7867_s11 + $0x1] ss:$0 sm:$0xff] }
0x1feb   :  { %v4691_v61 = vsel %vm4688_vm6, %v4690_v26, %v4686_v58 }
0x1fec   :  { %v4692_v3 = vmul.f32 %v7736_v4, %v4691_v61  ;;  %v5430_v61 = vld [vmem:[#allocation34 + $0x18] sm:$0xff] }
0x1fed   :  { %v4732_v50 = vpop.permute.xlu0 %4731  ;;  %4917 = vmatpush.bf16.msra.mxu3 %v5430_v61  ;;  %v5622_v61 = vld [vmem:[%s6654_s19 + $0x1] ss:$0 sm:$0xff]  ;;  %s5052_s19 = sshll.u32 %s6659_s8, 4  ;;  %s5053_s19 = int_to_ptr.hbm [resolvable:$true] %s5052_s19 }
0x1fee   :  { %v4708_v31 = vpack.c.bf16 %v4692_v3, %v4692_v3  ;;  %v4737_v9 = vsel %vm757_vm4, %v4732_v50, 0  ;;  %v5429_v3 = vld [vmem:[#allocation34 + $0x10] sm:$0xff]  ;;  %s6391_s24 = sshra.s32 %s5053_s19, 4  ;;  %s6392_s24 = int_to_ptr.hbm [resolvable:$true] %s6391_s24 }
0x1fef   :  { %4746 = vmatpush.bf16.msra.mxu1 %v4737_v9  ;;  %s6393_s25 = scalar_lea.hbm %s6392_s24, 4  ;;  %p6396_p13 = scmp.lt.s32.totalorder %s6392_s24, %s6659_s8 }
0x1ff0   :  { %5357 = vmatmul.msk.bf16.vlgmr.msra.gmra.mxu0 %vm660_vm14, %v4708_v31  ;;  %p6394_p12 = scmp.ne.s32.totalorder %s6392_s24, %s6393_s25  ;;  %p6397_p0 = scmp.lt.s32.totalorder %s6395_s21, %s6393_s25 }
0x1ff1   :  { %4918 = vmatpush.bf16.msra.mxu3 %v5429_v3 }
0x1ff2   :  { %5358 = vmatmul.msk.bf16.vlgmr.msra.gmra.mxu1 %vm660_vm14, %v4709_v40  ;;  %p6398_p1 = por %p6397_p0, %p6396_p13 }
0x1ff4   :  { %p6399_p2 = pnand %p6398_p1, %p6394_p12 }
0x2014   :  { %v4334_v23 = vpop.f32.mrf.mxu1 }
0x201c   :  { %v4336_v5 = vpop.f32.mrf.mxu1 }
0x2024   :  { %v4313_v7 = vpop.f32.mrf.mxu0 }
0x202c   :  { %v4315_v1 = vpop.f32.mrf.mxu0  ;;  %v4472_v48 = vpop.f32.mrf.mxu1 }
0x2034   :  { %v4451_v53 = vpop.f32.mrf.mxu0  ;;  %v4474_v13 = vpop.f32.mrf.mxu1 }
0x2035   :  { %v5565_v59 = vpack.i.bf16 %v4472_v48, %v4451_v53 }
0x2037   :  { %5566 = vrot.lane.b32.xlu1 %v5565_v59, %s6461_s1  ;;  %s6499_s1 = smov [#allocation37]  }
0x203c   :  { %v4453_v4 = vpop.f32.mrf.mxu0 }
0x2053   :  { %v4589_v14 = vpop.f32.mrf.mxu0 }
0x205b   :  { %v4591_v18 = vpop.f32.mrf.mxu0  ;;  %v4610_v20 = vpop.f32.mrf.mxu1 }
0x205c   :  { %v5570_v21 = vpack.i.bf16 %v4610_v20, %v4589_v14 }
0x205e   :  { %5571 = vrot.lane.b32.xlu2 %v5570_v21, %s6493_s17 }
0x2063   :  { %v4612_v29 = vpop.f32.mrf.mxu1 }
0x206d   :  { %v4727_v25 = vpop.f32.mrf.mxu0 }
0x206f   :  { %v4748_v49 = vpop.f32.mrf.mxu1 }
0x2070   :  { %v5575_v34 = vpack.i.bf16 %v4748_v49, %v4727_v25  ;;  %v5619_v49 = vld [vmem:[%s7868_s0 + $0x1] ss:$0 sm:$0xff] }
0x2072   :  { %5576 = vrot.lane.b32.xlu1 %v5575_v34, %s6494_s28 }
0x2075   :  { %v4729_v0 = vpop.f32.mrf.mxu0 }
0x2077   :  { %v4750_v41 = vpop.f32.mrf.mxu1 }
0x20a9   :  { %v5567_v27 = vpop.permute.xlu1 %5566 }
0x20aa   :  { %v5569_v12 = vunpack.i.h.bf16 %v5567_v27  ;;  %v5568_v17 = vunpack.i.l.bf16 %v5567_v27 }
0x20ac   :  { %v4777_v33 = vsel %vm660_vm14, %v4334_v23, %v5569_v12  ;;  %v4776_v19 = vsel %vm660_vm14, %v4313_v7, %v5568_v17 }
0x20b8   :  { %v5572_v46 = vpop.permute.xlu2 %5571 }
0x20b9   :  { %v5574_v43 = vunpack.i.h.bf16 %v5572_v46  ;;  %v5573_v44 = vunpack.i.l.bf16 %v5572_v46 }
0x20bb   :  { %v4778_v54 = vsel %vm1244_vm7, %v4776_v19, %v5573_v44  ;;  %v4779_v16 = vsel %vm1244_vm7, %v4777_v33, %v5574_v43  ;;  %v5621_v33 = vld [vmem:[%s6644_s30 + $0x1] ss:$0 sm:$0xff]  ;;  %s6498_s30 = smov 32  }
0x20e4   :  { %v5577_v10 = vpop.permute.xlu1 %5576 }
0x20e5   :  { %v5579_v35 = vunpack.i.h.bf16 %v5577_v10  ;;  %v5578_v62 = vunpack.i.l.bf16 %v5577_v10  ;;  %v5432_v10 = vld [vmem:[#allocation35 + $0x18] sm:$0xff] }
0x20e6   :  { %4968 = vmatpush.bf16.msrb.mxu0 %v5432_v10 }
0x20e7   :  { %v4780_v24 = vsel %vm1247_vm8, %v4778_v54, %v5578_v62  ;;  %v4781_v56 = vsel %vm1247_vm8, %v4779_v16, %v5579_v35  ;;  %v5431_v35 = vld [vmem:[#allocation35 + $0x10] sm:$0xff] }
0x20e8   :  { %v4787_v6 = vpack.c.bf16 %v4781_v56, %v4780_v24 }
0x20ea   :  { %5368 = vmatmul.msk.bf16.vlgmr.msra.gmra.mxu2 %vm454_vm0, %v4787_v6  ;;  %4969 = vmatpush.bf16.msrb.mxu0 %v5431_v35 }
0x216d   :  { %v4815_v30 = vpop.f32.mrf.mxu2 }
0x216e   :  { %v4816_v28 = vadd.f32 %v5618_v45, %v4815_v30 }
0x2170   :  { %v7779_v2 = vadd.f32 %v4816_v28, %v7610_v36 }
0x2172   :  { %v4834_v51 = vsel %vm454_vm0, %v7779_v2, 0.0  ;;  %v4842_v52 = vmul.f32 %v7779_v2, %v7779_v2 }
0x2173   :  { %4835 = vadd.xlane.f32.xlu0 %v4834_v51 }
0x2174   :  { %v4844_v57 = vsel %vm454_vm0, %v4842_v52, 0.0 }
0x2175   :  { %v4817_v39 = vpop.f32.mrf.mxu2  ;;  %4845 = vadd.xlane.f32.xlu2 %v4844_v57 }
0x2176   :  { %v4818_v38 = vadd.f32 %v5618_v45, %v4817_v39 }
0x2178   :  { %v7787_v47 = vadd.f32 %v4818_v38, %v7618_v42 }
0x217a   :  { %v4837_v55 = vsel %vm454_vm0, %v7787_v47, 0.0  ;;  %v4843_v36 = vmul.f32 %v7787_v47, %v7787_v47 }
0x217b   :  { %4838 = vadd.xlane.f32.xlu1 %v4837_v55 }
0x217c   :  { %v4847_v37 = vsel %vm454_vm0, %v4843_v36, 0.0 }
0x217d   :  { %4848 = vadd.xlane.f32.xlu0 %v4847_v37 }
0x21e6   :  { %v4836_v8 = vpop.xlane.xlu0 %4835 }
0x21e7   :  { %v4840_v11 = vmul.f32 %v4836_v8, %v6824_v22 }
0x21e8   :  { %v4846_v32 = vpop.xlane.xlu2 %4845 }
0x21e9   :  { %v4852_v26 = vmul.f32 %v4840_v11, %v4840_v11  ;;  %v4850_v58 = vmul.f32 %v4846_v32, %v6824_v22 }
0x21eb   :  { %v4854_v42 = vsub.f32 %v4850_v58, %v4852_v26 }
0x21ed   :  { %v4858_v63 = vadd.f32 1e-05, %v4854_v42 }
0x21ee   :  { %v4839_v50 = vpop.xlane.xlu1 %4838 }
0x21ef   :  { %5841 = vrsqrt.f32 %v4858_v63  ;;  %v4841_v31 = vmul.f32 %v4839_v50, %v6824_v22  ;;  %vm4866_vm4 = vweird.f32 %v4858_v63 }
0x21f0   :  { %v4849_v9 = vpop.xlane.xlu0 %4848 }
0x21f1   :  { %v4853_v40 = vmul.f32 %v4841_v31, %v4841_v31  ;;  %v4851_v23 = vmul.f32 %v4849_v9, %v6824_v22  ;;  %v4856_v22 = vsub.f32 %v7779_v2, %v4840_v11  ;;  %v4857_v41 = vsub.f32 %v7787_v47, %v4841_v31 }
0x21f3   :  { %v4855_v5 = vsub.f32 %v4851_v23, %v4853_v40 }
0x21f5   :  { %v5842_v7 = vpop.eup %5841  ;;  %v4859_v1 = vadd.f32 1e-05, %v4855_v5 }
0x21f6   :  { %v4861_v48 = vmul.f32 %v5842_v7, %v4858_v63  ;;  %vm4867_vm14 = vweird.f32 %v5842_v7 }
0x21f7   :  { %5843 = vrsqrt.f32 %v4859_v1  ;;  %vm4868_vm7 = vmor %vm4866_vm4, %vm4867_vm14  ;;  %vm4876_vm9 = vweird.f32 %v4859_v1 }
0x21f8   :  { %v4862_v53 = vmul.f32 %v5842_v7, %v4861_v48 }
0x21fa   :  { %v4863_v13 = vmul.f32 0.5, %v4862_v53 }
0x21fc   :  { %v4864_v59 = vsub.f32 1.5, %v4863_v13 }
0x21fd   :  { %v5844_v4 = vpop.eup %5843 }
0x21fe   :  { %v4865_v14 = vmul.f32 %v5842_v7, %v4864_v59  ;;  %v4871_v18 = vmul.f32 %v5844_v4, %v4859_v1  ;;  %vm4877_vm8 = vweird.f32 %v5844_v4 }
0x21ff   :  { %vm4878_vm10 = vmor %vm4876_vm9, %vm4877_vm8 }
0x2200   :  { %v4872_v20 = vmul.f32 %v5844_v4, %v4871_v18  ;;  %v4869_v21 = vsel %vm4868_vm7, %v5842_v7, %v4865_v14 }
0x2201   :  { %v4880_v34 = vmul.f32 %v4869_v21, %v4856_v22 }
0x2202   :  { %v4873_v29 = vmul.f32 0.5, %v4872_v20 }
0x2203   :  { %v4885_v27 = vmul.f32 %v5619_v49, %v4880_v34 }
0x2204   :  { %v4874_v25 = vsub.f32 1.5, %v4873_v29 }
0x2205   :  { %v4890_v17 = vadd.f32 %v5620_v60, %v4885_v27 }
0x2206   :  { %v4875_v0 = vmul.f32 %v5844_v4, %v4874_v25 }
0x2208   :  { %v4879_v15 = vsel %vm4878_vm10, %v5844_v4, %v4875_v0 }
0x2209   :  { %v4881_v46 = vmul.f32 %v4879_v15, %v4857_v41 }
0x220b   :  { %v4886_v12 = vmul.f32 %v5619_v49, %v4881_v46 }
0x220d   :  { %v4891_v43 = vadd.f32 %v5620_v60, %v4886_v12 }
0x220f   :  { %v4892_v44 = vpack.c.bf16 %v4891_v43, %v4890_v17  ;;  %v5040_v17 = vlaneseq }
0x2211   :  { %5381 = vmatmul.msk.bf16.vlgmr.msra.gmra.mxu3 %vm454_vm0, %v4892_v44  ;;  %vm5042_vm1 = vcmp.lt.s32.totalorder %v5040_v17, 256 }
0x2294   :  { %v4920_v19 = vpop.f32.mrf.mxu3 }
0x2295   :  { %v4921_v62 = vadd.f32 %v5621_v33, %v4920_v19 }
0x2297   :  { %v4925_v54 = vmul.f32 %v4921_v62, %v4921_v62 }
0x2299   :  { %v4927_v16 = vmul.f32 %v4925_v54, %v4921_v62 }
0x229b   :  { %v4929_v24 = vmul.f32 0.044715, %v4927_v16 }
0x229c   :  { %v4922_v56 = vpop.f32.mrf.mxu3 }
0x229d   :  { %v4931_v6 = vadd.f32 %v4929_v24, %v4921_v62  ;;  %v4923_v45 = vadd.f32 %v5621_v33, %v4922_v56 }
0x229f   :  { %v4933_v30 = vmul.f32 0.7978846, %v4931_v6  ;;  %v4926_v28 = vmul.f32 %v4923_v45, %v4923_v45 }
0x22a1   :  { %v4928_v51 = vmul.f32 %v4926_v28, %v4923_v45  ;;  %5845 = vtanh.f32 %v4933_v30 }
0x22a3   :  { %v4930_v52 = vmul.f32 0.044715, %v4928_v51 }
0x22a5   :  { %v4932_v57 = vadd.f32 %v4930_v52, %v4923_v45 }
0x22a7   :  { %v4934_v39 = vmul.f32 0.7978846, %v4932_v57  ;;  %v5846_v38 = vpop.eup %5845 }
0x22a8   :  { %v4937_v55 = vadd.f32 1.0, %v5846_v38 }
0x22a9   :  { %5847 = vtanh.f32 %v4934_v39 }
0x22aa   :  { %v4939_v37 = vmul.f32 0.5, %v4937_v55 }
0x22ac   :  { %v4941_v32 = vmul.f32 %v4939_v37, %v4921_v62 }
0x22af   :  { %v5848_v36 = vpop.eup %5847 }
0x22b0   :  { %v4938_v8 = vadd.f32 1.0, %v5848_v36 }
0x22b2   :  { %v4940_v11 = vmul.f32 0.5, %v4938_v8 }
0x22b4   :  { %v4942_v26 = vmul.f32 %v4940_v11, %v4923_v45 }
0x22b6   :  { %v4943_v58 = vpack.c.bf16 %v4942_v26, %v4941_v32 }
0x22b8   :  { %5390 = vmatmul.msk.bf16.vlgmr.msrb.gmra.mxu0 %vm454_vm0, %v4943_v58 }
0x2335   :  { %v4971_v42 = vpop.f32.mrf.mxu0 }
0x2336   :  { %v4972_v63 = vadd.f32 %v5622_v61, %v4971_v42 }
0x2338   :  { %v4976_v3 = vadd.f32 %v4972_v63, %v7779_v2 }
0x233a   :  { %v4984_v40 = vrot.slane %v4976_v3, 1  ;;  %v4995_v23 = vrot.slane %v4976_v3, 3  ;;  %v4989_v1 = vrot.slane %v4976_v3, 2  ;;  %v5001_v4 = vrot.slane %v4976_v3, 4 }
0x233b   :  { %v5005_v20 = vrot.slane %v4976_v3, 5  ;;  %v5017_v25 = vrot.slane %v4976_v3, 7  ;;  %v5011_v49 = vrot.slane %v4976_v3, 6 }
0x233d   :  { %v4973_v50 = vpop.f32.mrf.mxu0 }
0x233e   :  { %v4974_v31 = vadd.f32 %v5622_v61, %v4973_v50 }
0x2340   :  { %v4977_v9 = vadd.f32 %v4974_v31, %v7787_v47 }
0x2342   :  { %v4985_v5 = vsel %vm4981_vm11, %v4977_v9, %v4984_v40  ;;  %v4996_v7 = vrot.slane %v4977_v9, 2  ;;  %v4990_v48 = vrot.slane %v4977_v9, 1  ;;  %v4980_v53 = vrot.slane %v4977_v9, 7 }
0x2343   :  { %4986 = vrot.lane.b32.xlu1 %v4985_v5, %s6498_s30  ;;  %v5002_v13 = vrot.slane %v4977_v9, 3  ;;  %v5006_v14 = vrot.slane %v4977_v9, 4  ;;  %v5018_v21 = vrot.slane %v4977_v9, 6  ;;  %v5012_v29 = vrot.slane %v4977_v9, 5 }
0x2344   :  { %v4997_v59 = vsel %vm4981_vm11, %v4996_v7, %v4995_v23  ;;  %v4991_v2 = vsel %vm4981_vm11, %v4990_v48, %v4989_v1  ;;  %v4982_v47 = vsel %vm4981_vm11, %v4980_v53, %v4976_v3 }
0x2345   :  { %4998 = vrot.lane.b32.xlu2 %v4997_v59, %s6489_s6  ;;  %4992 = vrot.lane.b32.xlu0 %v4991_v2, %s6471_s10  ;;  %v5003_v18 = vsel %vm4981_vm11, %v5002_v13, %v5001_v4  ;;  %v5007_v22 = vsel %vm4981_vm11, %v5006_v14, %v5005_v20  ;;  %v5019_v34 = vsel %vm4981_vm11, %v5018_v21, %v5017_v25 }
0x2346   :  { %v5013_v0 = vsel %vm4981_vm11, %v5012_v29, %v5011_v49 }
0x234b   :  { %5008 = vrot.lane.b32.xlu1 %v5007_v22, %s6498_s30 }
0x234d   :  { %5020 = vrot.lane.b32.xlu2 %v5019_v34, %s6489_s6  ;;  %5014 = vrot.lane.b32.xlu0 %v5013_v0, %s6471_s10  ;;  %s5050_s10 = sshll.u32 %s6499_s1, 4  ;;  %s5051_s10 = int_to_ptr.vmem [resolvable:$true] %s5050_s10 }
0x239f   :  { %v4999_v15 = vpop.permute.xlu2 %4998 }
0x23a7   :  { %v5021_v44 = vpop.permute.xlu2 %5020 }
0x23b5   :  { %v4987_v41 = vpop.permute.xlu1 %4986 }
0x23b6   :  { %v5023_v27 = vsel %vm454_vm0, %v4982_v47, %v4987_v41 }
0x23b7   :  { %v4993_v60 = vpop.permute.xlu0 %4992 }
0x23b8   :  { %v5025_v10 = vsel %vm5024_vm12, %v5023_v27, %v4993_v60 }
0x23b9   :  { %v5027_v62 = vsel %vm5026_vm13, %v5025_v10, %v4999_v15 }
0x23bd   :  { %v5009_v46 = vpop.permute.xlu1 %5008 }
0x23be   :  { %v5028_v12 = vsel %vm454_vm0, %v5003_v18, %v5009_v46 }
0x23bf   :  { %v5015_v43 = vpop.permute.xlu0 %5014 }
0x23c0   :  { %v5029_v33 = vsel %vm5024_vm12, %v5028_v12, %v5015_v43 }
0x23c1   :  { %v5030_v19 = vsel %vm5026_vm13, %v5029_v33, %v5021_v44 }
0x23c2   :  { %v5033_v35 = vrot.slane %v5030_v19, 7 }
0x23c4   :  { %v5035_v54 = vsel %vm5034_vm15, %v5027_v62, %v5033_v35  ;;  %v5036_v16 = vsel %vm4981_vm11, %v5027_v62, %v5033_v35 }
0x23c5   :  { %v5037_v24 = vrot.slane %v5036_v16, 1  ;;  %5044 = vst.msk [vmem:[#allocation37] sm:$0x3] %vm5042_vm1, %v5035_v54 }
0x23c7   :  { %5045 = vst.msk [vmem:[#allocation37 + $0x2] sm:$0x3] %vm5042_vm1, %v5037_v24 }
0x23c8   :  { %6402 = shalt.err (!%p6399_p2)
}
0x23c9   :  { %s6500_s22 = smov 2  }
0x23ca   :  { %5058 = dma.vmem_to_hbm [thread:$0]  %s5051_s10, 64, %s5053_s19, [#allocation4], %s6498_s30, %s6498_s30, %s6500_s22  }
0x23cb   :  { %6427 = dma.done.wait [#allocation4], 64  }
0x23cc   :  { %6428 = vsyncadd [#allocation4], 4294967232 }
0x23cd   :  { %5063 = vsyncpa [#allocation3], 1 }
0x23ce   :  { %5064 = vsyncpa [#allocation6], 1 }
0x23cf   :  { %5065 = vsyncpa [#allocation9], 1 }
0x23d0   :  { %5066 = vsyncpa [#allocation12], 1 }
0x23d1   :  { %5067 = vsyncpa [#allocation15], 1 }
0x23d2   :  { %5068 = vsyncpa [#allocation18], 1 }
0x23d3   :  { %5069 = vsyncpa [#allocation21], 1 }
0x23d4   :  { %5070 = vsyncpa [#allocation24], 1 }
0x23d5   :  { %5071 = vsyncpa [#allocation27], 1 }
0x23d6   :  { %5072 = vsyncpa [#allocation30], 1 }
0x23d7   :  { %5073 = vsyncpa [#allocation33], 1 }
0x23d8   :  { %5074 = vsyncpa [#allocation36], 1 }
0x23d9   :  { %5075 = vsyncpa [#allocation4], 1 }

</bundles_post_ra>
